<compile_context>
chip_gen: v6e
topology: v6e:2x2x1
jax: 0.10.0
libtpu: 0.0.40
codegen_flags: <defaults>
</compile_context>

<pallas_src>
import jax
import jax.numpy as jnp
from jax import lax
from jax.experimental import pallas as pl
from jax.experimental.pallas import tpu as pltpu

N_RAYS = 256          # rays / pixels in the demo batch
FEAT_DIM = 12         # dn_dw_values (N, 3, 4) flattened to (N, 12)

# --- lane layout of the single (1, 128) result row ---------------------------
(_L_TOTAL, _L_RGB, _L_EIK, _L_MASK, _L_DEPTH,
 _L_NORMAL, _L_ANGULAR, _L_JGRA, _L_JCON) = range(9)


def _make_fused_kernel(*, pos_of, has_grad, use_mask, use_depth, use_normal,
                       use_angular, use_jaco, weights, n):
    """Build the fused loss kernel; all flags/weights/ref-positions are
    trace-time constants."""
    (w_eik, w_mask, w_depth, w_normal, w_angular, w_jc, w_jg) = weights

    def kernel(*args):
        out_ref = args[-1]

        def ref(name):
            return args[pos_of[name]]

        lane = lax.broadcasted_iota(jnp.int32, (1, 128), 1)

        def emit(idx, val11):                    # place a (1,1) scalar at lane idx
            return jnp.where(lane == idx, val11, 0.0)

        def sum_all(x):                          # full reduce -> (1,1)
            return jnp.sum(jnp.sum(x, axis=1, keepdims=True), axis=0, keepdims=True)

        # ---------------- RGB L1 (always on) --------------------------------
        rgb_loss = sum_all(jnp.abs(ref('rgb')[...] - ref('rgb_gt')[...])) \
            * (1.0 / (3 * n))                                          # (1,1)
        total = rgb_loss
        row = emit(_L_RGB, rgb_loss)

        # ---------------- Eikonal -------------------------------------------
        if has_grad:
            g = ref('grad')[...]                                       # (N, 3)
            gnorm = jnp.sqrt(jnp.sum(g * g, axis=1, keepdims=True))    # (N, 1)
            eik = sum_all((gnorm - 1.0) ** 2) * (1.0 / n)
            row = row + emit(_L_EIK, eik)
            if w_eik != 0.0:
                total = total + w_eik * eik

        # ---------------- Mask BCE ------------------------------------------
        if use_mask:
            p = jnp.clip(ref('wsum')[...], 0.001, 1.0 - 0.001)         # (N, 1)
            t = ref('mask_gt')[...]
            bce = -(t * jnp.log(p) + (1.0 - t) * jnp.log(1.0 - p))
            mask_loss = sum_all(bce) * (1.0 / n)
            row = row + emit(_L_MASK, mask_loss)
            total = total + w_mask * mask_loss

        # ---------------- Masked depth MSE ----------------------------------
        if use_depth:
            dm = ref('dmask')[...]                                     # (N, 1)
            derr = ref('depth')[...] - ref('depth_gt')[...]
            depth_loss = sum_all(dm * derr * derr) / sum_all(dm)
            row = row + emit(_L_DEPTH, depth_loss)
            total = total + w_depth * depth_loss

        # ---------------- Masked normal L1 (shared by normal + angular) -----
        if use_normal or use_angular:
            nm = ref('nmask')[...]                                     # (N, 1)
            ndot = jnp.sum(ref('nrm')[...] * ref('nrm_gt')[...],
                           axis=1, keepdims=True)                      # (N, 1)
            nl = sum_all(nm * jnp.abs(1.0 - ndot)) / sum_all(nm)
            if use_normal:
                row = row + emit(_L_NORMAL, nl)
                total = total + w_normal * nl
            if use_angular:
                # reference forward() reuses get_normal_l1_loss for angular
                row = row + emit(_L_ANGULAR, nl)
                total = total + w_angular * nl

        # ---------------- Jacobi contrastive / gradient losses --------------
        if use_jaco:
            feat = ref('feat')[...]                                    # (M, F) f32
            m = feat.shape[0]

            sq = jnp.sum(feat * feat, axis=1, keepdims=True)           # (M, 1)
            norm = jnp.sqrt(sq)                                        # (M, 1)
            fhat = feat * lax.rsqrt(sq + 1e-12)                        # (M, F)

            # M x M cosine Gram matrix on the MXU (single default-precision
            # pass); |fhat_i . fhat_j| == |feat_i . feat_j| / (|feat_i||feat_j|).
            fdot = lax.dot_general(
                fhat, fhat, (((1,), (1,)), ((), ())),
                preferred_element_type=jnp.float32)                    # (M, M)
            mi = jnp.exp(jnp.abs(fdot))                                # (M, M)

            pos = ref('pos')[...]                                      # (M, M) f32 {0,1}
            pos_sim = jnp.sum(pos * mi, axis=1, keepdims=True)         # (M, 1)
            row_sum = jnp.sum(mi, axis=1, keepdims=True)               # pos + neg
            contrastive = jnp.log(pos_sim / row_sum + 1e-7)            # (M, 1)

            jaco_gra = sum_all((norm - 1.0) ** 2) * (1.0 / m)          # (1, 1)
            ok = contrastive == contrastive                            # non-NaN mask
            nansum = jnp.sum(jnp.where(ok, contrastive, 0.0),
                             axis=0, keepdims=True)
            ok_cnt = jnp.sum(jnp.where(ok, 1.0, 0.0), axis=0, keepdims=True)
            jaco_con = -(nansum / ok_cnt)

            row = row + emit(_L_JGRA, jaco_gra)
            row = row + emit(_L_JCON, jaco_con)
            if w_jc != 0.0:
                total = total + w_jc * jaco_con
            if w_jg != 0.0:
                total = total + w_jg * jaco_gra

        row = row + emit(_L_TOTAL, total)
        out_ref[...] = row

    return kernel


# -----------------------------------------------------------------------------
# Forward pass: per-ray tensors go straight into ONE fused kernel (no slab).
# -----------------------------------------------------------------------------
def i2sdf_loss_forward(model_outputs, ground_truth, current_step, *,
                       eikonal_weight=0.1, smooth_weight=0.0, mask_weight=0.05,
                       depth_weight=0.1, normal_weight=0.05, angular_weight=0.05,
                       bubble_weight=0.0, light_mask_weight=0.0,
                       jacobi_contrastive_weight=0.01, jacobi_gradient_weight=0.01,
                       smooth_iter=None):
    f32 = jnp.float32
    rgb = model_outputs['rgb_values'].reshape(-1, 3).astype(f32)
    n = rgb.shape[0]

    # static branch conditions (checked BEFORE touching optional dict keys)
    has_grad = 'grad_theta' in model_outputs
    use_mask = ('mask' in ground_truth) and mask_weight > 0
    use_depth = ('depth' in ground_truth) and depth_weight > 0
    use_normal = ('normal' in ground_truth) and normal_weight > 0
    use_angular = ('normal' in ground_truth) and angular_weight > 0
    use_jaco = ('jaco_info' in ground_truth) and (
        jacobi_contrastive_weight > 0 or jacobi_gradient_weight > 0)
    use_smooth = ((smooth_iter is None or current_step > smooth_iter)
                  and smooth_weight > 0 and ('diff_norm' in model_outputs))
    use_bubble = ('surface_sdf' in model_outputs) and bubble_weight > 0
    use_light = ('light_mask' in model_outputs) and light_mask_weight > 0

    names, inputs = [], []

    def add(name, arr):
        names.append(name)
        inputs.append(arr)

    add('rgb', rgb)
    add('rgb_gt', ground_truth['rgb'].reshape(-1, 3).astype(f32))
    if has_grad:
        add('grad', model_outputs['grad_theta'].reshape(-1, 3).astype(f32))
    if use_mask:
        add('wsum', model_outputs['weight_sum'].reshape(-1, 1).astype(f32))
        add('mask_gt', ground_truth['mask'].reshape(-1, 1).astype(f32))
    if use_depth:
        add('depth', model_outputs['depth_values'].reshape(-1, 1).astype(f32))
        add('depth_gt', ground_truth['depth'].reshape(-1, 1).astype(f32))
        add('dmask', ground_truth['depth_mask'].reshape(-1, 1).astype(f32))
    if use_normal or use_angular:
        add('nrm', model_outputs['normal_values'].reshape(-1, 3).astype(f32))
        add('nrm_gt', ground_truth['normal'].reshape(-1, 3).astype(f32))
        add('nmask', ground_truth['normal_mask'].reshape(-1, 1).astype(f32))
    if use_jaco:
        feat = model_outputs['dn_dw_values']
        add('feat', feat.reshape(feat.shape[0], -1).astype(f32))       # (M, F)
        add('pos', ground_truth['jaco_info'].astype(f32))              # (M, M)

    pos_of = {nm: i for i, nm in enumerate(names)}

    kernel = _make_fused_kernel(
        pos_of=pos_of, has_grad=has_grad, use_mask=use_mask, use_depth=use_depth,
        use_normal=use_normal, use_angular=use_angular, use_jaco=use_jaco,
        weights=(eikonal_weight, mask_weight, depth_weight, normal_weight,
                 angular_weight, jacobi_contrastive_weight, jacobi_gradient_weight),
        n=n)

    vmem = pl.BlockSpec(memory_space=pltpu.MemorySpace.VMEM)
    res = pl.pallas_call(
        kernel,
        out_shape=jax.ShapeDtypeStruct((1, 128), jnp.float32),
        in_specs=[vmem] * len(inputs),
        out_specs=vmem,
    )(*inputs)[0]                                        # (128,) f32

    zero = jnp.zeros((), f32)

    # tiny logging-only scalar gathers (disabled terms never touch `res`)
    def pick(idx, enabled):
        return res[idx] if enabled else zero

    # optional plain-JAX terms (not exercised at the chosen weights / inputs)
    smooth_loss = jnp.mean(model_outputs['diff_norm'].astype(f32)) if use_smooth else zero
    bubble_loss = (jnp.mean(jnp.abs(model_outputs['surface_sdf'].astype(f32)))
                   if use_bubble else zero)
    if use_light:
        p = jnp.clip(model_outputs['light_mask'].reshape(-1).astype(f32), 0.001, 0.999)
        t = ground_truth['light_mask'].reshape(-1).astype(f32)
        light_mask_loss = jnp.mean(-(t * jnp.log(p) + (1.0 - t) * jnp.log(1.0 - p)))
    else:
        light_mask_loss = zero

    loss = res[_L_TOTAL]
    if use_smooth:
        loss = loss + smooth_weight * smooth_loss
    if use_bubble:
        loss = loss + bubble_weight * bubble_loss
    if use_light:
        loss = loss + light_mask_weight * light_mask_loss

    return {'loss': loss,
            'rgb_loss': res[_L_RGB],
            'eikonal_loss': pick(_L_EIK, has_grad),
            'smooth_loss': smooth_loss,
            'mask_loss': pick(_L_MASK, use_mask),
            'depth_loss': pick(_L_DEPTH, use_depth),
            'normal_loss': pick(_L_NORMAL, use_normal),
            'angular_loss': pick(_L_ANGULAR, use_angular),
            'bubble_loss': bubble_loss,
            'light_mask_loss': light_mask_loss,
            'jaco_con_loss': pick(_L_JCON, use_jaco),
            'jaco_gra_loss': pick(_L_JGRA, use_jaco)}


# -----------------------------------------------------------------------------
# Pure-JAX reference (test-only sanity check of the Pallas path).
# -----------------------------------------------------------------------------
def _reference(model_outputs, ground_truth, weights):
    f32 = jnp.float32
    rgb = model_outputs['rgb_values'].astype(f32)
    rgb_gt = ground_truth['rgb'].reshape(-1, 3).astype(f32)
    rgb_loss = jnp.mean(jnp.abs(rgb - rgb_gt))

    g = model_outputs['grad_theta'].astype(f32)
    eik = jnp.mean((jnp.linalg.norm(g, axis=1) - 1.0) ** 2)

    d = model_outputs['depth_values'].reshape(-1).astype(f32)
    dgt = ground_truth['depth'].reshape(-1).astype(f32)
    dm = ground_truth['depth_mask'].reshape(-1).astype(f32)
    depth = jnp.sum(dm * (d - dgt) ** 2) / jnp.sum(dm)

    nrm = model_outputs['normal_values'].astype(f32)
    ngt = ground_truth['normal'].reshape(-1, 3).astype(f32)
    nm = ground_truth['normal_mask'].reshape(-1).astype(f32)
    dot = jnp.sum(nrm * ngt, axis=-1)
    normal = jnp.sum(nm * jnp.abs(1.0 - dot)) / jnp.sum(nm)

    p = jnp.clip(model_outputs['weight_sum'].reshape(-1).astype(f32), 0.001, 0.999)
    t = ground_truth['mask'].reshape(-1).astype(f32)
    bce = jnp.mean(-(t * jnp.log(p) + (1 - t) * jnp.log(1 - p)))

    feat = model_outputs['dn_dw_values'].reshape(N_RAYS, -1).astype(f32)
    fdot = jnp.dot(feat, feat.T, precision=jax.lax.Precision.HIGHEST)
    fn = jnp.linalg.norm(feat, axis=-1)
    nsq = fn * fn[:, None] + 1e-7
    mi = jnp.exp(jnp.abs(fdot / nsq))
    pos = ground_truth['jaco_info'].astype(f32)
    ps = jnp.sum(pos * mi, axis=-1)
    ns = jnp.sum((1 - pos) * mi, axis=-1)
    con = jnp.log(ps / (ps + ns) + 1e-7)
    gra = jnp.mean((fn - 1.0) ** 2)
    con_loss = -jnp.sum(jnp.where(jnp.isnan(con), 0.0, con)) / jnp.sum(~jnp.isnan(con))

    return (rgb_loss + weights['eik'] * eik + weights['mask'] * bce
            + weights['depth'] * depth + weights['normal'] * normal
            + weights['angular'] * normal + weights['jc'] * con_loss
            + weights['jg'] * gra)


if __name__ == "__main__":
    key = jax.random.PRNGKey(0)
    keys = jax.random.split(key, 12)
    N = N_RAYS

    def unit(x):
        return x / jnp.linalg.norm(x, axis=-1, keepdims=True)

    model_outputs = {
        'rgb_values': jax.random.uniform(keys[0], (N, 3), jnp.float32),
        'grad_theta': jax.random.normal(keys[1], (N, 3), jnp.float32),
        'depth_values': jax.random.uniform(keys[2], (N,), jnp.float32) * 3.0,
        'normal_values': unit(jax.random.normal(keys[3], (N, 3), jnp.float32)),
        'weight_sum': jax.random.uniform(keys[4], (N, 1), jnp.float32),
        'dn_dw_values': jax.random.normal(keys[5], (N, 3, 4), jnp.float32) * 0.5,
    }
    ground_truth = {
        'rgb': jax.random.uniform(keys[6], (1, N, 3), jnp.float32),
        'depth': jax.random.uniform(keys[7], (1, N), jnp.float32) * 3.0,
        'depth_mask': jax.random.bernoulli(keys[8], 0.8, (1, N)),
        'normal': unit(jax.random.normal(keys[9], (N, 3), jnp.float32)).reshape(1, N, 3),
        'normal_mask': jax.random.bernoulli(keys[10], 0.8, (1, N)),
        'mask': (jax.random.uniform(keys[11], (N, 1), jnp.float32) > 0.5).astype(jnp.float32),
        'jaco_info': jnp.logical_or(
            jax.random.bernoulli(keys[5], 0.3, (N, N)), jnp.eye(N, dtype=bool)),
    }

    out = i2sdf_loss_forward(model_outputs, ground_truth, current_step=100)
    jax.block_until_ready(out['loss'])

    ref_total = _reference(model_outputs, ground_truth,
                           {'eik': 0.1, 'mask': 0.05, 'depth': 0.1,
                            'normal': 0.05, 'angular': 0.05, 'jc': 0.01, 'jg': 0.01})
    assert jnp.allclose(out['loss'], ref_total, rtol=1e-3, atol=1e-3), (
        float(out['loss']), float(ref_total))

    print("KERNEL_OK")
</pallas_src>

<mosaic_0001>
module attributes {stable_mosaic.version = 11 : i64} {
  func.func @kernel(%arg0: memref<256x3xf32, #tpu.memory_space<vmem>>, %arg1: memref<256x3xf32, #tpu.memory_space<vmem>>, %arg2: memref<256x3xf32, #tpu.memory_space<vmem>>, %arg3: memref<256x1xf32, #tpu.memory_space<vmem>>, %arg4: memref<256x1xf32, #tpu.memory_space<vmem>>, %arg5: memref<256x1xf32, #tpu.memory_space<vmem>>, %arg6: memref<256x1xf32, #tpu.memory_space<vmem>>, %arg7: memref<256x1xf32, #tpu.memory_space<vmem>>, %arg8: memref<256x3xf32, #tpu.memory_space<vmem>>, %arg9: memref<256x3xf32, #tpu.memory_space<vmem>>, %arg10: memref<256x1xf32, #tpu.memory_space<vmem>>, %arg11: memref<256x12xf32, #tpu.memory_space<vmem>>, %arg12: memref<256x256xf32, #tpu.memory_space<vmem>>, %arg13: memref<1x128xf32, #tpu.memory_space<vmem>>) attributes {dimension_semantics = [], scalar_prefetch = 0 : i64, scratch_operands = 0 : i64, tpu.core_type = #tpu.core_type<tc>} {
    %0 = tpu.iota {dimensions = array<i32: 1>} : vector<1x128xi32>
    %c0 = arith.constant 0 : index
    %c0_0 = arith.constant 0 : index
    %1 = vector.load %arg0[%c0, %c0_0] : memref<256x3xf32, #tpu.memory_space<vmem>>, vector<256x3xf32>
    %c0_1 = arith.constant 0 : index
    %c0_2 = arith.constant 0 : index
    %2 = vector.load %arg1[%c0_1, %c0_2] : memref<256x3xf32, #tpu.memory_space<vmem>>, vector<256x3xf32>
    %3 = arith.subf %1, %2 : vector<256x3xf32>
    %4 = math.absf %3 : vector<256x3xf32>
    %cst = arith.constant dense<0.000000e+00> : vector<256xf32>
    %5 = vector.multi_reduction <add>, %4, %cst [1] : vector<256x3xf32> to vector<256xf32>
    %6 = vector.shape_cast %5 : vector<256xf32> to vector<256x1xf32>
    %cst_3 = arith.constant dense<0.000000e+00> : vector<1xf32>
    %7 = vector.multi_reduction <add>, %6, %cst_3 [0] : vector<256x1xf32> to vector<1xf32>
    %8 = vector.shape_cast %7 : vector<1xf32> to vector<1x1xf32>
    %cst_4 = arith.constant 0.00130208337 : f32
    %9 = vector.broadcast %cst_4 : f32 to vector<1x1xf32>
    %10 = arith.mulf %8, %9 : vector<1x1xf32>
    %c1_i32 = arith.constant 1 : i32
    %11 = vector.broadcast %c1_i32 : i32 to vector<1x128xi32>
    %12 = arith.cmpi eq, %0, %11 : vector<1x128xi32>
    %cst_5 = arith.constant 0.000000e+00 : f32
    %13 = vector.shape_cast %10 : vector<1x1xf32> to vector<1x1xf32>
    %14 = vector.broadcast %13 : vector<1x1xf32> to vector<1x128xf32>
    %15 = vector.broadcast %cst_5 : f32 to vector<1x128xf32>
    %16 = arith.select %12, %14, %15 : vector<1x128xi1>, vector<1x128xf32>
    %c0_6 = arith.constant 0 : index
    %c0_7 = arith.constant 0 : index
    %17 = vector.load %arg2[%c0_6, %c0_7] : memref<256x3xf32, #tpu.memory_space<vmem>>, vector<256x3xf32>
    %18 = arith.mulf %17, %17 : vector<256x3xf32>
    %cst_8 = arith.constant dense<0.000000e+00> : vector<256xf32>
    %19 = vector.multi_reduction <add>, %18, %cst_8 [1] : vector<256x3xf32> to vector<256xf32>
    %20 = vector.shape_cast %19 : vector<256xf32> to vector<256x1xf32>
    %21 = math.sqrt %20 : vector<256x1xf32>
    %cst_9 = arith.constant 1.000000e+00 : f32
    %22 = vector.broadcast %cst_9 : f32 to vector<256x1xf32>
    %23 = arith.subf %21, %22 : vector<256x1xf32>
    %24 = arith.mulf %23, %23 : vector<256x1xf32>
    %cst_10 = arith.constant dense<0.000000e+00> : vector<256xf32>
    %25 = vector.multi_reduction <add>, %24, %cst_10 [1] : vector<256x1xf32> to vector<256xf32>
    %26 = vector.shape_cast %25 : vector<256xf32> to vector<256x1xf32>
    %cst_11 = arith.constant dense<0.000000e+00> : vector<1xf32>
    %27 = vector.multi_reduction <add>, %26, %cst_11 [0] : vector<256x1xf32> to vector<1xf32>
    %28 = vector.shape_cast %27 : vector<1xf32> to vector<1x1xf32>
    %cst_12 = arith.constant 3.906250e-03 : f32
    %29 = vector.broadcast %cst_12 : f32 to vector<1x1xf32>
    %30 = arith.mulf %28, %29 : vector<1x1xf32>
    %c2_i32 = arith.constant 2 : i32
    %31 = vector.broadcast %c2_i32 : i32 to vector<1x128xi32>
    %32 = arith.cmpi eq, %0, %31 : vector<1x128xi32>
    %cst_13 = arith.constant 0.000000e+00 : f32
    %33 = vector.shape_cast %30 : vector<1x1xf32> to vector<1x1xf32>
    %34 = vector.broadcast %33 : vector<1x1xf32> to vector<1x128xf32>
    %35 = vector.broadcast %cst_13 : f32 to vector<1x128xf32>
    %36 = arith.select %32, %34, %35 : vector<1x128xi1>, vector<1x128xf32>
    %37 = arith.addf %16, %36 : vector<1x128xf32>
    %cst_14 = arith.constant 1.000000e-01 : f32
    %38 = vector.broadcast %cst_14 : f32 to vector<1x1xf32>
    %39 = arith.mulf %38, %30 : vector<1x1xf32>
    %40 = arith.addf %10, %39 : vector<1x1xf32>
    %c0_15 = arith.constant 0 : index
    %c0_16 = arith.constant 0 : index
    %41 = vector.load %arg3[%c0_15, %c0_16] : memref<256x1xf32, #tpu.memory_space<vmem>>, vector<256x1xf32>
    %cst_17 = arith.constant 1.000000e-03 : f32
    %cst_18 = arith.constant 9.990000e-01 : f32
    %42 = vector.broadcast %cst_17 : f32 to vector<256x1xf32>
    %43 = arith.maximumf %42, %41 : vector<256x1xf32>
    %44 = vector.broadcast %cst_18 : f32 to vector<256x1xf32>
    %45 = arith.minimumf %44, %43 : vector<256x1xf32>
    %c0_19 = arith.constant 0 : index
    %c0_20 = arith.constant 0 : index
    %46 = vector.load %arg4[%c0_19, %c0_20] : memref<256x1xf32, #tpu.memory_space<vmem>>, vector<256x1xf32>
    %47 = math.log %45 : vector<256x1xf32>
    %48 = arith.mulf %46, %47 : vector<256x1xf32>
    %cst_21 = arith.constant 1.000000e+00 : f32
    %49 = vector.broadcast %cst_21 : f32 to vector<256x1xf32>
    %50 = arith.subf %49, %46 : vector<256x1xf32>
    %cst_22 = arith.constant 1.000000e+00 : f32
    %51 = vector.broadcast %cst_22 : f32 to vector<256x1xf32>
    %52 = arith.subf %51, %45 : vector<256x1xf32>
    %53 = math.log %52 : vector<256x1xf32>
    %54 = arith.mulf %50, %53 : vector<256x1xf32>
    %55 = arith.addf %48, %54 : vector<256x1xf32>
    %cst_23 = arith.constant 0.000000e+00 : f32
    %56 = vector.broadcast %cst_23 : f32 to vector<256x1xf32>
    %57 = arith.subf %56, %55 : vector<256x1xf32>
    %cst_24 = arith.constant dense<0.000000e+00> : vector<256xf32>
    %58 = vector.multi_reduction <add>, %57, %cst_24 [1] : vector<256x1xf32> to vector<256xf32>
    %59 = vector.shape_cast %58 : vector<256xf32> to vector<256x1xf32>
    %cst_25 = arith.constant dense<0.000000e+00> : vector<1xf32>
    %60 = vector.multi_reduction <add>, %59, %cst_25 [0] : vector<256x1xf32> to vector<1xf32>
    %61 = vector.shape_cast %60 : vector<1xf32> to vector<1x1xf32>
    %cst_26 = arith.constant 3.906250e-03 : f32
    %62 = vector.broadcast %cst_26 : f32 to vector<1x1xf32>
    %63 = arith.mulf %61, %62 : vector<1x1xf32>
    %c3_i32 = arith.constant 3 : i32
    %64 = vector.broadcast %c3_i32 : i32 to vector<1x128xi32>
    %65 = arith.cmpi eq, %0, %64 : vector<1x128xi32>
    %cst_27 = arith.constant 0.000000e+00 : f32
    %66 = vector.shape_cast %63 : vector<1x1xf32> to vector<1x1xf32>
    %67 = vector.broadcast %66 : vector<1x1xf32> to vector<1x128xf32>
    %68 = vector.broadcast %cst_27 : f32 to vector<1x128xf32>
    %69 = arith.select %65, %67, %68 : vector<1x128xi1>, vector<1x128xf32>
    %70 = arith.addf %37, %69 : vector<1x128xf32>
    %cst_28 = arith.constant 5.000000e-02 : f32
    %71 = vector.broadcast %cst_28 : f32 to vector<1x1xf32>
    %72 = arith.mulf %71, %63 : vector<1x1xf32>
    %73 = arith.addf %40, %72 : vector<1x1xf32>
    %c0_29 = arith.constant 0 : index
    %c0_30 = arith.constant 0 : index
    %74 = vector.load %arg7[%c0_29, %c0_30] : memref<256x1xf32, #tpu.memory_space<vmem>>, vector<256x1xf32>
    %c0_31 = arith.constant 0 : index
    %c0_32 = arith.constant 0 : index
    %75 = vector.load %arg5[%c0_31, %c0_32] : memref<256x1xf32, #tpu.memory_space<vmem>>, vector<256x1xf32>
    %c0_33 = arith.constant 0 : index
    %c0_34 = arith.constant 0 : index
    %76 = vector.load %arg6[%c0_33, %c0_34] : memref<256x1xf32, #tpu.memory_space<vmem>>, vector<256x1xf32>
    %77 = arith.subf %75, %76 : vector<256x1xf32>
    %78 = arith.mulf %74, %77 : vector<256x1xf32>
    %79 = arith.mulf %78, %77 : vector<256x1xf32>
    %cst_35 = arith.constant dense<0.000000e+00> : vector<256xf32>
    %80 = vector.multi_reduction <add>, %79, %cst_35 [1] : vector<256x1xf32> to vector<256xf32>
    %81 = vector.shape_cast %80 : vector<256xf32> to vector<256x1xf32>
    %cst_36 = arith.constant dense<0.000000e+00> : vector<1xf32>
    %82 = vector.multi_reduction <add>, %81, %cst_36 [0] : vector<256x1xf32> to vector<1xf32>
    %83 = vector.shape_cast %82 : vector<1xf32> to vector<1x1xf32>
    %cst_37 = arith.constant dense<0.000000e+00> : vector<256xf32>
    %84 = vector.multi_reduction <add>, %74, %cst_37 [1] : vector<256x1xf32> to vector<256xf32>
    %85 = vector.shape_cast %84 : vector<256xf32> to vector<256x1xf32>
    %cst_38 = arith.constant dense<0.000000e+00> : vector<1xf32>
    %86 = vector.multi_reduction <add>, %85, %cst_38 [0] : vector<256x1xf32> to vector<1xf32>
    %87 = vector.shape_cast %86 : vector<1xf32> to vector<1x1xf32>
    %88 = arith.divf %83, %87 : vector<1x1xf32>
    %c4_i32 = arith.constant 4 : i32
    %89 = vector.broadcast %c4_i32 : i32 to vector<1x128xi32>
    %90 = arith.cmpi eq, %0, %89 : vector<1x128xi32>
    %cst_39 = arith.constant 0.000000e+00 : f32
    %91 = vector.shape_cast %88 : vector<1x1xf32> to vector<1x1xf32>
    %92 = vector.broadcast %91 : vector<1x1xf32> to vector<1x128xf32>
    %93 = vector.broadcast %cst_39 : f32 to vector<1x128xf32>
    %94 = arith.select %90, %92, %93 : vector<1x128xi1>, vector<1x128xf32>
    %95 = arith.addf %70, %94 : vector<1x128xf32>
    %cst_40 = arith.constant 1.000000e-01 : f32
    %96 = vector.broadcast %cst_40 : f32 to vector<1x1xf32>
    %97 = arith.mulf %96, %88 : vector<1x1xf32>
    %98 = arith.addf %73, %97 : vector<1x1xf32>
    %c0_41 = arith.constant 0 : index
    %c0_42 = arith.constant 0 : index
    %99 = vector.load %arg10[%c0_41, %c0_42] : memref<256x1xf32, #tpu.memory_space<vmem>>, vector<256x1xf32>
    %c0_43 = arith.constant 0 : index
    %c0_44 = arith.constant 0 : index
    %100 = vector.load %arg8[%c0_43, %c0_44] : memref<256x3xf32, #tpu.memory_space<vmem>>, vector<256x3xf32>
    %c0_45 = arith.constant 0 : index
    %c0_46 = arith.constant 0 : index
    %101 = vector.load %arg9[%c0_45, %c0_46] : memref<256x3xf32, #tpu.memory_space<vmem>>, vector<256x3xf32>
    %102 = arith.mulf %100, %101 : vector<256x3xf32>
    %cst_47 = arith.constant dense<0.000000e+00> : vector<256xf32>
    %103 = vector.multi_reduction <add>, %102, %cst_47 [1] : vector<256x3xf32> to vector<256xf32>
    %104 = vector.shape_cast %103 : vector<256xf32> to vector<256x1xf32>
    %cst_48 = arith.constant 1.000000e+00 : f32
    %105 = vector.broadcast %cst_48 : f32 to vector<256x1xf32>
    %106 = arith.subf %105, %104 : vector<256x1xf32>
    %107 = math.absf %106 : vector<256x1xf32>
    %108 = arith.mulf %99, %107 : vector<256x1xf32>
    %cst_49 = arith.constant dense<0.000000e+00> : vector<256xf32>
    %109 = vector.multi_reduction <add>, %108, %cst_49 [1] : vector<256x1xf32> to vector<256xf32>
    %110 = vector.shape_cast %109 : vector<256xf32> to vector<256x1xf32>
    %cst_50 = arith.constant dense<0.000000e+00> : vector<1xf32>
    %111 = vector.multi_reduction <add>, %110, %cst_50 [0] : vector<256x1xf32> to vector<1xf32>
    %112 = vector.shape_cast %111 : vector<1xf32> to vector<1x1xf32>
    %cst_51 = arith.constant dense<0.000000e+00> : vector<256xf32>
    %113 = vector.multi_reduction <add>, %99, %cst_51 [1] : vector<256x1xf32> to vector<256xf32>
    %114 = vector.shape_cast %113 : vector<256xf32> to vector<256x1xf32>
    %cst_52 = arith.constant dense<0.000000e+00> : vector<1xf32>
    %115 = vector.multi_reduction <add>, %114, %cst_52 [0] : vector<256x1xf32> to vector<1xf32>
    %116 = vector.shape_cast %115 : vector<1xf32> to vector<1x1xf32>
    %117 = arith.divf %112, %116 : vector<1x1xf32>
    %c5_i32 = arith.constant 5 : i32
    %118 = vector.broadcast %c5_i32 : i32 to vector<1x128xi32>
    %119 = arith.cmpi eq, %0, %118 : vector<1x128xi32>
    %cst_53 = arith.constant 0.000000e+00 : f32
    %120 = vector.shape_cast %117 : vector<1x1xf32> to vector<1x1xf32>
    %121 = vector.broadcast %120 : vector<1x1xf32> to vector<1x128xf32>
    %122 = vector.broadcast %cst_53 : f32 to vector<1x128xf32>
    %123 = arith.select %119, %121, %122 : vector<1x128xi1>, vector<1x128xf32>
    %124 = arith.addf %95, %123 : vector<1x128xf32>
    %cst_54 = arith.constant 5.000000e-02 : f32
    %125 = vector.broadcast %cst_54 : f32 to vector<1x1xf32>
    %126 = arith.mulf %125, %117 : vector<1x1xf32>
    %127 = arith.addf %98, %126 : vector<1x1xf32>
    %c6_i32 = arith.constant 6 : i32
    %128 = vector.broadcast %c6_i32 : i32 to vector<1x128xi32>
    %129 = arith.cmpi eq, %0, %128 : vector<1x128xi32>
    %cst_55 = arith.constant 0.000000e+00 : f32
    %130 = vector.shape_cast %117 : vector<1x1xf32> to vector<1x1xf32>
    %131 = vector.broadcast %130 : vector<1x1xf32> to vector<1x128xf32>
    %132 = vector.broadcast %cst_55 : f32 to vector<1x128xf32>
    %133 = arith.select %129, %131, %132 : vector<1x128xi1>, vector<1x128xf32>
    %134 = arith.addf %124, %133 : vector<1x128xf32>
    %cst_56 = arith.constant 5.000000e-02 : f32
    %135 = vector.broadcast %cst_56 : f32 to vector<1x1xf32>
    %136 = arith.mulf %135, %117 : vector<1x1xf32>
    %137 = arith.addf %127, %136 : vector<1x1xf32>
    %c0_57 = arith.constant 0 : index
    %c0_58 = arith.constant 0 : index
    %138 = vector.load %arg11[%c0_57, %c0_58] : memref<256x12xf32, #tpu.memory_space<vmem>>, vector<256x12xf32>
    %139 = arith.mulf %138, %138 : vector<256x12xf32>
    %cst_59 = arith.constant dense<0.000000e+00> : vector<256xf32>
    %140 = vector.multi_reduction <add>, %139, %cst_59 [1] : vector<256x12xf32> to vector<256xf32>
    %141 = vector.shape_cast %140 : vector<256xf32> to vector<256x1xf32>
    %142 = math.sqrt %141 : vector<256x1xf32>
    %cst_60 = arith.constant 9.99999996E-13 : f32
    %143 = vector.broadcast %cst_60 : f32 to vector<256x1xf32>
    %144 = arith.addf %141, %143 : vector<256x1xf32>
    %145 = math.rsqrt %144 : vector<256x1xf32>
    %146 = vector.broadcast %145 : vector<256x1xf32> to vector<256x12xf32>
    %147 = arith.mulf %138, %146 : vector<256x12xf32>
    %cst_61 = arith.constant dense<0.000000e+00> : vector<256x256xf32>
    %148 = tpu.matmul %147, %147, %cst_61 {dimension_numbers = #tpu.dot_dimension_numbers<[1], [1], [0], [0], [0, 0, 1, 0], [], []>} : vector<256x12xf32>, vector<256x12xf32>, vector<256x256xf32> -> vector<256x256xf32>
    %149 = math.absf %148 : vector<256x256xf32>
    %150 = math.exp %149 : vector<256x256xf32>
    %c0_62 = arith.constant 0 : index
    %c0_63 = arith.constant 0 : index
    %151 = vector.load %arg12[%c0_62, %c0_63] : memref<256x256xf32, #tpu.memory_space<vmem>>, vector<256x256xf32>
    %152 = arith.mulf %151, %150 : vector<256x256xf32>
    %cst_64 = arith.constant dense<0.000000e+00> : vector<256xf32>
    %153 = vector.multi_reduction <add>, %152, %cst_64 [1] : vector<256x256xf32> to vector<256xf32>
    %154 = vector.shape_cast %153 : vector<256xf32> to vector<256x1xf32>
    %cst_65 = arith.constant dense<0.000000e+00> : vector<256xf32>
    %155 = vector.multi_reduction <add>, %150, %cst_65 [1] : vector<256x256xf32> to vector<256xf32>
    %156 = vector.shape_cast %155 : vector<256xf32> to vector<256x1xf32>
    %157 = arith.divf %154, %156 : vector<256x1xf32>
    %cst_66 = arith.constant 1.000000e-07 : f32
    %158 = vector.broadcast %cst_66 : f32 to vector<256x1xf32>
    %159 = arith.addf %157, %158 : vector<256x1xf32>
    %160 = math.log %159 : vector<256x1xf32>
    %cst_67 = arith.constant 1.000000e+00 : f32
    %161 = vector.broadcast %cst_67 : f32 to vector<256x1xf32>
    %162 = arith.subf %142, %161 : vector<256x1xf32>
    %163 = arith.mulf %162, %162 : vector<256x1xf32>
    %cst_68 = arith.constant dense<0.000000e+00> : vector<256xf32>
    %164 = vector.multi_reduction <add>, %163, %cst_68 [1] : vector<256x1xf32> to vector<256xf32>
    %165 = vector.shape_cast %164 : vector<256xf32> to vector<256x1xf32>
    %cst_69 = arith.constant dense<0.000000e+00> : vector<1xf32>
    %166 = vector.multi_reduction <add>, %165, %cst_69 [0] : vector<256x1xf32> to vector<1xf32>
    %167 = vector.shape_cast %166 : vector<1xf32> to vector<1x1xf32>
    %cst_70 = arith.constant 3.906250e-03 : f32
    %168 = vector.broadcast %cst_70 : f32 to vector<1x1xf32>
    %169 = arith.mulf %167, %168 : vector<1x1xf32>
    %170 = arith.cmpf oeq, %160, %160 : vector<256x1xf32>
    %cst_71 = arith.constant 0.000000e+00 : f32
    %171 = vector.broadcast %cst_71 : f32 to vector<256x1xf32>
    %172 = arith.select %170, %160, %171 : vector<256x1xi1>, vector<256x1xf32>
    %cst_72 = arith.constant dense<0.000000e+00> : vector<1xf32>
    %173 = vector.multi_reduction <add>, %172, %cst_72 [0] : vector<256x1xf32> to vector<1xf32>
    %174 = vector.shape_cast %173 : vector<1xf32> to vector<1x1xf32>
    %cst_73 = arith.constant 1.000000e+00 : f32
    %cst_74 = arith.constant 0.000000e+00 : f32
    %175 = vector.broadcast %cst_73 : f32 to vector<256x1xf32>
    %176 = vector.broadcast %cst_74 : f32 to vector<256x1xf32>
    %177 = arith.select %170, %175, %176 : vector<256x1xi1>, vector<256x1xf32>
    %cst_75 = arith.constant dense<0.000000e+00> : vector<1xf32>
    %178 = vector.multi_reduction <add>, %177, %cst_75 [0] : vector<256x1xf32> to vector<1xf32>
    %179 = vector.shape_cast %178 : vector<1xf32> to vector<1x1xf32>
    %180 = arith.divf %174, %179 : vector<1x1xf32>
    %cst_76 = arith.constant 0.000000e+00 : f32
    %181 = vector.broadcast %cst_76 : f32 to vector<1x1xf32>
    %182 = arith.subf %181, %180 : vector<1x1xf32>
    %c7_i32 = arith.constant 7 : i32
    %183 = vector.broadcast %c7_i32 : i32 to vector<1x128xi32>
    %184 = arith.cmpi eq, %0, %183 : vector<1x128xi32>
    %cst_77 = arith.constant 0.000000e+00 : f32
    %185 = vector.shape_cast %169 : vector<1x1xf32> to vector<1x1xf32>
    %186 = vector.broadcast %185 : vector<1x1xf32> to vector<1x128xf32>
    %187 = vector.broadcast %cst_77 : f32 to vector<1x128xf32>
    %188 = arith.select %184, %186, %187 : vector<1x128xi1>, vector<1x128xf32>
    %189 = arith.addf %134, %188 : vector<1x128xf32>
    %c8_i32 = arith.constant 8 : i32
    %190 = vector.broadcast %c8_i32 : i32 to vector<1x128xi32>
    %191 = arith.cmpi eq, %0, %190 : vector<1x128xi32>
    %cst_78 = arith.constant 0.000000e+00 : f32
    %192 = vector.shape_cast %182 : vector<1x1xf32> to vector<1x1xf32>
    %193 = vector.broadcast %192 : vector<1x1xf32> to vector<1x128xf32>
    %194 = vector.broadcast %cst_78 : f32 to vector<1x128xf32>
    %195 = arith.select %191, %193, %194 : vector<1x128xi1>, vector<1x128xf32>
    %196 = arith.addf %189, %195 : vector<1x128xf32>
    %cst_79 = arith.constant 0.00999999977 : f32
    %197 = vector.broadcast %cst_79 : f32 to vector<1x1xf32>
    %198 = arith.mulf %197, %182 : vector<1x1xf32>
    %199 = arith.addf %137, %198 : vector<1x1xf32>
    %cst_80 = arith.constant 0.00999999977 : f32
    %200 = vector.broadcast %cst_80 : f32 to vector<1x1xf32>
    %201 = arith.mulf %200, %169 : vector<1x1xf32>
    %202 = arith.addf %199, %201 : vector<1x1xf32>
    %c0_i32 = arith.constant 0 : i32
    %203 = vector.broadcast %c0_i32 : i32 to vector<1x128xi32>
    %204 = arith.cmpi eq, %0, %203 : vector<1x128xi32>
    %cst_81 = arith.constant 0.000000e+00 : f32
    %205 = vector.shape_cast %202 : vector<1x1xf32> to vector<1x1xf32>
    %206 = vector.broadcast %205 : vector<1x1xf32> to vector<1x128xf32>
    %207 = vector.broadcast %cst_81 : f32 to vector<1x128xf32>
    %208 = arith.select %204, %206, %207 : vector<1x128xi1>, vector<1x128xf32>
    %209 = arith.addf %196, %208 : vector<1x128xf32>
    %c0_82 = arith.constant 0 : index
    %c0_83 = arith.constant 0 : index
    %210 = vector.load %arg13[%c0_82, %c0_83] : memref<1x128xf32, #tpu.memory_space<vmem>>, vector<1x128xf32>
    tpu.vector_store %arg13[%c0_82, %c0_83], %209 {strides = array<i32>} : memref<1x128xf32, #tpu.memory_space<vmem>>, vector<1x128xf32>,
    return
  }
}

</mosaic_0001>

<bundles_post_ra>
// kernel: tpu_custom_call.1
= control target key start
LH: loop header
LB: loop body
LE: loop exit
PB: predicated region body
PF: predicated region fallthrough
CT: control target
= control target key end

     0   :  { %vm2404_vm0 = vcmask 97280   ;;  %s10313_s0 = inlined_call_operand.vmem [shape: f32[256,3], index: 0, kind: input, shape index: {}]   ;;  %s10314_s1 = inlined_call_operand.vmem [shape: f32[256,3], index: 1, kind: input, shape index: {}]   ;;  %s10315_s2 = inlined_call_operand.vmem [shape: f32[256,3], index: 2, kind: input, shape index: {}]   ;;  %s10316_s3 = inlined_call_operand.vmem [shape: f32[256,1], index: 3, kind: input, shape index: {}]   ;;  %s10317_s4 = inlined_call_operand.vmem [shape: f32[256,1], index: 4, kind: input, shape index: {}]   ;;  %s10318_s5 = inlined_call_operand.vmem [shape: f32[256,1], index: 5, kind: input, shape index: {}]   ;;  %s10319_s6 = inlined_call_operand.vmem [shape: f32[256,1], index: 6, kind: input, shape index: {}]   ;;  %s10320_s7 = inlined_call_operand.vmem [shape: f32[256,1], index: 7, kind: input, shape index: {}]   ;;  %s10321_s8 = inlined_call_operand.vmem [shape: f32[256,3], index: 8, kind: input, shape index: {}]   ;;  %s10322_s9 = inlined_call_operand.vmem [shape: f32[256,3], index: 9, kind: input, shape index: {}]   ;;  %s10323_s10 = inlined_call_operand.vmem [shape: f32[256,1], index: 10, kind: input, shape index: {}]   ;;  %s10324_s11 = inlined_call_operand.vmem [shape: f32[256,12], index: 11, kind: input, shape index: {}]   ;;  %s10325_s12 = inlined_call_operand.vmem [shape: f32[256,256], index: 12, kind: input, shape index: {}]   ;;  %s10326_s13 = inlined_call_operand.hbm [shape: f32[1,128], index: 13, kind: output, shape index: {}]  }
   0x1   :  { %v5135_v0 = vld [vmem:[%s10324_s11 + $0xf8] sm:$0xff]  ;;  %v5140_v1 = vld [vmem:[%s10324_s11 + $0xf0] sm:$0xff]  ;;  %v5163_v8 = vld [vmem:[%s10324_s11 + $0xe8] sm:$0xff] }
   0x2   :  { %v5145_v2 = vld [vmem:[%s10324_s11 + $0x78] sm:$0xff]  ;;  %v2403_v3 = vmul.f32 %v5135_v0, %v5135_v0  ;;  %v2402_v4 = vmul.f32 %v5140_v1, %v5140_v1  ;;  %v5156_v6 = vld [vmem:[%s10324_s11 + $0x70] sm:$0xff]  ;;  %v5168_v9 = vld [vmem:[%s10324_s11 + $0x68] sm:$0xff]  ;;  %v2401_v14 = vmul.f32 %v5163_v8, %v5163_v8 }
   0x3   :  { %v2387_v5 = vmul.f32 %v5145_v2, %v5145_v2  ;;  %v2386_v7 = vmul.f32 %v5156_v6, %v5156_v6  ;;  %v2385_v15 = vmul.f32 %v5168_v9, %v5168_v9  ;;  %v5181_v16 = vld [vmem:[%s10324_s11 + $0xe0] sm:$0xff]  ;;  %v5197_v22 = vld [vmem:[%s10324_s11 + $0xd8] sm:$0xff] }
   0x4   :  { %v2498_v10 = vsel %vm2404_vm0, %v2403_v3, 0.0  ;;  %v2495_v11 = vsel %vm2404_vm0, %v2402_v4, 0.0  ;;  %v5186_v17 = vld [vmem:[%s10324_s11 + $0x60] sm:$0xff]  ;;  %v2492_v18 = vsel %vm2404_vm0, %v2401_v14, 0.0  ;;  %v2400_v20 = vmul.f32 %v5181_v16, %v5181_v16  ;;  %v5202_v23 = vld [vmem:[%s10324_s11 + $0x58] sm:$0xff] }
   0x5   :  { %2499 = vadd.xlane.f32.xlu0 %v2498_v10  ;;  %2496 = vadd.xlane.f32.xlu1 %v2495_v11  ;;  %v2450_v12 = vsel %vm2404_vm0, %v2387_v5, 0.0  ;;  %v2447_v13 = vsel %vm2404_vm0, %v2386_v7, 0.0  ;;  %v2444_v19 = vsel %vm2404_vm0, %v2385_v15, 0.0  ;;  %v2384_v21 = vmul.f32 %v5186_v17, %v5186_v17 }
   0x9   :  { %2451 = vadd.xlane.f32.xlu0 %v2450_v12  ;;  %2448 = vadd.xlane.f32.xlu1 %v2447_v13 }
   0xa   :  { %18 = vsyncpa [#allocation3], 0  ;;  %v2489_v24 = vsel %vm2404_vm0, %v2400_v20, 0.0  ;;  %v2441_v25 = vsel %vm2404_vm0, %v2384_v21, 0.0  ;;  %v2399_v26 = vmul.f32 %v5197_v22, %v5197_v22  ;;  %v2383_v27 = vmul.f32 %v5202_v23, %v5202_v23  ;;  %v5213_v28 = vld [vmem:[%s10324_s11 + $0xd0] sm:$0xff]  ;;  %v5229_v34 = vld [vmem:[%s10324_s11 + $0xc8] sm:$0xff] }
   0xb   :  { %v5218_v29 = vld [vmem:[%s10324_s11 + $0x50] sm:$0xff]  ;;  %v2398_v32 = vmul.f32 %v5213_v28, %v5213_v28  ;;  %v5234_v35 = vld [vmem:[%s10324_s11 + $0x48] sm:$0xff]  ;;  %v2397_v38 = vmul.f32 %v5229_v34, %v5229_v34  ;;  %v5245_v40 = vld [vmem:[%s10324_s11 + $0xc0] sm:$0xff]  ;;  %vm175_vm1 = vcmask 23552  }
   0xc   :  { %v2486_v30 = vsel %vm2404_vm0, %v2399_v26, 0.0  ;;  %v2438_v31 = vsel %vm2404_vm0, %v2383_v27, 0.0  ;;  %v2382_v33 = vmul.f32 %v5218_v29, %v5218_v29  ;;  %v2381_v39 = vmul.f32 %v5234_v35, %v5234_v35  ;;  %v5250_v41 = vld [vmem:[%s10324_s11 + $0x40] sm:$0xff]  ;;  %v5261_v46 = vld [vmem:[%s10324_s11 + $0xb8] sm:$0xff]  ;;  %v5277_v52 = vld [vmem:[%s10324_s11 + $0xb0] sm:$0xff] }
   0xd   :  { %2493 = vadd.xlane.f32.xlu0 %v2492_v18  ;;  %2445 = vadd.xlane.f32.xlu1 %v2444_v19  ;;  %v2483_v36 = vsel %vm2404_vm0, %v2398_v32, 0.0  ;;  %v2480_v42 = vsel %vm2404_vm0, %v2397_v38, 0.0  ;;  %v2396_v44 = vmul.f32 %v5245_v40, %v5245_v40  ;;  %v2380_v45 = vmul.f32 %v5250_v41, %v5250_v41  ;;  %v5266_v47 = vld [vmem:[%s10324_s11 + $0x38] sm:$0xff]  ;;  %v5282_v53 = vld [vmem:[%s10324_s11 + $0x30] sm:$0xff]  ;;  %v5293_v58 = vld [vmem:[%s10324_s11 + $0xa8] sm:$0xff] }
   0xe   :  { %v2435_v37 = vsel %vm2404_vm0, %v2382_v33, 0.0  ;;  %v2432_v43 = vsel %vm2404_vm0, %v2381_v39, 0.0  ;;  %v2395_v50 = vmul.f32 %v5261_v46, %v5261_v46  ;;  %v2379_v51 = vmul.f32 %v5266_v47, %v5266_v47  ;;  %v5298_v59 = vld [vmem:[%s10324_s11 + $0x28] sm:$0xff]  ;;  %v5309_v3 = vld [vmem:[%s10324_s11 + $0xa0] sm:$0xff]  ;;  %v5325_v12 = vld [vmem:[%s10324_s11 + $0x98] sm:$0xff] }
   0xf   :  { %v2477_v48 = vsel %vm2404_vm0, %v2396_v44, 0.0  ;;  %v2429_v49 = vsel %vm2404_vm0, %v2380_v45, 0.0  ;;  %v2394_v56 = vmul.f32 %v5277_v52, %v5277_v52  ;;  %v2378_v57 = vmul.f32 %v5282_v53, %v5282_v53  ;;  %v5314_v4 = vld [vmem:[%s10324_s11 + $0x20] sm:$0xff]  ;;  %v5330_v13 = vld [vmem:[%s10324_s11 + $0x18] sm:$0xff]  ;;  %v5341_v20 = vld [vmem:[%s10324_s11 + $0x90] sm:$0xff] }
  0x10   :  { %v2474_v54 = vsel %vm2404_vm0, %v2395_v50, 0.0  ;;  %v2426_v55 = vsel %vm2404_vm0, %v2379_v51, 0.0  ;;  %v2393_v62 = vmul.f32 %v5293_v58, %v5293_v58  ;;  %v2377_v63 = vmul.f32 %v5298_v59, %v5298_v59  ;;  %v5346_v21 = vld [vmem:[%s10324_s11 + $0x10] sm:$0xff]  ;;  %v5373_v38 = vld [vmem:[%s10324_s11 + $0x80] sm:$0xff] }
  0x11   :  { %2490 = vadd.xlane.f32.xlu0 %v2489_v24  ;;  %2442 = vadd.xlane.f32.xlu1 %v2441_v25  ;;  %v2471_v60 = vsel %vm2404_vm0, %v2394_v56, 0.0  ;;  %v2423_v61 = vsel %vm2404_vm0, %v2378_v57, 0.0  ;;  %v2392_v10 = vmul.f32 %v5309_v3, %v5309_v3  ;;  %v2376_v11 = vmul.f32 %v5314_v4, %v5314_v4  ;;  %v5378_v39 = vld [vmem:[%s10324_s11] sm:$0xff]  ;;  %v48_v56 = vld [vmem:[%s10313_s0 + $0x8] sm:$0xff] }
  0x12   :  { %v2468_v5 = vsel %vm2404_vm0, %v2393_v62, 0.0  ;;  %v2420_v7 = vsel %vm2404_vm0, %v2377_v63, 0.0  ;;  %v2391_v18 = vmul.f32 %v5325_v12, %v5325_v12  ;;  %v2375_v19 = vmul.f32 %v5330_v13, %v5330_v13  ;;  %v47_v50 = vld [vmem:[%s10313_s0] sm:$0xff]  ;;  %v80_v57 = vld [vmem:[%s10314_s1 + $0x8] sm:$0xff]  ;;  %v49_v62 = vld [vmem:[%s10313_s0 + $0x10] sm:$0xff] }
  0x13   :  { %v2465_v14 = vsel %vm2404_vm0, %v2392_v10, 0.0  ;;  %v2417_v15 = vsel %vm2404_vm0, %v2376_v11, 0.0  ;;  %v2390_v26 = vmul.f32 %v5341_v20, %v5341_v20  ;;  %v2374_v27 = vmul.f32 %v5346_v21, %v5346_v21  ;;  %v79_v51 = vld [vmem:[%s10314_s1] sm:$0xff]  ;;  %v81_v63 = vld [vmem:[%s10314_s1 + $0x10] sm:$0xff] }
  0x14   :  { %v2462_v24 = vsel %vm2404_vm0, %v2391_v18, 0.0  ;;  %v2414_v25 = vsel %vm2404_vm0, %v2375_v19, 0.0  ;;  %v2388_v44 = vmul.f32 %v5373_v38, %v5373_v38  ;;  %v2372_v45 = vmul.f32 %v5378_v39, %v5378_v39 }
  0x15   :  { %2487 = vadd.xlane.f32.xlu0 %v2486_v30  ;;  %2439 = vadd.xlane.f32.xlu1 %v2438_v31  ;;  %v5357_v30 = vld [vmem:[%s10324_s11 + $0x88] sm:$0xff]  ;;  %v2459_v32 = vsel %vm2404_vm0, %v2390_v26, 0.0  ;;  %v2411_v33 = vsel %vm2404_vm0, %v2374_v27, 0.0 }
  0x16   :  { %v5362_v31 = vld [vmem:[%s10324_s11 + $0x8] sm:$0xff] }
  0x19   :  { %2484 = vadd.xlane.f32.xlu0 %v2483_v36  ;;  %2436 = vadd.xlane.f32.xlu1 %v2435_v37  ;;  %v2389_v36 = vmul.f32 %v5357_v30, %v5357_v30  ;;  %v2373_v37 = vmul.f32 %v5362_v31, %v5362_v31 }
  0x1d   :  { %2481 = vadd.xlane.f32.xlu0 %v2480_v42  ;;  %2433 = vadd.xlane.f32.xlu1 %v2432_v43  ;;  %v2456_v42 = vsel %vm2404_vm0, %v2389_v36, 0.0  ;;  %v2408_v43 = vsel %vm2404_vm0, %v2373_v37, 0.0 }
  0x21   :  { %2478 = vadd.xlane.f32.xlu0 %v2477_v48  ;;  %2430 = vadd.xlane.f32.xlu1 %v2429_v49  ;;  %v2453_v48 = vsel %vm2404_vm0, %v2388_v44, 0.0  ;;  %v2405_v49 = vsel %vm2404_vm0, %v2372_v45, 0.0  ;;  %v85_v44 = vld [vmem:[%s10314_s1 + $0x30] sm:$0xff] }
  0x25   :  { %2475 = vadd.xlane.f32.xlu0 %v2474_v54  ;;  %2427 = vadd.xlane.f32.xlu1 %v2426_v55  ;;  %v111_v54 = vsub.f32 %v47_v50, %v79_v51  ;;  %v54_v50 = vld [vmem:[%s10313_s0 + $0x38] sm:$0xff] }
  0x26   :  { %v86_v51 = vld [vmem:[%s10314_s1 + $0x38] sm:$0xff] }
  0x27   :  { %v143_v55 = vand.u32 2147483647, %v111_v54 }
  0x29   :  { %2472 = vadd.xlane.f32.xlu0 %v2471_v60  ;;  %2424 = vadd.xlane.f32.xlu1 %v2423_v61  ;;  %v176_v60 = vsel %vm175_vm1, %v143_v55, 0.0  ;;  %v112_v61 = vsub.f32 %v48_v56, %v80_v57  ;;  %v118_v56 = vsub.f32 %v54_v50, %v86_v51  ;;  %v55_v57 = vld [vmem:[%s10313_s0 + $0x40] sm:$0xff] }
  0x2d   :  { %2469 = vadd.xlane.f32.xlu0 %v2468_v5  ;;  %2421 = vadd.xlane.f32.xlu1 %v2420_v7  ;;  %v144_v5 = vand.u32 2147483647, %v112_v61  ;;  %v113_v7 = vsub.f32 %v49_v62, %v81_v63  ;;  %v150_v62 = vand.u32 2147483647, %v118_v56  ;;  %v93_v56 = vld [vmem:[%s10314_s1 + $0x70] sm:$0xff] }
  0x2f   :  { %v179_v10 = vsel %vm175_vm1, %v144_v5, 0.0  ;;  %v145_v11 = vand.u32 2147483647, %v113_v7  ;;  %v56_v5 = vld [vmem:[%s10313_s0 + $0x48] sm:$0xff] }
  0x30   :  { %v88_v7 = vld [vmem:[%s10314_s1 + $0x48] sm:$0xff] }
  0x31   :  { %2466 = vadd.xlane.f32.xlu0 %v2465_v14  ;;  %2418 = vadd.xlane.f32.xlu1 %v2417_v15  ;;  %v50_v14 = vld [vmem:[%s10313_s0 + $0x18] sm:$0xff]  ;;  %v182_v19 = vsel %vm175_vm1, %v145_v11, 0.0 }
  0x32   :  { %v82_v15 = vld [vmem:[%s10314_s1 + $0x18] sm:$0xff] }
  0x33   :  { %v114_v18 = vsub.f32 %v50_v14, %v82_v15  ;;  %v120_v14 = vsub.f32 %v56_v5, %v88_v7  ;;  %v57_v15 = vld [vmem:[%s10313_s0 + $0x50] sm:$0xff] }
  0x35   :  { %2463 = vadd.xlane.f32.xlu0 %v2462_v24  ;;  %2415 = vadd.xlane.f32.xlu1 %v2414_v25  ;;  %v51_v24 = vld [vmem:[%s10313_s0 + $0x20] sm:$0xff]  ;;  %v146_v26 = vand.u32 2147483647, %v114_v18  ;;  %v89_v18 = vld [vmem:[%s10314_s1 + $0x50] sm:$0xff] }
  0x36   :  { %v83_v25 = vld [vmem:[%s10314_s1 + $0x20] sm:$0xff] }
  0x37   :  { %v115_v27 = vsub.f32 %v51_v24, %v83_v25  ;;  %v185_v36 = vsel %vm175_vm1, %v146_v26, 0.0  ;;  %v152_v24 = vand.u32 2147483647, %v120_v14  ;;  %v121_v25 = vsub.f32 %v57_v15, %v89_v18  ;;  %v58_v26 = vld [vmem:[%s10313_s0 + $0x58] sm:$0xff]  ;;  %v95_v14 = vld [vmem:[%s10314_s1 + $0x80] sm:$0xff] }
  0x39   :  { %2460 = vadd.xlane.f32.xlu0 %v2459_v32  ;;  %2412 = vadd.xlane.f32.xlu1 %v2411_v33  ;;  %v52_v32 = vld [vmem:[%s10313_s0 + $0x28] sm:$0xff]  ;;  %v147_v37 = vand.u32 2147483647, %v115_v27  ;;  %v90_v27 = vld [vmem:[%s10314_s1 + $0x58] sm:$0xff] }
  0x3a   :  { %v84_v33 = vld [vmem:[%s10314_s1 + $0x28] sm:$0xff] }
  0x3b   :  { %v188_v45 = vsel %vm175_vm1, %v147_v37, 0.0  ;;  %v59_v37 = vld [vmem:[%s10313_s0 + $0x60] sm:$0xff] }
  0x3d   :  { %2457 = vadd.xlane.f32.xlu0 %v2456_v42  ;;  %2409 = vadd.xlane.f32.xlu1 %v2408_v43  ;;  %v116_v42 = vsub.f32 %v52_v32, %v84_v33  ;;  %v53_v43 = vld [vmem:[%s10313_s0 + $0x30] sm:$0xff]  ;;  %v203_v32 = vsel %vm175_vm1, %v152_v24, 0.0  ;;  %v153_v33 = vand.u32 2147483647, %v121_v25  ;;  %v64_v24 = vld [vmem:[%s10313_s0 + $0x88] sm:$0xff] }
  0x3e   :  { %v96_v25 = vld [vmem:[%s10314_s1 + $0x88] sm:$0xff] }
  0x41   :  { %2454 = vadd.xlane.f32.xlu0 %v2453_v48  ;;  %2406 = vadd.xlane.f32.xlu1 %v2405_v49  ;;  %v148_v48 = vand.u32 2147483647, %v116_v42  ;;  %v117_v49 = vsub.f32 %v53_v43, %v85_v44  ;;  %v91_v42 = vld [vmem:[%s10314_s1 + $0x60] sm:$0xff]  ;;  %v206_v43 = vsel %vm175_vm1, %v153_v33, 0.0  ;;  %v65_v33 = vld [vmem:[%s10313_s0 + $0x90] sm:$0xff] }
  0x43   :  { %v191_v54 = vsel %vm175_vm1, %v148_v48, 0.0  ;;  %v149_v55 = vand.u32 2147483647, %v117_v49  ;;  %v60_v48 = vld [vmem:[%s10313_s0 + $0x68] sm:$0xff] }
  0x44   :  { %v92_v49 = vld [vmem:[%s10314_s1 + $0x68] sm:$0xff] }
  0x45   :  { %177 = vadd.xlane.f32.xlu0 %v176_v60  ;;  %180 = vadd.xlane.f32.xlu1 %v179_v10  ;;  %v87_v60 = vld [vmem:[%s10314_s1 + $0x40] sm:$0xff]  ;;  %v194_v61 = vsel %vm175_vm1, %v149_v55, 0.0  ;;  %v197_v10 = vsel %vm175_vm1, %v150_v62, 0.0  ;;  %v61_v55 = vld [vmem:[%s10313_s0 + $0x70] sm:$0xff]  ;;  %v62_v62 = vld [vmem:[%s10313_s0 + $0x78] sm:$0xff] }
  0x46   :  { %v119_v63 = vsub.f32 %v55_v57, %v87_v60 }
  0x48   :  { %v151_v11 = vand.u32 2147483647, %v119_v63  ;;  %v94_v63 = vld [vmem:[%s10314_s1 + $0x78] sm:$0xff] }
  0x49   :  { %183 = vadd.xlane.f32.xlu0 %v182_v19  ;;  %186 = vadd.xlane.f32.xlu1 %v185_v36  ;;  %v122_v36 = vsub.f32 %v58_v26, %v90_v27 }
  0x4a   :  { %v200_v19 = vsel %vm175_vm1, %v151_v11, 0.0  ;;  %v63_v11 = vld [vmem:[%s10313_s0 + $0x80] sm:$0xff] }
  0x4b   :  { %v154_v44 = vand.u32 2147483647, %v122_v36  ;;  %v97_v36 = vld [vmem:[%s10314_s1 + $0x90] sm:$0xff] }
  0x4d   :  { %189 = vadd.xlane.f32.xlu0 %v188_v45  ;;  %192 = vadd.xlane.f32.xlu1 %v191_v54  ;;  %v123_v45 = vsub.f32 %v59_v37, %v91_v42  ;;  %v209_v50 = vsel %vm175_vm1, %v154_v44, 0.0  ;;  %v124_v54 = vsub.f32 %v60_v48, %v92_v49  ;;  %v66_v44 = vld [vmem:[%s10313_s0 + $0x98] sm:$0xff] }
  0x4f   :  { %v155_v51 = vand.u32 2147483647, %v123_v45  ;;  %v156_v60 = vand.u32 2147483647, %v124_v54  ;;  %v98_v45 = vld [vmem:[%s10314_s1 + $0x98] sm:$0xff]  ;;  %v99_v54 = vld [vmem:[%s10314_s1 + $0xa0] sm:$0xff] }
  0x51   :  { %195 = vadd.xlane.f32.xlu0 %v194_v61  ;;  %198 = vadd.xlane.f32.xlu1 %v197_v10  ;;  %v212_v57 = vsel %vm175_vm1, %v155_v51, 0.0  ;;  %v125_v61 = vsub.f32 %v61_v55, %v93_v56  ;;  %v215_v5 = vsel %vm175_vm1, %v156_v60, 0.0  ;;  %v126_v10 = vsub.f32 %v62_v62, %v94_v63  ;;  %v67_v51 = vld [vmem:[%s10313_s0 + $0xa0] sm:$0xff]  ;;  %v68_v60 = vld [vmem:[%s10313_s0 + $0xa8] sm:$0xff] }
  0x53   :  { %v157_v7 = vand.u32 2147483647, %v125_v61  ;;  %v158_v18 = vand.u32 2147483647, %v126_v10  ;;  %v100_v61 = vld [vmem:[%s10314_s1 + $0xa8] sm:$0xff]  ;;  %v101_v10 = vld [vmem:[%s10314_s1 + $0xb0] sm:$0xff] }
  0x55   :  { %201 = vadd.xlane.f32.xlu0 %v200_v19  ;;  %204 = vadd.xlane.f32.xlu1 %v203_v32  ;;  %v218_v15 = vsel %vm175_vm1, %v157_v7, 0.0  ;;  %v127_v19 = vsub.f32 %v63_v11, %v95_v14  ;;  %v221_v26 = vsel %vm175_vm1, %v158_v18, 0.0  ;;  %v128_v32 = vsub.f32 %v64_v24, %v96_v25  ;;  %v69_v7 = vld [vmem:[%s10313_s0 + $0xb0] sm:$0xff]  ;;  %v70_v18 = vld [vmem:[%s10313_s0 + $0xb8] sm:$0xff] }
  0x57   :  { %v159_v27 = vand.u32 2147483647, %v127_v19  ;;  %v160_v42 = vand.u32 2147483647, %v128_v32  ;;  %v102_v19 = vld [vmem:[%s10314_s1 + $0xb8] sm:$0xff] }
  0x59   :  { %207 = vadd.xlane.f32.xlu0 %v206_v43  ;;  %210 = vadd.xlane.f32.xlu1 %v209_v50  ;;  %v224_v37 = vsel %vm175_vm1, %v159_v27, 0.0  ;;  %v129_v43 = vsub.f32 %v65_v33, %v97_v36  ;;  %v227_v48 = vsel %vm175_vm1, %v160_v42, 0.0  ;;  %v130_v50 = vsub.f32 %v66_v44, %v98_v45  ;;  %v71_v33 = vld [vmem:[%s10313_s0 + $0xc0] sm:$0xff]  ;;  %v72_v42 = vld [vmem:[%s10313_s0 + $0xc8] sm:$0xff] }
  0x5a   :  { %v103_v36 = vld [vmem:[%s10314_s1 + $0xc0] sm:$0xff] }
  0x5b   :  { %v161_v49 = vand.u32 2147483647, %v129_v43  ;;  %v162_v56 = vand.u32 2147483647, %v130_v50  ;;  %v104_v43 = vld [vmem:[%s10314_s1 + $0xc8] sm:$0xff]  ;;  %v135_v50 = vsub.f32 %v71_v33, %v103_v36 }
  0x5d   :  { %213 = vadd.xlane.f32.xlu0 %v212_v57  ;;  %216 = vadd.xlane.f32.xlu1 %v215_v5  ;;  %v230_v55 = vsel %vm175_vm1, %v161_v49, 0.0  ;;  %v131_v57 = vsub.f32 %v67_v51, %v99_v54  ;;  %v233_v62 = vsel %vm175_vm1, %v162_v56, 0.0  ;;  %v132_v5 = vsub.f32 %v68_v60, %v100_v61  ;;  %v73_v54 = vld [vmem:[%s10313_s0 + $0xd0] sm:$0xff] }
  0x5e   :  { %v136_v51 = vsub.f32 %v72_v42, %v104_v43  ;;  %v167_v61 = vand.u32 2147483647, %v135_v50 }
  0x5f   :  { %v163_v63 = vand.u32 2147483647, %v131_v57  ;;  %v164_v14 = vand.u32 2147483647, %v132_v5 }
  0x61   :  { %219 = vadd.xlane.f32.xlu0 %v218_v15  ;;  %222 = vadd.xlane.f32.xlu1 %v221_v26  ;;  %v236_v11 = vsel %vm175_vm1, %v163_v63, 0.0  ;;  %v133_v15 = vsub.f32 %v69_v7, %v101_v10  ;;  %v239_v24 = vsel %vm175_vm1, %v164_v14, 0.0  ;;  %v134_v26 = vsub.f32 %v70_v18, %v102_v19 }
  0x62   :  { %v248_v10 = vsel %vm175_vm1, %v167_v61, 0.0 }
  0x63   :  { %v165_v25 = vand.u32 2147483647, %v133_v15  ;;  %v166_v45 = vand.u32 2147483647, %v134_v26 }
  0x65   :  { %225 = vadd.xlane.f32.xlu0 %v224_v37  ;;  %228 = vadd.xlane.f32.xlu1 %v227_v48  ;;  %v242_v44 = vsel %vm175_vm1, %v165_v25, 0.0  ;;  %v245_v56 = vsel %vm175_vm1, %v166_v45, 0.0 }
  0x69   :  { %231 = vadd.xlane.f32.xlu0 %v230_v55  ;;  %234 = vadd.xlane.f32.xlu1 %v233_v62  ;;  %v105_v55 = vld [vmem:[%s10314_s1 + $0xd0] sm:$0xff]  ;;  %v168_v62 = vand.u32 2147483647, %v136_v51 }
  0x6a   :  { %v137_v63 = vsub.f32 %v73_v54, %v105_v55 }
  0x6c   :  { %v169_v14 = vand.u32 2147483647, %v137_v63 }
  0x6d   :  { %237 = vadd.xlane.f32.xlu0 %v236_v11  ;;  %240 = vadd.xlane.f32.xlu1 %v239_v24  ;;  %v251_v11 = vsel %vm175_vm1, %v168_v62, 0.0 }
  0x6e   :  { %v254_v19 = vsel %vm175_vm1, %v169_v14, 0.0 }
  0x71   :  { %243 = vadd.xlane.f32.xlu0 %v242_v44  ;;  %246 = vadd.xlane.f32.xlu1 %v245_v56 }
  0x75   :  { %249 = vadd.xlane.f32.xlu0 %v248_v10  ;;  %252 = vadd.xlane.f32.xlu1 %v251_v11 }
  0x79   :  { %255 = vadd.xlane.f32.xlu0 %v254_v19 }
  0x8e   :  { %v5554_v27 = vpop.xlane.xlu0 %2499  ;;  %v5556_v32 = vpop.xlane.xlu1 %2496 }
  0x8f   :  { %10529 = vst [vmem:[#allocation5_spill] sm:$0xff] %v5554_v27  ;;  %v2756_v37 = vadd.f32 1e-12, %v5554_v27  ;;  %v2755_v5 = vadd.f32 1e-12, %v5556_v32  ;;  %vm2720_vm2 = vcmp.eq.f32.partialorder %v5554_v27, inf }
  0x90   :  { %vm2713_vm3 = vcmp.eq.f32.partialorder %v5556_v32, inf  ;;  %vm2715_vm4 = vcmp.eq.f32.partialorder %v5556_v32, 0.0 }
  0x91   :  { %4447 = vrsqrt.f32 %v2756_v37 }
  0x92   :  { %v5572_v48 = vpop.xlane.xlu0 %2451  ;;  %v5574_v49 = vpop.xlane.xlu1 %2448 }
  0x93   :  { %v2740_v57 = vadd.f32 1e-12, %v5572_v48  ;;  %v2739_v24 = vadd.f32 1e-12, %v5574_v49  ;;  %vm2608_vm5 = vcmp.eq.f32.partialorder %v5572_v48, inf  ;;  %vm2610_vm6 = vcmp.eq.f32.partialorder %v5572_v48, 0.0 }
  0x94   :  { %vm2601_vm7 = vcmp.eq.f32.partialorder %v5574_v49, inf  ;;  %vm2603_vm8 = vcmp.eq.f32.partialorder %v5574_v49, 0.0 }
  0x95   :  { %4449 = vrsqrt.f32 %v2740_v57 }
  0x96   :  { %v5584_v60 = vpop.xlane.xlu0 %2493  ;;  %v5587_v7 = vpop.xlane.xlu1 %2445  ;;  %4451 = vrsqrt.f32 %v2755_v5 }
  0x97   :  { %4453 = vrsqrt.f32 %v2739_v24  ;;  %v2754_v37 = vadd.f32 1e-12, %v5584_v60  ;;  %v2738_v42 = vadd.f32 1e-12, %v5587_v7  ;;  %vm2706_vm9 = vcmp.eq.f32.partialorder %v5584_v60, inf }
  0x98   :  { %vm2708_vm10 = vcmp.eq.f32.partialorder %v5584_v60, 0.0  ;;  %vm2594_vm11 = vcmp.eq.f32.partialorder %v5587_v7, inf  ;;  %vm2596_vm13 = vcmp.eq.f32.partialorder %v5587_v7, 0.0 }
  0x99   :  { %4455 = vrsqrt.f32 %v2754_v37 }
  0x9a   :  { %v5591_v15 = vpop.xlane.xlu0 %2490  ;;  %v5593_v18 = vpop.xlane.xlu1 %2442  ;;  %4457 = vrsqrt.f32 %v2738_v42 }
  0x9b   :  { %v2753_v50 = vadd.f32 1e-12, %v5591_v15  ;;  %v2737_v51 = vadd.f32 1e-12, %v5593_v18  ;;  %vm2699_vm12 = vcmp.eq.f32.partialorder %v5591_v15, inf  ;;  %vm2587_vm14 = vcmp.eq.f32.partialorder %v5593_v18, inf }
  0x9c   :  { %vm2701_vm15 = vcmp.eq.f32.partialorder %v5591_v15, 0.0 }
  0x9d   :  { %4459 = vrsqrt.f32 %v2753_v50 }
  0x9e   :  { %v4448_v25 = vpop.eup %4447  ;;  %v5597_v26 = vpop.xlane.xlu0 %2487  ;;  %4461 = vrsqrt.f32 %v2737_v51 }
  0x9f   :  { %v5599_v33 = vpop.xlane.xlu1 %2439  ;;  %v5602_v36 = vmul.f32 %v4448_v25, %v5135_v0 }
  0xa1   :  { %4314 = vmatprep.subr.msk.mxu0 %vm2404_vm0, %v5602_v36  ;;  %4410 = vmatprep.subr.msk.mxu1 %vm2404_vm0, %v5602_v36 }
  0xa2   :  { %v4450_v43 = vpop.eup %4449  ;;  %v5610_v44 = vpop.xlane.xlu0 %2484 }
  0xa3   :  { %v4452_v45 = vpop.eup %4451  ;;  %v5613_v0 = vpop.xlane.xlu1 %2436  ;;  %v5617_v54 = vmul.f32 %v4450_v43, %v5145_v2  ;;  %v2752_v2 = vadd.f32 1e-12, %v5597_v26  ;;  %v2751_v5 = vadd.f32 1e-12, %v5610_v44 }
  0xa4   :  { %10530 = vst [vmem:[#allocation6_spill] sm:$0xff] %v5613_v0  ;;  %v5620_v55 = vmul.f32 %v4452_v45, %v5140_v1  ;;  %v2736_v1 = vadd.f32 1e-12, %v5599_v33  ;;  %v4454_v61 = vpop.eup %4453  ;;  %v2735_v11 = vadd.f32 1e-12, %v5613_v0 }
  0xa5   :  { %4315 = vmatpush3.xpose.msk.msra.mxu0 %vm2404_vm0, %v5617_v54  ;;  %4426 = vmatpush3.xpose.msk.msra.mxu1 %vm2404_vm0, %v5617_v54  ;;  %4463 = vrsqrt.f32 %v2752_v2  ;;  %v5637_v62 = vmul.f32 %v4454_v61, %v5156_v6 }
  0xa6   :  { %4316 = vmatprep.subr.msk.mxu0 %vm2404_vm0, %v5620_v55  ;;  %4411 = vmatprep.subr.msk.mxu1 %vm2404_vm0, %v5620_v55  ;;  %v5630_v56 = vpop.xlane.xlu0 %2481  ;;  %4465 = vrsqrt.f32 %v2736_v1  ;;  %v4456_v10 = vpop.eup %4455 }
  0xa7   :  { %10531 = vst [vmem:[#allocation7_spill] sm:$0xff] %v5630_v56  ;;  %v5634_v57 = vpop.xlane.xlu1 %2433  ;;  %v4458_v19 = vpop.eup %4457  ;;  %4467 = vrsqrt.f32 %v2751_v5  ;;  %v5650_v6 = vmul.f32 %v4456_v10, %v5163_v8  ;;  %v2750_v43 = vadd.f32 1e-12, %v5630_v56 }
  0xa8   :  { %10532 = vst [vmem:[#allocation8_spill] sm:$0xff] %v5634_v57  ;;  %4469 = vrsqrt.f32 %v2735_v11  ;;  %v5653_v24 = vmul.f32 %v4458_v19, %v5168_v9  ;;  %v2734_v8 = vadd.f32 1e-12, %v5634_v57 }
  0xa9   :  { %4317 = vmatpush3.xpose.msk.msra.mxu0 %vm2404_vm0, %v5637_v62  ;;  %4427 = vmatpush3.xpose.msk.msra.mxu1 %vm2404_vm0, %v5637_v62  ;;  %4471 = vrsqrt.f32 %v2750_v43 }
  0xaa   :  { %v5639_v63 = vpop.xlane.xlu0 %2478  ;;  %v4460_v37 = vpop.eup %4459  ;;  %4318 = vmatprep.subr.msk.mxu0 %vm2404_vm0, %v5650_v6  ;;  %4412 = vmatprep.subr.msk.mxu1 %vm2404_vm0, %v5650_v6  ;;  %4473 = vrsqrt.f32 %v2734_v8 }
  0xab   :  { %10533 = vst [vmem:[#allocation9_spill] sm:$0xff] %v5639_v63  ;;  %v5647_v14 = vpop.xlane.xlu1 %2430  ;;  %v4462_v42 = vpop.eup %4461  ;;  %v5670_v9 = vmul.f32 %v4460_v37, %v5181_v16  ;;  %v2749_v61 = vadd.f32 1e-12, %v5639_v63 }
  0xac   :  { %10534 = vst [vmem:[#allocation10_spill] sm:$0xff] %v5647_v14  ;;  %v5673_v50 = vmul.f32 %v4462_v42, %v5186_v17  ;;  %v2733_v17 = vadd.f32 1e-12, %v5647_v14 }
  0xad   :  { %4319 = vmatpush3.xpose.msk.msra.mxu0 %vm2404_vm0, %v5653_v24  ;;  %4428 = vmatpush3.xpose.msk.msra.mxu1 %vm2404_vm0, %v5653_v24  ;;  %4475 = vrsqrt.f32 %v2749_v61 }
  0xae   :  { %v5655_v25 = vpop.xlane.xlu0 %2475  ;;  %4320 = vmatprep.subr.msk.mxu0 %vm2404_vm0, %v5670_v9  ;;  %4413 = vmatprep.subr.msk.mxu1 %vm2404_vm0, %v5670_v9  ;;  %4477 = vrsqrt.f32 %v2733_v17 }
  0xaf   :  { %10535 = vst [vmem:[#allocation11_spill] sm:$0xff] %v5655_v25  ;;  %v5662_v45 = vpop.xlane.xlu1 %2427 }
  0xb0   :  { %10536 = vst [vmem:[#allocation12_spill] sm:$0xff] %v5662_v45  ;;  %v2732_v42 = vadd.f32 1e-12, %v5662_v45 }
  0xb1   :  { %4321 = vmatpush3.xpose.msk.msra.mxu0 %vm2404_vm0, %v5673_v50  ;;  %4429 = vmatpush3.xpose.msk.msra.mxu1 %vm2404_vm0, %v5673_v50 }
  0xb2   :  { %v4464_v51 = vpop.eup %4463  ;;  %v5675_v2 = vpop.xlane.xlu0 %2472 }
  0xb3   :  { %10537 = vst [vmem:[#allocation13_spill] sm:$0xff] %v5675_v2  ;;  %v4466_v1 = vpop.eup %4465  ;;  %v5686_v16 = vpop.xlane.xlu1 %2424  ;;  %v5690_v5 = vmul.f32 %v4464_v51, %v5197_v22  ;;  %v2748_v22 = vadd.f32 1e-12, %v5655_v25 }
  0xb4   :  { %10538 = vst [vmem:[#allocation14_spill] sm:$0xff] %v5686_v16  ;;  %v5693_v10 = vmul.f32 %v4466_v1, %v5202_v23  ;;  %v4468_v11 = vpop.eup %4467  ;;  %v2731_v17 = vadd.f32 1e-12, %v5686_v16 }
  0xb5   :  { %4322 = vmatprep.subr.msk.mxu0 %vm2404_vm0, %v5690_v5  ;;  %4414 = vmatprep.subr.msk.mxu1 %vm2404_vm0, %v5690_v5  ;;  %v4470_v37 = vpop.eup %4469  ;;  %v5710_v43 = vmul.f32 %v4468_v11, %v5213_v28  ;;  %4479 = vrsqrt.f32 %v2748_v22 }
  0xb6   :  { %v5699_v19 = vpop.xlane.xlu0 %2469  ;;  %4323 = vmatpush3.xpose.msk.msra.mxu0 %vm2404_vm0, %v5693_v10  ;;  %4430 = vmatpush3.xpose.msk.msra.mxu1 %vm2404_vm0, %v5693_v10  ;;  %v5713_v8 = vmul.f32 %v4470_v37, %v5218_v29  ;;  %v4472_v28 = vpop.eup %4471  ;;  %4481 = vrsqrt.f32 %v2732_v42  ;;  %v2747_v29 = vadd.f32 1e-12, %v5675_v2 }
  0xb7   :  { %10539 = vst [vmem:[#allocation15_spill] sm:$0xff] %v5699_v19  ;;  %v5706_v23 = vpop.xlane.xlu1 %2421  ;;  %4324 = vmatprep.subr.msk.mxu0 %vm2404_vm0, %v5710_v43  ;;  %4415 = vmatprep.subr.msk.mxu1 %vm2404_vm0, %v5710_v43  ;;  %v4474_v1 = vpop.eup %4473  ;;  %v5730_v11 = vmul.f32 %v4472_v28, %v5229_v34  ;;  %v2746_v2 = vadd.f32 1e-12, %v5699_v19 }
  0xb8   :  { %10540 = vst [vmem:[#allocation16_spill] sm:$0xff] %v5706_v23  ;;  %v5733_v37 = vmul.f32 %v4474_v1, %v5234_v35  ;;  %4483 = vrsqrt.f32 %v2747_v29  ;;  %v2730_v35 = vadd.f32 1e-12, %v5706_v23 }
  0xb9   :  { %4485 = vrsqrt.f32 %v2731_v17 }
  0xba   :  { %4325 = vmatpush3.xpose.msk.msra.mxu0 %vm2404_vm0, %v5713_v8  ;;  %4431 = vmatpush3.xpose.msk.msra.mxu1 %vm2404_vm0, %v5713_v8  ;;  %v5723_v51 = vpop.xlane.xlu0 %2466  ;;  %v4476_v42 = vpop.eup %4475  ;;  %4487 = vrsqrt.f32 %v2746_v2 }
  0xbb   :  { %10541 = vst [vmem:[#allocation17_spill] sm:$0xff] %v5723_v51  ;;  %v5726_v61 = vpop.xlane.xlu1 %2418  ;;  %4326 = vmatprep.subr.msk.mxu0 %vm2404_vm0, %v5730_v11  ;;  %4416 = vmatprep.subr.msk.mxu1 %vm2404_vm0, %v5730_v11  ;;  %v4478_v34 = vpop.eup %4477  ;;  %v2745_v1 = vadd.f32 1e-12, %v5723_v51  ;;  %v5752_v17 = vmul.f32 %v4476_v42, %v5245_v40  ;;  %4489 = vrsqrt.f32 %v2730_v35 }
  0xbc   :  { %10542 = vst [vmem:[#allocation18_spill] sm:$0xff] %v5726_v61  ;;  %v2729_v29 = vadd.f32 1e-12, %v5726_v61  ;;  %v5755_v19 = vmul.f32 %v4478_v34, %v5250_v41 }
  0xbd   :  { %4491 = vrsqrt.f32 %v2745_v1 }
  0xbe   :  { %v5739_v22 = vpop.xlane.xlu0 %2463  ;;  %4327 = vmatpush3.xpose.msk.msra.mxu0 %vm2404_vm0, %v5733_v37  ;;  %4432 = vmatpush3.xpose.msk.msra.mxu1 %vm2404_vm0, %v5733_v37  ;;  %4493 = vrsqrt.f32 %v2729_v29  ;;  %v106_v29 = vld [vmem:[%s10314_s1 + $0xd8] sm:$0xff] }
  0xbf   :  { %10543 = vst [vmem:[#allocation19_spill] sm:$0xff] %v5739_v22  ;;  %v5747_v28 = vpop.xlane.xlu1 %2415  ;;  %v2744_v25 = vadd.f32 1e-12, %v5739_v22  ;;  %4328 = vmatprep.subr.msk.mxu0 %vm2404_vm0, %v5752_v17  ;;  %4417 = vmatprep.subr.msk.mxu1 %vm2404_vm0, %v5752_v17 }
  0xc0   :  { %10544 = vst [vmem:[#allocation20_spill] sm:$0xff] %v5747_v28  ;;  %v2728_v41 = vadd.f32 1e-12, %v5747_v28 }
  0xc1   :  { %4495 = vrsqrt.f32 %v2744_v25 }
  0xc2   :  { %v5758_v16 = vpop.xlane.xlu0 %2460  ;;  %v4480_v45 = vpop.eup %4479  ;;  %4329 = vmatpush3.xpose.msk.msra.mxu0 %vm2404_vm0, %v5755_v19  ;;  %4433 = vmatpush3.xpose.msk.msra.mxu1 %vm2404_vm0, %v5755_v19  ;;  %4497 = vrsqrt.f32 %v2728_v41 }
  0xc3   :  { %10545 = vst [vmem:[#allocation21_spill] sm:$0xff] %v5758_v16  ;;  %v4482_v2 = vpop.eup %4481  ;;  %v5768_v40 = vpop.xlane.xlu1 %2412  ;;  %v2743_v42 = vadd.f32 1e-12, %v5758_v16  ;;  %v5773_v34 = vmul.f32 %v4480_v45, %v5261_v46  ;;  %v74_v45 = vld [vmem:[%s10313_s0 + $0xd8] sm:$0xff] }
  0xc4   :  { %10546 = vst [vmem:[#allocation22_spill] sm:$0xff] %v5768_v40  ;;  %v5776_v35 = vmul.f32 %v4482_v2, %v5266_v47  ;;  %v2727_v51 = vadd.f32 1e-12, %v5768_v40 }
  0xc5   :  { %v4484_v22 = vpop.eup %4483  ;;  %4330 = vmatprep.subr.msk.mxu0 %vm2404_vm0, %v5773_v34  ;;  %4418 = vmatprep.subr.msk.mxu1 %vm2404_vm0, %v5773_v34  ;;  %4499 = vrsqrt.f32 %v2743_v42 }
  0xc6   :  { %v5778_v1 = vpop.xlane.xlu0 %2457  ;;  %v4486_v25 = vpop.eup %4485  ;;  %4331 = vmatpush3.xpose.msk.msra.mxu0 %vm2404_vm0, %v5776_v35  ;;  %4434 = vmatpush3.xpose.msk.msra.mxu1 %vm2404_vm0, %v5776_v35  ;;  %4501 = vrsqrt.f32 %v2727_v51  ;;  %v5800_v41 = vmul.f32 %v4484_v22, %v5277_v52 }
  0xc7   :  { %10547 = vst [vmem:[#allocation23_spill] sm:$0xff] %v5778_v1  ;;  %v2742_v46 = vadd.f32 1e-12, %v5778_v1  ;;  %v5790_v47 = vpop.xlane.xlu1 %2409  ;;  %v5803_v42 = vmul.f32 %v4486_v25, %v5282_v53  ;;  %v138_v1 = vsub.f32 %v74_v45, %v106_v29  ;;  %v4488_v40 = vpop.eup %4487  ;;  %v75_v45 = vld [vmem:[%s10313_s0 + $0xe0] sm:$0xff] }
  0xc8   :  { %10548 = vst [vmem:[#allocation24_spill] sm:$0xff] %v5790_v47  ;;  %v2726_v2 = vadd.f32 1e-12, %v5790_v47  ;;  %v4490_v28 = vpop.eup %4489  ;;  %4332 = vmatprep.subr.msk.mxu0 %vm2404_vm0, %v5800_v41  ;;  %4419 = vmatprep.subr.msk.mxu1 %vm2404_vm0, %v5800_v41  ;;  %v107_v29 = vld [vmem:[%s10314_s1 + $0xe0] sm:$0xff] }
  0xc9   :  { %4503 = vrsqrt.f32 %v2742_v46  ;;  %v170_v22 = vand.u32 2147483647, %v138_v1  ;;  %v5820_v46 = vmul.f32 %v4488_v40, %v5293_v58  ;;  %v76_v58 = vld [vmem:[%s10313_s0 + $0xe8] sm:$0xff]  ;;  %v77_v1 = vld [vmem:[%s10313_s0 + $0xf0] sm:$0xff]  ;;  %v139_v23 = vsub.f32 %v75_v45, %v107_v29 }
  0xca   :  { %v5805_v16 = vpop.xlane.xlu0 %2454  ;;  %v4492_v47 = vpop.eup %4491  ;;  %4505 = vrsqrt.f32 %v2726_v2  ;;  %4333 = vmatpush3.xpose.msk.msra.mxu0 %vm2404_vm0, %v5803_v42  ;;  %4435 = vmatpush3.xpose.msk.msra.mxu1 %vm2404_vm0, %v5803_v42  ;;  %v108_v40 = vld [vmem:[%s10314_s1 + $0xe8] sm:$0xff] }
  0xcb   :  { %10549 = vst [vmem:[#allocation25_spill] sm:$0xff] %v5805_v16  ;;  %v2741_v51 = vadd.f32 1e-12, %v5805_v16  ;;  %v5816_v52 = vpop.xlane.xlu1 %2406  ;;  %v4494_v25 = vpop.eup %4493  ;;  %v5829_v16 = vmul.f32 %v4490_v28, %v5298_v59  ;;  %4334 = vmatprep.subr.msk.mxu0 %vm2404_vm0, %v5820_v46  ;;  %4420 = vmatprep.subr.msk.mxu1 %vm2404_vm0, %v5820_v46  ;;  %v109_v59 = vld [vmem:[%s10314_s1 + $0xf0] sm:$0xff]  ;;  %v110_v28 = vld [vmem:[%s10314_s1 + $0xf8] sm:$0xff]  ;;  %v140_v14 = vsub.f32 %v76_v58, %v108_v40 }
  0xcc   :  { %10550 = vst [vmem:[#allocation26_spill] sm:$0xff] %v5816_v52  ;;  %v2725_v53 = vadd.f32 1e-12, %v5816_v52  ;;  %v141_v56 = vsub.f32 %v77_v1, %v109_v59  ;;  %v314_v59 = vld [vmem:[%s10315_s2 + $0x10] sm:$0xff] }
  0xcd   :  { %4507 = vrsqrt.f32 %v2741_v51  ;;  %v5832_v51 = vmul.f32 %v4492_v47, %v5309_v3  ;;  %v78_v3 = vld [vmem:[%s10313_s0 + $0xf8] sm:$0xff]  ;;  %v5861_v47 = vmul.f32 %v4494_v25, %v5314_v4  ;;  %v171_v4 = vand.u32 2147483647, %v139_v23 }
  0xce   :  { %v4496_v2 = vpop.eup %4495  ;;  %4509 = vrsqrt.f32 %v2725_v53  ;;  %4335 = vmatpush3.xpose.msk.msra.mxu0 %vm2404_vm0, %v5829_v16  ;;  %4436 = vmatpush3.xpose.msk.msra.mxu1 %vm2404_vm0, %v5829_v16  ;;  %v257_v53 = vsel %vm175_vm1, %v170_v22, 0.0  ;;  %v142_v57 = vsub.f32 %v78_v3, %v110_v28  ;;  %v172_v25 = vand.u32 2147483647, %v140_v14 }
  0xcf   :  { %v4498_v52 = vpop.eup %4497  ;;  %4336 = vmatprep.subr.msk.mxu0 %vm2404_vm0, %v5832_v51  ;;  %4421 = vmatprep.subr.msk.mxu1 %vm2404_vm0, %v5832_v51  ;;  %v5869_v61 = vmul.f32 %v4496_v2, %v5325_v12  ;;  %v173_v0 = vand.u32 2147483647, %v141_v56  ;;  %v260_v45 = vsel %vm175_vm1, %v171_v4, 0.0  ;;  %v313_v56 = vld [vmem:[%s10315_s2 + $0x8] sm:$0xff]  ;;  %4511 = vrsqrt.f32 %v5556_v32 }
  0xd0   :  { %258 = vadd.xlane.f32.xlu1 %v257_v53  ;;  %v5876_v22 = vmul.f32 %v4498_v52, %v5330_v13  ;;  %v174_v12 = vand.u32 2147483647, %v142_v57  ;;  %v312_v13 = vld [vmem:[%s10315_s2] sm:$0xff]  ;;  %261 = vadd.xlane.f32.xlu0 %v260_v45  ;;  %v263_v14 = vsel %vm175_vm1, %v172_v25, 0.0  ;;  %v345_v40 = vmul.f32 %v313_v56, %v313_v56 }
  0xd1   :  { %v266_v52 = vsel %vm175_vm1, %v173_v0, 0.0  ;;  %v344_v58 = vmul.f32 %v312_v13, %v312_v13  ;;  %4513 = vrsqrt.f32 %v5554_v27 }
  0xd2   :  { %v4500_v63 = vpop.eup %4499  ;;  %4337 = vmatpush3.xpose.msk.msra.mxu0 %vm2404_vm0, %v5861_v47  ;;  %4437 = vmatpush3.xpose.msk.msra.mxu1 %vm2404_vm0, %v5861_v47  ;;  %v379_v25 = vsel %vm175_vm1, %v345_v40, 0.0  ;;  %v320_v40 = vld [vmem:[%s10315_s2 + $0x40] sm:$0xff]  ;;  %4515 = vrsqrt.f32 %v5572_v48 }
  0xd3   :  { %v4502_v2 = vpop.eup %4501  ;;  %4338 = vmatprep.subr.msk.mxu0 %vm2404_vm0, %v5869_v61  ;;  %4422 = vmatprep.subr.msk.mxu1 %vm2404_vm0, %v5869_v61  ;;  %v5883_v23 = vmul.f32 %v4500_v63, %v5341_v20  ;;  %v269_v63 = vsel %vm175_vm1, %v174_v12, 0.0  ;;  %v376_v4 = vsel %vm175_vm1, %v344_v58, 0.0  ;;  %v346_v12 = vmul.f32 %v314_v59, %v314_v59 }
  0xd4   :  { %264 = vadd.xlane.f32.xlu1 %v263_v14  ;;  %v5899_v20 = vmul.f32 %v4502_v2, %v5346_v21  ;;  %v315_v21 = vld [vmem:[%s10315_s2 + $0x18] sm:$0xff]  ;;  %267 = vadd.xlane.f32.xlu0 %v266_v52  ;;  %4517 = vrsqrt.f32 %v5574_v49 }
  0xd5   :  { %v347_v2 = vmul.f32 %v315_v21, %v315_v21  ;;  %v319_v14 = vld [vmem:[%s10315_s2 + $0x38] sm:$0xff]  ;;  %4519 = vrsqrt.f32 %v5584_v60 }
  0xd6   :  { %v4504_v57 = vpop.eup %4503  ;;  %4339 = vmatpush3.xpose.msk.msra.mxu0 %vm2404_vm0, %v5876_v22  ;;  %4438 = vmatpush3.xpose.msk.msra.mxu1 %vm2404_vm0, %v5876_v22  ;;  %v351_v58 = vmul.f32 %v319_v14, %v319_v14  ;;  %v328_v14 = vld [vmem:[%s10315_s2 + $0x80] sm:$0xff]  ;;  %4521 = vrsqrt.f32 %v5587_v7 }
  0xd7   :  { %v4506_v29 = vpop.eup %4505  ;;  %4340 = vmatprep.subr.msk.mxu0 %vm2404_vm0, %v5883_v23  ;;  %4423 = vmatprep.subr.msk.mxu1 %vm2404_vm0, %v5883_v23  ;;  %v2806_v0 = vmul.f32 %v4504_v57, %v5357_v30  ;;  %v385_v45 = vsel %vm175_vm1, %v347_v2, 0.0  ;;  %v318_v57 = vld [vmem:[%s10315_s2 + $0x30] sm:$0xff]  ;;  %v324_v2 = vld [vmem:[%s10315_s2 + $0x60] sm:$0xff]  ;;  %4523 = vrsqrt.f32 %v5591_v15 }
  0xd8   :  { %v2790_v53 = vmul.f32 %v4506_v29, %v5362_v31  ;;  %270 = vadd.xlane.f32.xlu1 %v269_v63  ;;  %377 = vadd.xlane.f32.xlu0 %v376_v4  ;;  %v316_v31 = vld [vmem:[%s10315_s2 + $0x20] sm:$0xff]  ;;  %v350_v63 = vmul.f32 %v318_v57, %v318_v57  ;;  %v397_v21 = vsel %vm175_vm1, %v351_v58, 0.0  ;;  %v322_v4 = vld [vmem:[%s10315_s2 + $0x50] sm:$0xff]  ;;  %4525 = vrsqrt.f32 %v5593_v18 }
  0xd9   :  { %v348_v13 = vmul.f32 %v316_v31, %v316_v31  ;;  %v325_v31 = vld [vmem:[%s10315_s2 + $0x68] sm:$0xff]  ;;  %v330_v58 = vld [vmem:[%s10315_s2 + $0x90] sm:$0xff]  ;;  %4527 = vrsqrt.f32 %v5597_v26 }
  0xda   :  { %v4508_v1 = vpop.eup %4507  ;;  %4341 = vmatpush3.xpose.msk.msra.mxu0 %vm2404_vm0, %v5899_v20  ;;  %4439 = vmatpush3.xpose.msk.msra.mxu1 %vm2404_vm0, %v5899_v20  ;;  %v394_v59 = vsel %vm175_vm1, %v350_v63, 0.0  ;;  %4529 = vrsqrt.f32 %v5599_v33 }
  0xdb   :  { %v2805_v3 = vmul.f32 %v4508_v1, %v5373_v38  ;;  %v4510_v28 = vpop.eup %4509  ;;  %4342 = vmatprep.subr.msk.mxu0 %vm2404_vm0, %v2806_v0  ;;  %4424 = vmatprep.subr.msk.mxu1 %vm2404_vm0, %v2806_v0  ;;  %v317_v38 = vld [vmem:[%s10315_s2 + $0x28] sm:$0xff]  ;;  %v388_v52 = vsel %vm175_vm1, %v348_v13, 0.0  ;;  %v327_v13 = vld [vmem:[%s10315_s2 + $0x78] sm:$0xff]  ;;  %4531 = vrsqrt.f32 %v5610_v44 }
  0xdc   :  { %v2789_v30 = vmul.f32 %v4510_v28, %v5378_v39  ;;  %380 = vadd.xlane.f32.xlu1 %v379_v25  ;;  %v382_v39 = vsel %vm175_vm1, %v346_v12, 0.0  ;;  %v349_v56 = vmul.f32 %v317_v38, %v317_v38  ;;  %v321_v1 = vld [vmem:[%s10315_s2 + $0x48] sm:$0xff]  ;;  %v352_v28 = vmul.f32 %v320_v40, %v320_v40  ;;  %v331_v40 = vld [vmem:[%s10315_s2 + $0x98] sm:$0xff] }
  0xdd   :  { %4378 = vmatprep.mubr.msk.f32.mxu1 %vm2404_vm0, %v2805_v3  ;;  %383 = vadd.xlane.f32.xlu0 %v382_v39  ;;  %v354_v25 = vmul.f32 %v322_v4, %v322_v4  ;;  %v356_v38 = vmul.f32 %v324_v2, %v324_v2  ;;  %v357_v39 = vmul.f32 %v325_v31, %v325_v31  ;;  %v337_v2 = vld [vmem:[%s10315_s2 + $0xc8] sm:$0xff] }
  0xde   :  { %4346 = vmatprep.mubr.msk.f32.mxu0 %vm2404_vm0, %v2789_v30  ;;  %4343 = vmatpush3.xpose.msk.msra.mxu0 %vm2404_vm0, %v2790_v53  ;;  %v391_v29 = vsel %vm175_vm1, %v349_v56, 0.0  ;;  %v359_v57 = vmul.f32 %v327_v13, %v327_v13 }
  0xdf   :  { %4440 = vmatpush3.xpose.msk.msra.mxu1 %vm2404_vm0, %v2790_v53  ;;  %4344 = vmatprep.subr.msk.mxu0 %vm2404_vm0, %v2805_v3 }
  0xe0   :  { %4425 = vmatprep.subr.msk.mxu1 %vm2404_vm0, %v2805_v3  ;;  %386 = vadd.xlane.f32.xlu1 %v385_v45  ;;  %v326_v45 = vld [vmem:[%s10315_s2 + $0x70] sm:$0xff] }
  0xe1   :  { %389 = vadd.xlane.f32.xlu0 %v388_v52  ;;  %v358_v56 = vmul.f32 %v326_v45, %v326_v45  ;;  %v329_v52 = vld [vmem:[%s10315_s2 + $0x88] sm:$0xff] }
  0xe2   :  { %4345 = vmatpush3.xpose.msk.msra.mxu0 %vm2404_vm0, %v2789_v30  ;;  %v361_v63 = vmul.f32 %v329_v52, %v329_v52 }
  0xe3   :  { %4441 = vmatpush3.xpose.msk.msra.mxu1 %vm2404_vm0, %v2789_v30 }
  0xe4   :  { %392 = vadd.xlane.f32.xlu1 %v391_v29  ;;  %v360_v29 = vmul.f32 %v328_v14, %v328_v14 }
  0xe5   :  { %4347 = vmatmul.mubr.msk.f32.vlgmr.msra.gmra.mxu0 %vm2404_vm0, %v2789_v30  ;;  %v323_v30 = vld [vmem:[%s10315_s2 + $0x58] sm:$0xff]  ;;  %395 = vadd.xlane.f32.xlu0 %v394_v59  ;;  %v363_v59 = vmul.f32 %v331_v40, %v331_v40 }
  0xe6   :  { %4379 = vmatmul.mubr.msk.f32.vlgmr.msra.gmra.mxu1 %vm2404_vm0, %v2805_v3  ;;  %4348 = vmatprep.mubr.msk.f32.mxu0 %vm2404_vm0, %v2790_v53  ;;  %v353_v3 = vmul.f32 %v321_v1, %v321_v1  ;;  %v355_v12 = vmul.f32 %v323_v30, %v323_v30  ;;  %v362_v1 = vmul.f32 %v330_v58, %v330_v58  ;;  %v334_v30 = vld [vmem:[%s10315_s2 + $0xb0] sm:$0xff] }
  0xe7   :  { %4380 = vmatprep.mubr.msk.f32.mxu1 %vm2404_vm0, %v2806_v0 }
  0xe8   :  { %398 = vadd.xlane.f32.xlu1 %v397_v21  ;;  %v332_v21 = vld [vmem:[%s10315_s2 + $0xa0] sm:$0xff] }
  0xe9   :  { %4349 = vmatmul.mubr.msk.f32.gmra.mxu0 %vm2404_vm0, %v2790_v53  ;;  %v400_v53 = vsel %vm175_vm1, %v352_v28, 0.0  ;;  %v333_v28 = vld [vmem:[%s10315_s2 + $0xa8] sm:$0xff] }
  0xea   :  { %4381 = vmatmul.mubr.msk.f32.gmra.mxu1 %vm2404_vm0, %v2806_v0  ;;  %4350 = vmatprep.mubr.msk.f32.mxu0 %vm2404_vm0, %v5899_v20  ;;  %v403_v0 = vsel %vm175_vm1, %v353_v3, 0.0  ;;  %v364_v3 = vmul.f32 %v332_v21, %v332_v21  ;;  %v365_v4 = vmul.f32 %v333_v28, %v333_v28 }
  0xeb   :  { %4382 = vmatprep.mubr.msk.f32.mxu1 %vm2404_vm0, %v5883_v23  ;;  %401 = vadd.xlane.f32.xlu0 %v400_v53  ;;  %v335_v53 = vld [vmem:[%s10315_s2 + $0xb8] sm:$0xff] }
  0xec   :  { %404 = vadd.xlane.f32.xlu1 %v403_v0  ;;  %v366_v0 = vmul.f32 %v334_v30, %v334_v30 }
  0xed   :  { %4351 = vmatmul.mubr.msk.f32.gmra.mxu0 %vm2404_vm0, %v5899_v20  ;;  %v406_v20 = vsel %vm175_vm1, %v354_v25, 0.0  ;;  %v367_v25 = vmul.f32 %v335_v53, %v335_v53 }
  0xee   :  { %4383 = vmatmul.mubr.msk.f32.gmra.mxu1 %vm2404_vm0, %v5883_v23  ;;  %4352 = vmatprep.mubr.msk.f32.mxu0 %vm2404_vm0, %v5876_v22  ;;  %v409_v23 = vsel %vm175_vm1, %v355_v12, 0.0  ;;  %v336_v12 = vld [vmem:[%s10315_s2 + $0xc0] sm:$0xff] }
  0xef   :  { %4384 = vmatprep.mubr.msk.f32.mxu1 %vm2404_vm0, %v5869_v61  ;;  %407 = vadd.xlane.f32.xlu0 %v406_v20  ;;  %v368_v31 = vmul.f32 %v336_v12, %v336_v12  ;;  %v369_v20 = vmul.f32 %v337_v2, %v337_v2  ;;  %v1838_v12 = vld [vmem:[%s10321_s8 + $0x20] sm:$0xff] }
  0xf0   :  { %410 = vadd.xlane.f32.xlu1 %v409_v23  ;;  %v338_v23 = vld [vmem:[%s10315_s2 + $0xd0] sm:$0xff]  ;;  %v1870_v2 = vld [vmem:[%s10322_s9 + $0x20] sm:$0xff] }
  0xf1   :  { %4353 = vmatmul.mubr.msk.f32.gmra.mxu0 %vm2404_vm0, %v5876_v22  ;;  %v412_v22 = vsel %vm175_vm1, %v356_v38, 0.0  ;;  %v339_v38 = vld [vmem:[%s10315_s2 + $0xd8] sm:$0xff]  ;;  %v451_v45 = vsel %vm175_vm1, %v369_v20, 0.0  ;;  %v370_v13 = vmul.f32 %v338_v23, %v338_v23  ;;  %v1839_v20 = vld [vmem:[%s10321_s8 + $0x28] sm:$0xff] }
  0xf2   :  { %4385 = vmatmul.mubr.msk.f32.gmra.mxu1 %vm2404_vm0, %v5869_v61  ;;  %4354 = vmatprep.mubr.msk.f32.mxu0 %vm2404_vm0, %v5861_v47  ;;  %v415_v61 = vsel %vm175_vm1, %v357_v39, 0.0  ;;  %v6096_v39 = vpop.xlane.xlu0 %177  ;;  %v1871_v23 = vld [vmem:[%s10322_s9 + $0x28] sm:$0xff] }
  0xf3   :  { %4386 = vmatprep.mubr.msk.f32.mxu1 %vm2404_vm0, %v5832_v51  ;;  %413 = vadd.xlane.f32.xlu0 %v412_v22  ;;  %v371_v22 = vmul.f32 %v339_v38, %v339_v38 }
  0xf4   :  { %416 = vadd.xlane.f32.xlu1 %v415_v61  ;;  %v340_v61 = vld [vmem:[%s10315_s2 + $0xe0] sm:$0xff] }
  0xf5   :  { %4355 = vmatmul.mubr.msk.f32.gmra.mxu0 %vm2404_vm0, %v5861_v47  ;;  %v418_v47 = vsel %vm175_vm1, %v358_v56, 0.0  ;;  %v341_v56 = vld [vmem:[%s10315_s2 + $0xe8] sm:$0xff]  ;;  %v372_v14 = vmul.f32 %v340_v61, %v340_v61 }
  0xf6   :  { %4387 = vmatmul.mubr.msk.f32.gmra.mxu1 %vm2404_vm0, %v5832_v51  ;;  %4356 = vmatprep.mubr.msk.f32.mxu0 %vm2404_vm0, %v5829_v16  ;;  %v421_v51 = vsel %vm175_vm1, %v359_v57, 0.0  ;;  %v457_v57 = vsel %vm175_vm1, %v371_v22, 0.0  ;;  %v373_v52 = vmul.f32 %v341_v56, %v341_v56  ;;  %v1872_v22 = vld [vmem:[%s10322_s9 + $0x30] sm:$0xff] }
  0xf7   :  { %4388 = vmatprep.mubr.msk.f32.mxu1 %vm2404_vm0, %v5820_v46  ;;  %419 = vadd.xlane.f32.xlu0 %v418_v47  ;;  %v342_v47 = vld [vmem:[%s10315_s2 + $0xf0] sm:$0xff] }
  0xf8   :  { %422 = vadd.xlane.f32.xlu1 %v421_v51  ;;  %v343_v51 = vld [vmem:[%s10315_s2 + $0xf8] sm:$0xff] }
  0xf9   :  { %4357 = vmatmul.mubr.msk.f32.gmra.mxu0 %vm2404_vm0, %v5829_v16  ;;  %v424_v16 = vsel %vm175_vm1, %v360_v29, 0.0  ;;  %v375_v58 = vmul.f32 %v343_v51, %v343_v51  ;;  %v1842_v51 = vld [vmem:[%s10321_s8 + $0x40] sm:$0xff] }
  0xfa   :  { %4389 = vmatmul.mubr.msk.f32.gmra.mxu1 %vm2404_vm0, %v5820_v46  ;;  %4358 = vmatprep.mubr.msk.f32.mxu0 %vm2404_vm0, %v5803_v42  ;;  %v427_v46 = vsel %vm175_vm1, %v361_v63, 0.0  ;;  %v374_v63 = vmul.f32 %v342_v47, %v342_v47 }
  0xfb   :  { %4390 = vmatprep.mubr.msk.f32.mxu1 %vm2404_vm0, %v5800_v41  ;;  %425 = vadd.xlane.f32.xlu0 %v424_v16 }
  0xfc   :  { %428 = vadd.xlane.f32.xlu1 %v427_v46  ;;  %v466_v46 = vsel %vm175_vm1, %v374_v63, 0.0 }
  0xfd   :  { %4359 = vmatmul.mubr.msk.f32.gmra.mxu0 %vm2404_vm0, %v5803_v42  ;;  %v430_v42 = vsel %vm175_vm1, %v362_v1, 0.0  ;;  %v469_v1 = vsel %vm175_vm1, %v375_v58, 0.0 }
  0xfe   :  { %4391 = vmatmul.mubr.msk.f32.gmra.mxu1 %vm2404_vm0, %v5800_v41  ;;  %4360 = vmatprep.mubr.msk.f32.mxu0 %vm2404_vm0, %v5776_v35  ;;  %v433_v41 = vsel %vm175_vm1, %v363_v59, 0.0 }
  0xff   :  { %4392 = vmatprep.mubr.msk.f32.mxu1 %vm2404_vm0, %v5773_v34  ;;  %431 = vadd.xlane.f32.xlu0 %v430_v42 }
 0x100   :  { %434 = vadd.xlane.f32.xlu1 %v433_v41  ;;  %v1836_v41 = vld [vmem:[%s10321_s8 + $0x10] sm:$0xff] }
 0x101   :  { %4361 = vmatmul.mubr.msk.f32.gmra.mxu0 %vm2404_vm0, %v5776_v35  ;;  %v436_v35 = vsel %vm175_vm1, %v364_v3, 0.0  ;;  %v1868_v3 = vld [vmem:[%s10322_s9 + $0x10] sm:$0xff] }
 0x102   :  { %4393 = vmatmul.mubr.msk.f32.gmra.mxu1 %vm2404_vm0, %v5773_v34  ;;  %4362 = vmatprep.mubr.msk.f32.mxu0 %vm2404_vm0, %v5755_v19  ;;  %v439_v34 = vsel %vm175_vm1, %v365_v4, 0.0  ;;  %v1900_v30 = vmul.f32 %v1868_v3, %v1836_v41  ;;  %v10551_v3 = vld [vmem:[#allocation6_spill] sm:$0xff] }
 0x103   :  { %4394 = vmatprep.mubr.msk.f32.mxu1 %vm2404_vm0, %v5752_v17  ;;  %437 = vadd.xlane.f32.xlu0 %v436_v35  ;;  %v1837_v35 = vld [vmem:[%s10321_s8 + $0x18] sm:$0xff]  ;;  %4533 = vrsqrt.f32 %v10551_v3 }
 0x104   :  { %440 = vadd.xlane.f32.xlu1 %v439_v34  ;;  %v1869_v34 = vld [vmem:[%s10322_s9 + $0x18] sm:$0xff] }
 0x105   :  { %4363 = vmatmul.mubr.msk.f32.gmra.mxu0 %vm2404_vm0, %v5755_v19  ;;  %v442_v19 = vsel %vm175_vm1, %v366_v0, 0.0  ;;  %v1936_v0 = vsel %vm175_vm1, %v1900_v30, 0.0 }
 0x106   :  { %4395 = vmatmul.mubr.msk.f32.gmra.mxu1 %vm2404_vm0, %v5752_v17  ;;  %4364 = vmatprep.mubr.msk.f32.mxu0 %vm2404_vm0, %v5733_v37  ;;  %v445_v17 = vsel %vm175_vm1, %v367_v25, 0.0  ;;  %v1901_v25 = vmul.f32 %v1869_v34, %v1837_v35  ;;  %v2716_v34 = vand.u32 2147483648, %v5556_v32 }
 0x107   :  { %4396 = vmatprep.mubr.msk.f32.mxu1 %vm2404_vm0, %v5730_v11  ;;  %443 = vadd.xlane.f32.xlu0 %v442_v19 }
 0x108   :  { %446 = vadd.xlane.f32.xlu1 %v445_v17  ;;  %v1939_v19 = vsel %vm175_vm1, %v1901_v25, 0.0  ;;  %v1902_v17 = vmul.f32 %v1870_v2, %v1838_v12 }
 0x109   :  { %4365 = vmatmul.mubr.msk.f32.gmra.mxu0 %vm2404_vm0, %v5733_v37  ;;  %v6102_v37 = vpop.xlane.xlu1 %180 }
 0x10a   :  { %4397 = vmatmul.mubr.msk.f32.gmra.mxu1 %vm2404_vm0, %v5730_v11  ;;  %4366 = vmatprep.mubr.msk.f32.mxu0 %vm2404_vm0, %v5713_v8  ;;  %v448_v11 = vsel %vm175_vm1, %v368_v31, 0.0  ;;  %v1942_v38 = vsel %vm175_vm1, %v1902_v17, 0.0 }
 0x10b   :  { %4398 = vmatprep.mubr.msk.f32.mxu1 %vm2404_vm0, %v5710_v43  ;;  %449 = vadd.xlane.f32.xlu0 %v448_v11  ;;  %v1903_v11 = vmul.f32 %v1871_v23, %v1839_v20  ;;  %v2604_v20 = vand.u32 2147483648, %v5574_v49  ;;  %v2709_v23 = vand.u32 2147483648, %v5584_v60 }
 0x10c   :  { %452 = vadd.xlane.f32.xlu1 %v451_v45 }
 0x10d   :  { %4367 = vmatmul.mubr.msk.f32.gmra.mxu0 %vm2404_vm0, %v5713_v8  ;;  %v6120_v8 = vpop.xlane.xlu0 %183  ;;  %v6134_v29 = vpop.xlane.xlu1 %186  ;;  %v1945_v61 = vsel %vm175_vm1, %v1903_v11, 0.0 }
 0x10e   :  { %4399 = vmatmul.mubr.msk.f32.gmra.mxu1 %vm2404_vm0, %v5710_v43  ;;  %4368 = vmatprep.mubr.msk.f32.mxu0 %vm2404_vm0, %v5693_v10  ;;  %v454_v43 = vsel %vm175_vm1, %v370_v13, 0.0  ;;  %v1840_v13 = vld [vmem:[%s10321_s8 + $0x30] sm:$0xff] }
 0x10f   :  { %4400 = vmatprep.mubr.msk.f32.mxu1 %vm2404_vm0, %v5690_v5  ;;  %455 = vadd.xlane.f32.xlu0 %v454_v43  ;;  %v1904_v56 = vmul.f32 %v1872_v22, %v1840_v13  ;;  %v1841_v43 = vld [vmem:[%s10321_s8 + $0x38] sm:$0xff]  ;;  %v2597_v13 = vand.u32 2147483648, %v5587_v7 }
 0x110   :  { %458 = vadd.xlane.f32.xlu1 %v457_v57  ;;  %v1873_v57 = vld [vmem:[%s10322_s9 + $0x38] sm:$0xff] }
 0x111   :  { %4369 = vmatmul.mubr.msk.f32.gmra.mxu0 %vm2404_vm0, %v5693_v10  ;;  %v463_v10 = vsel %vm175_vm1, %v373_v52, 0.0  ;;  %v6146_v40 = vpop.xlane.xlu0 %189  ;;  %v6152_v16 = vpop.xlane.xlu1 %192  ;;  %v1905_v52 = vmul.f32 %v1873_v57, %v1841_v43  ;;  %v2590_v43 = vand.u32 2147483648, %v5593_v18  ;;  %v10554_v57 = vld [vmem:[#allocation8_spill] sm:$0xff] }
 0x112   :  { %4401 = vmatmul.mubr.msk.f32.gmra.mxu1 %vm2404_vm0, %v5690_v5  ;;  %4370 = vmatprep.mubr.msk.f32.mxu0 %vm2404_vm0, %v5673_v50  ;;  %v460_v5 = vsel %vm175_vm1, %v372_v14, 0.0  ;;  %v1948_v14 = vsel %vm175_vm1, %v1904_v56, 0.0  ;;  %v2702_v56 = vand.u32 2147483648, %v5591_v15  ;;  %4535 = vrsqrt.f32 %v10554_v57 }
 0x113   :  { %4402 = vmatprep.mubr.msk.f32.mxu1 %vm2404_vm0, %v5670_v9  ;;  %461 = vadd.xlane.f32.xlu0 %v460_v5  ;;  %v1874_v5 = vld [vmem:[%s10322_s9 + $0x40] sm:$0xff] }
 0x114   :  { %464 = vadd.xlane.f32.xlu1 %v463_v10  ;;  %v1951_v10 = vsel %vm175_vm1, %v1905_v52, 0.0  ;;  %v1906_v63 = vmul.f32 %v1874_v5, %v1842_v51 }
 0x115   :  { %4371 = vmatmul.mubr.msk.f32.gmra.mxu0 %vm2404_vm0, %v5673_v50  ;;  %v1866_v50 = vld [vmem:[%s10322_s9] sm:$0xff] }
 0x116   :  { %4403 = vmatmul.mubr.msk.f32.gmra.mxu1 %vm2404_vm0, %v5670_v9  ;;  %4372 = vmatprep.mubr.msk.f32.mxu0 %vm2404_vm0, %v5653_v24  ;;  %v6164_v9 = vpop.xlane.xlu0 %195 }
 0x117   :  { %4404 = vmatprep.mubr.msk.f32.mxu1 %vm2404_vm0, %v5650_v6  ;;  %467 = vadd.xlane.f32.xlu0 %v466_v46  ;;  %v1954_v46 = vsel %vm175_vm1, %v1906_v63, 0.0 }
 0x118   :  { %470 = vadd.xlane.f32.xlu1 %v469_v1 }
 0x119   :  { %4373 = vmatmul.mubr.msk.f32.gmra.mxu0 %vm2404_vm0, %v5653_v24  ;;  %v6170_v24 = vpop.xlane.xlu1 %198 }
 0x11a   :  { %4405 = vmatmul.mubr.msk.f32.gmra.mxu1 %vm2404_vm0, %v5650_v6  ;;  %4374 = vmatprep.mubr.msk.f32.mxu0 %vm2404_vm0, %v5637_v62  ;;  %v6180_v6 = vpop.xlane.xlu0 %201 }
 0x11b   :  { %4406 = vmatprep.mubr.msk.f32.mxu1 %vm2404_vm0, %v5620_v55 }
 0x11d   :  { %4375 = vmatmul.mubr.msk.f32.gmra.mxu0 %vm2404_vm0, %v5637_v62  ;;  %v6182_v62 = vpop.xlane.xlu1 %204 }
 0x11e   :  { %4407 = vmatmul.mubr.msk.f32.gmra.mxu1 %vm2404_vm0, %v5620_v55  ;;  %4376 = vmatprep.mubr.msk.f32.mxu0 %vm2404_vm0, %v5617_v54  ;;  %v1834_v55 = vld [vmem:[%s10321_s8] sm:$0xff]  ;;  %v6197_v42 = vpop.xlane.xlu0 %207 }
 0x11f   :  { %4408 = vmatprep.mubr.msk.f32.mxu1 %vm2404_vm0, %v5602_v36  ;;  %v1898_v59 = vmul.f32 %v1866_v50, %v1834_v55 }
 0x121   :  { %4377 = vmatmul.mubr.msk.f32.gmra.mxu0 %vm2404_vm0, %v5617_v54  ;;  %v1835_v54 = vld [vmem:[%s10321_s8 + $0x8] sm:$0xff]  ;;  %v1930_v21 = vsel %vm175_vm1, %v1898_v59, 0.0  ;;  %v6206_v53 = vpop.xlane.xlu1 %210 }
 0x122   :  { %4409 = vmatmul.mubr.msk.f32.gmra.mxu1 %vm2404_vm0, %v5602_v36  ;;  %v1867_v36 = vld [vmem:[%s10322_s9 + $0x8] sm:$0xff]  ;;  %1931 = vadd.xlane.f32.xlu1 %v1930_v21  ;;  %v6222_v31 = vpop.xlane.xlu0 %213  ;;  %vm2589_vm0 = vcmp.eq.f32.partialorder %v5593_v18, 0.0 }
 0x123   :  { %v1899_v28 = vmul.f32 %v1867_v36, %v1835_v54  ;;  %v4512_v54 = vpop.eup %4511 }
 0x124   :  { %v4514_v36 = vpop.eup %4513  ;;  %v2712_v41 = vmul.f32 %v4512_v54, %v5556_v32 }
 0x125   :  { %v1933_v4 = vsel %vm175_vm1, %v1899_v28, 0.0  ;;  %v6231_v45 = vpop.xlane.xlu1 %216  ;;  %v4516_v28 = vpop.eup %4515  ;;  %v2719_v12 = vmul.f32 %v4514_v36, %v5554_v27  ;;  %v10557_v36 = vld [vmem:[#allocation7_spill] sm:$0xff] }
 0x126   :  { %1934 = vadd.xlane.f32.xlu0 %v1933_v4  ;;  %1937 = vadd.xlane.f32.xlu1 %v1936_v0  ;;  %v6247_v47 = vpop.xlane.xlu0 %219  ;;  %v4518_v35 = vpop.eup %4517  ;;  %v2611_v0 = vand.u32 2147483648, %v5572_v48  ;;  %v2607_v2 = vmul.f32 %v4516_v28, %v5572_v48  ;;  %v2714_v17 = vsel %vm2713_vm3, %v5556_v32, %v2712_v41  ;;  %v2695_v32 = vand.u32 2147483648, %v5597_v26 }
 0x127   :  { %v4520_v25 = vpop.eup %4519  ;;  %v2600_v11 = vmul.f32 %v4518_v35, %v5574_v49  ;;  %v6315_v52 = vsel %vm2720_vm2, %v5554_v27, %v2719_v12  ;;  %v2717_v51 = vsel %vm2715_vm4, %v2716_v34, %v2714_v17  ;;  %vm2692_vm2 = vcmp.eq.f32.partialorder %v5597_v26, inf }
 0x128   :  { %10555 = vst [vmem:[#allocation8_spill] sm:$0xff] %v6315_v52  ;;  %v2609_v5 = vsel %vm2608_vm5, %v5572_v48, %v2607_v2  ;;  %4537 = vrsqrt.f32 %v10557_v36  ;;  %vm2694_vm3 = vcmp.eq.f32.partialorder %v5597_v26, 0.0  ;;  %vm2580_vm4 = vcmp.eq.f32.partialorder %v5599_v33, inf  ;;  %v10559_v2 = vld [vmem:[#allocation10_spill] sm:$0xff] }
 0x129   :  { %v6256_v58 = vpop.xlane.xlu1 %222  ;;  %v2602_v28 = vsel %vm2601_vm7, %v5574_v49, %v2600_v11  ;;  %vm2582_vm5 = vcmp.eq.f32.partialorder %v5599_v33, 0.0  ;;  %v6338_v34 = vadd.f32 -1.0, %v2717_v51  ;;  %4539 = vrsqrt.f32 %v10559_v2 }
 0x12a   :  { %1940 = vadd.xlane.f32.xlu0 %v1939_v19  ;;  %1943 = vadd.xlane.f32.xlu1 %v1942_v38  ;;  %v6262_v1 = vpop.xlane.xlu0 %225  ;;  %v4522_v19 = vpop.eup %4521  ;;  %v2583_v11 = vand.u32 2147483648, %v5599_v33  ;;  %v2605_v48 = vsel %vm2603_vm8, %v2604_v20, %v2602_v28  ;;  %vm2687_vm7 = vcmp.eq.f32.partialorder %v5610_v44, 0.0  ;;  %v10564_v28 = vld [vmem:[#allocation14_spill] sm:$0xff]  ;;  %vm2573_vm8 = vcmp.eq.f32.partialorder %v10551_v3, inf }
 0x12b   :  { %v4524_v38 = vpop.eup %4523  ;;  %v2593_v54 = vmul.f32 %v4522_v19, %v5587_v7  ;;  %10558 = vst [vmem:[#allocation7_spill] sm:$0xff] %v6338_v34  ;;  %v272_v34 = vadd.f32 %v6102_v37, %v6096_v39  ;;  %v10583_v39 = vld [vmem:[#allocation17_spill] sm:$0xff] }
 0x12c   :  { %v2698_v41 = vmul.f32 %v4524_v38, %v5591_v15 }
 0x12d   :  { %v6265_v55 = vpop.xlane.xlu1 %228  ;;  %v273_v27 = vadd.f32 %v272_v34, %v6120_v8  ;;  %v10586_v8 = vld [vmem:[#allocation13_spill] sm:$0xff] }
 0x12e   :  { %1946 = vadd.xlane.f32.xlu0 %v1945_v61  ;;  %1949 = vadd.xlane.f32.xlu1 %v1948_v14  ;;  %v6271_v50 = vpop.xlane.xlu0 %231  ;;  %v4526_v61 = vpop.eup %4525 }
 0x12f   :  { %v4528_v14 = vpop.eup %4527  ;;  %v2586_v12 = vmul.f32 %v4526_v61, %v5593_v18  ;;  %v10561_v61 = vld [vmem:[#allocation9_spill] sm:$0xff] }
 0x130   :  { %v2691_v17 = vmul.f32 %v4528_v14, %v5597_v26  ;;  %4541 = vrsqrt.f32 %v10561_v61  ;;  %v2700_v14 = vsel %vm2699_vm12, %v5591_v15, %v2698_v41  ;;  %vm2566_vm12 = vcmp.eq.f32.partialorder %v10554_v57, inf }
 0x131   :  { %v6275_v59 = vpop.xlane.xlu1 %234 }
 0x132   :  { %1952 = vadd.xlane.f32.xlu0 %v1951_v10  ;;  %1955 = vadd.xlane.f32.xlu1 %v1954_v46  ;;  %v6278_v21 = vpop.xlane.xlu0 %237  ;;  %v2705_v10 = vmul.f32 %v4520_v25, %v5584_v60  ;;  %v4530_v46 = vpop.eup %4529  ;;  %v2612_v25 = vsel %vm2610_vm6, %v2611_v0, %v2609_v5  ;;  %v2595_v0 = vsel %vm2594_vm11, %v5587_v7, %v2593_v54  ;;  %vm2685_vm6 = vcmp.eq.f32.partialorder %v5610_v44, inf }
 0x133   :  { %v4532_v35 = vpop.eup %4531  ;;  %v2579_v38 = vmul.f32 %v4530_v46, %v5599_v33  ;;  %v4297_v5 = vadd.f32 -1.0, %v2612_v25  ;;  %v10562_v46 = vld [vmem:[#allocation12_spill] sm:$0xff]  ;;  %v2588_v54 = vsel %vm2587_vm14, %v5593_v18, %v2586_v12  ;;  %v4296_v25 = vadd.f32 -1.0, %v2605_v48 }
 0x134   :  { %v2707_v19 = vsel %vm2706_vm9, %v5584_v60, %v2705_v10  ;;  %v4534_v51 = vpop.eup %4533  ;;  %v2684_v10 = vmul.f32 %v4532_v35, %v5610_v44  ;;  %4543 = vrsqrt.f32 %v10562_v46  ;;  %v2598_v41 = vsel %vm2596_vm13, %v2597_v13, %v2595_v0 }
 0x135   :  { %v6286_v30 = vpop.xlane.xlu1 %240  ;;  %v2710_v20 = vsel %vm2708_vm10, %v2709_v23, %v2707_v19  ;;  %4545 = vrsqrt.f32 %v10564_v28  ;;  %v2693_v35 = vsel %vm2692_vm2, %v5597_v26, %v2691_v17  ;;  %v2581_v60 = vsel %vm2580_vm4, %v5599_v33, %v2579_v38 }
 0x136   :  { %10552 = vst [vmem:[#allocation6_spill] sm:$0xff] %v6286_v30  ;;  %v6305_v22 = vpop.xlane.xlu0 %243  ;;  %v2703_v23 = vsel %vm2701_vm15, %v2702_v56, %v2700_v14  ;;  %v2688_v12 = vand.u32 2147483648, %v5610_v44  ;;  %v2572_v19 = vmul.f32 %v4534_v51, %v10551_v3  ;;  %v6386_v48 = vmul.f32 %v4297_v5, %v4297_v5  ;;  %v4536_v51 = vpop.eup %4535  ;;  %v10568_v14 = vld [vmem:[#allocation16_spill] sm:$0xff] }
 0x137   :  { %10553 = vst [vmem:[#allocation27_spill] sm:$0xff] %v6305_v22  ;;  %v4311_v7 = vadd.f32 -1.0, %v2710_v20  ;;  %v2591_v13 = vsel %vm2589_vm0, %v2590_v43, %v2588_v54  ;;  %v2686_v17 = vsel %vm2685_vm6, %v5610_v44, %v2684_v10  ;;  %v4295_v15 = vadd.f32 -1.0, %v2598_v41 }
 0x138   :  { %10565 = vst [vmem:[#allocation12_spill] sm:$0xff] %v6386_v48  ;;  %v2696_v56 = vsel %vm2694_vm3, %v2695_v32, %v2693_v35  ;;  %v2584_v0 = vsel %vm2582_vm5, %v2583_v11, %v2581_v60  ;;  %vm2575_vm9 = vcmp.eq.f32.partialorder %v10551_v3, 0.0  ;;  %v6400_v5 = vmul.f32 %v4296_v25, %v4296_v25  ;;  %v10570_v32 = vld [vmem:[#allocation11_spill] sm:$0xff]  ;;  %v4538_v11 = vpop.eup %4537 }
 0x139   :  { %v6324_v63 = vpop.xlane.xlu1 %246  ;;  %v4310_v18 = vadd.f32 -1.0, %v2703_v23  ;;  %v2576_v43 = vand.u32 2147483648, %v10551_v3  ;;  %4547 = vrsqrt.f32 %v10568_v14  ;;  %v4294_v20 = vadd.f32 -1.0, %v2591_v13  ;;  %v4540_v23 = vpop.eup %4539 }
 0x13a   :  { %10556 = vst [vmem:[#allocation28_spill] sm:$0xff] %v6324_v63  ;;  %v6350_v4 = vpop.xlane.xlu0 %249  ;;  %10567 = vst [vmem:[#allocation29_spill] sm:$0xff] %v6400_v5  ;;  %v2689_v26 = vsel %vm2687_vm7, %v2688_v12, %v2686_v17  ;;  %v2574_v33 = vsel %vm2573_vm8, %v10551_v3, %v2572_v19  ;;  %4549 = vrsqrt.f32 %v10570_v32  ;;  %v6412_v54 = vmul.f32 %v4311_v7, %v4311_v7  ;;  %v10579_v3 = vld [vmem:[#allocation18_spill] sm:$0xff] }
 0x13b   :  { %10560 = vst [vmem:[#allocation10_spill] sm:$0xff] %v6350_v4  ;;  %v4309_v25 = vadd.f32 -1.0, %v2696_v56  ;;  %v4293_v41 = vadd.f32 -1.0, %v2584_v0  ;;  %vm2678_vm10 = vcmp.eq.f32.partialorder %v10557_v36, inf  ;;  %v6415_v35 = vmul.f32 %v4295_v15, %v4295_v15  ;;  %v3399_v63 = vld [vmem:[%s10325_s12 + $0x108] sm:$0xff] }
 0x13c   :  { %10571 = vst [vmem:[#allocation30_spill] sm:$0xff] %v6412_v54  ;;  %vm2680_vm11 = vcmp.eq.f32.partialorder %v10557_v36, 0.0  ;;  %v2681_v44 = vand.u32 2147483648, %v10557_v36  ;;  %v2565_v60 = vmul.f32 %v4536_v51, %v10554_v57  ;;  %v6420_v12 = vmul.f32 %v4310_v18, %v4310_v18 }
 0x13d   :  { %v6364_v49 = vpop.xlane.xlu1 %252  ;;  %10572 = vst [vmem:[#allocation31_spill] sm:$0xff] %v6415_v35  ;;  %v4308_v19 = vadd.f32 -1.0, %v2689_v26  ;;  %v2577_v7 = vsel %vm2575_vm9, %v2576_v43, %v2574_v33  ;;  %v6427_v17 = vmul.f32 %v4294_v20, %v4294_v20  ;;  %v2677_v15 = vmul.f32 %v4538_v11, %v10557_v36  ;;  %v4542_v51 = vpop.eup %4541 }
 0x13e   :  { %10563 = vst [vmem:[#allocation9_spill] sm:$0xff] %v6364_v49  ;;  %v6393_v38 = vpop.xlane.xlu0 %255  ;;  %10573 = vst [vmem:[#allocation32_spill] sm:$0xff] %v6420_v12  ;;  %vm2568_vm13 = vcmp.eq.f32.partialorder %v10554_v57, 0.0  ;;  %v2569_v56 = vand.u32 2147483648, %v10554_v57  ;;  %v6434_v18 = vmul.f32 %v4309_v25, %v4309_v25  ;;  %v6436_v26 = vmul.f32 %v4293_v41, %v4293_v41  ;;  %v10581_v41 = vld [vmem:[#allocation15_spill] sm:$0xff] }
 0x13f   :  { %10566 = vst [vmem:[#allocation14_spill] sm:$0xff] %v6393_v38  ;;  %10575 = vst [vmem:[#allocation34_spill] sm:$0xff] %v6427_v17  ;;  %vm2671_vm14 = vcmp.eq.f32.partialorder %v10561_v61, inf  ;;  %4551 = vrsqrt.f32 %v10579_v3  ;;  %v4292_v20 = vadd.f32 -1.0, %v2577_v7  ;;  %v2567_v33 = vsel %vm2566_vm12, %v10554_v57, %v2565_v60 }
 0x140   :  { %10577 = vst [vmem:[#allocation36_spill] sm:$0xff] %v6434_v18  ;;  %10578 = vst [vmem:[#allocation37_spill] sm:$0xff] %v6436_v26  ;;  %v2558_v11 = vmul.f32 %v4540_v23, %v10559_v2  ;;  %v6444_v12 = vmul.f32 %v4308_v19, %v4308_v19  ;;  %vm2673_vm15 = vcmp.eq.f32.partialorder %v10561_v61, 0.0  ;;  %v2674_v25 = vand.u32 2147483648, %v10561_v61 }
 0x141   :  { %v4544_v43 = vpop.eup %4543  ;;  %4553 = vrsqrt.f32 %v10581_v41  ;;  %v2679_v60 = vsel %vm2678_vm10, %v10557_v36, %v2677_v15  ;;  %v2670_v23 = vmul.f32 %v4542_v51, %v10561_v61  ;;  %vm2559_vm0 = vcmp.eq.f32.partialorder %v10559_v2, inf }
 0x142   :  { %v4546_v54 = vpop.eup %4545  ;;  %10580 = vst [vmem:[#allocation18_spill] sm:$0xff] %v6444_v12  ;;  %4555 = vrsqrt.f32 %v10583_v39  ;;  %v2570_v19 = vsel %vm2568_vm13, %v2569_v56, %v2567_v33  ;;  %vm2561_vm2 = vcmp.eq.f32.partialorder %v10559_v2, 0.0  ;;  %v2562_v7 = vand.u32 2147483648, %v10559_v2 }
 0x143   :  { %v2551_v18 = vmul.f32 %v4544_v43, %v10562_v46  ;;  %v6464_v12 = vmul.f32 %v4292_v20, %v4292_v20  ;;  %v2560_v15 = vsel %vm2559_vm0, %v10559_v2, %v2558_v11  ;;  %v2544_v51 = vmul.f32 %v4546_v54, %v10564_v28 }
 0x144   :  { %v2682_v48 = vsel %vm2680_vm11, %v2681_v44, %v2679_v60  ;;  %vm2664_vm3 = vcmp.eq.f32.partialorder %v10570_v32, inf  ;;  %vm2552_vm4 = vcmp.eq.f32.partialorder %v10562_v46, inf  ;;  %vm2554_vm5 = vcmp.eq.f32.partialorder %v10562_v46, 0.0 }
 0x145   :  { %10585 = vst [vmem:[#allocation40_spill] sm:$0xff] %v6464_v12  ;;  %v4291_v43 = vadd.f32 -1.0, %v2570_v19  ;;  %v2672_v20 = vsel %vm2671_vm14, %v10561_v61, %v2670_v23  ;;  %v2555_v54 = vand.u32 2147483648, %v10562_v46  ;;  %4557 = vrsqrt.f32 %v10586_v8 }
 0x146   :  { %v4548_v56 = vpop.eup %4547  ;;  %v2563_v33 = vsel %vm2561_vm2, %v2562_v7, %v2560_v15  ;;  %v2553_v11 = vsel %vm2552_vm4, %v10562_v46, %v2551_v18  ;;  %vm2545_vm6 = vcmp.eq.f32.partialorder %v10564_v28, inf  ;;  %v6489_v60 = vadd.f32 -1.0, %v2682_v48 }
 0x147   :  { %v4550_v44 = vpop.eup %4549  ;;  %v2546_v23 = vsel %vm2545_vm6, %v10564_v28, %v2544_v51  ;;  %v274_v19 = vadd.f32 %v273_v27, %v6134_v29  ;;  %v2675_v57 = vsel %vm2673_vm15, %v2674_v25, %v2672_v20  ;;  %v2548_v7 = vand.u32 2147483648, %v10564_v28 }
 0x148   :  { %10587 = vst [vmem:[#allocation41_spill] sm:$0xff] %v6489_v60  ;;  %v2537_v18 = vmul.f32 %v4548_v56, %v10568_v14  ;;  %v4290_v15 = vadd.f32 -1.0, %v2563_v33  ;;  %v2663_v5 = vmul.f32 %v4550_v44, %v10570_v32  ;;  %v2556_v48 = vsel %vm2554_vm5, %v2555_v54, %v2553_v11 }
 0x149   :  { %vm2547_vm7 = vcmp.eq.f32.partialorder %v10564_v28, 0.0  ;;  %v6507_v61 = vmul.f32 %v4291_v43, %v4291_v43  ;;  %v6511_v20 = vadd.f32 -1.0, %v2675_v57  ;;  %vm2538_vm8 = vcmp.eq.f32.partialorder %v10568_v14, inf }
 0x14a   :  { %v2549_v25 = vsel %vm2547_vm7, %v2548_v7, %v2546_v23  ;;  %v275_v46 = vadd.f32 %v274_v19, %v6146_v40  ;;  %v4289_v28 = vadd.f32 -1.0, %v2556_v48  ;;  %v2539_v54 = vsel %vm2538_vm8, %v10568_v14, %v2537_v18  ;;  %v10592_v23 = vld [vmem:[#allocation19_spill] sm:$0xff]  ;;  %v10593_v18 = vld [vmem:[#allocation20_spill] sm:$0xff]  ;;  %v10594_v48 = vld [vmem:[#allocation21_spill] sm:$0xff] }
 0x14b   :  { %10588 = vst [vmem:[#allocation42_spill] sm:$0xff] %v6507_v61  ;;  %10589 = vst [vmem:[#allocation43_spill] sm:$0xff] %v6511_v20  ;;  %vm2540_vm9 = vcmp.eq.f32.partialorder %v10568_v14, 0.0  ;;  %v2541_v43 = vand.u32 2147483648, %v10568_v14  ;;  %v6519_v33 = vmul.f32 %v4290_v15, %v4290_v15  ;;  %v6524_v57 = vsel %vm2664_vm3, %v10570_v32, %v2663_v5 }
 0x14c   :  { %v4552_v56 = vpop.eup %4551  ;;  %10591 = vst [vmem:[#allocation45_spill] sm:$0xff] %v6524_v57  ;;  %v4288_v11 = vadd.f32 -1.0, %v2549_v25  ;;  %vm2531_vm10 = vcmp.eq.f32.partialorder %v10579_v3, inf  ;;  %v276_v5 = vadd.f32 %v275_v46, %v6152_v16  ;;  %v6538_v51 = vmul.f32 %v4289_v28, %v4289_v28 }
 0x14d   :  { %10590 = vst [vmem:[#allocation44_spill] sm:$0xff] %v6519_v33  ;;  %v2530_v7 = vmul.f32 %v4552_v56, %v10579_v3  ;;  %v2542_v14 = vsel %vm2540_vm9, %v2541_v43, %v2539_v54 }
 0x14e   :  { %v4554_v44 = vpop.eup %4553  ;;  %10595 = vst [vmem:[#allocation20_spill] sm:$0xff] %v6538_v51  ;;  %v6545_v54 = vmul.f32 %v4288_v11, %v4288_v11  ;;  %v6554_v28 = vadd.f32 -1.0, %v2542_v14  ;;  %v10599_v11 = vld [vmem:[#allocation22_spill] sm:$0xff] }
 0x14f   :  { %v4556_v40 = vpop.eup %4555  ;;  %v6541_v19 = vmul.f32 %v4554_v44, %v10581_v41  ;;  %v6559_v44 = vsel %vm2531_vm10, %v10579_v3, %v2530_v7 }
 0x150   :  { %v6548_v43 = vmul.f32 %v4556_v40, %v10583_v39  ;;  %v6564_v40 = vadd.f32 %v276_v5, %v6164_v9 }
 0x151   :  { %10596 = vst [vmem:[#allocation46_spill] sm:$0xff] %v6541_v19 }
 0x152   :  { %10597 = vst [vmem:[#allocation47_spill] sm:$0xff] %v6548_v43  ;;  %v6552_v46 = vpop.eup %4557 }
 0x153   :  { %10598 = vst [vmem:[#allocation48_spill] sm:$0xff] %v6552_v46 }
 0x159   :  { %v6404_v10 = vpop.xlane.xlu1 %258  ;;  %v6425_v13 = vpop.xlane.xlu0 %261 }
 0x15a   :  { %10569 = vst [vmem:[#allocation16_spill] sm:$0xff] %v6404_v10  ;;  %10574 = vst [vmem:[#allocation33_spill] sm:$0xff] %v6425_v13 }
 0x15d   :  { %v6432_v0 = vpop.xlane.xlu1 %264  ;;  %v6449_v52 = vpop.xlane.xlu0 %267 }
 0x15e   :  { %10576 = vst [vmem:[#allocation35_spill] sm:$0xff] %v6432_v0  ;;  %10582 = vst [vmem:[#allocation38_spill] sm:$0xff] %v6449_v52 }
 0x161   :  { %v6457_v37 = vpop.xlane.xlu1 %270  ;;  %v6480_v36 = vpop.xlane.xlu0 %377 }
 0x162   :  { %10584 = vst [vmem:[#allocation39_spill] sm:$0xff] %v6457_v37  ;;  %4559 = vrsqrt.f32 %v6480_v36  ;;  %vm474_vm11 = vcmp.eq.f32.partialorder %v6480_v36, inf  ;;  %vm476_vm12 = vcmp.eq.f32.partialorder %v6480_v36, 0.0  ;;  %v477_v14 = vand.u32 2147483648, %v6480_v36 }
 0x165   :  { %v6482_v34 = vpop.xlane.xlu1 %380 }
 0x166   :  { %4561 = vrsqrt.f32 %v6482_v34  ;;  %v6503_v27 = vpop.xlane.xlu0 %383  ;;  %vm481_vm13 = vcmp.eq.f32.partialorder %v6482_v34, inf  ;;  %v484_v56 = vand.u32 2147483648, %v6482_v34  ;;  %vm483_vm14 = vcmp.eq.f32.partialorder %v6482_v34, 0.0 }
 0x167   :  { %4563 = vrsqrt.f32 %v6503_v27  ;;  %vm488_vm15 = vcmp.eq.f32.partialorder %v6503_v27, inf  ;;  %vm490_vm0 = vcmp.eq.f32.partialorder %v6503_v27, 0.0 }
 0x169   :  { %v6505_v29 = vpop.xlane.xlu1 %386 }
 0x16a   :  { %4565 = vrsqrt.f32 %v6505_v29  ;;  %v6534_v2 = vpop.xlane.xlu0 %389  ;;  %vm495_vm2 = vcmp.eq.f32.partialorder %v6505_v29, inf  ;;  %vm497_vm3 = vcmp.eq.f32.partialorder %v6505_v29, 0.0  ;;  %v498_v32 = vand.u32 2147483648, %v6505_v29 }
 0x16b   :  { %4567 = vrsqrt.f32 %v10592_v23  ;;  %vm502_vm4 = vcmp.eq.f32.partialorder %v6534_v2, inf  ;;  %vm504_vm5 = vcmp.eq.f32.partialorder %v6534_v2, 0.0 }
 0x16c   :  { %4569 = vrsqrt.f32 %v10593_v18 }
 0x16d   :  { %4571 = vrsqrt.f32 %v10594_v48  ;;  %v6536_v25 = vpop.xlane.xlu1 %392 }
 0x16e   :  { %4573 = vrsqrt.f32 %v6534_v2  ;;  %v6569_v16 = vpop.xlane.xlu0 %395  ;;  %vm509_vm6 = vcmp.eq.f32.partialorder %v6536_v25, inf  ;;  %vm511_vm7 = vcmp.eq.f32.partialorder %v6536_v25, 0.0 }
 0x16f   :  { %4575 = vrsqrt.f32 %v6536_v25  ;;  %v4560_v15 = vpop.eup %4559  ;;  %vm516_vm8 = vcmp.eq.f32.partialorder %v6569_v16, inf  ;;  %vm518_vm9 = vcmp.eq.f32.partialorder %v6569_v16, 0.0 }
 0x170   :  { %4577 = vrsqrt.f32 %v10599_v11  ;;  %v473_v60 = vmul.f32 %v4560_v15, %v6480_v36  ;;  %v491_v15 = vand.u32 2147483648, %v6503_v27 }
 0x171   :  { %v6571_v20 = vpop.xlane.xlu1 %398  ;;  %4579 = vrsqrt.f32 %v6569_v16 }
 0x172   :  { %4581 = vrsqrt.f32 %v6571_v20  ;;  %v475_v5 = vsel %vm474_vm11, %v6480_v36, %v473_v60  ;;  %vm523_vm10 = vcmp.eq.f32.partialorder %v6571_v20, inf  ;;  %vm525_vm11 = vcmp.eq.f32.partialorder %v6571_v20, 0.0 }
 0x173   :  { %v4562_v7 = vpop.eup %4561  ;;  %v478_v19 = vsel %vm476_vm12, %v477_v14, %v475_v5 }
 0x174   :  { %v480_v9 = vmul.f32 %v4562_v7, %v6482_v34  ;;  %v4564_v57 = vpop.eup %4563  ;;  %v6590_v46 = vpop.xlane.xlu0 %401  ;;  %v4186_v8 = vadd.f32 -1.0, %v478_v19 }
 0x175   :  { %v6592_v43 = vpop.xlane.xlu1 %404  ;;  %v487_v39 = vmul.f32 %v4564_v57, %v6503_v27  ;;  %4583 = vrsqrt.f32 %v6590_v46  ;;  %vm530_vm12 = vcmp.eq.f32.partialorder %v6590_v46, inf }
 0x176   :  { %v482_v7 = vsel %vm481_vm13, %v6482_v34, %v480_v9  ;;  %v728_v5 = vmul.f32 %v4186_v8, %v4186_v8  ;;  %v505_v34 = vand.u32 2147483648, %v6534_v2  ;;  %4585 = vrsqrt.f32 %v6592_v43 }
 0x177   :  { %v4566_v60 = vpop.eup %4565  ;;  %v485_v41 = vsel %vm483_vm14, %v484_v56, %v482_v7  ;;  %v489_v19 = vsel %vm488_vm15, %v6503_v27, %v487_v39  ;;  %v512_v27 = vand.u32 2147483648, %v6536_v25  ;;  %vm532_vm13 = vcmp.eq.f32.partialorder %v6590_v46, 0.0 }
 0x178   :  { %v4187_v36 = vadd.f32 -1.0, %v485_v41  ;;  %v494_v14 = vmul.f32 %v4566_v60, %v6505_v29  ;;  %v6601_v9 = vpop.eup %4567  ;;  %v492_v56 = vsel %vm490_vm0, %v491_v15, %v489_v19  ;;  %v6616_v8 = vpop.xlane.xlu0 %407  ;;  %vm537_vm14 = vcmp.eq.f32.partialorder %v6592_v43, inf }
 0x179   :  { %v6608_v57 = vpop.eup %4569  ;;  %v6618_v60 = vpop.xlane.xlu1 %410  ;;  %v4188_v35 = vadd.f32 -1.0, %v492_v56  ;;  %4587 = vrsqrt.f32 %v6616_v8  ;;  %vm539_vm15 = vcmp.eq.f32.partialorder %v6592_v43, 0.0  ;;  %vm544_vm0 = vcmp.eq.f32.partialorder %v6616_v8, inf }
 0x17a   :  { %v729_v41 = vmul.f32 %v4187_v36, %v4187_v36  ;;  %v496_v7 = vsel %vm495_vm2, %v6505_v29, %v494_v14  ;;  %v6620_v39 = vpop.eup %4571  ;;  %v519_v29 = vand.u32 2147483648, %v6569_v16  ;;  %4589 = vrsqrt.f32 %v6618_v60 }
 0x17b   :  { %v499_v37 = vsel %vm497_vm3, %v498_v32, %v496_v7  ;;  %v4574_v15 = vpop.eup %4573  ;;  %v730_v52 = vmul.f32 %v4188_v35, %v4188_v35  ;;  %vm546_vm2 = vcmp.eq.f32.partialorder %v6616_v8, 0.0  ;;  %vm551_vm3 = vcmp.eq.f32.partialorder %v6618_v60, inf }
 0x17c   :  { %v792_v36 = vadd.f32 %v729_v41, %v728_v5  ;;  %v4189_v19 = vadd.f32 -1.0, %v499_v37  ;;  %v4576_v14 = vpop.eup %4575  ;;  %v501_v17 = vmul.f32 %v4574_v15, %v6534_v2  ;;  %v6636_v37 = vpop.xlane.xlu0 %413  ;;  %v526_v15 = vand.u32 2147483648, %v6571_v20 }
 0x17d   :  { %v6631_v32 = vpop.eup %4577  ;;  %v508_v7 = vmul.f32 %v4576_v14, %v6536_v25  ;;  %v6638_v5 = vpop.xlane.xlu1 %416  ;;  %4591 = vrsqrt.f32 %v6636_v37 }
 0x17e   :  { %v731_v56 = vmul.f32 %v4189_v19, %v4189_v19  ;;  %v793_v35 = vadd.f32 %v792_v36, %v730_v52  ;;  %v503_v41 = vsel %vm502_vm4, %v6534_v2, %v501_v17  ;;  %v4580_v19 = vpop.eup %4579  ;;  %4593 = vrsqrt.f32 %v6638_v5 }
 0x17f   :  { %v506_v14 = vsel %vm504_vm5, %v505_v34, %v503_v41  ;;  %v510_v0 = vsel %vm509_vm6, %v6536_v25, %v508_v7  ;;  %v4582_v52 = vpop.eup %4581  ;;  %v515_v13 = vmul.f32 %v4580_v19, %v6569_v16  ;;  %v533_v34 = vand.u32 2147483648, %v6590_v46 }
 0x180   :  { %v794_v36 = vadd.f32 %v793_v35, %v731_v56  ;;  %v4190_v26 = vadd.f32 -1.0, %v506_v14  ;;  %v513_v17 = vsel %vm511_vm7, %v512_v27, %v510_v0  ;;  %v522_v2 = vmul.f32 %v4582_v52, %v6571_v20  ;;  %v6658_v7 = vpop.xlane.xlu0 %419 }
 0x181   :  { %v4191_v10 = vadd.f32 -1.0, %v513_v17  ;;  %v517_v56 = vsel %vm516_vm8, %v6569_v16, %v515_v13  ;;  %v540_v16 = vand.u32 2147483648, %v6592_v43  ;;  %4595 = vrsqrt.f32 %v6658_v7 }
 0x182   :  { %v732_v41 = vmul.f32 %v4190_v26, %v4190_v26  ;;  %v4584_v0 = vpop.eup %4583  ;;  %v520_v27 = vsel %vm518_vm9, %v519_v29, %v517_v56  ;;  %v524_v35 = vsel %vm523_vm10, %v6571_v20, %v522_v2  ;;  %v6671_v26 = vpop.xlane.xlu1 %422  ;;  %vm553_vm4 = vcmp.eq.f32.partialorder %v6618_v60, 0.0 }
 0x183   :  { %v733_v25 = vmul.f32 %v4191_v10, %v4191_v10  ;;  %v4192_v14 = vadd.f32 -1.0, %v520_v27  ;;  %v527_v13 = vsel %vm525_vm11, %v526_v15, %v524_v35  ;;  %v529_v52 = vmul.f32 %v4584_v0, %v6590_v46  ;;  %v4586_v17 = vpop.eup %4585 }
 0x184   :  { %v795_v19 = vadd.f32 %v794_v36, %v732_v41  ;;  %v4193_v10 = vadd.f32 -1.0, %v527_v13  ;;  %v536_v41 = vmul.f32 %v4586_v17, %v6592_v43  ;;  %v6683_v20 = vpop.xlane.xlu0 %425  ;;  %v547_v0 = vand.u32 2147483648, %v6616_v8 }
 0x185   :  { %v734_v2 = vmul.f32 %v4192_v14, %v4192_v14  ;;  %v531_v36 = vsel %vm530_vm12, %v6590_v46, %v529_v52  ;;  %4597 = vrsqrt.f32 %v6671_v26  ;;  %vm558_vm5 = vcmp.eq.f32.partialorder %v6636_v37, inf }
 0x186   :  { %v796_v29 = vadd.f32 %v795_v19, %v733_v25  ;;  %v735_v15 = vmul.f32 %v4193_v10, %v4193_v10  ;;  %v534_v56 = vsel %vm532_vm13, %v533_v34, %v531_v36  ;;  %v4588_v27 = vpop.eup %4587  ;;  %v538_v19 = vsel %vm537_vm14, %v6592_v43, %v536_v41  ;;  %v6698_v46 = vpop.xlane.xlu1 %428 }
 0x187   :  { %v4194_v25 = vadd.f32 -1.0, %v534_v56  ;;  %v541_v14 = vsel %vm539_vm15, %v540_v16, %v538_v19  ;;  %v543_v13 = vmul.f32 %v4588_v27, %v6616_v8  ;;  %v4590_v34 = vpop.eup %4589  ;;  %4599 = vrsqrt.f32 %v6683_v20 }
 0x188   :  { %v797_v35 = vadd.f32 %v796_v29, %v734_v2  ;;  %v4195_v10 = vadd.f32 -1.0, %v541_v14  ;;  %v554_v29 = vand.u32 2147483648, %v6618_v60  ;;  %v550_v43 = vmul.f32 %v4590_v34, %v6618_v60  ;;  %v6710_v27 = vpop.xlane.xlu0 %431 }
 0x189   :  { %v736_v17 = vmul.f32 %v4194_v25, %v4194_v25  ;;  %v545_v2 = vsel %vm544_vm0, %v6616_v8, %v543_v13  ;;  %v561_v56 = vand.u32 2147483648, %v6636_v37  ;;  %vm560_vm6 = vcmp.eq.f32.partialorder %v6636_v37, 0.0 }
 0x18a   :  { %v798_v52 = vadd.f32 %v797_v35, %v735_v15  ;;  %v4592_v16 = vpop.eup %4591  ;;  %v737_v41 = vmul.f32 %v4195_v10, %v4195_v10  ;;  %v548_v15 = vsel %vm546_vm2, %v547_v0, %v545_v2  ;;  %v552_v25 = vsel %vm551_vm3, %v6618_v60, %v550_v43  ;;  %v6726_v10 = vpop.xlane.xlu1 %434 }
 0x18b   :  { %v4196_v35 = vadd.f32 -1.0, %v548_v15  ;;  %v557_v19 = vmul.f32 %v4592_v16, %v6636_v37  ;;  %vm2533_vm7 = vcmp.eq.f32.partialorder %v10579_v3, 0.0  ;;  %v555_v8 = vsel %vm553_vm4, %v554_v29, %v552_v25  ;;  %v4594_v0 = vpop.eup %4593 }
 0x18c   :  { %v799_v36 = vadd.f32 %v798_v52, %v736_v17  ;;  %vm565_vm8 = vcmp.eq.f32.partialorder %v6638_v5, inf  ;;  %4601 = vrsqrt.f32 %v6698_v46  ;;  %v4197_v34 = vadd.f32 -1.0, %v555_v8  ;;  %v6738_v15 = vpop.xlane.xlu0 %437 }
 0x18d   :  { %v738_v13 = vmul.f32 %v4196_v35, %v4196_v35  ;;  %v559_v52 = vsel %vm558_vm5, %v6636_v37, %v557_v19  ;;  %v568_v17 = vand.u32 2147483648, %v6638_v5  ;;  %v564_v43 = vmul.f32 %v4594_v0, %v6638_v5 }
 0x18e   :  { %v800_v14 = vadd.f32 %v799_v36, %v737_v41  ;;  %v562_v2 = vsel %vm560_vm6, %v561_v56, %v559_v52  ;;  %vm567_vm9 = vcmp.eq.f32.partialorder %v6638_v5, 0.0  ;;  %4603 = vrsqrt.f32 %v6710_v27  ;;  %v4596_v36 = vpop.eup %4595 }
 0x18f   :  { %v739_v29 = vmul.f32 %v4197_v34, %v4197_v34  ;;  %v4198_v16 = vadd.f32 -1.0, %v562_v2  ;;  %vm572_vm10 = vcmp.eq.f32.partialorder %v6658_v7, inf  ;;  %v566_v37 = vsel %vm565_vm8, %v6638_v5, %v564_v43 }
 0x190   :  { %v801_v60 = vadd.f32 %v800_v14, %v738_v13  ;;  %vm574_vm11 = vcmp.eq.f32.partialorder %v6658_v7, 0.0  ;;  %v575_v41 = vand.u32 2147483648, %v6658_v7  ;;  %4605 = vrsqrt.f32 %v6726_v10  ;;  %v10600_v14 = vld [vmem:[#allocation24_spill] sm:$0xff] }
 0x191   :  { %v740_v35 = vmul.f32 %v4198_v16, %v4198_v16  ;;  %v569_v25 = vsel %vm567_vm9, %v568_v17, %v566_v37  ;;  %v571_v19 = vmul.f32 %v4596_v36, %v6658_v7  ;;  %4607 = vrsqrt.f32 %v10600_v14  ;;  %v6763_v36 = vpop.xlane.xlu1 %440 }
 0x192   :  { %v802_v56 = vadd.f32 %v801_v60, %v739_v29  ;;  %v278_v8 = vadd.f32 %v6564_v40, %v6170_v24  ;;  %v4199_v0 = vadd.f32 -1.0, %v569_v25  ;;  %vm579_vm12 = vcmp.eq.f32.partialorder %v6671_v26, inf  ;;  %v4598_v5 = vpop.eup %4597  ;;  %v10602_v29 = vld [vmem:[#allocation26_spill] sm:$0xff] }
 0x193   :  { %v573_v34 = vsel %vm572_vm10, %v6658_v7, %v571_v19  ;;  %v582_v52 = vand.u32 2147483648, %v6671_v26  ;;  %4609 = vrsqrt.f32 %v6738_v15  ;;  %v578_v43 = vmul.f32 %v4598_v5, %v6671_v26 }
 0x194   :  { %v803_v13 = vadd.f32 %v802_v56, %v740_v35  ;;  %v741_v17 = vmul.f32 %v4199_v0, %v4199_v0  ;;  %v576_v2 = vsel %vm574_vm11, %v575_v41, %v573_v34  ;;  %vm581_vm13 = vcmp.eq.f32.partialorder %v6671_v26, 0.0  ;;  %v4600_v7 = vpop.eup %4599 }
 0x195   :  { %v10601_v24 = vand.u32 2147483648, %v10579_v3  ;;  %4611 = vrsqrt.f32 %v10602_v29  ;;  %v4200_v16 = vadd.f32 -1.0, %v576_v2  ;;  %v580_v41 = vsel %vm579_vm12, %v6671_v26, %v578_v43 }
 0x196   :  { %v804_v37 = vadd.f32 %v803_v13, %v741_v17  ;;  %vm586_vm14 = vcmp.eq.f32.partialorder %v6683_v20, inf  ;;  %v589_v56 = vand.u32 2147483648, %v6683_v20  ;;  %v585_v35 = vmul.f32 %v4600_v7, %v6683_v20 }
 0x197   :  { %v6759_v40 = vsel %vm2533_vm7, %v10601_v24, %v6559_v44  ;;  %v742_v3 = vmul.f32 %v4200_v16, %v4200_v16  ;;  %v583_v44 = vsel %vm581_vm13, %v582_v52, %v580_v41  ;;  %vm588_vm15 = vcmp.eq.f32.partialorder %v6683_v20, 0.0  ;;  %v6783_v52 = vpop.xlane.xlu0 %443 }
 0x198   :  { %v6774_v25 = vmul.f32 %v6608_v57, %v10593_v18  ;;  %v6777_v19 = vadd.f32 %v278_v8, %v6180_v6  ;;  %v4201_v0 = vadd.f32 -1.0, %v583_v44  ;;  %4613 = vrsqrt.f32 %v6763_v36 }
 0x199   :  { %v4602_v26 = vpop.eup %4601  ;;  %v805_v5 = vadd.f32 %v804_v37, %v742_v3  ;;  %v587_v13 = vsel %vm586_vm14, %v6683_v20, %v585_v35  ;;  %vm593_vm0 = vcmp.eq.f32.partialorder %v6698_v46, inf  ;;  %v596_v34 = vand.u32 2147483648, %v6698_v46 }
 0x19a   :  { %v743_v17 = vmul.f32 %v4201_v0, %v4201_v0  ;;  %v590_v2 = vsel %vm588_vm15, %v589_v56, %v587_v13  ;;  %v592_v57 = vmul.f32 %v4602_v26, %v6698_v46  ;;  %vm595_vm2 = vcmp.eq.f32.partialorder %v6698_v46, 0.0 }
 0x19b   :  { %v4604_v6 = vpop.eup %4603  ;;  %v4202_v8 = vadd.f32 -1.0, %v590_v2  ;;  %vm600_vm3 = vcmp.eq.f32.partialorder %v6710_v27, inf  ;;  %vm602_vm4 = vcmp.eq.f32.partialorder %v6710_v27, 0.0  ;;  %v603_v20 = vand.u32 2147483648, %v6710_v27 }
 0x19c   :  { %v806_v43 = vadd.f32 %v805_v5, %v743_v17  ;;  %v594_v24 = vsel %vm593_vm0, %v6698_v46, %v592_v57  ;;  %v599_v16 = vmul.f32 %v4604_v6, %v6710_v27  ;;  %4615 = vrsqrt.f32 %v6783_v52  ;;  %v6805_v5 = vpop.xlane.xlu1 %446 }
 0x19d   :  { %v4606_v7 = vpop.eup %4605  ;;  %v744_v37 = vmul.f32 %v4202_v8, %v4202_v8  ;;  %v597_v41 = vsel %vm595_vm2, %v596_v34, %v594_v24  ;;  %vm607_vm5 = vcmp.eq.f32.partialorder %v6726_v10, inf  ;;  %v610_v56 = vand.u32 2147483648, %v6726_v10 }
 0x19e   :  { %vm2524_vm6 = vcmp.eq.f32.partialorder %v10593_v18, inf  ;;  %v4203_v3 = vadd.f32 -1.0, %v597_v41  ;;  %v601_v44 = vsel %vm600_vm3, %v6710_v27, %v599_v16  ;;  %v606_v35 = vmul.f32 %v4606_v7, %v6726_v10  ;;  %v6799_v46 = vpop.eup %4607 }
 0x19f   :  { %vm609_vm7 = vcmp.eq.f32.partialorder %v6726_v10, 0.0  ;;  %v807_v0 = vadd.f32 %v806_v43, %v744_v37  ;;  %v604_v26 = vsel %vm602_vm4, %v603_v20, %v601_v44  ;;  %vm614_vm8 = vcmp.eq.f32.partialorder %v6738_v15, inf }
 0x1a0   :  { %vm616_vm9 = vcmp.eq.f32.partialorder %v6738_v15, 0.0  ;;  %v4610_v13 = vpop.eup %4609  ;;  %v745_v2 = vmul.f32 %v4203_v3, %v4203_v3  ;;  %v4204_v57 = vadd.f32 -1.0, %v604_v26  ;;  %v608_v6 = vsel %vm607_vm5, %v6726_v10, %v606_v35 }
 0x1a1   :  { %v617_v8 = vand.u32 2147483648, %v6738_v15  ;;  %v611_v20 = vsel %vm609_vm7, %v610_v56, %v608_v6  ;;  %v613_v24 = vmul.f32 %v4610_v13, %v6738_v15  ;;  %4617 = vrsqrt.f32 %v6805_v5 }
 0x1a2   :  { %v4612_v16 = vpop.eup %4611  ;;  %v808_v41 = vadd.f32 %v807_v0, %v745_v2  ;;  %v746_v44 = vmul.f32 %v4204_v57, %v4204_v57  ;;  %v4205_v3 = vadd.f32 -1.0, %v611_v20  ;;  %v6823_v57 = vadd.f32 -1.0, %v6759_v40  ;;  %v6837_v40 = vpop.xlane.xlu0 %449 }
 0x1a3   :  { %vm2517_vm10 = vcmp.eq.f32.partialorder %v10599_v11, inf  ;;  %vm2510_vm11 = vcmp.eq.f32.partialorder %v10600_v14, inf  ;;  %vm621_vm12 = vcmp.eq.f32.partialorder %v6763_v36, inf  ;;  %vm2503_vm13 = vcmp.eq.f32.partialorder %v10602_v29, inf }
 0x1a4   :  { %v809_v13 = vadd.f32 %v808_v41, %v746_v44  ;;  %v747_v6 = vmul.f32 %v4205_v3, %v4205_v3  ;;  %vm623_vm14 = vcmp.eq.f32.partialorder %v6763_v36, 0.0  ;;  %vm2526_vm15 = vcmp.eq.f32.partialorder %v10593_v18, 0.0 }
 0x1a5   :  { %v2983_v34 = vpop.f32.mrf.mxu0  ;;  %v4614_v2 = vpop.eup %4613  ;;  %vm2519_vm0 = vcmp.eq.f32.partialorder %v10599_v11, 0.0  ;;  %vm628_vm2 = vcmp.eq.f32.partialorder %v6783_v52, inf  ;;  %vm630_vm3 = vcmp.eq.f32.partialorder %v6783_v52, 0.0  ;;  %vm2505_vm4 = vcmp.eq.f32.partialorder %v10602_v29, 0.0 }
 0x1a6   :  { %v3079_v17 = vpop.f32.mrf.mxu1  ;;  %v3174_v43 = vand.u32 2147483647, %v2983_v34  ;;  %v615_v34 = vsel %vm614_vm8, %v6738_v15, %v613_v24  ;;  %v6832_v15 = vsel %vm2524_vm6, %v10593_v18, %v6774_v25  ;;  %v620_v44 = vmul.f32 %v4614_v2, %v6763_v36 }
 0x1a7   :  { %v3206_v27 = vand.u32 2147483647, %v3079_v17  ;;  %v2985_v7 = vpop.f32.mrf.mxu0  ;;  %v618_v0 = vsel %vm616_vm9, %v617_v8, %v615_v34  ;;  %v624_v25 = vand.u32 2147483648, %v6763_v36  ;;  %v2506_v34 = vand.u32 2147483648, %v10602_v29 }
 0x1a8   :  { %v3081_v37 = vpop.f32.mrf.mxu1  ;;  %v3238_v26 = vmul.f32 1.442695, %v3174_v43  ;;  %v3175_v35 = vand.u32 2147483647, %v2985_v7  ;;  %v280_v43 = vadd.f32 %v6777_v19, %v6182_v62  ;;  %v4206_v41 = vadd.f32 -1.0, %v618_v0  ;;  %v6877_v62 = vpop.xlane.xlu0 %455 }
 0x1a9   :  { %v3302_v60 = vmul.f32 1.442695, %v3206_v27  ;;  %v3207_v17 = vand.u32 2147483647, %v3081_v37  ;;  %v2989_v10 = vpop.f32.mrf.mxu0  ;;  %v810_v37 = vadd.f32 %v809_v13, %v747_v6  ;;  %v4616_v3 = vpop.eup %4615  ;;  %v622_v2 = vsel %vm621_vm12, %v6763_v36, %v620_v44 }
 0x1aa   :  { %v6818_v56 = vpop.f32.mrf.mxu1  ;;  %4619 = vpow2.f32 %v3238_v26  ;;  %v3240_v27 = vmul.f32 1.442695, %v3175_v35  ;;  %v748_v8 = vmul.f32 %v4206_v41, %v4206_v41  ;;  %v281_v26 = vadd.f32 %v280_v43, %v6197_v42 }
 0x1ab   :  { %4621 = vpow2.f32 %v3302_v60  ;;  %v3304_v20 = vmul.f32 1.442695, %v3207_v17  ;;  %v2991_v24 = vpop.f32.mrf.mxu0  ;;  %v3176_v35 = vand.u32 2147483647, %v2989_v10  ;;  %v2516_v42 = vmul.f32 %v6631_v32, %v10599_v11 }
 0x1ac   :  { %v3087_v7 = vpop.f32.mrf.mxu1  ;;  %4623 = vpow2.f32 %v3240_v27  ;;  %v3177_v17 = vand.u32 2147483647, %v2991_v24  ;;  %v811_v0 = vadd.f32 %v810_v37, %v748_v8  ;;  %v2502_v10 = vmul.f32 %v4612_v16, %v10602_v29  ;;  %v6862_v27 = vpop.xlane.xlu1 %452 }
 0x1ad   :  { %4625 = vpow2.f32 %v3304_v20  ;;  %v6839_v60 = vpop.f32.mrf.mxu0  ;;  %v3209_v43 = vand.u32 2147483647, %v3087_v7  ;;  %v2509_v20 = vmul.f32 %v6799_v46, %v10600_v14  ;;  %v625_v41 = vsel %vm623_vm14, %v624_v25, %v622_v2 }
 0x1ae   :  { %v6841_v19 = vpop.f32.mrf.mxu1  ;;  %v627_v8 = vmul.f32 %v4616_v3, %v6783_v52  ;;  %v631_v32 = vand.u32 2147483648, %v6783_v52  ;;  %v282_v16 = vadd.f32 %v281_v26, %v6206_v53  ;;  %v3242_v7 = vmul.f32 1.442695, %v3176_v35  ;;  %v4618_v53 = vpop.eup %4617 }
 0x1af   :  { %v6851_v13 = vpop.f32.mrf.mxu0  ;;  %v3208_v44 = vand.u32 2147483647, %v6818_v56  ;;  %v3244_v46 = vmul.f32 1.442695, %v3177_v17  ;;  %v4207_v36 = vadd.f32 -1.0, %v625_v41  ;;  %4627 = vrsqrt.f32 %v6837_v40 }
 0x1b0   :  { %v6853_v6 = vpop.f32.mrf.mxu1  ;;  %v629_v25 = vsel %vm628_vm2, %v6783_v52, %v627_v8  ;;  %v2518_v56 = vsel %vm2517_vm10, %v10599_v11, %v2516_v42  ;;  %v2504_v3 = vsel %vm2503_vm13, %v10602_v29, %v2502_v10  ;;  %v3308_v26 = vmul.f32 1.442695, %v3209_v43 }
 0x1b1   :  { %v6866_v24 = vpop.f32.mrf.mxu0  ;;  %4629 = vrsqrt.f32 %v6862_v27  ;;  %v2511_v35 = vsel %vm2510_vm11, %v10600_v14, %v2509_v20  ;;  %v749_v41 = vmul.f32 %v4207_v36, %v4207_v36  ;;  %v632_v8 = vsel %vm630_vm3, %v631_v32, %v629_v25 }
 0x1b2   :  { %v6868_v37 = vpop.f32.mrf.mxu1  ;;  %4631 = vrsqrt.f32 %v6877_v62  ;;  %v283_v42 = vadd.f32 %v282_v16, %v6222_v31  ;;  %v3306_v10 = vmul.f32 1.442695, %v3208_v44  ;;  %vm2512_vm5 = vcmp.eq.f32.partialorder %v10600_v14, 0.0 }
 0x1b3   :  { %v6879_v12 = vpop.f32.mrf.mxu0  ;;  %4633 = vpow2.f32 %v3242_v7  ;;  %v2507_v20 = vsel %vm2505_vm4, %v2506_v34, %v2504_v3  ;;  %v4208_v52 = vadd.f32 -1.0, %v632_v8  ;;  %v10603_v29 = vand.u32 2147483648, %v10593_v18 }
 0x1b4   :  { %v6881_v38 = vpop.f32.mrf.mxu1  ;;  %4635 = vpow2.f32 %v3244_v46  ;;  %v10604_v16 = vand.u32 2147483648, %v10599_v11  ;;  %v10605_v34 = vand.u32 2147483648, %v10600_v14  ;;  %v3211_v25 = vand.u32 2147483647, %v6853_v6 }
 0x1b5   :  { %v6897_v17 = vpop.f32.mrf.mxu0  ;;  %v2528_v31 = vsel %vm2526_vm15, %v10603_v29, %v6832_v15  ;;  %4637 = vpow2.f32 %v3308_v26  ;;  %v812_v61 = vadd.f32 %v811_v0, %v749_v41  ;;  %v750_v4 = vmul.f32 %v4208_v52, %v4208_v52 }
 0x1b6   :  { %v6899_v2 = vpop.f32.mrf.mxu1  ;;  %v2521_v7 = vsel %vm2519_vm0, %v10604_v16, %v2518_v56  ;;  %v2514_v44 = vsel %vm2512_vm5, %v10605_v34, %v2511_v35  ;;  %v634_v18 = vmul.f32 %v4618_v53, %v6805_v5  ;;  %v4282_v29 = vadd.f32 -1.0, %v2507_v20 }
 0x1b7   :  { %v6906_v43 = vpop.eup %4619  ;;  %v6909_v49 = vpop.f32.mrf.mxu0  ;;  %v284_v11 = vadd.f32 %v283_v42, %v6231_v45  ;;  %4639 = vpow2.f32 %v3306_v10  ;;  %vm635_vm6 = vcmp.eq.f32.partialorder %v6805_v5, inf  ;;  %v3210_v14 = vand.u32 2147483647, %v6841_v19  ;;  %v10607_v45 = vld [vmem:[#allocation23_spill] sm:$0xff] }
 0x1b8   :  { %v6911_v36 = vpop.f32.mrf.mxu1  ;;  %v6913_v32 = vpop.eup %4621  ;;  %v638_v35 = vand.u32 2147483648, %v6805_v5  ;;  %v4285_v53 = vadd.f32 -1.0, %v2528_v31  ;;  %v4284_v41 = vadd.f32 -1.0, %v2521_v7  ;;  %v4283_v20 = vadd.f32 -1.0, %v2514_v44  ;;  %v10610_v7 = vld [vmem:[#allocation25_spill] sm:$0xff] }
 0x1b9   :  { %v4624_v46 = vpop.eup %4623  ;;  %v6927_v3 = vpop.f32.mrf.mxu0  ;;  %vm637_vm7 = vcmp.eq.f32.partialorder %v6805_v5, 0.0  ;;  %4641 = vrsqrt.f32 %v10607_v45  ;;  %v3312_v42 = vmul.f32 1.442695, %v3211_v25  ;;  %v6948_v52 = vadd.f32 %v812_v61, %v750_v4  ;;  %v3366_v25 = vld [vmem:[%s10325_s12] sm:$0xff]  ;;  %v3367_v4 = vld [vmem:[%s10325_s12 + $0x8] sm:$0xff] }
 0x1ba   :  { %v6929_v8 = vpop.f32.mrf.mxu1  ;;  %v4626_v15 = vpop.eup %4625  ;;  %v3590_v26 = vadd.f32 %v4624_v46, %v6906_v43  ;;  %v636_v16 = vsel %vm635_vm6, %v6805_v5, %v634_v18  ;;  %v6955_v31 = vmul.f32 %v6554_v28, %v6554_v28  ;;  %4643 = vrsqrt.f32 %v10610_v7 }
 0x1bb   :  { %v6935_v56 = vpop.f32.mrf.mxu0  ;;  %v3638_v0 = vadd.f32 %v4626_v15, %v6913_v32  ;;  %v3878_v34 = vmul.f32 %v4282_v29, %v4282_v29  ;;  %v3178_v44 = vand.u32 2147483647, %v6839_v60  ;;  %v285_v61 = vadd.f32 %v284_v11, %v6247_v47  ;;  %v3398_v29 = vld [vmem:[%s10325_s12 + $0x100] sm:$0xff] }
 0x1bc   :  { %10606 = vst [vmem:[#allocation22_spill] sm:$0xff] %v6935_v56  ;;  %v6937_v6 = vpop.f32.mrf.mxu1  ;;  %3591 = vadd.xlane.f32.xlu1 %v3590_v26  ;;  %v3310_v18 = vmul.f32 1.442695, %v3210_v14  ;;  %v3179_v26 = vand.u32 2147483647, %v6851_v13  ;;  %v639_v60 = vsel %vm637_vm7, %v638_v35, %v636_v16  ;;  %v4628_v22 = vpop.eup %4627  ;;  %v6981_v47 = vmul.f32 %v6823_v57, %v6823_v57 }
 0x1bd   :  { %3639 = vadd.xlane.f32.xlu0 %v3638_v0  ;;  %v6944_v19 = vpop.f32.mrf.mxu0  ;;  %v3881_v13 = vmul.f32 %v4285_v53, %v4285_v53  ;;  %v3880_v11 = vmul.f32 %v4284_v41, %v4284_v41  ;;  %v3879_v14 = vmul.f32 %v4283_v20, %v4283_v20  ;;  %4645 = vpow2.f32 %v3312_v42 }
 0x1be   :  { %10608 = vst [vmem:[#allocation24_spill] sm:$0xff] %v6944_v19  ;;  %v6946_v10 = vpop.f32.mrf.mxu1  ;;  %v4630_v33 = vpop.eup %4629  ;;  %v4209_v5 = vadd.f32 -1.0, %v639_v60  ;;  %v3430_v35 = vmul.f32 %v6906_v43, %v3366_v25  ;;  %v3431_v16 = vmul.f32 %v4624_v46, %v3367_v4  ;;  %v3246_v56 = vmul.f32 1.442695, %v3178_v44 }
 0x1bf   :  { %10609 = vst [vmem:[#allocation26_spill] sm:$0xff] %v6946_v10  ;;  %v6967_v28 = vpop.f32.mrf.mxu0  ;;  %v3942_v19 = vadd.f32 %v3879_v14, %v3878_v34  ;;  %v3462_v30 = vmul.f32 %v6913_v32, %v3398_v29  ;;  %v3463_v57 = vmul.f32 %v4626_v15, %v3399_v63  ;;  %v286_v53 = vadd.f32 %v285_v61, %v6256_v58 }
 0x1c0   :  { %10611 = vst [vmem:[#allocation23_spill] sm:$0xff] %v6967_v28  ;;  %v6969_v0 = vpop.f32.mrf.mxu1  ;;  %4647 = vpow2.f32 %v3310_v18  ;;  %v3248_v41 = vmul.f32 1.442695, %v3179_v26  ;;  %v3494_v20 = vadd.f32 %v3431_v16, %v3430_v35  ;;  %vm642_vm8 = vcmp.eq.f32.partialorder %v6837_v40, inf }
 0x1c1   :  { %10612 = vst [vmem:[#allocation25_spill] sm:$0xff] %v6969_v0  ;;  %v6984_v28 = vpop.f32.mrf.mxu0  ;;  %v4632_v0 = vpop.eup %4631  ;;  %v3542_v25 = vadd.f32 %v3463_v57, %v3462_v30  ;;  %vm644_vm9 = vcmp.eq.f32.partialorder %v6837_v40, 0.0  ;;  %v645_v63 = vand.u32 2147483648, %v6837_v40  ;;  %v751_v15 = vmul.f32 %v4209_v5, %v4209_v5 }
 0x1c2   :  { %v6986_v10 = vpop.f32.mrf.mxu1  ;;  %v6989_v51 = vpop.eup %4633  ;;  %3495 = vadd.xlane.f32.xlu1 %v3494_v20  ;;  %v641_v58 = vmul.f32 %v4628_v22, %v6837_v40  ;;  %vm649_vm10 = vcmp.eq.f32.partialorder %v6862_v27, inf  ;;  %v652_v34 = vand.u32 2147483648, %v6862_v27  ;;  %v3943_v30 = vadd.f32 %v3942_v19, %v3880_v11 }
 0x1c3   :  { %v6992_v42 = vpop.f32.mrf.mxu0  ;;  %v6996_v46 = vpop.eup %4635  ;;  %4649 = vpow2.f32 %v3246_v56  ;;  %3543 = vadd.xlane.f32.xlu0 %v3542_v25  ;;  %v648_v61 = vmul.f32 %v4630_v33, %v6862_v27  ;;  %vm651_vm11 = vcmp.eq.f32.partialorder %v6862_v27, 0.0  ;;  %v287_v26 = vadd.f32 %v286_v53, %v6262_v1 }
 0x1c4   :  { %v6994_v43 = vpop.f32.mrf.mxu1  ;;  %v7001_v32 = vpop.eup %4637  ;;  %4651 = vpow2.f32 %v3248_v41  ;;  %v643_v22 = vsel %vm642_vm8, %v6837_v40, %v641_v58  ;;  %v3593_v60 = vadd.f32 %v6996_v46, %v6989_v51  ;;  %vm656_vm12 = vcmp.eq.f32.partialorder %v6877_v62, inf }
 0x1c5   :  { %v7006_v44 = vpop.f32.mrf.mxu0  ;;  %v7012_v18 = vpop.eup %4639  ;;  %v646_v56 = vsel %vm644_vm9, %v645_v63, %v643_v22  ;;  %v650_v33 = vsel %vm649_vm10, %v6862_v27, %v648_v61  ;;  %v3181_v19 = vand.u32 2147483647, %v6879_v12  ;;  %v814_v11 = vadd.f32 %v6948_v52, %v751_v15  ;;  %v3369_v61 = vld [vmem:[%s10325_s12 + $0x18] sm:$0xff] }
 0x1c6   :  { %v7008_v4 = vpop.f32.mrf.mxu1  ;;  %v3641_v1 = vadd.f32 %v7012_v18, %v7001_v32  ;;  %v4210_v14 = vadd.f32 -1.0, %v646_v56  ;;  %v653_v5 = vsel %vm651_vm11, %v652_v34, %v650_v33  ;;  %3594 = vadd.xlane.f32.xlu1 %v3593_v60  ;;  %v7036_v16 = vpop.eup %4641  ;;  %vm2636_vm13 = vcmp.eq.f32.partialorder %v10592_v23, inf }
 0x1c7   :  { %v7020_v29 = vpop.f32.mrf.mxu0  ;;  %v3944_v27 = vadd.f32 %v3943_v30, %v3881_v13  ;;  %v3180_v57 = vand.u32 2147483647, %v6866_v24  ;;  %v4211_v53 = vadd.f32 -1.0, %v653_v5  ;;  %v655_v12 = vmul.f32 %v4632_v0, %v6877_v62  ;;  %v4644_v41 = vpop.eup %4643 }
 0x1c8   :  { %v7032_v35 = vpop.f32.mrf.mxu1  ;;  %3642 = vadd.xlane.f32.xlu0 %v3641_v1  ;;  %v288_v52 = vadd.f32 %v287_v26, %v6265_v55  ;;  %v3212_v20 = vand.u32 2147483647, %v6868_v37  ;;  %v752_v25 = vmul.f32 %v4210_v14, %v4210_v14  ;;  %vm658_vm14 = vcmp.eq.f32.partialorder %v6877_v62, 0.0  ;;  %v7051_v0 = vpop.xlane.xlu1 %458 }
 0x1c9   :  { %v7034_v40 = vpop.f32.mrf.mxu0  ;;  %v3213_v15 = vand.u32 2147483647, %v6881_v38  ;;  %v753_v58 = vmul.f32 %v4211_v53, %v4211_v53  ;;  %v657_v24 = vsel %vm656_vm12, %v6877_v62, %v655_v12  ;;  %v659_v13 = vand.u32 2147483648, %v6877_v62  ;;  %v3368_v38 = vld [vmem:[%s10325_s12 + $0x10] sm:$0xff] }
 0x1ca   :  { %v2635_v55 = vmul.f32 %v6601_v9, %v10592_v23  ;;  %v3252_v34 = vmul.f32 1.442695, %v3181_v19  ;;  %v815_v30 = vadd.f32 %v814_v11, %v752_v25  ;;  %v7062_v26 = vpop.f32.mrf.mxu1  ;;  %v7066_v60 = vpop.eup %4645  ;;  %v2614_v9 = vmul.f32 %v4644_v41, %v10610_v7 }
 0x1cb   :  { %v7044_v63 = vpop.f32.mrf.mxu0  ;;  %v3945_v56 = vadd.f32 %v3944_v27, %v6981_v47  ;;  %v3250_v33 = vmul.f32 1.442695, %v3180_v57  ;;  %v660_v1 = vsel %vm658_vm14, %v659_v13, %v657_v24  ;;  %v289_v19 = vadd.f32 %v288_v52, %v6271_v50  ;;  %v7080_v27 = vpop.xlane.xlu0 %461 }
 0x1cc   :  { %v3314_v11 = vmul.f32 1.442695, %v3212_v20  ;;  %v816_v14 = vadd.f32 %v815_v30, %v753_v58  ;;  %v4212_v5 = vadd.f32 -1.0, %v660_v1  ;;  %v3316_v25 = vmul.f32 1.442695, %v3213_v15  ;;  %v7087_v52 = vpop.f32.mrf.mxu1  ;;  %v3401_v30 = vld [vmem:[%s10325_s12 + $0x118] sm:$0xff] }
 0x1cd   :  { %v7064_v22 = vpop.f32.mrf.mxu0  ;;  %v7075_v12 = vpop.eup %4647  ;;  %4653 = vrsqrt.f32 %v7051_v0  ;;  %v3432_v41 = vmul.f32 %v6989_v51, %v3368_v38  ;;  %v3433_v47 = vmul.f32 %v6996_v46, %v3369_v61  ;;  %vm2629_vm15 = vcmp.eq.f32.partialorder %v10594_v48, inf  ;;  %v3370_v38 = vld [vmem:[%s10325_s12 + $0x20] sm:$0xff]  ;;  %v3371_v61 = vld [vmem:[%s10325_s12 + $0x28] sm:$0xff] }
 0x1ce   :  { %vm2622_vm0 = vcmp.eq.f32.partialorder %v10607_v45, inf  ;;  %4655 = vpow2.f32 %v3252_v34  ;;  %v3182_v50 = vand.u32 2147483647, %v6897_v17  ;;  %v754_v62 = vmul.f32 %v4212_v5, %v4212_v5 }
 0x1cf   :  { %v7073_v53 = vpop.f32.mrf.mxu0  ;;  %v3644_v57 = vadd.f32 %v7075_v12, %v7066_v60  ;;  %4657 = vpow2.f32 %v3250_v33  ;;  %v3214_v51 = vand.u32 2147483647, %v6899_v2  ;;  %v3215_v46 = vand.u32 2147483647, %v6911_v36  ;;  %v3400_v2 = vld [vmem:[%s10325_s12 + $0x110] sm:$0xff]  ;;  %v7124_v33 = vpop.f32.mrf.mxu1 }
 0x1d0   :  { %v3497_v15 = vadd.f32 %v3433_v47, %v3432_v41  ;;  %v4650_v58 = vpop.eup %4649  ;;  %v7096_v24 = vsel %vm2636_vm13, %v10592_v23, %v2635_v55  ;;  %vm2615_vm2 = vcmp.eq.f32.partialorder %v10610_v7, inf  ;;  %v7099_v17 = vadd.f32 %v816_v14, %v754_v62 }
 0x1d1   :  { %v7089_v20 = vpop.f32.mrf.mxu0  ;;  %10613 = vst [vmem:[#allocation49_spill] sm:$0xff] %v7096_v24  ;;  %3645 = vadd.xlane.f32.xlu0 %v3644_v57  ;;  %4659 = vrsqrt.f32 %v7080_v27  ;;  %v4652_v13 = vpop.eup %4651  ;;  %v3946_v36 = vadd.f32 %v3945_v56, %v6955_v31  ;;  %v290_v34 = vadd.f32 %v289_v19, %v6275_v59  ;;  %v3183_v55 = vand.u32 2147483647, %v6909_v49 }
 0x1d2   :  { %4661 = vpow2.f32 %v3316_v25  ;;  %3498 = vadd.xlane.f32.xlu1 %v3497_v15  ;;  %v2628_v31 = vmul.f32 %v6620_v39, %v10594_v48  ;;  %v2621_v59 = vmul.f32 %v7036_v16, %v10607_v45  ;;  %v2616_v49 = vsel %vm2615_vm2, %v10610_v7, %v2614_v9  ;;  %v3402_v15 = vld [vmem:[%s10325_s12 + $0x120] sm:$0xff] }
 0x1d3   :  { %v3254_v56 = vmul.f32 1.442695, %v3182_v50  ;;  %v7126_v1 = vpop.f32.mrf.mxu0  ;;  %4663 = vpow2.f32 %v3314_v11  ;;  %v3318_v19 = vmul.f32 1.442695, %v3214_v51  ;;  %v3320_v14 = vmul.f32 1.442695, %v3215_v46  ;;  %v7135_v46 = vpop.f32.mrf.mxu1 }
 0x1d4   :  { %v3184_v5 = vand.u32 2147483647, %v6927_v3  ;;  %v3464_v25 = vmul.f32 %v7012_v18, %v3400_v2  ;;  %v3465_v39 = vmul.f32 %v7001_v32, %v3401_v30  ;;  %v3434_v41 = vmul.f32 %v4650_v58, %v3370_v38  ;;  %v3403_v2 = vld [vmem:[%s10325_s12 + $0x128] sm:$0xff] }
 0x1d5   :  { %v3435_v16 = vmul.f32 %v4652_v13, %v3371_v61  ;;  %v3947_v47 = vadd.f32 %v3946_v36, %v6545_v54  ;;  %v291_v9 = vadd.f32 %v290_v34, %v6278_v21  ;;  %v3256_v50 = vmul.f32 1.442695, %v3183_v55  ;;  %v7137_v3 = vpop.f32.mrf.mxu0  ;;  %v10615_v36 = vld [vmem:[#allocation20_spill] sm:$0xff]  ;;  %v10617_v61 = vld [vmem:[#allocation22_spill] sm:$0xff] }
 0x1d6   :  { %v3216_v62 = vand.u32 2147483647, %v6929_v8  ;;  %v2618_v57 = vand.u32 2147483648, %v10610_v7  ;;  %4665 = vpow2.f32 %v3254_v56  ;;  %v3545_v11 = vadd.f32 %v3465_v39, %v3464_v25 }
 0x1d7   :  { %v3500_v51 = vadd.f32 %v3435_v16, %v3434_v41  ;;  %v7142_v32 = vsel %vm2629_vm15, %v10594_v48, %v2628_v31  ;;  %v7147_v21 = vsel %vm2622_vm0, %v10607_v45, %v2621_v59  ;;  %vm2617_vm3 = vcmp.eq.f32.partialorder %v10610_v7, 0.0  ;;  %v10616_v7 = vld [vmem:[#allocation6_spill] sm:$0xff]  ;;  %v7166_v56 = vpop.f32.mrf.mxu0  ;;  %v10618_v16 = vld [vmem:[#allocation24_spill] sm:$0xff] }
 0x1d8   :  { %10614 = vst [vmem:[#allocation50_spill] sm:$0xff] %v7142_v32  ;;  %4667 = vpow2.f32 %v3320_v14  ;;  %v7150_v54 = vsel %vm2617_vm3, %v2618_v57, %v2616_v49  ;;  %v3258_v8 = vmul.f32 1.442695, %v3184_v5  ;;  %v3217_v18 = vand.u32 2147483647, %v6937_v6  ;;  %3546 = vadd.xlane.f32.xlu1 %v3545_v11  ;;  %v7164_v49 = vpop.f32.mrf.mxu1 }
 0x1d9   :  { %4669 = vpow2.f32 %v3318_v19  ;;  %3501 = vadd.xlane.f32.xlu0 %v3500_v51  ;;  %v3948_v34 = vadd.f32 %v3947_v47, %v10615_v36  ;;  %v292_v55 = vadd.f32 %v291_v9, %v10616_v7  ;;  %v3322_v30 = vmul.f32 1.442695, %v3216_v62  ;;  %v7197_v7 = vld [vmem:[%s10316_s3] sm:$0xff] }
 0x1da   :  { %4671 = vpow2.f32 %v3256_v50  ;;  %v4654_v38 = vpop.eup %4653  ;;  %v3185_v31 = vand.u32 2147483647, %v10617_v61  ;;  %vm663_vm4 = vcmp.eq.f32.partialorder %v7051_v0, inf  ;;  %v666_v6 = vand.u32 2147483648, %v7051_v0  ;;  %v7187_v51 = vpop.f32.mrf.mxu1 }
 0x1db   :  { %v3596_v59 = vadd.f32 %v4652_v13, %v4650_v58  ;;  %v7168_v19 = vpop.eup %4655  ;;  %v662_v14 = vmul.f32 %v4654_v38, %v7051_v0  ;;  %vm665_vm5 = vcmp.eq.f32.partialorder %v7051_v0, 0.0  ;;  %v3466_v5 = vmul.f32 %v7075_v12, %v3402_v15  ;;  %v10619_v13 = vld [vmem:[#allocation25_spill] sm:$0xff]  ;;  %v10620_v15 = vld [vmem:[#allocation26_spill] sm:$0xff] }
 0x1dc   :  { %v3467_v25 = vmul.f32 %v7066_v60, %v3403_v2  ;;  %v7174_v39 = vpop.eup %4657  ;;  %4673 = vpow2.f32 %v3258_v8  ;;  %v3324_v41 = vmul.f32 1.442695, %v3217_v18  ;;  %v3186_v58 = vand.u32 2147483647, %v10618_v16  ;;  %v7191_v18 = vpop.f32.mrf.mxu0 }
 0x1dd   :  { %v3219_v47 = vand.u32 2147483647, %v10619_v13  ;;  %3597 = vadd.xlane.f32.xlu1 %v3596_v59  ;;  %v664_v50 = vsel %vm663_vm4, %v7051_v0, %v662_v14  ;;  %vm670_vm6 = vcmp.eq.f32.partialorder %v7080_v27, inf  ;;  %v673_v12 = vand.u32 2147483648, %v7080_v27  ;;  %v10622_v13 = vld [vmem:[#allocation44_spill] sm:$0xff] }
 0x1de   :  { %v4660_v9 = vpop.eup %4659  ;;  %v3548_v62 = vadd.f32 %v3467_v25, %v3466_v5  ;;  %v667_v57 = vsel %vm665_vm5, %v666_v6, %v664_v50  ;;  %vm672_vm7 = vcmp.eq.f32.partialorder %v7080_v27, 0.0  ;;  %v3599_v8 = vadd.f32 %v7174_v39, %v7168_v19  ;;  %v10621_v6 = vld [vmem:[#allocation23_spill] sm:$0xff] }
 0x1df   :  { %v7183_v60 = vpop.eup %4661  ;;  %v669_v11 = vmul.f32 %v4660_v9, %v7080_v27  ;;  %4675 = vpow2.f32 %v3322_v30  ;;  %v3260_v0 = vmul.f32 1.442695, %v3185_v31  ;;  %v3218_v2 = vand.u32 2147483647, %v10620_v15  ;;  %v10623_v9 = vld [vmem:[#allocation27_spill] sm:$0xff] }
 0x1e0   :  { %v4213_v36 = vadd.f32 -1.0, %v667_v57  ;;  %3549 = vadd.xlane.f32.xlu0 %v3548_v62  ;;  %v7199_v38 = vpop.eup %4663  ;;  %v3262_v61 = vmul.f32 1.442695, %v3186_v58  ;;  %v3187_v59 = vand.u32 2147483647, %v10621_v6  ;;  %v7213_v58 = vld [vmem:[%s10316_s3 + $0x8] sm:$0xff]  ;;  %v293_v50 = vadd.f32 %v292_v55, %v10623_v9  ;;  %v7221_v57 = vpop.f32.mrf.mxu0 }
 0x1e1   :  { %v3328_v14 = vmul.f32 1.442695, %v3219_v47  ;;  %v671_v30 = vsel %vm670_vm6, %v7080_v27, %v669_v11  ;;  %3600 = vadd.xlane.f32.xlu1 %v3599_v8  ;;  %v3223_v31 = vand.u32 2147483647, %v7032_v35  ;;  %v3647_v16 = vadd.f32 %v7199_v38, %v7183_v60  ;;  %v7219_v35 = vpop.f32.mrf.mxu1  ;;  %v3373_v55 = vld [vmem:[%s10325_s12 + $0x38] sm:$0xff] }
 0x1e2   :  { %v755_v5 = vmul.f32 %v4213_v36, %v4213_v36  ;;  %v674_v25 = vsel %vm672_vm7, %v673_v12, %v671_v30  ;;  %v7216_v47 = vadd.f32 %v3948_v34, %v10622_v13  ;;  %4677 = vpow2.f32 %v3324_v41  ;;  %v3372_v34 = vld [vmem:[%s10325_s12 + $0x30] sm:$0xff] }
 0x1e3   :  { %v4214_v62 = vadd.f32 -1.0, %v674_v25  ;;  %v7223_v27 = vpop.eup %4665  ;;  %4679 = vpow2.f32 %v3260_v0  ;;  %v3222_v12 = vand.u32 2147483647, %v7008_v4  ;;  %v3326_v15 = vmul.f32 1.442695, %v3218_v2  ;;  %v7237_v4 = vld [vmem:[%s10316_s3 + $0x10] sm:$0xff]  ;;  %v3153_v13 = vpop.f32.mrf.mxu1 }
 0x1e4   :  { %v818_v11 = vadd.f32 %v7099_v17, %v755_v5  ;;  %3648 = vadd.xlane.f32.xlu0 %v3647_v16  ;;  %4681 = vpow2.f32 %v3262_v61  ;;  %v7242_v17 = vld [vmem:[%s10316_s3 + $0x18] sm:$0xff]  ;;  %v3264_v30 = vmul.f32 1.442695, %v3187_v59  ;;  %v3188_v5 = vand.u32 2147483647, %v6984_v28  ;;  %v3404_v0 = vld [vmem:[%s10325_s12 + $0x130] sm:$0xff]  ;;  %v7259_v59 = vpop.f32.mrf.mxu0 }
 0x1e5   :  { %v4668_v8 = vpop.eup %4667  ;;  %v756_v36 = vmul.f32 %v4214_v62, %v4214_v62  ;;  %4683 = vpow2.f32 %v3328_v14  ;;  %v3336_v61 = vmul.f32 1.442695, %v3223_v31  ;;  %v3227_v16 = vand.u32 2147483647, %v7135_v46  ;;  %v3405_v28 = vld [vmem:[%s10325_s12 + $0x138] sm:$0xff] }
 0x1e6   :  { %v4670_v6 = vpop.eup %4669  ;;  %v3436_v9 = vmul.f32 %v7174_v39, %v3372_v34  ;;  %v3437_v62 = vmul.f32 %v7168_v19, %v3373_v55  ;;  %v3220_v14 = vand.u32 2147483647, %v6986_v10  ;;  %v3334_v31 = vmul.f32 1.442695, %v3222_v12  ;;  %v3406_v10 = vld [vmem:[%s10325_s12 + $0x140] sm:$0xff] }
 0x1e7   :  { %v7246_v2 = vpop.eup %4671  ;;  %v7248_v25 = vadd.f32 %v818_v11, %v756_v36  ;;  %v3226_v46 = vand.u32 2147483647, %v7124_v33  ;;  %v3650_v11 = vadd.f32 %v4670_v6, %v4668_v8  ;;  %4685 = vpow2.f32 %v3326_v15  ;;  %v10625_v36 = vld [vmem:[#allocation28_spill] sm:$0xff]  ;;  %v3407_v33 = vld [vmem:[%s10325_s12 + $0x148] sm:$0xff] }
 0x1e8   :  { %v3503_v39 = vadd.f32 %v3437_v62, %v3436_v9  ;;  %v294_v41 = vadd.f32 %v293_v50, %v10625_v36  ;;  %4687 = vpow2.f32 %v3264_v30  ;;  %v3266_v37 = vmul.f32 1.442695, %v3188_v5  ;;  %v7276_v50 = vpop.f32.mrf.mxu0  ;;  %v7281_v30 = vld [vmem:[%s10316_s3 + $0x20] sm:$0xff]  ;;  %v7286_v5 = vld [vmem:[%s10316_s3 + $0x28] sm:$0xff] }
 0x1e9   :  { %10624 = vst [vmem:[#allocation20_spill] sm:$0xff] %v7248_v25  ;;  %v7265_v55 = vpop.eup %4673  ;;  %v3231_v24 = vand.u32 2147483647, %v3153_v13  ;;  %3651 = vadd.xlane.f32.xlu0 %v3650_v11  ;;  %4689 = vpow2.f32 %v3336_v61  ;;  %v3344_v12 = vmul.f32 1.442695, %v3227_v16  ;;  %v3468_v15 = vmul.f32 %v7199_v38, %v3404_v0 }
 0x1ea   :  { %3504 = vadd.xlane.f32.xlu1 %v3503_v39  ;;  %v3469_v9 = vmul.f32 %v7183_v60, %v3405_v28  ;;  %v3330_v13 = vmul.f32 1.442695, %v3220_v14  ;;  %v3189_v61 = vand.u32 2147483647, %v6992_v42  ;;  %4691 = vpow2.f32 %v3334_v31  ;;  %v7294_v34 = vpop.f32.mrf.mxu0  ;;  %v10638_v42 = vld [vmem:[#allocation40_spill] sm:$0xff] }
 0x1eb   :  { %v3342_v16 = vmul.f32 1.442695, %v3226_v46  ;;  %v3230_v60 = vand.u32 2147483647, %v7219_v35  ;;  %v3470_v62 = vmul.f32 %v4670_v6, %v3406_v10  ;;  %v3471_v28 = vmul.f32 %v4668_v8, %v3407_v33  ;;  %v10626_v35 = vld [vmem:[#allocation10_spill] sm:$0xff] }
 0x1ec   :  { %v7289_v38 = vpop.eup %4675  ;;  %v3551_v0 = vadd.f32 %v3469_v9, %v3468_v15  ;;  %4693 = vpow2.f32 %v3266_v37  ;;  %v3221_v11 = vand.u32 2147483647, %v6994_v43  ;;  %v3352_v39 = vmul.f32 1.442695, %v3231_v24  ;;  %v3374_v24 = vld [vmem:[%s10325_s12 + $0x40] sm:$0xff] }
 0x1ed   :  { %v3201_v36 = vand.u32 2147483647, %v7221_v57  ;;  %4695 = vpow2.f32 %v3344_v12  ;;  %v3554_v14 = vadd.f32 %v3471_v28, %v3470_v62  ;;  %v295_v6 = vadd.f32 %v294_v41, %v10626_v35  ;;  %v3375_v57 = vld [vmem:[%s10325_s12 + $0x48] sm:$0xff] }
 0x1ee   :  { %3552 = vadd.xlane.f32.xlu1 %v3551_v0  ;;  %4697 = vpow2.f32 %v3330_v13  ;;  %v3268_v37 = vmul.f32 1.442695, %v3189_v61  ;;  %v3190_v43 = vand.u32 2147483647, %v7006_v44  ;;  %v3350_v10 = vmul.f32 1.442695, %v3230_v60  ;;  %v7316_v61 = vpop.xlane.xlu1 %464  ;;  %v3075_v60 = vpop.f32.mrf.mxu0 }
 0x1ef   :  { %v7298_v46 = vpop.eup %4677  ;;  %4699 = vpow2.f32 %v3342_v16  ;;  %v3200_v33 = vand.u32 2147483647, %v7191_v18  ;;  %3555 = vadd.xlane.f32.xlu0 %v3554_v14  ;;  %v3602_v41 = vadd.f32 %v7246_v2, %v7223_v27  ;;  %v3332_v44 = vmul.f32 1.442695, %v3221_v11  ;;  %10627 = vst [vmem:[#allocation6_spill] sm:$0xff] %v7316_v61  ;;  %v10628_v28 = vld [vmem:[#allocation42_spill] sm:$0xff] }
 0x1f0   :  { %v4680_v8 = vpop.eup %4679  ;;  %v3191_v15 = vand.u32 2147483647, %v7020_v29  ;;  %4701 = vpow2.f32 %v3352_v39  ;;  %v3292_v9 = vmul.f32 1.442695, %v3201_v36  ;;  %v3203_v16 = vand.u32 2147483647, %v7276_v50  ;;  %v7328_v36 = vpop.f32.mrf.mxu1 }
 0x1f1   :  { %v7311_v12 = vpop.eup %4681  ;;  %v3653_v18 = vadd.f32 %v7298_v46, %v7289_v38  ;;  %v3438_v0 = vmul.f32 %v7223_v27, %v3374_v24  ;;  %v3439_v62 = vmul.f32 %v7246_v2, %v3375_v57  ;;  %v7325_v29 = vadd.f32 %v7216_v47, %v10628_v28  ;;  %v7333_v50 = vld [vmem:[%s10316_s3 + $0x30] sm:$0xff]  ;;  %v10629_v47 = vld [vmem:[#allocation9_spill] sm:$0xff]  ;;  %v3377_v24 = vld [vmem:[%s10325_s12 + $0x58] sm:$0xff] }
 0x1f2   :  { %v7314_v13 = vpop.eup %4683  ;;  %3603 = vadd.xlane.f32.xlu1 %v3602_v41  ;;  %4703 = vpow2.f32 %v3268_v37  ;;  %v3270_v11 = vmul.f32 1.442695, %v3190_v43  ;;  %v3192_v39 = vand.u32 2147483647, %v7034_v40  ;;  %v3290_v14 = vmul.f32 1.442695, %v3200_v33 }
 0x1f3   :  { %4705 = vpow2.f32 %v3350_v10  ;;  %v3202_v27 = vand.u32 2147483647, %v7259_v59  ;;  %3654 = vadd.xlane.f32.xlu0 %v3653_v18  ;;  %v3506_v2 = vadd.f32 %v3439_v62, %v3438_v0  ;;  %v296_v37 = vadd.f32 %v295_v6, %v10629_v47  ;;  %v3376_v33 = vld [vmem:[%s10325_s12 + $0x50] sm:$0xff]  ;;  %v7353_v18 = vpop.f32.mrf.mxu1 }
 0x1f4   :  { %v7336_v35 = vpop.eup %4685  ;;  %4707 = vpow2.f32 %v3332_v44  ;;  %v3272_v43 = vmul.f32 1.442695, %v3191_v15  ;;  %v3205_v40 = vand.u32 2147483647, %v3075_v60  ;;  %v3296_v10 = vmul.f32 1.442695, %v3203_v16  ;;  %v7358_v60 = vpop.xlane.xlu1 %470 }
 0x1f5   :  { %v7342_v57 = vpop.eup %4687  ;;  %4709 = vpow2.f32 %v3292_v9  ;;  %v3656_v59 = vadd.f32 %v7336_v35, %v7314_v13  ;;  %v3274_v44 = vmul.f32 1.442695, %v3192_v39  ;;  %v3224_v15 = vand.u32 2147483647, %v7062_v26  ;;  %10630 = vst [vmem:[#allocation22_spill] sm:$0xff] %v7358_v60 }
 0x1f6   :  { %3507 = vadd.xlane.f32.xlu1 %v3506_v2  ;;  %v7350_v41 = vpop.eup %4689  ;;  %4711 = vpow2.f32 %v3270_v11  ;;  %v3204_v9 = vand.u32 2147483647, %v7294_v34  ;;  %v3294_v0 = vmul.f32 1.442695, %v3202_v27  ;;  %v3605_v62 = vadd.f32 %v4680_v8, %v7265_v55  ;;  %v10631_v2 = vld [vmem:[#allocation14_spill] sm:$0xff]  ;;  %v3409_v34 = vld [vmem:[%s10325_s12 + $0x158] sm:$0xff] }
 0x1f7   :  { %v7356_v16 = vpop.eup %4691  ;;  %4713 = vpow2.f32 %v3290_v14  ;;  %3657 = vadd.xlane.f32.xlu0 %v3656_v59  ;;  %v3441_v28 = vmul.f32 %v4680_v8, %v3377_v24  ;;  %v7362_v47 = vadd.f32 %v296_v37, %v10631_v2  ;;  %v3193_v26 = vand.u32 2147483647, %v7044_v63  ;;  %v3408_v63 = vld [vmem:[%s10325_s12 + $0x150] sm:$0xff]  ;;  %v7380_v37 = vld [vmem:[%s10316_s3 + $0x38] sm:$0xff]  ;;  %v7385_v24 = vpop.xlane.xlu0 %467 }
 0x1f8   :  { %4715 = vpow2.f32 %v3272_v43  ;;  %v3300_v11 = vmul.f32 1.442695, %v3205_v40  ;;  %v3225_v14 = vand.u32 2147483647, %v7087_v52  ;;  %v3662_v8 = vadd.f32 %v7356_v16, %v7350_v41  ;;  %10632 = vst [vmem:[#allocation24_spill] sm:$0xff] %v7380_v37  ;;  %10633 = vst [vmem:[#allocation25_spill] sm:$0xff] %v7385_v24  ;;  %v7393_v6 = vpop.xlane.xlu1 %1931 }
 0x1f9   :  { %v7368_v39 = vpop.eup %4693  ;;  %4717 = vpow2.f32 %v3296_v10  ;;  %v3440_v27 = vmul.f32 %v7265_v55, %v3376_v33  ;;  %v3338_v52 = vmul.f32 1.442695, %v3224_v15  ;;  %v3194_v40 = vand.u32 2147483647, %v7064_v22  ;;  %v7387_v10 = vpop.f32.mrf.mxu1  ;;  %v7398_v22 = vld [vmem:[%s10316_s3 + $0x40] sm:$0xff] }
 0x1fa   :  { %3606 = vadd.xlane.f32.xlu1 %v3605_v62  ;;  %v7382_v43 = vpop.eup %4695  ;;  %4719 = vpow2.f32 %v3274_v44  ;;  %v3298_v55 = vmul.f32 1.442695, %v3204_v9  ;;  %v3195_v33 = vand.u32 2147483647, %v7073_v53  ;;  %v3473_v2 = vmul.f32 %v7298_v46, %v3409_v34  ;;  %10634 = vst [vmem:[#allocation26_spill] sm:$0xff] %v7398_v22  ;;  %v1808_v22 = vld [vmem:[%s10323_s10 + $0x30] sm:$0xff] }
 0x1fb   :  { %v7389_v59 = vpop.eup %4697  ;;  %4721 = vpow2.f32 %v3294_v0  ;;  %3663 = vadd.xlane.f32.xlu0 %v3662_v8  ;;  %v3509_v62 = vadd.f32 %v3441_v28, %v3440_v27  ;;  %v3276_v15 = vmul.f32 1.442695, %v3193_v26  ;;  %v3196_v9 = vand.u32 2147483647, %v7089_v20  ;;  %v7413_v26 = vld [vmem:[%s10316_s3 + $0x48] sm:$0xff]  ;;  %v3165_v27 = vpop.f32.mrf.mxu1 }
 0x1fc   :  { %v7400_v44 = vpop.eup %4699  ;;  %4723 = vpow2.f32 %v3300_v11  ;;  %v3340_v28 = vmul.f32 1.442695, %v3225_v14  ;;  %v3228_v46 = vand.u32 2147483647, %v7164_v49  ;;  %v3472_v8 = vmul.f32 %v7289_v38, %v3408_v63  ;;  %10636 = vst [vmem:[#allocation44_spill] sm:$0xff] %v7413_v26  ;;  %v7416_v53 = vpop.xlane.xlu0 %1934 }
 0x1fd   :  { %v7404_v0 = vpop.eup %4701  ;;  %v3668_v34 = vadd.f32 %v7400_v44, %v7382_v43  ;;  %v3278_v20 = vmul.f32 1.442695, %v3194_v40  ;;  %v3197_v11 = vand.u32 2147483647, %v7126_v1  ;;  %4725 = vpow2.f32 %v3298_v55  ;;  %v3379_v55 = vld [vmem:[%s10325_s12 + $0x68] sm:$0xff] }
 0x1fe   :  { %10635 = vst [vmem:[#allocation23_spill] sm:$0xff] %v7404_v0  ;;  %3510 = vadd.xlane.f32.xlu1 %v3509_v62  ;;  %4727 = vpow2.f32 %v3338_v52  ;;  %v3280_v62 = vmul.f32 1.442695, %v3195_v33  ;;  %v3229_v38 = vand.u32 2147483647, %v7187_v51  ;;  %v3557_v63 = vadd.f32 %v3473_v2, %v3472_v8 }
 0x1ff   :  { %v7419_v14 = vpop.eup %4703  ;;  %3669 = vadd.xlane.f32.xlu0 %v3668_v34  ;;  %v7426_v40 = vadd.f32 %v7325_v29, %v10638_v42  ;;  %4729 = vpow2.f32 %v3276_v15  ;;  %v3282_v1 = vmul.f32 1.442695, %v3196_v9  ;;  %v3346_v51 = vmul.f32 1.442695, %v3228_v46  ;;  %v1938_v42 = vpop.xlane.xlu1 %1937  ;;  %v10639_v15 = vld [vmem:[#allocation16_spill] sm:$0xff] }
 0x200   :  { %v7422_v31 = vpop.eup %4705  ;;  %4731 = vpow2.f32 %v3340_v28  ;;  %v3235_v33 = vand.u32 2147483647, %v3165_v27  ;;  %vm1315_vm8 = vcmask 7168   ;;  %v7440_v9 = vadd.f32 %v7362_v47, %v10639_v15  ;;  %v3378_v28 = vld [vmem:[%s10325_s12 + $0x60] sm:$0xff]  ;;  %v1941_v15 = vpop.xlane.xlu0 %1940 }
 0x201   :  { %10637 = vst [vmem:[#allocation27_spill] sm:$0xff] %v7422_v31  ;;  %v7432_v52 = vpop.eup %4707  ;;  %v3674_v2 = vadd.f32 %v7422_v31, %v7404_v0  ;;  %4733 = vpow2.f32 %v3278_v20  ;;  %v3284_v34 = vmul.f32 1.442695, %v3197_v11  ;;  %v3234_v8 = vand.u32 2147483647, %v7387_v10 }
 0x202   :  { %3558 = vadd.xlane.f32.xlu1 %v3557_v63  ;;  %v7436_v29 = vpop.eup %4709  ;;  %4735 = vpow2.f32 %v3280_v62  ;;  %v3348_v27 = vmul.f32 1.442695, %v3229_v38  ;;  %v3608_v63 = vadd.f32 %v7342_v57, %v7311_v12  ;;  %v3443_v49 = vmul.f32 %v7342_v57, %v3379_v55  ;;  %v7457_v62 = vld [vmem:[%s10316_s3 + $0x50] sm:$0xff] }
 0x203   :  { %v7446_v46 = vpop.eup %4711  ;;  %3675 = vadd.xlane.f32.xlu0 %v3674_v2  ;;  %4737 = vpow2.f32 %v3282_v1  ;;  %v3198_v20 = vand.u32 2147483647, %v7137_v3  ;;  %v3199_v10 = vand.u32 2147483647, %v7166_v56  ;;  %v2026_v11 = vsub.f32 1.0, %v7393_v6  ;;  %10640 = vst [vmem:[#allocation28_spill] sm:$0xff] %v7457_v62 }
 0x204   :  { %v4714_v47 = vpop.eup %4713  ;;  %4739 = vpow2.f32 %v3346_v51  ;;  %v3360_v2 = vmul.f32 1.442695, %v3235_v33  ;;  %v3442_v1 = vmul.f32 %v7311_v12, %v3378_v28  ;;  %v1802_v3 = vld [vmem:[%s10323_s10] sm:$0xff]  ;;  %v3358_v6 = vmul.f32 1.442695, %v3234_v8  ;;  %v3411_v12 = vld [vmem:[%s10325_s12 + $0x168] sm:$0xff]  ;;  %v1944_v28 = vpop.xlane.xlu1 %1943 }
 0x205   :  { %v7459_v38 = vpop.eup %4715  ;;  %v3629_v57 = vadd.f32 %v4714_v47, %v7436_v29  ;;  %4741 = vpow2.f32 %v3284_v34  ;;  %v2058_v55 = vand.u32 2147483647, %v2026_v11  ;;  %v2027_v19 = vsub.f32 1.0, %v7416_v53  ;;  %v1803_v33 = vld [vmem:[%s10323_s10 + $0x8] sm:$0xff]  ;;  %v1804_v34 = vld [vmem:[%s10323_s10 + $0x10] sm:$0xff] }
 0x206   :  { %3609 = vadd.xlane.f32.xlu1 %v3608_v63  ;;  %v7466_v56 = vpop.eup %4717  ;;  %4743 = vpow2.f32 %v3348_v27  ;;  %v3512_v51 = vadd.f32 %v3443_v49, %v3442_v1  ;;  %v2028_v8 = vsub.f32 1.0, %v1938_v42  ;;  %v7483_v27 = vmul.f32 1.442695, %v3198_v20  ;;  %v3392_v53 = vld [vmem:[%s10325_s12 + $0xd0] sm:$0xff]  ;;  %v3393_v20 = vld [vmem:[%s10325_s12 + $0xd8] sm:$0xff] }
 0x207   :  { %v7469_v23 = vpop.eup %4719  ;;  %3630 = vadd.xlane.f32.xlu0 %v3629_v57  ;;  %v7485_v49 = vmul.f32 1.442695, %v3199_v10  ;;  %v2090_v11 = vmul.f32 %v2058_v55, %v1802_v3  ;;  %v2059_v57 = vand.u32 2147483647, %v2027_v19  ;;  %4745 = vpow2.f32 %v3360_v2  ;;  %v1805_v3 = vld [vmem:[%s10323_s10 + $0x18] sm:$0xff] }
 0x208   :  { %v7481_v63 = vpop.eup %4721  ;;  %v2060_v32 = vand.u32 2147483647, %v2028_v8  ;;  %v2029_v42 = vsub.f32 1.0, %v1941_v15  ;;  %4747 = vpow2.f32 %v3358_v6  ;;  %v3611_v19 = vadd.f32 %v7419_v14, %v7368_v39  ;;  %v1947_v15 = vpop.xlane.xlu0 %1946 }
 0x209   :  { %v7487_v1 = vpop.eup %4723  ;;  %v3632_v25 = vadd.f32 %v7481_v63, %v7466_v56  ;;  %v2154_v10 = vsel %vm1315_vm8, %v2090_v11, 0.0  ;;  %v2091_v2 = vmul.f32 %v2059_v57, %v1803_v33  ;;  %v3475_v6 = vmul.f32 %v7314_v13, %v3411_v12  ;;  %v3381_v11 = vld [vmem:[%s10325_s12 + $0x78] sm:$0xff]  ;;  %v1806_v57 = vld [vmem:[%s10323_s10 + $0x20] sm:$0xff]  ;;  %v1843_v12 = vld [vmem:[%s10321_s8 + $0x48] sm:$0xff]  ;;  %v1950_v62 = vpop.xlane.xlu1 %1949 }
 0x20a   :  { %3513 = vadd.xlane.f32.xlu1 %v3512_v51  ;;  %v7503_v55 = vpop.eup %4725  ;;  %v3410_v51 = vld [vmem:[%s10325_s12 + $0x160] sm:$0xff]  ;;  %v2092_v8 = vmul.f32 %v2060_v32, %v1804_v34  ;;  %v2061_v48 = vand.u32 2147483647, %v2029_v42  ;;  %v2030_v60 = vsub.f32 1.0, %v1944_v28  ;;  %v3456_v0 = vmul.f32 %v4714_v47, %v3392_v53  ;;  %v1875_v34 = vld [vmem:[%s10322_s9 + $0x48] sm:$0xff] }
 0x20b   :  { %3633 = vadd.xlane.f32.xlu0 %v3632_v25  ;;  %v7509_v24 = vpop.eup %4727  ;;  %v3635_v33 = vadd.f32 %v7503_v55, %v7487_v1  ;;  %v2155_v25 = vsel %vm1315_vm8, %v2091_v2, 0.0  ;;  %v3457_v32 = vmul.f32 %v7436_v29, %v3393_v20  ;;  %v3659_v29 = vadd.f32 %v7432_v52, %v7389_v59  ;;  %v3380_v20 = vld [vmem:[%s10325_s12 + $0x70] sm:$0xff] }
 0x20c   :  { %v7521_v13 = vpop.eup %4729  ;;  %v2156_v28 = vadd.f32 %v2155_v25, %v2154_v10  ;;  %v2157_v42 = vsel %vm1315_vm8, %v2092_v8, 0.0  ;;  %v2093_v2 = vmul.f32 %v2061_v48, %v1805_v3  ;;  %v2062_v31 = vand.u32 2147483647, %v2030_v60  ;;  %v7542_v8 = vpop.f32.mrf.mxu1 }
 0x20d   :  { %v7530_v47 = vpop.eup %4731  ;;  %v3474_v53 = vmul.f32 %v7336_v35, %v3410_v51  ;;  %v2031_v26 = vsub.f32 1.0, %v1947_v15  ;;  %v3445_v48 = vmul.f32 %v7419_v14, %v3381_v11  ;;  %v1807_v35 = vld [vmem:[%s10323_s10 + $0x28] sm:$0xff]  ;;  %v3232_v14 = vand.u32 2147483647, %v7328_v36 }
 0x20e   :  { %3612 = vadd.xlane.f32.xlu1 %v3611_v19  ;;  %v7538_v19 = vadd.f32 %v3457_v32, %v3456_v0  ;;  %v7540_v10 = vpop.eup %4733  ;;  %v2158_v60 = vadd.f32 %v2157_v42, %v2156_v28  ;;  %v2159_v3 = vsel %vm1315_vm8, %v2093_v2, 0.0  ;;  %v2094_v25 = vmul.f32 %v2062_v31, %v1806_v57  ;;  %v3394_v0 = vld [vmem:[%s10325_s12 + $0xe0] sm:$0xff]  ;;  %v3395_v15 = vld [vmem:[%s10325_s12 + $0xe8] sm:$0xff]  ;;  %v1953_v31 = vpop.xlane.xlu0 %1952 }
 0x20f   :  { %3636 = vadd.xlane.f32.xlu0 %v3635_v33  ;;  %v7555_v51 = vpop.eup %4735  ;;  %v1907_v33 = vmul.f32 %v1875_v34, %v1843_v12  ;;  %v2063_v11 = vand.u32 2147483647, %v2031_v26  ;;  %v2032_v32 = vsub.f32 1.0, %v1950_v62  ;;  %v3560_v28 = vadd.f32 %v3475_v6, %v3474_v53 }
 0x210   :  { %10641 = vst [vmem:[#allocation10_spill] sm:$0xff] %v7538_v19  ;;  %v7558_v57 = vpop.eup %4737  ;;  %v3444_v42 = vmul.f32 %v7368_v39, %v3380_v20  ;;  %v2160_v2 = vadd.f32 %v2159_v3, %v2158_v60  ;;  %v2161_v19 = vsel %vm1315_vm8, %v2094_v25, 0.0  ;;  %v3458_v26 = vmul.f32 %v7481_v63, %v3394_v0  ;;  %v3171_v39 = vpop.f32.mrf.mxu1  ;;  %v3383_v25 = vld [vmem:[%s10325_s12 + $0x88] sm:$0xff] }
 0x211   :  { %v7565_v37 = vpop.eup %4739  ;;  %v2095_v36 = vmul.f32 %v2063_v11, %v1807_v35  ;;  %v2064_v12 = vand.u32 2147483647, %v2032_v32  ;;  %v3459_v62 = vmul.f32 %v7466_v56, %v3395_v15  ;;  %v3233_v6 = vand.u32 2147483647, %v7353_v18  ;;  %v1809_v18 = vld [vmem:[%s10323_s10 + $0x38] sm:$0xff]  ;;  %v3414_v15 = vld [vmem:[%s10325_s12 + $0x180] sm:$0xff] }
 0x212   :  { %3660 = vadd.xlane.f32.xlu1 %v3659_v29  ;;  %10642 = vst [vmem:[#allocation42_spill] sm:$0xff] %v7565_v37  ;;  %v7569_v34 = vpop.eup %4741  ;;  %v3515_v29 = vadd.f32 %v3445_v48, %v3444_v42  ;;  %v2162_v53 = vadd.f32 %v2161_v19, %v2160_v2  ;;  %v2033_v20 = vsub.f32 1.0, %v1953_v31  ;;  %v1957_v3 = vsel %vm175_vm1, %v1907_v33, 0.0  ;;  %v3412_v19 = vld [vmem:[%s10325_s12 + $0x170] sm:$0xff]  ;;  %v10644_v48 = vld [vmem:[#allocation33_spill] sm:$0xff]  ;;  %v3413_v32 = vld [vmem:[%s10325_s12 + $0x178] sm:$0xff] }
 0x213   :  { %3561 = vadd.xlane.f32.xlu0 %v3560_v28  ;;  %v7572_v60 = vpop.eup %4743  ;;  %v2163_v63 = vsel %vm1315_vm8, %v2095_v36, 0.0  ;;  %v2096_v56 = vmul.f32 %v2064_v12, %v1808_v22  ;;  %v7579_v35 = vadd.f32 %v3459_v62, %v3458_v26  ;;  %v7589_v0 = vadd.f32 %v7440_v9, %v10644_v48  ;;  %v3382_v22 = vld [vmem:[%s10325_s12 + $0x80] sm:$0xff]  ;;  %v3415_v28 = vld [vmem:[%s10325_s12 + $0x188] sm:$0xff] }
 0x214   :  { %10643 = vst [vmem:[#allocation9_spill] sm:$0xff] %v7572_v60  ;;  %4749 = vpow2.f32 %v7483_v27  ;;  %v2164_v33 = vadd.f32 %v2163_v63, %v2162_v53  ;;  %v2065_v11 = vand.u32 2147483647, %v2033_v20  ;;  %v7601_v31 = vpop.eup %4745  ;;  %vm2624_vm9 = vcmp.eq.f32.partialorder %v10607_v45, 0.0 }
 0x215   :  { %10645 = vst [vmem:[#allocation14_spill] sm:$0xff] %v7601_v31  ;;  %4751 = vpow2.f32 %v7485_v49  ;;  %v3354_v9 = vmul.f32 1.442695, %v3232_v14  ;;  %v3237_v27 = vand.u32 2147483647, %v3171_v39  ;;  %v2165_v42 = vsel %vm1315_vm8, %v2096_v56, 0.0  ;;  %v7609_v2 = vpop.eup %4747 }
 0x216   :  { %3516 = vadd.xlane.f32.xlu1 %v3515_v29  ;;  %10646 = vst [vmem:[#allocation40_spill] sm:$0xff] %v7609_v2  ;;  %v3614_v36 = vadd.f32 %v7459_v38, %v7446_v46  ;;  %v3447_v12 = vmul.f32 %v7459_v38, %v3383_v25  ;;  %v1845_v49 = vld [vmem:[%s10321_s8 + $0x58] sm:$0xff]  ;;  %v2166_v26 = vadd.f32 %v2165_v42, %v2164_v33  ;;  %v3416_v39 = vld [vmem:[%s10325_s12 + $0x190] sm:$0xff]  ;;  %v3356_v29 = vmul.f32 1.442695, %v3233_v6  ;;  %v3418_v56 = vld [vmem:[%s10325_s12 + $0x1a0] sm:$0xff] }
 0x217   :  { %1958 = vadd.xlane.f32.xlu0 %v1957_v3  ;;  %v1877_v14 = vld [vmem:[%s10322_s9 + $0x58] sm:$0xff]  ;;  %v2097_v62 = vmul.f32 %v2065_v11, %v1809_v18  ;;  %v3236_v53 = vand.u32 2147483647, %v7542_v8  ;;  %v3476_v20 = vmul.f32 %v7389_v59, %v3412_v19  ;;  %v3477_v38 = vmul.f32 %v7432_v52, %v3413_v32  ;;  %v3396_v3 = vld [vmem:[%s10325_s12 + $0xf0] sm:$0xff]  ;;  %v3419_v18 = vld [vmem:[%s10325_s12 + $0x1a8] sm:$0xff] }
 0x218   :  { %v3397_v25 = vld [vmem:[%s10325_s12 + $0xf8] sm:$0xff]  ;;  %v3680_v63 = vadd.f32 %v7609_v2, %v7601_v31  ;;  %v3446_v6 = vmul.f32 %v7446_v46, %v3382_v22  ;;  %v3479_v8 = vmul.f32 %v7350_v41, %v3415_v28  ;;  %v3364_v19 = vmul.f32 1.442695, %v3237_v27 }
 0x219   :  { %v2167_v59 = vsel %vm1315_vm8, %v2097_v62, 0.0  ;;  %v3417_v52 = vld [vmem:[%s10325_s12 + $0x198] sm:$0xff]  ;;  %v3478_v48 = vmul.f32 %v7356_v16, %v3414_v15  ;;  %v7649_v41 = vadd.f32 %v3477_v38, %v3476_v20  ;;  %v1909_v11 = vmul.f32 %v1877_v14, %v1845_v49  ;;  %v7688_v20 = vld [vmem:[%s10316_s3 + $0x70] sm:$0xff] }
 0x21a   :  { %3615 = vadd.xlane.f32.xlu1 %v3614_v36  ;;  %v7647_v46 = vadd.f32 %v2167_v59, %v2166_v26  ;;  %v7654_v22 = vld [vmem:[%s10316_s3 + $0x58] sm:$0xff]  ;;  %v3518_v33 = vadd.f32 %v3447_v12, %v3446_v6  ;;  %v3460_v32 = vmul.f32 %v7503_v55, %v3396_v3  ;;  %v3461_v28 = vmul.f32 %v7487_v1, %v3397_v25  ;;  %v7665_v36 = vld [vmem:[%s10316_s3 + $0x60] sm:$0xff]  ;;  %v1847_v6 = vld [vmem:[%s10321_s8 + $0x68] sm:$0xff] }
 0x21b   :  { %3681 = vadd.xlane.f32.xlu0 %v3680_v63  ;;  %v3480_v27 = vmul.f32 %v7509_v24, %v3416_v39  ;;  %v3481_v16 = vmul.f32 %v7530_v47, %v3417_v52  ;;  %v3482_v15 = vmul.f32 %v7400_v44, %v3418_v56  ;;  %v3483_v42 = vmul.f32 %v7382_v43, %v3419_v18  ;;  %v1846_v55 = vld [vmem:[%s10321_s8 + $0x60] sm:$0xff]  ;;  %v7678_v43 = vld [vmem:[%s10316_s3 + $0x68] sm:$0xff]  ;;  %v7693_v38 = vld [vmem:[%s10316_s3 + $0x78] sm:$0xff] }
 0x21c   :  { %10647 = vst [vmem:[#allocation16_spill] sm:$0xff] %v7647_v46  ;;  %v3566_v12 = vadd.f32 %v3479_v8, %v3478_v48  ;;  %v1878_v1 = vld [vmem:[%s10322_s9 + $0x60] sm:$0xff]  ;;  %v7673_v49 = vadd.f32 %v3461_v28, %v3460_v32  ;;  %4753 = vpow2.f32 %v3356_v29  ;;  %v3362_v14 = vmul.f32 1.442695, %v3236_v53  ;;  %v3385_v63 = vld [vmem:[%s10325_s12 + $0x98] sm:$0xff]  ;;  %v1879_v8 = vld [vmem:[%s10322_s9 + $0x68] sm:$0xff] }
 0x21d   :  { %v7681_v26 = vadd.f32 %v3481_v16, %v3480_v27  ;;  %v7683_v62 = vadd.f32 %v3483_v42, %v3482_v15  ;;  %v5059_v39 = vmov 0   ;;  %v7698_v29 = vld [vmem:[%s10316_s3 + $0x80] sm:$0xff]  ;;  %v10651_v53 = vand.u32 2147483648, %v10607_v45  ;;  %v7721_v45 = vld [vmem:[%s10316_s3 + $0x88] sm:$0xff]  ;;  %v1848_v52 = vld [vmem:[%s10321_s8 + $0x70] sm:$0xff] }
 0x21e   :  { %3519 = vadd.xlane.f32.xlu1 %v3518_v33  ;;  %10648 = vst [vmem:[#allocation33_spill] sm:$0xff] %v7673_v49  ;;  %4445 = vset.pattern.permute.xlu0 %v5059_v39  ;;  %4755 = vpow2.f32 %v3354_v9  ;;  %v3617_v25 = vadd.f32 %v7521_v13, %v7469_v23  ;;  %v1963_v9 = vsel %vm175_vm1, %v1909_v11, 0.0  ;;  %v1910_v59 = vmul.f32 %v1878_v1, %v1846_v55  ;;  %v1880_v56 = vld [vmem:[%s10322_s9 + $0x70] sm:$0xff]  ;;  %v3387_v18 = vld [vmem:[%s10325_s12 + $0xa8] sm:$0xff]  ;;  %v1849_v15 = vld [vmem:[%s10321_s8 + $0x78] sm:$0xff] }
 0x21f   :  { %10649 = vst [vmem:[#allocation51_spill] sm:$0xff] %v7681_v26  ;;  %10650 = vst [vmem:[#allocation52_spill] sm:$0xff] %v7683_v62  ;;  %4446 = vset.pattern.permute.xlu1 %v5059_v39  ;;  %v7705_v3 = vsel %vm2624_vm9, %v10651_v53, %v7147_v21  ;;  %3567 = vadd.xlane.f32.xlu0 %v3566_v12  ;;  %4757 = vpow2.f32 %v3364_v19  ;;  %v7737_v48 = vld [vmem:[%s10316_s3 + $0x90] sm:$0xff]  ;;  %v7741_v33 = vadd.f32 -1.0, %v7150_v54  ;;  %v10654_v11 = vld [vmem:[#allocation37_spill] sm:$0xff] }
 0x220   :  { %10652 = vst [vmem:[#allocation53_spill] sm:$0xff] %v7705_v3  ;;  %v3952_v32 = vadd.f32 %v7426_v40, %v10654_v11  ;;  %v10655_v28 = vld [vmem:[#allocation35_spill] sm:$0xff]  ;;  %4759 = vpow2.f32 %v3362_v14  ;;  %v3449_v40 = vmul.f32 %v7521_v13, %v3385_v63  ;;  %v3386_v55 = vld [vmem:[%s10325_s12 + $0xa0] sm:$0xff]  ;;  %v3665_v13 = vadd.f32 %v7530_v47, %v7509_v24  ;;  %v3391_v24 = vld [vmem:[%s10325_s12 + $0xc8] sm:$0xff] }
 0x221   :  { %10653 = vst [vmem:[#allocation54_spill] sm:$0xff] %v7741_v33  ;;  %v300_v27 = vadd.f32 %v7589_v0, %v10655_v28  ;;  %v3384_v16 = vld [vmem:[%s10325_s12 + $0x90] sm:$0xff]  ;;  %v1881_v54 = vld [vmem:[%s10322_s9 + $0x78] sm:$0xff]  ;;  %v7757_v12 = vpop.eup %4749  ;;  %v1911_v0 = vmul.f32 %v1879_v8, %v1847_v6  ;;  %v1850_v1 = vld [vmem:[%s10321_s8 + $0x80] sm:$0xff]  ;;  %v1912_v14 = vmul.f32 %v1880_v56, %v1848_v52  ;;  %v3451_v63 = vmul.f32 %v7555_v51, %v3387_v18 }
 0x222   :  { %3618 = vadd.xlane.f32.xlu1 %v3617_v25  ;;  %v1882_v39 = vld [vmem:[%s10322_s9 + $0x80] sm:$0xff]  ;;  %v7770_v25 = vpop.eup %4751  ;;  %v1851_v6 = vld [vmem:[%s10321_s8 + $0x88] sm:$0xff]  ;;  %v3389_v11 = vld [vmem:[%s10325_s12 + $0xb8] sm:$0xff]  ;;  %v1966_v47 = vsel %vm175_vm1, %v1910_v59, 0.0  ;;  %v3448_v52 = vmul.f32 %v7469_v23, %v3384_v16  ;;  %v1913_v56 = vmul.f32 %v1881_v54, %v1849_v15  ;;  %v3450_v42 = vmul.f32 %v7540_v10, %v3386_v55 }
 0x223   :  { %1964 = vadd.xlane.f32.xlu0 %v1963_v9  ;;  %v1883_v8 = vld [vmem:[%s10322_s9 + $0x88] sm:$0xff]  ;;  %v1852_v9 = vld [vmem:[%s10321_s8 + $0x90] sm:$0xff]  ;;  %v1854_v28 = vld [vmem:[%s10321_s8 + $0xa0] sm:$0xff]  ;;  %4761 = vrsqrt.f32 %v7316_v61  ;;  %v10667_v31 = vmax.f32 %v7213_v58, 0.001 }
 0x224   :  { %v1884_v18 = vld [vmem:[%s10322_s9 + $0x90] sm:$0xff]  ;;  %v1886_v53 = vld [vmem:[%s10322_s9 + $0xa0] sm:$0xff]  ;;  %v3521_v55 = vadd.f32 %v3449_v40, %v3448_v52  ;;  %v1914_v52 = vmul.f32 %v1882_v39, %v1850_v1  ;;  %v8016_v58 = vld [vmem:[%s10316_s3 + $0xf8] sm:$0xff] }
 0x225   :  { %v10656_v23 = vld [vmem:[#allocation34_spill] sm:$0xff]  ;;  %v1890_v44 = vld [vmem:[%s10322_s9 + $0xc0] sm:$0xff]  ;;  %v1916_v33 = vmul.f32 %v1884_v18, %v1852_v9  ;;  %v1918_v61 = vmul.f32 %v1886_v53, %v1854_v28 }
 0x226   :  { %v7804_v16 = vadd.f32 %v3952_v32, %v10656_v23  ;;  %v10658_v15 = vld [vmem:[#allocation38_spill] sm:$0xff]  ;;  %3666 = vadd.xlane.f32.xlu1 %v3665_v13  ;;  %v1858_v32 = vld [vmem:[%s10321_s8 + $0xc0] sm:$0xff]  ;;  %v1969_v13 = vsel %vm175_vm1, %v1911_v0, 0.0  ;;  %v3620_v23 = vadd.f32 %v7555_v51, %v7540_v10  ;;  %v1972_v0 = vsel %vm175_vm1, %v1912_v14, 0.0 }
 0x227   :  { %v7807_v54 = vadd.f32 %v300_v27, %v10658_v15  ;;  %v3388_v19 = vld [vmem:[%s10325_s12 + $0xb0] sm:$0xff]  ;;  %v3390_v15 = vld [vmem:[%s10325_s12 + $0xc0] sm:$0xff]  ;;  %1967 = vadd.xlane.f32.xlu0 %v1966_v47  ;;  %v7840_v10 = vadd.f32 %v3451_v63, %v3450_v42  ;;  %v7844_v51 = vadd.f32 %v7569_v34, %v7558_v57  ;;  %v7856_v42 = vsel %vm175_vm1, %v1913_v56, 0.0  ;;  %v8261_v49 = vld [vmem:[%s10317_s4 + $0x68] sm:$0xff] }
 0x228   :  { %10657 = vst [vmem:[#allocation37_spill] sm:$0xff] %v7804_v16  ;;  %v1856_v21 = vld [vmem:[%s10321_s8 + $0xb0] sm:$0xff]  ;;  %v1862_v46 = vld [vmem:[%s10321_s8 + $0xe0] sm:$0xff]  ;;  %v1915_v14 = vmul.f32 %v1883_v8, %v1851_v6  ;;  %v3453_v63 = vmul.f32 %v7569_v34, %v3389_v11  ;;  %v3455_v56 = vmul.f32 %v7770_v25, %v3391_v24  ;;  %v1922_v8 = vmul.f32 %v1890_v44, %v1858_v32  ;;  %v7883_v44 = vld [vmem:[%s10316_s3 + $0x98] sm:$0xff] }
 0x229   :  { %10659 = vst [vmem:[#allocation35_spill] sm:$0xff] %v7807_v54  ;;  %v1888_v59 = vld [vmem:[%s10322_s9 + $0xb0] sm:$0xff]  ;;  %v1894_v16 = vld [vmem:[%s10322_s9 + $0xe0] sm:$0xff]  ;;  %v7871_v34 = vadd.f32 %v7572_v60, %v7565_v37  ;;  %v3452_v11 = vmul.f32 %v7558_v57, %v3388_v19  ;;  %v7874_v54 = vpop.eup %4753  ;;  %v7877_v2 = vsel %vm175_vm1, %v1914_v52, 0.0  ;;  %v3454_v53 = vmul.f32 %v7757_v12, %v3390_v15  ;;  %10737 = vst [vmem:[#allocation97_spill] sm:$0xff] %v8261_v49 }
 0x22a   :  { %v1860_v27 = vld [vmem:[%s10321_s8 + $0xd0] sm:$0xff]  ;;  %3522 = vadd.xlane.f32.xlu1 %v3521_v55  ;;  %v1920_v6 = vmul.f32 %v1888_v59, %v1856_v21  ;;  %v1926_v18 = vmul.f32 %v1894_v16, %v1862_v46  ;;  %10660 = vst [vmem:[#allocation34_spill] sm:$0xff] %v7874_v54  ;;  %v7888_v57 = vsel %vm175_vm1, %v1915_v14, 0.0  ;;  %v7893_v19 = vsel %vm175_vm1, %v1916_v33, 0.0  ;;  %v7907_v16 = vld [vmem:[%s10316_s3 + $0xa8] sm:$0xff]  ;;  %v1428_v14 = vld [vmem:[%s10318_s5] sm:$0xff] }
 0x22b   :  { %v1892_v40 = vld [vmem:[%s10322_s9 + $0xd0] sm:$0xff]  ;;  %1970 = vadd.xlane.f32.xlu0 %v1969_v13  ;;  %v7885_v21 = vpop.eup %4755  ;;  %v7890_v46 = vadd.f32 %v3453_v63, %v3452_v11  ;;  %v7897_v59 = vadd.f32 %v7770_v25, %v7757_v12  ;;  %v7917_v12 = vsel %vm175_vm1, %v1918_v61, 0.0  ;;  %v7919_v25 = vadd.f32 %v3455_v56, %v3454_v53  ;;  %v7930_v13 = vld [vmem:[%s10316_s3 + $0xb8] sm:$0xff]  ;;  %v7940_v61 = vld [vmem:[%s10316_s3 + $0xc8] sm:$0xff] }
 0x22c   :  { %v1864_v47 = vld [vmem:[%s10321_s8 + $0xf0] sm:$0xff]  ;;  %v1924_v9 = vmul.f32 %v1892_v40, %v1860_v27  ;;  %10661 = vst [vmem:[#allocation38_spill] sm:$0xff] %v7885_v21  ;;  %v7914_v33 = vpop.eup %4757  ;;  %v7922_v27 = vsel %vm175_vm1, %v1920_v6, 0.0  ;;  %v7925_v55 = vsel %vm175_vm1, %v1922_v8, 0.0  ;;  %v7947_v40 = vadd.f32 %v7885_v21, %v7874_v54  ;;  %v1460_v63 = vld [vmem:[%s10319_s6] sm:$0xff]  ;;  %v7974_v6 = vld [vmem:[%s10316_s3 + $0xd8] sm:$0xff] }
 0x22d   :  { %v1896_v1 = vld [vmem:[%s10322_s9 + $0xf0] sm:$0xff]  ;;  %10662 = vst [vmem:[#allocation55_spill] sm:$0xff] %v7914_v33  ;;  %v7950_v52 = vsel %vm175_vm1, %v1926_v18, 0.0  ;;  %v7979_v8 = vld [vmem:[%s10316_s3 + $0xe0] sm:$0xff]  ;;  %v7993_v53 = vld [vmem:[%s10316_s3 + $0xe8] sm:$0xff]  ;;  %v8053_v37 = vsub.f32 %v1428_v14, %v1460_v63 }
 0x22e   :  { %v1844_v39 = vld [vmem:[%s10321_s8 + $0x50] sm:$0xff]  ;;  %v1928_v28 = vmul.f32 %v1896_v1, %v1864_v47  ;;  %3621 = vadd.xlane.f32.xlu1 %v3620_v23  ;;  %v7935_v23 = vld [vmem:[%s10316_s3 + $0xc0] sm:$0xff]  ;;  %v7943_v15 = vsel %vm175_vm1, %v1924_v9, 0.0  ;;  %v7963_v1 = vpop.eup %4759  ;;  %v7999_v11 = vmin.f32 %v10667_v31, 0.999 }
 0x22f   :  { %v1876_v3 = vld [vmem:[%s10322_s9 + $0x50] sm:$0xff]  ;;  %10663 = vst [vmem:[#allocation56_spill] sm:$0xff] %v7963_v1  ;;  %1973 = vadd.xlane.f32.xlu0 %v1972_v0  ;;  %v10665_v0 = vmax.f32 %v7197_v7, 0.001  ;;  %v7988_v18 = vadd.f32 %v7963_v1, %v7914_v33  ;;  %v1429_v7 = vld [vmem:[%s10318_s5 + $0x8] sm:$0xff]  ;;  %10673 = vst [vmem:[#allocation61_spill] sm:$0xff] %v8053_v37 }
 0x230   :  { %v1908_v24 = vmul.f32 %v1876_v3, %v1844_v39  ;;  %v7902_v3 = vld [vmem:[%s10316_s3 + $0xa0] sm:$0xff]  ;;  %v7912_v32 = vld [vmem:[%s10316_s3 + $0xb0] sm:$0xff]  ;;  %v7966_v39 = vsel %vm175_vm1, %v1928_v28, 0.0  ;;  %v10668_v1 = vmax.f32 %v7237_v4, 0.001 }
 0x231   :  { %v7955_v47 = vld [vmem:[%s10316_s3 + $0xd0] sm:$0xff]  ;;  %v7984_v9 = vmin.f32 %v10665_v0, 0.999  ;;  %10666 = vst [vmem:[#allocation58_spill] sm:$0xff] %v7988_v18  ;;  %v1461_v0 = vld [vmem:[%s10319_s6 + $0x8] sm:$0xff]  ;;  %v1432_v14 = vld [vmem:[%s10318_s5 + $0x20] sm:$0xff] }
 0x232   :  { %v7969_v56 = vsel %vm175_vm1, %v1908_v24, 0.0  ;;  %3525 = vadd.xlane.f32.xlu1 %v7840_v10  ;;  %v8011_v28 = vld [vmem:[%s10316_s3 + $0xf0] sm:$0xff]  ;;  %v889_v31 = vmax.f32 %v7912_v32, 0.001  ;;  %v8022_v33 = vmin.f32 %v10668_v1, 0.999  ;;  %v8038_v1 = vpop.eup %4761  ;;  %v8075_v63 = vsub.f32 %v1429_v7, %v1461_v0 }
 0x233   :  { %10664 = vst [vmem:[#allocation57_spill] sm:$0xff] %v7969_v56  ;;  %4763 = vlog2.f32 %v7984_v9  ;;  %v10669_v21 = vmax.f32 %v7242_v17, 0.001  ;;  %v1430_v32 = vld [vmem:[%s10318_s5 + $0x10] sm:$0xff]  ;;  %10670 = vst [vmem:[#allocation59_spill] sm:$0xff] %v8038_v1  ;;  %1976 = vadd.xlane.f32.xlu0 %v7856_v42  ;;  %v1431_v10 = vld [vmem:[%s10318_s5 + $0x18] sm:$0xff] }
 0x234   :  { %4765 = vlog2.f32 %v7999_v11  ;;  %v1462_v4 = vld [vmem:[%s10319_s6 + $0x10] sm:$0xff]  ;;  %v893_v54 = vmax.f32 %v7955_v47, 0.001  ;;  %v10671_v17 = vmax.f32 %v7281_v30, 0.001  ;;  %v1463_v24 = vld [vmem:[%s10319_s6 + $0x18] sm:$0xff] }
 0x235   :  { %v8029_v62 = vmin.f32 %v10669_v21, 0.999  ;;  %4767 = vlog2.f32 %v8022_v33  ;;  %v894_v42 = vmax.f32 %v7974_v6, 0.001  ;;  %v895_v47 = vmax.f32 %v7979_v8, 0.001 }
 0x236   :  { %v8044_v21 = vmin.f32 %v10671_v17, 0.999  ;;  %v10674_v30 = vmax.f32 %v7286_v5, 0.001  ;;  %3624 = vadd.xlane.f32.xlu1 %v7844_v51  ;;  %v896_v1 = vmax.f32 %v7993_v53, 0.001  ;;  %v8090_v7 = vsub.f32 %v1430_v32, %v1462_v4 }
 0x237   :  { %4769 = vlog2.f32 %v8029_v62  ;;  %v10676_v60 = vmax.f32 %v7333_v50, 0.001  ;;  %v1464_v5 = vld [vmem:[%s10319_s6 + $0x20] sm:$0xff]  ;;  %10678 = vst [vmem:[#allocation64_spill] sm:$0xff] %v8075_v63  ;;  %v897_v51 = vmax.f32 %v8011_v28, 0.001  ;;  %1979 = vadd.xlane.f32.xlu0 %v7877_v2  ;;  %v8092_v0 = vsub.f32 %v1431_v10, %v1463_v24 }
 0x238   :  { %10672 = vst [vmem:[#allocation60_spill] sm:$0xff] %v8044_v21  ;;  %v8059_v17 = vmin.f32 %v10674_v30, 0.999  ;;  %4771 = vlog2.f32 %v8044_v21  ;;  %v898_v6 = vmax.f32 %v8016_v58, 0.001  ;;  %v10679_v8 = vld [vmem:[#allocation24_spill] sm:$0xff]  ;;  %v8103_v2 = vsub.f32 %v1432_v14, %v1464_v5 }
 0x239   :  { %v8066_v26 = vmin.f32 %v10676_v60, 0.999  ;;  %v10680_v50 = vmax.f32 %v10679_v8, 0.001  ;;  %v10682_v53 = vld [vmem:[#allocation26_spill] sm:$0xff]  ;;  %10685 = vst [vmem:[#allocation65_spill] sm:$0xff] %v8090_v7 }
 0x23a   :  { %10675 = vst [vmem:[#allocation62_spill] sm:$0xff] %v8059_v17  ;;  %4773 = vlog2.f32 %v8059_v17  ;;  %v10683_v30 = vmax.f32 %v10682_v53, 0.001  ;;  %10686 = vst [vmem:[#allocation66_spill] sm:$0xff] %v8092_v0  ;;  %v10687_v28 = vld [vmem:[#allocation44_spill] sm:$0xff]  ;;  %3672 = vadd.xlane.f32.xlu1 %v7871_v34 }
 0x23b   :  { %10677 = vst [vmem:[#allocation63_spill] sm:$0xff] %v8066_v26  ;;  %v8081_v60 = vmin.f32 %v10680_v50, 0.999  ;;  %4775 = vlog2.f32 %v8066_v26  ;;  %v10688_v58 = vmax.f32 %v10687_v28, 0.001  ;;  %v10690_v8 = vld [vmem:[#allocation28_spill] sm:$0xff]  ;;  %1982 = vadd.xlane.f32.xlu0 %v7888_v57 }
 0x23c   :  { %v8087_v37 = vmin.f32 %v10683_v30, 0.999  ;;  %v10691_v50 = vmax.f32 %v10690_v8, 0.001  ;;  %10693 = vst [vmem:[#allocation67_spill] sm:$0xff] %v8103_v2  ;;  %v8153_v57 = vld [vmem:[%s10317_s4 + $0x8] sm:$0xff] }
 0x23d   :  { %10681 = vst [vmem:[#allocation24_spill] sm:$0xff] %v8081_v60  ;;  %v8096_v63 = vmin.f32 %v10688_v58, 0.999  ;;  %4777 = vlog2.f32 %v8081_v60  ;;  %v10694_v53 = vmax.f32 %v7654_v22, 0.001  ;;  %10713 = vst [vmem:[#allocation78_spill] sm:$0xff] %v8153_v57 }
 0x23e   :  { %10684 = vst [vmem:[#allocation26_spill] sm:$0xff] %v8087_v37  ;;  %v8100_v18 = vmin.f32 %v10691_v50, 0.999  ;;  %v10696_v24 = vmax.f32 %v7665_v36, 0.001  ;;  %4779 = vlog2.f32 %v8087_v37  ;;  %3528 = vadd.xlane.f32.xlu1 %v7890_v46  ;;  %v8208_v46 = vld [vmem:[%s10317_s4 + $0x38] sm:$0xff] }
 0x23f   :  { %10689 = vst [vmem:[#allocation44_spill] sm:$0xff] %v8096_v63  ;;  %v8108_v32 = vmin.f32 %v10694_v53, 0.999  ;;  %v10698_v4 = vmax.f32 %v7678_v43, 0.001  ;;  %4781 = vlog2.f32 %v8096_v63  ;;  %10725 = vst [vmem:[#allocation85_spill] sm:$0xff] %v8208_v46  ;;  %1985 = vadd.xlane.f32.xlu0 %v7893_v19 }
 0x240   :  { %10692 = vst [vmem:[#allocation28_spill] sm:$0xff] %v8100_v18  ;;  %v8112_v10 = vmin.f32 %v10696_v24, 0.999  ;;  %v10700_v28 = vmax.f32 %v7688_v20, 0.001  ;;  %4783 = vlog2.f32 %v8100_v18  ;;  %v8241_v19 = vld [vmem:[%s10317_s4 + $0x50] sm:$0xff] }
 0x241   :  { %10695 = vst [vmem:[#allocation68_spill] sm:$0xff] %v8108_v32  ;;  %v8116_v30 = vmin.f32 %v10698_v4, 0.999  ;;  %v10702_v34 = vmax.f32 %v7693_v38, 0.001  ;;  %4785 = vlog2.f32 %v8108_v32  ;;  %10734 = vst [vmem:[#allocation94_spill] sm:$0xff] %v8241_v19 }
 0x242   :  { %10697 = vst [vmem:[#allocation69_spill] sm:$0xff] %v8112_v10  ;;  %v8121_v14 = vmin.f32 %v10700_v28, 0.999  ;;  %v10704_v22 = vmax.f32 %v7698_v29, 0.001  ;;  %v8148_v29 = vld [vmem:[%s10317_s4] sm:$0xff]  ;;  %4787 = vlog2.f32 %v8112_v10  ;;  %3627 = vadd.xlane.f32.xlu1 %v7897_v59 }
 0x243   :  { %10699 = vst [vmem:[#allocation70_spill] sm:$0xff] %v8116_v30  ;;  %v8125_v5 = vmin.f32 %v10702_v34, 0.999  ;;  %v10706_v36 = vmax.f32 %v7721_v45, 0.001  ;;  %10712 = vst [vmem:[#allocation77_spill] sm:$0xff] %v8148_v29  ;;  %4789 = vlog2.f32 %v8116_v30  ;;  %1991 = vadd.xlane.f32.xlu0 %v7917_v12 }
 0x244   :  { %10701 = vst [vmem:[#allocation71_spill] sm:$0xff] %v8121_v14  ;;  %v8129_v58 = vmin.f32 %v10704_v22, 0.999  ;;  %v10708_v20 = vmax.f32 %v7737_v48, 0.001  ;;  %v8158_v45 = vld [vmem:[%s10317_s4 + $0x10] sm:$0xff]  ;;  %4791 = vlog2.f32 %v8121_v14 }
 0x245   :  { %10703 = vst [vmem:[#allocation72_spill] sm:$0xff] %v8125_v5  ;;  %v8135_v43 = vmin.f32 %v10706_v36, 0.999  ;;  %v10710_v38 = vmax.f32 %v7883_v44, 0.001  ;;  %10714 = vst [vmem:[#allocation79_spill] sm:$0xff] %v8158_v45  ;;  %4793 = vlog2.f32 %v8125_v5 }
 0x246   :  { %10705 = vst [vmem:[#allocation73_spill] sm:$0xff] %v8129_v58  ;;  %v8139_v8 = vmin.f32 %v10708_v20, 0.999  ;;  %v10715_v48 = vmax.f32 %v7902_v3, 0.001  ;;  %v8174_v28 = vld [vmem:[%s10317_s4 + $0x18] sm:$0xff]  ;;  %v3640_v59 = vpop.xlane.xlu0 %3639  ;;  %3531 = vadd.xlane.f32.xlu1 %v7919_v25 }
 0x247   :  { %10707 = vst [vmem:[#allocation74_spill] sm:$0xff] %v8135_v43  ;;  %v8143_v50 = vmin.f32 %v10710_v38, 0.999  ;;  %v10717_v53 = vmax.f32 %v7907_v16, 0.001  ;;  %v8179_v34 = vld [vmem:[%s10317_s4 + $0x20] sm:$0xff]  ;;  %1997 = vadd.xlane.f32.xlu0 %v7922_v27 }
 0x248   :  { %10709 = vst [vmem:[#allocation75_spill] sm:$0xff] %v8139_v8  ;;  %v8163_v44 = vmin.f32 %v10715_v48, 0.999  ;;  %v8169_v4 = vmin.f32 %v889_v31, 0.999  ;;  %10720 = vst [vmem:[#allocation83_spill] sm:$0xff] %v8179_v34 }
 0x249   :  { %10711 = vst [vmem:[#allocation76_spill] sm:$0xff] %v8143_v50  ;;  %v8167_v24 = vmin.f32 %v10717_v53, 0.999  ;;  %v8184_v3 = vld [vmem:[%s10317_s4 + $0x28] sm:$0xff]  ;;  %v10722_v16 = vmax.f32 %v7930_v13, 0.001 }
 0x24a   :  { %10716 = vst [vmem:[#allocation80_spill] sm:$0xff] %v8163_v44  ;;  %10719 = vst [vmem:[#allocation82_spill] sm:$0xff] %v8169_v4  ;;  %v10723_v22 = vmax.f32 %v7935_v23, 0.001  ;;  %v10724_v20 = vmax.f32 %v7940_v61, 0.001  ;;  %v4764_v23 = vpop.eup %4763  ;;  %4795 = vlog2.f32 %v8129_v58 }
 0x24b   :  { %10718 = vst [vmem:[#allocation81_spill] sm:$0xff] %v8167_v24  ;;  %10721 = vst [vmem:[#allocation84_spill] sm:$0xff] %v8184_v3  ;;  %v8190_v31 = vmin.f32 %v10722_v16, 0.999  ;;  %v8203_v48 = vld [vmem:[%s10317_s4 + $0x30] sm:$0xff]  ;;  %v8213_v13 = vld [vmem:[%s10317_s4 + $0x40] sm:$0xff]  ;;  %2003 = vadd.xlane.f32.xlu0 %v7925_v55 }
 0x24c   :  { %v8194_v36 = vmin.f32 %v10723_v22, 0.999  ;;  %v8198_v38 = vmin.f32 %v10724_v20, 0.999  ;;  %10726 = vst [vmem:[#allocation86_spill] sm:$0xff] %v8213_v13  ;;  %v4766_v22 = vpop.eup %4765  ;;  %v8256_v14 = vld [vmem:[%s10317_s4 + $0x60] sm:$0xff]  ;;  %4797 = vlog2.f32 %v8135_v43 }
 0x24d   :  { %v8216_v61 = vmin.f32 %v893_v54, 0.999  ;;  %v8218_v53 = vmin.f32 %v894_v42, 0.999  ;;  %v8220_v16 = vmin.f32 %v895_v47, 0.999  ;;  %v4768_v7 = vpop.eup %4767  ;;  %v8231_v54 = vpop.xlane.xlu1 %1955  ;;  %4799 = vlog2.f32 %v8139_v8 }
 0x24e   :  { %v8224_v20 = vmin.f32 %v896_v1, 0.999  ;;  %v8226_v2 = vmin.f32 %v897_v51, 0.999  ;;  %v8228_v0 = vmin.f32 %v898_v6, 0.999 }
 0x24f   :  { %10727 = vst [vmem:[#allocation87_spill] sm:$0xff] %v8218_v53  ;;  %10728 = vst [vmem:[#allocation88_spill] sm:$0xff] %v8220_v16  ;;  %v8236_v42 = vld [vmem:[%s10317_s4 + $0x48] sm:$0xff]  ;;  %v8246_v1 = vld [vmem:[%s10317_s4 + $0x58] sm:$0xff]  ;;  %v964_v8 = vmul.f32 0.6931472, %v4764_v23  ;;  %2009 = vadd.xlane.f32.xlu0 %v7943_v15 }
 0x250   :  { %10729 = vst [vmem:[#allocation89_spill] sm:$0xff] %v8224_v20  ;;  %10730 = vst [vmem:[#allocation90_spill] sm:$0xff] %v8226_v2  ;;  %v8270_v30 = vld [vmem:[%s10317_s4 + $0x70] sm:$0xff]  ;;  %v8275_v10 = vld [vmem:[%s10317_s4 + $0x78] sm:$0xff]  ;;  %v966_v6 = vmul.f32 0.6931472, %v4766_v22 }
 0x251   :  { %10731 = vst [vmem:[#allocation91_spill] sm:$0xff] %v8228_v0  ;;  %10732 = vst [vmem:[#allocation92_spill] sm:$0xff] %v8231_v54  ;;  %v4770_v54 = vpop.eup %4769  ;;  %v8285_v32 = vld [vmem:[%s10317_s4 + $0x80] sm:$0xff]  ;;  %v8290_v18 = vld [vmem:[%s10317_s4 + $0x88] sm:$0xff]  ;;  %v3592_v12 = vpop.xlane.xlu1 %3591  ;;  %4801 = vrcp.f32 %v3640_v59  ;;  %v968_v47 = vmul.f32 0.6931472, %v4768_v7  ;;  %v8335_v17 = vmul.f32 %v964_v8, %v8148_v29 }
 0x252   :  { %10733 = vst [vmem:[#allocation93_spill] sm:$0xff] %v8236_v42  ;;  %10735 = vst [vmem:[#allocation95_spill] sm:$0xff] %v8246_v1  ;;  %v4772_v5 = vpop.eup %4771  ;;  %v8299_v63 = vld [vmem:[%s10317_s4 + $0x90] sm:$0xff]  ;;  %v8304_v37 = vld [vmem:[%s10317_s4 + $0x98] sm:$0xff]  ;;  %4803 = vlog2.f32 %v8143_v50  ;;  %v970_v50 = vmul.f32 0.6931472, %v4770_v54 }
 0x253   :  { %10736 = vst [vmem:[#allocation96_spill] sm:$0xff] %v8256_v14  ;;  %10738 = vst [vmem:[#allocation98_spill] sm:$0xff] %v8270_v30  ;;  %v4774_v58 = vpop.eup %4773  ;;  %v8312_v59 = vld [vmem:[%s10317_s4 + $0xa0] sm:$0xff]  ;;  %v8320_v51 = vld [vmem:[%s10317_s4 + $0xa8] sm:$0xff]  ;;  %4805 = vlog2.f32 %v8163_v44  ;;  %v972_v25 = vmul.f32 0.6931472, %v4772_v5  ;;  %v8351_v5 = vmul.f32 %v966_v6, %v8153_v57  ;;  %2015 = vadd.xlane.f32.xlu0 %v7950_v52 }
 0x254   :  { %10739 = vst [vmem:[#allocation99_spill] sm:$0xff] %v8275_v10  ;;  %10740 = vst [vmem:[#allocation100_spill] sm:$0xff] %v8285_v32  ;;  %v4776_v43 = vpop.eup %4775  ;;  %4807 = vlog2.f32 %v8167_v24  ;;  %v8332_v7 = vld [vmem:[%s10317_s4 + $0xb0] sm:$0xff]  ;;  %v8342_v26 = vld [vmem:[%s10317_s4 + $0xb8] sm:$0xff]  ;;  %v974_v56 = vmul.f32 0.6931472, %v4774_v58  ;;  %v8363_v58 = vmul.f32 %v968_v47, %v8158_v45 }
 0x255   :  { %10741 = vst [vmem:[#allocation101_spill] sm:$0xff] %v8290_v18  ;;  %10742 = vst [vmem:[#allocation102_spill] sm:$0xff] %v8299_v63  ;;  %v4778_v60 = vpop.eup %4777  ;;  %4809 = vrcp.f32 %v3592_v12  ;;  %v10748_v44 = vld [vmem:[#allocation10_spill] sm:$0xff]  ;;  %v8347_v12 = vld [vmem:[%s10317_s4 + $0xc0] sm:$0xff]  ;;  %v976_v29 = vmul.f32 0.6931472, %v4776_v43 }
 0x256   :  { %10743 = vst [vmem:[#allocation103_spill] sm:$0xff] %v8304_v37  ;;  %10744 = vst [vmem:[#allocation104_spill] sm:$0xff] %v8312_v59  ;;  %v4780_v23 = vpop.eup %4779  ;;  %3534 = vadd.xlane.f32.xlu1 %v10748_v44  ;;  %4811 = vlog2.f32 %v8169_v4  ;;  %v8354_v44 = vpop.xlane.xlu1 %3495  ;;  %v978_v24 = vmul.f32 0.6931472, %v4778_v60  ;;  %v8369_v6 = vld [vmem:[%s10317_s4 + $0xd0] sm:$0xff]  ;;  %v8379_v47 = vld [vmem:[%s10317_s4 + $0xd8] sm:$0xff] }
 0x257   :  { %10745 = vst [vmem:[#allocation105_spill] sm:$0xff] %v8320_v51  ;;  %v4782_v22 = vpop.eup %4781  ;;  %10746 = vst [vmem:[#allocation106_spill] sm:$0xff] %v8332_v7  ;;  %4813 = vlog2.f32 %v8190_v31  ;;  %v980_v8 = vmul.f32 0.6931472, %v4780_v23  ;;  %v8400_v23 = vld [vmem:[%s10317_s4 + $0xe8] sm:$0xff]  ;;  %2021 = vadd.xlane.f32.xlu0 %v7966_v39 }
 0x258   :  { %v4784_v21 = vpop.eup %4783  ;;  %10747 = vst [vmem:[#allocation107_spill] sm:$0xff] %v8335_v17  ;;  %10749 = vst [vmem:[#allocation10_spill] sm:$0xff] %v8342_v26  ;;  %v8359_v17 = vld [vmem:[%s10317_s4 + $0xc8] sm:$0xff]  ;;  %4815 = vlog2.f32 %v8194_v36  ;;  %v982_v55 = vmul.f32 0.6931472, %v4782_v22  ;;  %v8394_v22 = vmul.f32 %v974_v56, %v8184_v3  ;;  %v8430_v3 = vld [vmem:[%s10317_s4 + $0xf8] sm:$0xff] }
 0x259   :  { %v4786_v54 = vpop.eup %4785  ;;  %10750 = vst [vmem:[#allocation108_spill] sm:$0xff] %v8347_v12  ;;  %10751 = vst [vmem:[#allocation109_spill] sm:$0xff] %v8351_v5  ;;  %v8373_v5 = vmul.f32 %v970_v50, %v8174_v28  ;;  %v8390_v50 = vld [vmem:[%s10317_s4 + $0xe0] sm:$0xff]  ;;  %v984_v60 = vmul.f32 0.6931472, %v4784_v21  ;;  %4817 = vlog2.f32 %v8198_v38  ;;  %v8407_v21 = vmul.f32 %v978_v24, %v8208_v46 }
 0x25a   :  { %v4788_v27 = vpop.eup %4787  ;;  %10752 = vst [vmem:[#allocation110_spill] sm:$0xff] %v8359_v17  ;;  %10753 = vst [vmem:[#allocation111_spill] sm:$0xff] %v8363_v58  ;;  %v8382_v58 = vmul.f32 %v972_v25, %v8179_v34  ;;  %3537 = vadd.xlane.f32.xlu1 %v7579_v35  ;;  %v3595_v45 = vpop.xlane.xlu1 %3594  ;;  %4819 = vlog2.f32 %v8216_v61  ;;  %v8404_v35 = vmul.f32 %v976_v29, %v8203_v48  ;;  %v986_v25 = vmul.f32 0.6931472, %v4786_v54  ;;  %v8419_v29 = vld [vmem:[%s10317_s4 + $0xf0] sm:$0xff]  ;;  %v1484_v46 = vld [vmem:[%s10319_s6 + $0xc0] sm:$0xff] }
 0x25b   :  { %v4790_v4 = vpop.eup %4789  ;;  %10754 = vst [vmem:[#allocation112_spill] sm:$0xff] %v8369_v6  ;;  %10755 = vst [vmem:[#allocation113_spill] sm:$0xff] %v8373_v5  ;;  %4821 = vlog2.f32 %v8218_v53  ;;  %v8413_v5 = vmul.f32 %v980_v8, %v8213_v13  ;;  %v988_v24 = vmul.f32 0.6931472, %v4788_v27  ;;  %v8423_v56 = vmul.f32 %v982_v55, %v8236_v42  ;;  %v3544_v8 = vpop.xlane.xlu0 %3543  ;;  %v1453_v13 = vld [vmem:[%s10318_s5 + $0xc8] sm:$0xff] }
 0x25c   :  { %v4792_v43 = vpop.eup %4791  ;;  %10756 = vst [vmem:[#allocation114_spill] sm:$0xff] %v8379_v47  ;;  %10757 = vst [vmem:[#allocation115_spill] sm:$0xff] %v8382_v58  ;;  %4823 = vlog2.f32 %v8220_v16  ;;  %v8433_v27 = vmul.f32 %v984_v60, %v8241_v19  ;;  %v1450_v19 = vld [vmem:[%s10318_s5 + $0xb0] sm:$0xff]  ;;  %v1452_v16 = vld [vmem:[%s10318_s5 + $0xc0] sm:$0xff] }
 0x25d   :  { %v4794_v57 = vpop.eup %4793  ;;  %10758 = vst [vmem:[#allocation116_spill] sm:$0xff] %v8390_v50  ;;  %10759 = vst [vmem:[#allocation117_spill] sm:$0xff] %v8394_v22  ;;  %4825 = vrcp.f32 %v3595_v45  ;;  %v992_v15 = vmul.f32 0.6931472, %v4792_v43  ;;  %v1091_v43 = vsub.f32 1.0, %v7984_v9  ;;  %v10791_v9 = vld [vmem:[#allocation33_spill] sm:$0xff] }
 0x25e   :  { %v4796_v58 = vpop.eup %4795  ;;  %10760 = vst [vmem:[#allocation118_spill] sm:$0xff] %v8400_v23  ;;  %10761 = vst [vmem:[#allocation119_spill] sm:$0xff] %v8404_v35  ;;  %3678 = vadd.xlane.f32.xlu1 %v7947_v40  ;;  %v994_v35 = vmul.f32 0.6931472, %v4794_v57  ;;  %4827 = vlog2.f32 %v8224_v20  ;;  %v1451_v20 = vld [vmem:[%s10318_s5 + $0xb8] sm:$0xff] }
 0x25f   :  { %10762 = vst [vmem:[#allocation120_spill] sm:$0xff] %v8407_v21  ;;  %v4798_v22 = vpop.eup %4797  ;;  %10763 = vst [vmem:[#allocation121_spill] sm:$0xff] %v8413_v5  ;;  %v990_v5 = vmul.f32 0.6931472, %v4790_v4  ;;  %v996_v45 = vmul.f32 0.6931472, %v4796_v58  ;;  %4829 = vlog2.f32 %v8226_v2  ;;  %v8442_v4 = vmul.f32 %v986_v25, %v8246_v1 }
 0x260   :  { %v4800_v34 = vpop.eup %4799  ;;  %10764 = vst [vmem:[#allocation122_spill] sm:$0xff] %v8419_v29  ;;  %10765 = vst [vmem:[#allocation123_spill] sm:$0xff] %v8423_v56  ;;  %v998_v21 = vmul.f32 0.6931472, %v4798_v22  ;;  %4831 = vlog2.f32 %v8228_v0  ;;  %v8460_v57 = vmul.f32 %v994_v35, %v8275_v10  ;;  %v10775_v25 = vld [vmem:[#allocation60_spill] sm:$0xff]  ;;  %v1449_v0 = vld [vmem:[%s10318_s5 + $0xa8] sm:$0xff] }
 0x261   :  { %v4802_v54 = vpop.eup %4801  ;;  %10766 = vst [vmem:[#allocation124_spill] sm:$0xff] %v8430_v3  ;;  %10767 = vst [vmem:[#allocation125_spill] sm:$0xff] %v8433_v27  ;;  %v1000_v52 = vmul.f32 0.6931472, %v4800_v34  ;;  %v8453_v58 = vmul.f32 %v990_v5, %v8261_v49  ;;  %v8465_v34 = vmul.f32 %v996_v45, %v8285_v32  ;;  %v10780_v45 = vld [vmem:[#allocation63_spill] sm:$0xff]  ;;  %v10781_v5 = vld [vmem:[#allocation24_spill] sm:$0xff]  ;;  %v3643_v32 = vpop.xlane.xlu0 %3642 }
 0x262   :  { %v4804_v55 = vpop.eup %4803  ;;  %v8436_v56 = vmul.f32 %v4802_v54, %v3544_v8  ;;  %10769 = vst [vmem:[#allocation127_spill] sm:$0xff] %v8442_v4  ;;  %v8446_v54 = vmul.f32 %v988_v24, %v8256_v14  ;;  %3564 = vadd.xlane.f32.xlu1 %v7649_v41  ;;  %v8457_v24 = vmul.f32 %v992_v15, %v8270_v30  ;;  %10773 = vst [vmem:[#allocation131_spill] sm:$0xff] %v8460_v57  ;;  %v10777_v57 = vld [vmem:[#allocation62_spill] sm:$0xff]  ;;  %v10800_v14 = vld [vmem:[#allocation76_spill] sm:$0xff] }
 0x263   :  { %v4806_v40 = vpop.eup %4805  ;;  %10771 = vst [vmem:[#allocation129_spill] sm:$0xff] %v8453_v58  ;;  %v1002_v22 = vmul.f32 0.6931472, %v4804_v55  ;;  %10774 = vst [vmem:[#allocation132_spill] sm:$0xff] %v8465_v34  ;;  %v8471_v35 = vmul.f32 %v998_v21, %v8290_v18  ;;  %v10783_v21 = vld [vmem:[#allocation26_spill] sm:$0xff]  ;;  %v10787_v34 = vld [vmem:[#allocation68_spill] sm:$0xff]  ;;  %4833 = vrcp.f32 %v3643_v32 }
 0x264   :  { %10768 = vst [vmem:[#allocation126_spill] sm:$0xff] %v8436_v56  ;;  %v4808_v27 = vpop.eup %4807  ;;  %10770 = vst [vmem:[#allocation128_spill] sm:$0xff] %v8446_v54  ;;  %v1004_v41 = vmul.f32 0.6931472, %v4806_v40  ;;  %v10778_v54 = vld [vmem:[#allocation57_spill] sm:$0xff]  ;;  %v8476_v40 = vmul.f32 %v1000_v52, %v8299_v63  ;;  %v10786_v52 = vld [vmem:[#allocation28_spill] sm:$0xff]  ;;  %4835 = vlog2.f32 %v1091_v43  ;;  %v3499_v63 = vpop.xlane.xlu1 %3498 }
 0x265   :  { %v4810_v8 = vpop.eup %4809  ;;  %10772 = vst [vmem:[#allocation130_spill] sm:$0xff] %v8457_v24  ;;  %v1006_v24 = vmul.f32 0.6931472, %v4808_v27  ;;  %10776 = vst [vmem:[#allocation60_spill] sm:$0xff] %v8471_v35  ;;  %v1448_v1 = vld [vmem:[%s10318_s5 + $0xa0] sm:$0xff]  ;;  %v10832_v42 = vsub.f32 1.0, %v10786_v52 }
 0x266   :  { %v4812_v60 = vpop.eup %4811  ;;  %v3687_v15 = vmul.f32 %v4810_v8, %v8354_v44  ;;  %1961 = vadd.xlane.f32.xlu1 %v10778_v54  ;;  %10779 = vst [vmem:[#allocation62_spill] sm:$0xff] %v8476_v40  ;;  %v8481_v44 = vmul.f32 %v1002_v22, %v8304_v37  ;;  %v10784_v8 = vld [vmem:[#allocation44_spill] sm:$0xff]  ;;  %v10789_v22 = vld [vmem:[#allocation69_spill] sm:$0xff]  ;;  %v10790_v37 = vld [vmem:[#allocation70_spill] sm:$0xff] }
 0x267   :  { %v4814_v56 = vpop.eup %4813  ;;  %v1008_v39 = vmul.f32 0.6931472, %v4812_v60  ;;  %v8486_v60 = vmul.f32 %v1004_v41, %v8312_v59  ;;  %v10794_v59 = vld [vmem:[#allocation72_spill] sm:$0xff]  ;;  %v10828_v2 = vsub.f32 1.0, %v10784_v8 }
 0x268   :  { %v4816_v55 = vpop.eup %4815  ;;  %v1010_v10 = vmul.f32 0.6931472, %v4814_v56  ;;  %10782 = vst [vmem:[#allocation57_spill] sm:$0xff] %v8481_v44  ;;  %v3750_v18 = vadd.f32 1e-07, %v3687_v15  ;;  %v8491_v56 = vmul.f32 %v1006_v24, %v8320_v51  ;;  %v10796_v44 = vld [vmem:[#allocation73_spill] sm:$0xff] }
 0x269   :  { %v4818_v58 = vpop.eup %4817  ;;  %v1012_v54 = vmul.f32 0.6931472, %v4816_v55  ;;  %10785 = vst [vmem:[#allocation63_spill] sm:$0xff] %v8486_v60  ;;  %v8497_v41 = vmul.f32 %v1008_v39, %v8332_v7  ;;  %v10793_v60 = vld [vmem:[#allocation71_spill] sm:$0xff]  ;;  %v3646_v7 = vpop.xlane.xlu0 %3645 }
 0x26a   :  { %v4820_v35 = vpop.eup %4819  ;;  %10788 = vst [vmem:[#allocation24_spill] sm:$0xff] %v8491_v56  ;;  %3540 = vadd.xlane.f32.xlu1 %v10791_v9  ;;  %v1014_v55 = vmul.f32 0.6931472, %v4818_v58  ;;  %v8502_v24 = vmul.f32 %v1010_v10, %v8342_v26  ;;  %v10798_v58 = vld [vmem:[#allocation74_spill] sm:$0xff]  ;;  %v10799_v39 = vld [vmem:[#allocation75_spill] sm:$0xff]  ;;  %4837 = vlog2.f32 %v3750_v18  ;;  %v10804_v9 = vsub.f32 1.0, %v7999_v11 }
 0x26b   :  { %v4822_v4 = vpop.eup %4821  ;;  %10792 = vst [vmem:[#allocation26_spill] sm:$0xff] %v8497_v41  ;;  %v1016_v15 = vmul.f32 0.6931472, %v4820_v35  ;;  %v8506_v51 = vmul.f32 %v1012_v54, %v8347_v12  ;;  %v10803_v54 = vld [vmem:[#allocation80_spill] sm:$0xff]  ;;  %v10807_v10 = vsub.f32 1.0, %v8022_v33  ;;  %v10811_v33 = vsub.f32 1.0, %v8029_v62 }
 0x26c   :  { %v4824_v30 = vpop.eup %4823  ;;  %10795 = vst [vmem:[#allocation44_spill] sm:$0xff] %v8502_v24  ;;  %v1018_v32 = vmul.f32 0.6931472, %v4822_v4  ;;  %v10801_v24 = vld [vmem:[#allocation58_spill] sm:$0xff]  ;;  %v8513_v26 = vmul.f32 %v1014_v55, %v8359_v17  ;;  %4839 = vlog2.f32 %v10804_v9  ;;  %v10806_v4 = vld [vmem:[#allocation81_spill] sm:$0xff]  ;;  %v3421_v11 = vld [vmem:[%s10325_s12 + $0x1b8] sm:$0xff] }
 0x26d   :  { %v4826_v49 = vpop.eup %4825  ;;  %10797 = vst [vmem:[#allocation28_spill] sm:$0xff] %v8506_v51  ;;  %v1020_v35 = vmul.f32 0.6931472, %v4824_v30  ;;  %v8519_v18 = vmul.f32 %v1016_v15, %v8369_v6  ;;  %4841 = vlog2.f32 %v10807_v10  ;;  %v10813_v55 = vsub.f32 1.0, %v10775_v25  ;;  %v3420_v62 = vld [vmem:[%s10325_s12 + $0x1b0] sm:$0xff]  ;;  %v1467_v25 = vld [vmem:[%s10319_s6 + $0x38] sm:$0xff] }
 0x26e   :  { %v4828_v27 = vpop.eup %4827  ;;  %3684 = vadd.xlane.f32.xlu1 %v10801_v24  ;;  %v3689_v56 = vmul.f32 %v4826_v49, %v3499_v63  ;;  %10802 = vst [vmem:[#allocation68_spill] sm:$0xff] %v8513_v26  ;;  %4843 = vrcp.f32 %v3646_v7  ;;  %v10808_v63 = vld [vmem:[#allocation82_spill] sm:$0xff]  ;;  %v10812_v24 = vld [vmem:[#allocation51_spill] sm:$0xff]  ;;  %v10816_v9 = vsub.f32 1.0, %v10777_v57  ;;  %v10817_v30 = vld [vmem:[#allocation9_spill] sm:$0xff] }
 0x26f   :  { %v4830_v40 = vpop.eup %4829  ;;  %v1022_v41 = vmul.f32 0.6931472, %v4828_v27  ;;  %10805 = vst [vmem:[#allocation69_spill] sm:$0xff] %v8519_v18  ;;  %v8530_v27 = vmul.f32 %v1018_v32, %v8379_v47  ;;  %v8533_v15 = vmul.f32 %v1020_v35, %v8390_v50  ;;  %4845 = vlog2.f32 %v10811_v33  ;;  %v1433_v7 = vld [vmem:[%s10318_s5 + $0x28] sm:$0xff]  ;;  %v1434_v33 = vld [vmem:[%s10318_s5 + $0x30] sm:$0xff]  ;;  %v1468_v35 = vld [vmem:[%s10319_s6 + $0x40] sm:$0xff] }
 0x270   :  { %v4832_v43 = vpop.eup %4831  ;;  %v1024_v49 = vmul.f32 0.6931472, %v4830_v40  ;;  %v1465_v40 = vld [vmem:[%s10319_s6 + $0x28] sm:$0xff]  ;;  %v3751_v10 = vadd.f32 1e-07, %v3689_v56  ;;  %4847 = vlog2.f32 %v10813_v55  ;;  %v1435_v56 = vld [vmem:[%s10318_s5 + $0x38] sm:$0xff]  ;;  %v8563_v55 = vpop.xlane.xlu1 %3546  ;;  %v3485_v51 = vmul.f32 %v10817_v30, %v3421_v11 }
 0x271   :  { %10809 = vst [vmem:[#allocation70_spill] sm:$0xff] %v8530_v27  ;;  %10810 = vst [vmem:[#allocation33_spill] sm:$0xff] %v8533_v15  ;;  %v1026_v32 = vmul.f32 0.6931472, %v4832_v43  ;;  %v1466_v43 = vld [vmem:[%s10319_s6 + $0x30] sm:$0xff]  ;;  %4849 = vlog2.f32 %v10816_v9  ;;  %v1436_v15 = vld [vmem:[%s10318_s5 + $0x40] sm:$0xff] }
 0x272   :  { %3570 = vadd.xlane.f32.xlu1 %v10812_v24  ;;  %10814 = vst [vmem:[#allocation71_spill] sm:$0xff] %v8563_v55  ;;  %v8566_v24 = vmul.f32 %v1022_v41, %v8400_v23  ;;  %v1437_v27 = vld [vmem:[%s10318_s5 + $0x48] sm:$0xff]  ;;  %v1438_v41 = vld [vmem:[%s10318_s5 + $0x50] sm:$0xff]  ;;  %v8591_v11 = vmul.f32 %v1024_v49, %v8419_v29  ;;  %v1439_v23 = vld [vmem:[%s10318_s5 + $0x58] sm:$0xff]  ;;  %v8655_v55 = vsub.f32 %v1433_v7, %v1465_v40 }
 0x273   :  { %v1469_v57 = vld [vmem:[%s10319_s6 + $0x48] sm:$0xff]  ;;  %v1470_v30 = vld [vmem:[%s10319_s6 + $0x50] sm:$0xff]  ;;  %v1440_v50 = vld [vmem:[%s10318_s5 + $0x60] sm:$0xff]  ;;  %v8679_v40 = vsub.f32 %v1435_v56, %v1467_v25  ;;  %v8700_v8 = vsub.f32 %v1436_v15, %v1468_v35 }
 0x274   :  { %10815 = vst [vmem:[#allocation72_spill] sm:$0xff] %v8566_v24  ;;  %10818 = vst [vmem:[#allocation73_spill] sm:$0xff] %v8591_v11  ;;  %v10819_v24 = vsub.f32 1.0, %v10780_v45  ;;  %v1441_v49 = vld [vmem:[%s10318_s5 + $0x68] sm:$0xff]  ;;  %v1471_v9 = vld [vmem:[%s10319_s6 + $0x58] sm:$0xff]  ;;  %v8704_v25 = vsub.f32 %v1438_v41, %v1470_v30  ;;  %v3598_v53 = vpop.xlane.xlu1 %3597 }
 0x275   :  { %v10821_v11 = vld [vmem:[#allocation42_spill] sm:$0xff]  ;;  %v1443_v47 = vld [vmem:[%s10318_s5 + $0x78] sm:$0xff]  ;;  %v1444_v26 = vld [vmem:[%s10318_s5 + $0x80] sm:$0xff]  ;;  %10826 = vst [vmem:[#allocation76_spill] sm:$0xff] %v8679_v40  ;;  %v8717_v15 = vsub.f32 %v1439_v23, %v1471_v9 }
 0x276   :  { %4851 = vlog2.f32 %v10819_v24  ;;  %v10820_v24 = vsub.f32 1.0, %v10781_v5  ;;  %v3484_v29 = vmul.f32 %v10821_v11, %v3420_v62  ;;  %v1442_v18 = vld [vmem:[%s10318_s5 + $0x70] sm:$0xff]  ;;  %v1472_v45 = vld [vmem:[%s10319_s6 + $0x60] sm:$0xff]  ;;  %v1473_v5 = vld [vmem:[%s10319_s6 + $0x68] sm:$0xff]  ;;  %10829 = vst [vmem:[#allocation80_spill] sm:$0xff] %v8700_v8 }
 0x277   :  { %v1474_v62 = vld [vmem:[%s10319_s6 + $0x70] sm:$0xff]  ;;  %v10822_v11 = vld [vmem:[#allocation52_spill] sm:$0xff]  ;;  %v1445_v6 = vld [vmem:[%s10318_s5 + $0x88] sm:$0xff]  ;;  %10831 = vst [vmem:[#allocation82_spill] sm:$0xff] %v8704_v25  ;;  %v8719_v35 = vsub.f32 %v1440_v50, %v1472_v45  ;;  %v8721_v41 = vsub.f32 %v1441_v49, %v1473_v5 }
 0x278   :  { %4853 = vlog2.f32 %v10820_v24  ;;  %3573 = vadd.xlane.f32.xlu1 %v10822_v11  ;;  %v8634_v24 = vmul.f32 %v1026_v32, %v8430_v3  ;;  %v1446_v17 = vld [vmem:[%s10318_s5 + $0x90] sm:$0xff]  ;;  %v1447_v12 = vld [vmem:[%s10318_s5 + $0x98] sm:$0xff]  ;;  %v1476_v32 = vld [vmem:[%s10319_s6 + $0x80] sm:$0xff]  ;;  %v3575_v3 = vadd.f32 %v3485_v51, %v3484_v29  ;;  %10833 = vst [vmem:[#allocation51_spill] sm:$0xff] %v8717_v15  ;;  %v8734_v50 = vsub.f32 %v1442_v18, %v1474_v62 }
 0x279   :  { %4855 = vlog2.f32 %v3751_v10  ;;  %v1475_v10 = vld [vmem:[%s10319_s6 + $0x78] sm:$0xff]  ;;  %v1477_v11 = vld [vmem:[%s10319_s6 + $0x88] sm:$0xff]  ;;  %v1478_v7 = vld [vmem:[%s10319_s6 + $0x90] sm:$0xff]  ;;  %v8738_v49 = vsub.f32 %v1444_v26, %v1476_v32 }
 0x27a   :  { %10823 = vst [vmem:[#allocation74_spill] sm:$0xff] %v8634_v24  ;;  %v10824_v24 = vsub.f32 1.0, %v10783_v21  ;;  %v1479_v51 = vld [vmem:[%s10319_s6 + $0x98] sm:$0xff]  ;;  %v1480_v29 = vld [vmem:[%s10319_s6 + $0xa0] sm:$0xff]  ;;  %v8677_v21 = vsub.f32 %v1434_v33, %v1466_v43  ;;  %v1481_v33 = vld [vmem:[%s10319_s6 + $0xa8] sm:$0xff]  ;;  %v8702_v43 = vsub.f32 %v1437_v27, %v1469_v57  ;;  %v8736_v9 = vsub.f32 %v1443_v47, %v1475_v10 }
 0x27b   :  { %v1482_v56 = vld [vmem:[%s10319_s6 + $0xb0] sm:$0xff]  ;;  %v1485_v27 = vld [vmem:[%s10319_s6 + $0xc8] sm:$0xff]  ;;  %v1455_v30 = vld [vmem:[%s10318_s5 + $0xd8] sm:$0xff]  ;;  %v8751_v47 = vsub.f32 %v1445_v6, %v1477_v11  ;;  %v8753_v26 = vsub.f32 %v1446_v17, %v1478_v7  ;;  %v8755_v62 = vsub.f32 %v1447_v12, %v1479_v51  ;;  %v10843_v12 = vsub.f32 1.0, %v10790_v37 }
 0x27c   :  { %4857 = vlog2.f32 %v10824_v24  ;;  %10825 = vst [vmem:[#allocation75_spill] sm:$0xff] %v8677_v21  ;;  %v8681_v24 = vpop.eup %4833  ;;  %10830 = vst [vmem:[#allocation81_spill] sm:$0xff] %v8702_v43  ;;  %3576 = vadd.xlane.f32.xlu1 %v3575_v3  ;;  %v1454_v57 = vld [vmem:[%s10318_s5 + $0xd0] sm:$0xff]  ;;  %v10835_v3 = vsub.f32 1.0, %v10789_v22  ;;  %v1456_v45 = vld [vmem:[%s10318_s5 + $0xe0] sm:$0xff]  ;;  %v8767_v6 = vsub.f32 %v1450_v19, %v1482_v56  ;;  %v8775_v11 = vsub.f32 %v1452_v16, %v1484_v46 }
 0x27d   :  { %10827 = vst [vmem:[#allocation58_spill] sm:$0xff] %v8681_v24  ;;  %4859 = vlog2.f32 %v10828_v2  ;;  %v1483_v2 = vld [vmem:[%s10319_s6 + $0xb8] sm:$0xff]  ;;  %v4836_v24 = vpop.eup %4835  ;;  %v1486_v23 = vld [vmem:[%s10319_s6 + $0xd0] sm:$0xff]  ;;  %v1488_v18 = vld [vmem:[%s10319_s6 + $0xe0] sm:$0xff]  ;;  %v8777_v7 = vsub.f32 %v1453_v13, %v1485_v27  ;;  %v10853_v19 = vsub.f32 1.0, %v10794_v59 }
 0x27e   :  { %4861 = vlog2.f32 %v10832_v42  ;;  %v4838_v52 = vpop.eup %4837  ;;  %v10834_v42 = vsub.f32 1.0, %v10787_v34  ;;  %v1487_v5 = vld [vmem:[%s10319_s6 + $0xd8] sm:$0xff]  ;;  %10836 = vst [vmem:[#allocation9_spill] sm:$0xff] %v8751_v47  ;;  %10837 = vst [vmem:[#allocation42_spill] sm:$0xff] %v8753_v26  ;;  %v1457_v10 = vld [vmem:[%s10318_s5 + $0xe8] sm:$0xff]  ;;  %v8795_v13 = vsub.f32 %v1456_v45, %v1488_v18 }
 0x27f   :  { %v4840_v34 = vpop.eup %4839  ;;  %10838 = vst [vmem:[#allocation52_spill] sm:$0xff] %v8755_v62  ;;  %v1489_v32 = vld [vmem:[%s10319_s6 + $0xe8] sm:$0xff]  ;;  %10841 = vst [vmem:[#allocation135_spill] sm:$0xff] %v8767_v6  ;;  %v10847_v62 = vsub.f32 1.0, %v10793_v60  ;;  %v8793_v46 = vsub.f32 %v1455_v30, %v1487_v5  ;;  %v8807_v60 = vld [vmem:[%s10320_s7 + $0x18] sm:$0xff]  ;;  %v10859_v30 = vsub.f32 1.0, %v10796_v44 }
 0x280   :  { %4863 = vlog2.f32 %v10834_v42  ;;  %v4842_v22 = vpop.eup %4841  ;;  %v8763_v42 = vsub.f32 %v1448_v1, %v1480_v29  ;;  %10845 = vst [vmem:[#allocation138_spill] sm:$0xff] %v8775_v11  ;;  %10846 = vst [vmem:[#allocation139_spill] sm:$0xff] %v8777_v7  ;;  %v8789_v37 = vld [vmem:[%s10320_s7 + $0x8] sm:$0xff]  ;;  %v8802_v1 = vld [vmem:[%s10320_s7 + $0x10] sm:$0xff]  ;;  %v8809_v29 = vsub.f32 %v1457_v10, %v1489_v32  ;;  %v3783_v10 = vmul.f32 0.6931472, %v4838_v52 }
 0x281   :  { %4865 = vlog2.f32 %v10835_v3  ;;  %v8765_v3 = vsub.f32 %v1449_v0, %v1481_v33  ;;  %v8769_v17 = vpop.eup %4843  ;;  %v8784_v0 = vld [vmem:[%s10320_s7] sm:$0xff]  ;;  %10849 = vst [vmem:[#allocation141_spill] sm:$0xff] %v8789_v37  ;;  %10851 = vst [vmem:[#allocation143_spill] sm:$0xff] %v8793_v46  ;;  %v8829_v45 = vld [vmem:[%s10320_s7 + $0x28] sm:$0xff]  ;;  %v10864_v32 = vsub.f32 1.0, %v10798_v58 }
 0x282   :  { %4867 = vrcp.f32 %v3598_v53  ;;  %10839 = vst [vmem:[#allocation133_spill] sm:$0xff] %v8763_v42  ;;  %10842 = vst [vmem:[#allocation136_spill] sm:$0xff] %v8769_v17  ;;  %v8773_v53 = vsub.f32 %v1451_v20, %v1483_v2  ;;  %v4846_v51 = vpop.eup %4845  ;;  %v8791_v20 = vsub.f32 %v1454_v57, %v1486_v23  ;;  %v10857_v33 = vld [vmem:[#allocation61_spill] sm:$0xff]  ;;  %v10858_v2 = vld [vmem:[#allocation64_spill] sm:$0xff]  ;;  %v1124_v57 = vmul.f32 0.6931472, %v4836_v24 }
 0x283   :  { %10840 = vst [vmem:[#allocation134_spill] sm:$0xff] %v8765_v3  ;;  %4869 = vlog2.f32 %v10843_v12  ;;  %10848 = vst [vmem:[#allocation140_spill] sm:$0xff] %v8784_v0  ;;  %v4848_v16 = vpop.eup %4847  ;;  %v8813_v56 = vmul.f32 %v10857_v33, %v8784_v0  ;;  %v8817_v59 = vmul.f32 %v10858_v2, %v8789_v37  ;;  %v8824_v23 = vld [vmem:[%s10320_s7 + $0x20] sm:$0xff]  ;;  %v8844_v12 = vld [vmem:[%s10320_s7 + $0x30] sm:$0xff]  ;;  %v8862_v58 = vmul.f32 %v8655_v55, %v8829_v45 }
 0x284   :  { %10844 = vst [vmem:[#allocation137_spill] sm:$0xff] %v8773_v53  ;;  %4871 = vlog2.f32 %v10847_v62  ;;  %10850 = vst [vmem:[#allocation142_spill] sm:$0xff] %v8791_v20  ;;  %v4850_v27 = vpop.eup %4849  ;;  %v10862_v5 = vld [vmem:[#allocation65_spill] sm:$0xff]  ;;  %v10863_v62 = vld [vmem:[#allocation66_spill] sm:$0xff]  ;;  %v10874_v0 = vsub.f32 1.0, %v10800_v14  ;;  %vm3980_vm10 = vcmp.eq.f32.partialorder %v3783_v10, %v3783_v10 }
 0x285   :  { %10852 = vst [vmem:[#allocation144_spill] sm:$0xff] %v8795_v13  ;;  %4873 = vlog2.f32 %v10853_v19  ;;  %10854 = vst [vmem:[#allocation145_spill] sm:$0xff] %v8802_v1  ;;  %v8833_v18 = vmul.f32 %v10862_v5, %v8802_v1  ;;  %v8837_v24 = vmul.f32 %v10863_v62, %v8807_v60  ;;  %v4852_v44 = vpop.eup %4851  ;;  %v8849_v19 = vld [vmem:[%s10320_s7 + $0x38] sm:$0xff]  ;;  %v8873_v1 = vmul.f32 %v8677_v21, %v8844_v12  ;;  %v10877_v7 = vld [vmem:[#allocation77_spill] sm:$0xff] }
 0x286   :  { %10855 = vst [vmem:[#allocation146_spill] sm:$0xff] %v8807_v60  ;;  %10856 = vst [vmem:[#allocation147_spill] sm:$0xff] %v8809_v29  ;;  %4875 = vlog2.f32 %v10859_v30  ;;  %v8854_v30 = vld [vmem:[%s10320_s7 + $0x40] sm:$0xff]  ;;  %v10868_v52 = vld [vmem:[#allocation67_spill] sm:$0xff]  ;;  %v10869_v29 = vsub.f32 1.0, %v10799_v39  ;;  %v10878_v11 = vsub.f32 1.0, %v10877_v7 }
 0x287   :  { %10860 = vst [vmem:[#allocation61_spill] sm:$0xff] %v8824_v23  ;;  %10861 = vst [vmem:[#allocation64_spill] sm:$0xff] %v8829_v45  ;;  %4877 = vlog2.f32 %v10864_v32  ;;  %v8858_v17 = vmul.f32 %v10868_v52, %v8824_v23  ;;  %v4854_v32 = vpop.eup %4853  ;;  %v8869_v60 = vld [vmem:[%s10320_s7 + $0x48] sm:$0xff]  ;;  %v8877_v23 = vmul.f32 %v8679_v40, %v8849_v19  ;;  %v8881_v45 = vmul.f32 %v8700_v8, %v8854_v30  ;;  %v10907_v8 = vld [vmem:[#allocation115_spill] sm:$0xff] }
 0x288   :  { %10865 = vst [vmem:[#allocation65_spill] sm:$0xff] %v8844_v12  ;;  %10866 = vst [vmem:[#allocation66_spill] sm:$0xff] %v8849_v19  ;;  %4879 = vlog2.f32 %v10869_v29  ;;  %v4856_v37 = vpop.eup %4855  ;;  %v1126_v39 = vmul.f32 0.6931472, %v4840_v34  ;;  %v1128_v29 = vmul.f32 0.6931472, %v4842_v22  ;;  %v8887_v13 = vmul.f32 %v8702_v43, %v8869_v60 }
 0x289   :  { %10867 = vst [vmem:[#allocation148_spill] sm:$0xff] %v8854_v30  ;;  %10870 = vst [vmem:[#allocation67_spill] sm:$0xff] %v8869_v60  ;;  %4881 = vlog2.f32 %v10874_v0  ;;  %v4858_v12 = vpop.eup %4857  ;;  %v1130_v46 = vmul.f32 0.6931472, %v4846_v51  ;;  %v1132_v20 = vmul.f32 0.6931472, %v4848_v16  ;;  %v1187_v30 = vmul.f32 %v1124_v57, %v10878_v11 }
 0x28a   :  { %10871 = vst [vmem:[#allocation149_spill] sm:$0xff] %v8873_v1  ;;  %10872 = vst [vmem:[#allocation150_spill] sm:$0xff] %v8877_v23  ;;  %v10876_v19 = vsub.f32 1.0, %v10803_v54  ;;  %v8896_v34 = vld [vmem:[%s10320_s7 + $0x50] sm:$0xff]  ;;  %v4860_v14 = vpop.eup %4859  ;;  %v1134_v22 = vmul.f32 0.6931472, %v4850_v27 }
 0x28b   :  { %10873 = vst [vmem:[#allocation151_spill] sm:$0xff] %v8881_v45  ;;  %10875 = vst [vmem:[#allocation152_spill] sm:$0xff] %v8887_v13  ;;  %v10880_v0 = vsub.f32 1.0, %v10806_v4  ;;  %v8903_v51 = vld [vmem:[%s10320_s7 + $0x58] sm:$0xff]  ;;  %v8907_v54 = vmul.f32 %v8704_v25, %v8896_v34  ;;  %v4862_v11 = vpop.eup %4861  ;;  %v3785_v7 = vmul.f32 0.6931472, %v4856_v37 }
 0x28c   :  { %4883 = vlog2.f32 %v10876_v19  ;;  %10879 = vst [vmem:[#allocation77_spill] sm:$0xff] %v8896_v34  ;;  %10881 = vst [vmem:[#allocation153_spill] sm:$0xff] %v8903_v51  ;;  %v1136_v16 = vmul.f32 0.6931472, %v4852_v44  ;;  %v10883_v57 = vsub.f32 1.0, %v10808_v63  ;;  %v8913_v27 = vmul.f32 %v8717_v15, %v8903_v51  ;;  %v10886_v60 = vld [vmem:[#allocation78_spill] sm:$0xff] }
 0x28d   :  { %4885 = vlog2.f32 %v10880_v0  ;;  %10882 = vst [vmem:[#allocation154_spill] sm:$0xff] %v8907_v54  ;;  %v4864_v4 = vpop.eup %4863  ;;  %v1138_v19 = vmul.f32 0.6931472, %v4854_v32  ;;  %v10885_v0 = vsub.f32 1.0, %v8190_v31  ;;  %v10887_v13 = vsub.f32 1.0, %v10886_v60  ;;  %v10888_v34 = vld [vmem:[#allocation79_spill] sm:$0xff] }
 0x28e   :  { %4887 = vlog2.f32 %v10883_v57  ;;  %10884 = vst [vmem:[#allocation155_spill] sm:$0xff] %v8913_v27  ;;  %v10889_v54 = vsub.f32 1.0, %v10888_v34  ;;  %v4866_v37 = vpop.eup %4865  ;;  %v1140_v44 = vmul.f32 0.6931472, %v4858_v12  ;;  %v10890_v63 = vsub.f32 1.0, %v8194_v36  ;;  %v10892_v27 = vld [vmem:[#allocation83_spill] sm:$0xff] }
 0x28f   :  { %4889 = vlog2.f32 %v10885_v0  ;;  %v1188_v43 = vmul.f32 %v1126_v39, %v10887_v13  ;;  %v10891_v57 = vsub.f32 1.0, %v8174_v28  ;;  %v10893_v15 = vsub.f32 1.0, %v10892_v27  ;;  %v4868_v45 = vpop.eup %4867  ;;  %v10895_v60 = vld [vmem:[#allocation84_spill] sm:$0xff]  ;;  %v10900_v27 = vld [vmem:[#allocation85_spill] sm:$0xff] }
 0x290   :  { %v1189_v25 = vmul.f32 %v1128_v29, %v10889_v54  ;;  %4891 = vlog2.f32 %v10890_v63  ;;  %v4012_v31 = vsel %vm3980_vm10, %v3783_v10, 0.0  ;;  %v1142_v0 = vmul.f32 0.6931472, %v4860_v14  ;;  %v4870_v12 = vpop.eup %4869  ;;  %v3502_v14 = vpop.xlane.xlu0 %3501  ;;  %v10903_v10 = vld [vmem:[#allocation111_spill] sm:$0xff]  ;;  %v10915_v23 = vld [vmem:[#allocation88_spill] sm:$0xff]  ;;  %v10936_v1 = vld [vmem:[#allocation121_spill] sm:$0xff] }
 0x291   :  { %v1190_v51 = vmul.f32 %v1130_v46, %v10891_v57  ;;  %v1191_v32 = vmul.f32 %v1132_v20, %v10893_v15  ;;  %v10894_v13 = vsub.f32 1.0, %v8198_v38  ;;  %v10896_v39 = vsub.f32 1.0, %v10895_v60  ;;  %v10898_v15 = vld [vmem:[#allocation107_spill] sm:$0xff]  ;;  %v4872_v54 = vpop.eup %4871  ;;  %v10902_v57 = vld [vmem:[#allocation109_spill] sm:$0xff] }
 0x292   :  { %v10495_v34 = vmov 0.0   ;;  %vm3981_vm11 = vcmp.eq.f32.partialorder %v3785_v7, %v3785_v7  ;;  %v10897_v28 = vsub.f32 1.0, %v8203_v48  ;;  %v8937_v20 = vadd.f32 %v1187_v30, %v10898_v15  ;;  %v10906_v15 = vld [vmem:[#allocation113_spill] sm:$0xff] }
 0x293   :  { %4893 = vlog2.f32 %v10894_v13  ;;  %v1192_v29 = vmul.f32 %v1134_v22, %v10896_v39  ;;  %v4081_v36 = vsel %vm3980_vm10, 1.0, %v10495_v34  ;;  %v10899_v38 = vsub.f32 1.0, %v8216_v61  ;;  %v4874_v39 = vpop.eup %4873 }
 0x294   :  { %v1193_v46 = vmul.f32 %v1136_v16, %v10897_v28  ;;  %v10901_v63 = vsub.f32 1.0, %v10900_v27  ;;  %v8944_v13 = vadd.f32 %v1188_v43, %v10902_v57  ;;  %v8947_v60 = vadd.f32 %v1189_v25, %v10903_v10  ;;  %v10904_v16 = vld [vmem:[#allocation86_spill] sm:$0xff]  ;;  %v10908_v43 = vld [vmem:[#allocation93_spill] sm:$0xff] }
 0x295   :  { %4895 = vlog2.f32 %v10899_v38  ;;  %v3691_v48 = vmul.f32 %v4868_v45, %v3502_v14  ;;  %v10905_v28 = vsub.f32 1.0, %v10904_v16  ;;  %v8952_v34 = vadd.f32 %v1190_v51, %v10906_v15  ;;  %v4876_v38 = vpop.eup %4875  ;;  %v10910_v25 = vld [vmem:[#allocation117_spill] sm:$0xff]  ;;  %v10913_v51 = vld [vmem:[#allocation119_spill] sm:$0xff] }
 0x296   :  { %v1194_v22 = vmul.f32 %v1138_v19, %v10901_v63  ;;  %v8955_v61 = vadd.f32 %v1191_v32, %v10907_v8  ;;  %v4013_v19 = vsel %vm3981_vm11, %v3785_v7, 0.0  ;;  %v1144_v27 = vmul.f32 0.6931472, %v4862_v11  ;;  %v4878_v45 = vpop.eup %4877  ;;  %v10921_v7 = vld [vmem:[#allocation90_spill] sm:$0xff] }
 0x297   :  { %v1195_v30 = vmul.f32 %v1140_v44, %v10905_v28  ;;  %v10909_v63 = vsub.f32 1.0, %v10908_v43  ;;  %v8961_v10 = vadd.f32 %v1192_v29, %v10910_v25  ;;  %v1146_v14 = vmul.f32 0.6931472, %v4864_v4  ;;  %v10911_v44 = vld [vmem:[#allocation87_spill] sm:$0xff]  ;;  %v4880_v8 = vpop.eup %4879 }
 0x298   :  { %v1148_v16 = vmul.f32 0.6931472, %v4866_v37  ;;  %v10912_v28 = vsub.f32 1.0, %v10911_v44  ;;  %v8966_v15 = vadd.f32 %v1193_v46, %v10913_v51  ;;  %v10914_v32 = vmov 0.0   ;;  %v10919_v44 = vld [vmem:[#allocation89_spill] sm:$0xff] }
 0x299   :  { %v1196_v57 = vmul.f32 %v1142_v0, %v10909_v63  ;;  %v4082_v53 = vsel %vm3981_vm11, 1.0, %v10914_v32  ;;  %v1150_v11 = vmul.f32 0.6931472, %v4870_v12  ;;  %v10916_v43 = vsub.f32 1.0, %v10915_v23  ;;  %v10917_v0 = vld [vmem:[#allocation120_spill] sm:$0xff]  ;;  %v4882_v63 = vpop.eup %4881  ;;  %v10923_v12 = vld [vmem:[#allocation94_spill] sm:$0xff] }
 0x29a   :  { %4897 = vlog2.f32 %v10912_v28  ;;  %v8973_v29 = vadd.f32 %v1194_v22, %v10917_v0  ;;  %v8975_v4 = vadd.f32 %v4013_v19, %v4012_v31  ;;  %v3752_v37 = vadd.f32 1e-07, %v3691_v48  ;;  %v4884_v46 = vpop.eup %4883  ;;  %v10925_v0 = vld [vmem:[#allocation91_spill] sm:$0xff]  ;;  %v10929_v19 = vld [vmem:[#allocation96_spill] sm:$0xff] }
 0x29b   :  { %4899 = vlog2.f32 %v10916_v43  ;;  %v1152_v25 = vmul.f32 0.6931472, %v4872_v54  ;;  %v10920_v28 = vsub.f32 1.0, %v10919_v44  ;;  %v1154_v51 = vmul.f32 0.6931472, %v4874_v39  ;;  %v4886_v6 = vpop.eup %4885  ;;  %v10927_v31 = vld [vmem:[#allocation95_spill] sm:$0xff] }
 0x29c   :  { %10918 = vst [vmem:[#allocation78_spill] sm:$0xff] %v8975_v4  ;;  %v1156_v40 = vmul.f32 0.6931472, %v4876_v38  ;;  %v10922_v32 = vsub.f32 1.0, %v10921_v7  ;;  %v10924_v23 = vsub.f32 1.0, %v10923_v12  ;;  %v10926_v3 = vsub.f32 1.0, %v10925_v0  ;;  %v4888_v4 = vpop.eup %4887 }
 0x29d   :  { %4901 = vlog2.f32 %v10920_v28  ;;  %v1158_v22 = vmul.f32 0.6931472, %v4878_v45  ;;  %v10928_v48 = vsub.f32 1.0, %v10927_v31  ;;  %v10930_v44 = vsub.f32 1.0, %v10929_v19 }
 0x29e   :  { %4903 = vlog2.f32 %v10922_v32  ;;  %v1197_v43 = vmul.f32 %v1144_v27, %v10924_v23  ;;  %v8989_v39 = vadd.f32 %v4082_v53, %v4081_v36  ;;  %v1160_v38 = vmul.f32 0.6931472, %v4880_v8  ;;  %v10932_v32 = vld [vmem:[#allocation97_spill] sm:$0xff]  ;;  %v4890_v27 = vpop.eup %4889  ;;  %v10934_v23 = vld [vmem:[#allocation98_spill] sm:$0xff]  ;;  %v10939_v53 = vld [vmem:[#allocation100_spill] sm:$0xff] }
 0x29f   :  { %4905 = vlog2.f32 %v10926_v3  ;;  %v1198_v54 = vmul.f32 %v1146_v14, %v10928_v48  ;;  %v1199_v28 = vmul.f32 %v1148_v16, %v10930_v44  ;;  %v1162_v7 = vmul.f32 0.6931472, %v4882_v63  ;;  %v4892_v14 = vpop.eup %4891  ;;  %v10937_v48 = vld [vmem:[#allocation99_spill] sm:$0xff] }
 0x2a0   :  { %10931 = vst [vmem:[#allocation79_spill] sm:$0xff] %v8989_v39  ;;  %v10933_v42 = vsub.f32 1.0, %v10932_v32  ;;  %4907 = vlog2.f32 %v3752_v37  ;;  %v1164_v45 = vmul.f32 0.6931472, %v4884_v46  ;;  %v10935_v0 = vsub.f32 1.0, %v10934_v23  ;;  %v10941_v63 = vld [vmem:[#allocation123_spill] sm:$0xff]  ;;  %v4894_v37 = vpop.eup %4893 }
 0x2a1   :  { %v8996_v31 = vadd.f32 %v1195_v30, %v10936_v1  ;;  %v10938_v16 = vsub.f32 1.0, %v10937_v48  ;;  %v10940_v36 = vsub.f32 1.0, %v10939_v53  ;;  %v9003_v44 = vadd.f32 %v1196_v57, %v10941_v63  ;;  %v10943_v32 = vld [vmem:[#allocation101_spill] sm:$0xff]  ;;  %v10945_v1 = vld [vmem:[#allocation127_spill] sm:$0xff] }
 0x2a2   :  { %v1200_v12 = vmul.f32 %v1150_v11, %v10933_v42  ;;  %v1201_v3 = vmul.f32 %v1152_v25, %v10935_v0  ;;  %v10942_v42 = vld [vmem:[#allocation125_spill] sm:$0xff]  ;;  %v1166_v46 = vmul.f32 0.6931472, %v4886_v6  ;;  %v10944_v25 = vsub.f32 1.0, %v10943_v32  ;;  %v10946_v0 = vld [vmem:[#allocation128_spill] sm:$0xff]  ;;  %v4896_v32 = vpop.eup %4895 }
 0x2a3   :  { %v1202_v19 = vmul.f32 %v1154_v51, %v10938_v16  ;;  %v1203_v8 = vmul.f32 %v1156_v40, %v10940_v36  ;;  %v9006_v11 = vadd.f32 %v1197_v43, %v10942_v42  ;;  %v9011_v30 = vadd.f32 %v1198_v54, %v10945_v1  ;;  %v9016_v51 = vpop.xlane.xlu1 %3600  ;;  %v10947_v16 = vld [vmem:[#allocation102_spill] sm:$0xff]  ;;  %v10949_v36 = vld [vmem:[#allocation103_spill] sm:$0xff]  ;;  %v10951_v42 = vld [vmem:[#allocation129_spill] sm:$0xff] }
 0x2a4   :  { %v1204_v23 = vmul.f32 %v1158_v22, %v10944_v25  ;;  %v9014_v48 = vadd.f32 %v1199_v28, %v10946_v0  ;;  %v1168_v40 = vmul.f32 0.6931472, %v4888_v4  ;;  %v10948_v57 = vsub.f32 1.0, %v10947_v16  ;;  %v10952_v54 = vld [vmem:[#allocation104_spill] sm:$0xff]  ;;  %v10954_v28 = vld [vmem:[#allocation130_spill] sm:$0xff]  ;;  %v10955_v4 = vld [vmem:[#allocation131_spill] sm:$0xff] }
 0x2a5   :  { %v10950_v43 = vsub.f32 1.0, %v10949_v36  ;;  %v9023_v6 = vadd.f32 %v1200_v12, %v10951_v42  ;;  %v1170_v22 = vmul.f32 0.6931472, %v4890_v27  ;;  %v1172_v25 = vmul.f32 0.6931472, %v4892_v14  ;;  %v10956_v16 = vld [vmem:[#allocation105_spill] sm:$0xff] }
 0x2a6   :  { %v1205_v53 = vmul.f32 %v1160_v38, %v10948_v57  ;;  %v10953_v1 = vsub.f32 1.0, %v10952_v54  ;;  %v9028_v0 = vadd.f32 %v1201_v3, %v10954_v28  ;;  %v1174_v21 = vmul.f32 0.6931472, %v4894_v37  ;;  %v10958_v36 = vld [vmem:[#allocation132_spill] sm:$0xff]  ;;  %v10960_v42 = vld [vmem:[#allocation106_spill] sm:$0xff] }
 0x2a7   :  { %v1206_v63 = vmul.f32 %v1162_v7, %v10950_v43  ;;  %v9031_v26 = vadd.f32 %v1202_v19, %v10955_v4  ;;  %v1251_v38 = vsub.f32 0.0, %v8937_v20  ;;  %v1252_v7 = vsub.f32 0.0, %v8944_v13  ;;  %v10959_v14 = vld [vmem:[#allocation60_spill] sm:$0xff]  ;;  %v4898_v3 = vpop.eup %4897 }
 0x2a8   :  { %v1207_v39 = vmul.f32 %v1164_v45, %v10953_v1  ;;  %v10957_v12 = vsub.f32 1.0, %v10956_v16  ;;  %v9038_v27 = vadd.f32 %v1203_v8, %v10958_v36  ;;  %v9041_v43 = vadd.f32 %v1204_v23, %v10959_v14  ;;  %v10962_v1 = vld [vmem:[#allocation62_spill] sm:$0xff]  ;;  %v4900_v28 = vpop.eup %4899  ;;  %v10965_v16 = vld [vmem:[#allocation108_spill] sm:$0xff]  ;;  %v10967_v36 = vld [vmem:[#allocation57_spill] sm:$0xff] }
 0x2a9   :  { %v1253_v45 = vsub.f32 0.0, %v8947_v60  ;;  %v1176_v37 = vmul.f32 0.6931472, %v4896_v32  ;;  %v10961_v19 = vsub.f32 1.0, %v10960_v42  ;;  %v9047_v20 = vadd.f32 %v1205_v53, %v10962_v1  ;;  %v10968_v60 = vld [vmem:[#allocation63_spill] sm:$0xff]  ;;  %v9060_v42 = vpop.xlane.xlu1 %3504  ;;  %v10970_v53 = vld [vmem:[#allocation110_spill] sm:$0xff] }
 0x2aa   :  { %v1208_v57 = vmul.f32 %v1166_v46, %v10957_v12  ;;  %v1254_v13 = vsub.f32 0.0, %v8952_v34  ;;  %v10963_v46 = vld [vmem:[#allocation10_spill] sm:$0xff]  ;;  %v10966_v12 = vsub.f32 1.0, %v10965_v16  ;;  %v9055_v14 = vadd.f32 %v1206_v63, %v10967_v36  ;;  %10969 = vst [vmem:[#allocation83_spill] sm:$0xff] %v9060_v42  ;;  %v10972_v16 = vld [vmem:[#allocation24_spill] sm:$0xff] }
 0x2ab   :  { %v1209_v54 = vmul.f32 %v1168_v40, %v10961_v19  ;;  %v10964_v4 = vsub.f32 1.0, %v10963_v46  ;;  %v9058_v32 = vadd.f32 %v1207_v39, %v10968_v60  ;;  %v4902_v40 = vpop.eup %4901  ;;  %v10971_v19 = vsub.f32 1.0, %v10970_v53  ;;  %v10973_v60 = vld [vmem:[#allocation112_spill] sm:$0xff]  ;;  %v10975_v53 = vld [vmem:[#allocation26_spill] sm:$0xff] }
 0x2ac   :  { %v1211_v23 = vmul.f32 %v1172_v25, %v10966_v12  ;;  %v1255_v34 = vsub.f32 0.0, %v8955_v61  ;;  %v1316_v46 = vsel %vm1315_vm8, %v1251_v38, 0.0  ;;  %v1178_v25 = vmul.f32 0.6931472, %v4898_v3 }
 0x2ad   :  { %v1210_v8 = vmul.f32 %v1170_v22, %v10964_v4  ;;  %v1212_v1 = vmul.f32 %v1174_v21, %v10971_v19  ;;  %v1317_v22 = vsel %vm1315_vm8, %v1252_v7, 0.0  ;;  %v4904_v4 = vpop.eup %4903  ;;  %v9068_v63 = vadd.f32 %v1208_v57, %v10972_v16  ;;  %v10976_v19 = vld [vmem:[#allocation44_spill] sm:$0xff] }
 0x2ae   :  { %v1318_v12 = vadd.f32 %v1317_v22, %v1316_v46  ;;  %v1319_v39 = vsel %vm1315_vm8, %v1253_v45, 0.0  ;;  %v4906_v36 = vpop.eup %4905  ;;  %v10974_v42 = vsub.f32 1.0, %v10973_v60  ;;  %v9074_v21 = vadd.f32 %v1209_v54, %v10975_v53  ;;  %v10977_v57 = vld [vmem:[#allocation28_spill] sm:$0xff]  ;;  %v9084_v45 = vpop.xlane.xlu1 %3552 }
 0x2af   :  { %v1256_v61 = vsub.f32 0.0, %v8961_v10  ;;  %v1321_v38 = vsel %vm1315_vm8, %v1254_v13, 0.0  ;;  %v1180_v7 = vmul.f32 0.6931472, %v4900_v28  ;;  %v9079_v3 = vadd.f32 %v1210_v8, %v10976_v19  ;;  %10978 = vst [vmem:[#allocation84_spill] sm:$0xff] %v9084_v45  ;;  %v9086_v22 = vpop.eup %4907  ;;  %v10981_v8 = vld [vmem:[#allocation114_spill] sm:$0xff] }
 0x2b0   :  { %v1213_v47 = vmul.f32 %v1176_v37, %v10974_v42  ;;  %v9082_v16 = vadd.f32 %v1211_v23, %v10977_v57  ;;  %v1320_v46 = vadd.f32 %v1319_v39, %v1318_v12  ;;  %10979 = vst [vmem:[#allocation107_spill] sm:$0xff] %v9086_v22  ;;  %v1182_v37 = vmul.f32 0.6931472, %v4902_v40  ;;  %v10980_v42 = vld [vmem:[#allocation68_spill] sm:$0xff]  ;;  %v10983_v57 = vld [vmem:[#allocation69_spill] sm:$0xff] }
 0x2b1   :  { %v9089_v54 = vadd.f32 %v1212_v1, %v10980_v42  ;;  %v1257_v10 = vsub.f32 0.0, %v8966_v15  ;;  %v1323_v13 = vsel %vm1315_vm8, %v1255_v34, 0.0  ;;  %v1184_v28 = vmul.f32 0.6931472, %v4904_v4  ;;  %v10984_v42 = vld [vmem:[#allocation116_spill] sm:$0xff] }
 0x2b2   :  { %v1186_v60 = vmul.f32 0.6931472, %v4906_v36  ;;  %v10982_v53 = vsub.f32 1.0, %v10981_v8  ;;  %v1322_v23 = vadd.f32 %v1321_v38, %v1320_v46  ;;  %v9096_v12 = vadd.f32 %v1213_v47, %v10983_v57  ;;  %v9105_v8 = vpop.xlane.xlu1 %3603 }
 0x2b3   :  { %v1258_v39 = vsub.f32 0.0, %v8973_v29  ;;  %v1259_v40 = vsub.f32 0.0, %v8996_v31  ;;  %v1325_v1 = vsel %vm1315_vm8, %v1256_v61, 0.0  ;;  %v10985_v45 = vsub.f32 1.0, %v10984_v42  ;;  %10986 = vst [vmem:[#allocation85_spill] sm:$0xff] %v9105_v8  ;;  %v10989_v61 = vld [vmem:[#allocation122_spill] sm:$0xff] }
 0x2b4   :  { %v1214_v19 = vmul.f32 %v1178_v25, %v10982_v53  ;;  %v1260_v34 = vsub.f32 0.0, %v9003_v44  ;;  %v1261_v4 = vsub.f32 0.0, %v9006_v11  ;;  %v1324_v36 = vadd.f32 %v1323_v13, %v1322_v23  ;;  %v10987_v25 = vld [vmem:[#allocation118_spill] sm:$0xff] }
 0x2b5   :  { %v1215_v15 = vmul.f32 %v1180_v7, %v10985_v45  ;;  %v10988_v38 = vsub.f32 1.0, %v10987_v25  ;;  %v1262_v46 = vsub.f32 0.0, %v9011_v30  ;;  %v1263_v29 = vsub.f32 0.0, %v9014_v48  ;;  %v10991_v7 = vld [vmem:[#allocation124_spill] sm:$0xff]  ;;  %v10993_v42 = vld [vmem:[#allocation70_spill] sm:$0xff]  ;;  %v10994_v48 = vld [vmem:[#allocation33_spill] sm:$0xff] }
 0x2b6   :  { %v1327_v31 = vsel %vm1315_vm8, %v1257_v10, 0.0  ;;  %v10990_v53 = vsub.f32 1.0, %v10989_v61  ;;  %v10992_v45 = vsub.f32 1.0, %v10991_v7  ;;  %v1246_v11 = vadd.f32 %v1214_v19, %v10993_v42  ;;  %v11047_v8 = vld [vmem:[#allocation82_spill] sm:$0xff] }
 0x2b7   :  { %v1216_v47 = vmul.f32 %v1182_v37, %v10988_v38  ;;  %v1326_v13 = vadd.f32 %v1325_v1, %v1324_v36  ;;  %v1264_v23 = vsub.f32 0.0, %v9023_v6  ;;  %v1265_v25 = vsub.f32 0.0, %v9028_v0 }
 0x2b8   :  { %v1217_v57 = vmul.f32 %v1184_v28, %v10990_v53  ;;  %v1218_v44 = vmul.f32 %v1186_v60, %v10992_v45  ;;  %v1266_v37 = vsub.f32 0.0, %v9031_v26  ;;  %v1329_v30 = vsel %vm1315_vm8, %v1258_v39, 0.0  ;;  %v9124_v53 = vpop.xlane.xlu1 %3507  ;;  %v10996_v60 = vld [vmem:[#allocation72_spill] sm:$0xff]  ;;  %v10997_v26 = vld [vmem:[#allocation73_spill] sm:$0xff]  ;;  %v10998_v39 = vld [vmem:[#allocation74_spill] sm:$0xff] }
 0x2b9   :  { %v1247_v38 = vadd.f32 %v1215_v15, %v10994_v48  ;;  %v1267_v10 = vsub.f32 0.0, %v9038_v27  ;;  %v1268_v28 = vsub.f32 0.0, %v9041_v43  ;;  %v1328_v61 = vadd.f32 %v1327_v31, %v1326_v13  ;;  %10995 = vst [vmem:[#allocation109_spill] sm:$0xff] %v9124_v53  ;;  %v9322_v53 = vld [vmem:[%s10320_s7 + $0xd0] sm:$0xff] }
 0x2ba   :  { %v1248_v19 = vadd.f32 %v1216_v47, %v10996_v60  ;;  %v1269_v1 = vsub.f32 0.0, %v9047_v20  ;;  %v1270_v6 = vsub.f32 0.0, %v9055_v14  ;;  %v1331_v0 = vsel %vm1315_vm8, %v1259_v40, 0.0  ;;  %11033 = vst [vmem:[#allocation127_spill] sm:$0xff] %v9322_v53 }
 0x2bb   :  { %v1249_v36 = vadd.f32 %v1217_v57, %v10997_v26  ;;  %v1250_v7 = vadd.f32 %v1218_v44, %v10998_v39  ;;  %v1271_v15 = vsub.f32 0.0, %v9058_v32  ;;  %v1330_v27 = vadd.f32 %v1329_v30, %v1328_v61 }
 0x2bc   :  { %v1272_v43 = vsub.f32 0.0, %v9068_v63  ;;  %v1273_v31 = vsub.f32 0.0, %v9074_v21  ;;  %v1274_v45 = vsub.f32 0.0, %v9079_v3  ;;  %v1333_v47 = vsel %vm1315_vm8, %v1260_v34, 0.0  ;;  %v9140_v42 = vpop.xlane.xlu1 %3606 }
 0x2bd   :  { %v1275_v20 = vsub.f32 0.0, %v9082_v16  ;;  %v1276_v14 = vsub.f32 0.0, %v9089_v54  ;;  %v1277_v40 = vsub.f32 0.0, %v9096_v12  ;;  %v1332_v57 = vadd.f32 %v1331_v0, %v1330_v27  ;;  %10999 = vst [vmem:[#allocation111_spill] sm:$0xff] %v9140_v42  ;;  %v9211_v27 = vld [vmem:[%s10320_s7 + $0x60] sm:$0xff] }
 0x2be   :  { %v1278_v44 = vsub.f32 0.0, %v1246_v11  ;;  %v1279_v32 = vsub.f32 0.0, %v1247_v38  ;;  %v1280_v13 = vsub.f32 0.0, %v1248_v19  ;;  %v1335_v63 = vsel %vm1315_vm8, %v1261_v4, 0.0  ;;  %11007 = vst [vmem:[#allocation88_spill] sm:$0xff] %v9211_v27 }
 0x2bf   :  { %v1281_v30 = vsub.f32 0.0, %v1249_v36  ;;  %v1282_v21 = vsub.f32 0.0, %v1250_v7  ;;  %v1334_v48 = vadd.f32 %v1333_v47, %v1332_v57  ;;  %v1337_v3 = vsel %vm1315_vm8, %v1262_v46, 0.0 }
 0x2c0   :  { %v1339_v34 = vsel %vm1315_vm8, %v1263_v29, 0.0  ;;  %v1341_v16 = vsel %vm1315_vm8, %v1264_v23, 0.0  ;;  %v1343_v54 = vsel %vm1315_vm8, %v1265_v25, 0.0  ;;  %v1345_v12 = vsel %vm1315_vm8, %v1266_v37, 0.0  ;;  %v9155_v60 = vpop.xlane.xlu1 %3510 }
 0x2c1   :  { %v1336_v61 = vadd.f32 %v1335_v63, %v1334_v48  ;;  %v1347_v11 = vsel %vm1315_vm8, %v1267_v10, 0.0  ;;  %v9150_v38 = vsel %vm1315_vm8, %v1268_v28, 0.0  ;;  %v9153_v4 = vsel %vm1315_vm8, %v1269_v1, 0.0  ;;  %11000 = vst [vmem:[#allocation86_spill] sm:$0xff] %v9155_v60  ;;  %v9258_v63 = vld [vmem:[%s10320_s7 + $0x90] sm:$0xff]  ;;  %v11015_v48 = vld [vmem:[#allocation9_spill] sm:$0xff] }
 0x2c2   :  { %v9158_v46 = vsel %vm1315_vm8, %v1270_v6, 0.0  ;;  %v9161_v29 = vsel %vm1315_vm8, %v1271_v15, 0.0  ;;  %v9164_v23 = vsel %vm1315_vm8, %v1272_v43, 0.0  ;;  %v9167_v25 = vsel %vm1315_vm8, %v1273_v31, 0.0  ;;  %11014 = vst [vmem:[#allocation96_spill] sm:$0xff] %v9258_v63  ;;  %v11029_v60 = vld [vmem:[#allocation135_spill] sm:$0xff] }
 0x2c3   :  { %v1338_v37 = vadd.f32 %v1337_v3, %v1336_v61  ;;  %v1556_v10 = vmul.f32 %v8813_v56, %v10857_v33  ;;  %v1557_v28 = vmul.f32 %v8817_v59, %v10858_v2  ;;  %v1558_v19 = vmul.f32 %v8833_v18, %v10862_v5  ;;  %v11019_v61 = vld [vmem:[#allocation42_spill] sm:$0xff] }
 0x2c4   :  { %v9176_v1 = vsel %vm1315_vm8, %v1274_v45, 0.0  ;;  %v9179_v6 = vsel %vm1315_vm8, %v1275_v20, 0.0  ;;  %v9182_v0 = vsel %vm1315_vm8, %v1276_v14, 0.0  ;;  %v9185_v26 = vsel %vm1315_vm8, %v1277_v40, 0.0  ;;  %v9195_v59 = vpop.xlane.xlu1 %3558  ;;  %v9236_v14 = vld [vmem:[%s10320_s7 + $0x78] sm:$0xff]  ;;  %v9246_v40 = vld [vmem:[%s10320_s7 + $0x88] sm:$0xff] }
 0x2c5   :  { %v1340_v36 = vadd.f32 %v1339_v34, %v1338_v37  ;;  %v9188_v33 = vsel %vm1315_vm8, %v1278_v44, 0.0  ;;  %v9191_v56 = vsel %vm1315_vm8, %v1279_v32, 0.0  ;;  %v1559_v2 = vmul.f32 %v8837_v24, %v10863_v62  ;;  %11003 = vst [vmem:[#allocation93_spill] sm:$0xff] %v9195_v59  ;;  %v9216_v62 = vld [vmem:[%s10320_s7 + $0x68] sm:$0xff]  ;;  %11010 = vst [vmem:[#allocation90_spill] sm:$0xff] %v9236_v14 }
 0x2c6   :  { %11001 = vst [vmem:[#allocation113_spill] sm:$0xff] %v9188_v33  ;;  %11002 = vst [vmem:[#allocation115_spill] sm:$0xff] %v9191_v56  ;;  %v9198_v5 = vsel %vm1315_vm8, %v1280_v13, 0.0  ;;  %v9201_v18 = vsel %vm1315_vm8, %v1281_v30, 0.0  ;;  %v9204_v39 = vsel %vm1315_vm8, %v1282_v21, 0.0  ;;  %v1560_v7 = vmul.f32 %v8858_v17, %v10868_v52  ;;  %v9225_v17 = vld [vmem:[%s10320_s7 + $0x70] sm:$0xff] }
 0x2c7   :  { %11004 = vst [vmem:[#allocation117_spill] sm:$0xff] %v9198_v5  ;;  %11005 = vst [vmem:[#allocation87_spill] sm:$0xff] %v9201_v18  ;;  %v1342_v15 = vadd.f32 %v1341_v16, %v1340_v36  ;;  %v1620_v24 = vsel %vm1315_vm8, %v1556_v10, 0.0  ;;  %v1621_v43 = vsel %vm1315_vm8, %v1557_v28, 0.0  ;;  %v1623_v31 = vsel %vm1315_vm8, %v1558_v19, 0.0  ;;  %v9274_v16 = vld [vmem:[%s10320_s7 + $0xa0] sm:$0xff] }
 0x2c8   :  { %11006 = vst [vmem:[#allocation119_spill] sm:$0xff] %v9204_v39  ;;  %11008 = vst [vmem:[#allocation120_spill] sm:$0xff] %v9216_v62  ;;  %4909 = vrcp.f32 %v9016_v51  ;;  %v1536_v52 = vmul.f32 %v8719_v35, %v9211_v27  ;;  %v9231_v45 = vmul.f32 %v8721_v41, %v9216_v62  ;;  %v1622_v47 = vadd.f32 %v1621_v43, %v1620_v24  ;;  %v9241_v51 = vld [vmem:[%s10320_s7 + $0x80] sm:$0xff]  ;;  %v9253_v13 = vpop.xlane.xlu1 %3609  ;;  %v11020_v10 = vld [vmem:[#allocation75_spill] sm:$0xff] }
 0x2c9   :  { %11009 = vst [vmem:[#allocation89_spill] sm:$0xff] %v9225_v17  ;;  %v1344_v20 = vadd.f32 %v1343_v54, %v1342_v15  ;;  %11011 = vst [vmem:[#allocation94_spill] sm:$0xff] %v9241_v51  ;;  %v1538_v57 = vmul.f32 %v8734_v50, %v9225_v17  ;;  %v1561_v44 = vmul.f32 %v8862_v58, %v8655_v55  ;;  %v1625_v32 = vsel %vm1315_vm8, %v1559_v2, 0.0  ;;  %v9269_v58 = vld [vmem:[%s10320_s7 + $0x98] sm:$0xff]  ;;  %v9279_v54 = vld [vmem:[%s10320_s7 + $0xa8] sm:$0xff] }
 0x2ca   :  { %11012 = vst [vmem:[#allocation91_spill] sm:$0xff] %v9246_v40  ;;  %11013 = vst [vmem:[#allocation95_spill] sm:$0xff] %v9253_v13  ;;  %v1539_v30 = vmul.f32 %v8736_v9, %v9236_v14  ;;  %v1540_v21 = vmul.f32 %v8738_v49, %v9241_v51  ;;  %v1541_v3 = vmul.f32 %v11015_v48, %v9246_v40  ;;  %v1627_v19 = vsel %vm1315_vm8, %v1560_v7, 0.0  ;;  %v9289_v36 = vld [vmem:[%s10320_s7 + $0xb0] sm:$0xff]  ;;  %v11023_v2 = vld [vmem:[#allocation52_spill] sm:$0xff] }
 0x2cb   :  { %v1624_v34 = vadd.f32 %v1623_v31, %v1622_v47  ;;  %v1346_v55 = vadd.f32 %v1345_v12, %v1344_v20  ;;  %11016 = vst [vmem:[#allocation97_spill] sm:$0xff] %v9269_v58  ;;  %11017 = vst [vmem:[#allocation98_spill] sm:$0xff] %v9274_v16  ;;  %v1542_v37 = vmul.f32 %v11019_v61, %v9258_v63  ;;  %v11021_v12 = vld [vmem:[#allocation149_spill] sm:$0xff]  ;;  %v11025_v31 = vld [vmem:[#allocation134_spill] sm:$0xff] }
 0x2cc   :  { %11018 = vst [vmem:[#allocation121_spill] sm:$0xff] %v9279_v54  ;;  %v1562_v28 = vmul.f32 %v11021_v12, %v11020_v10  ;;  %11022 = vst [vmem:[#allocation99_spill] sm:$0xff] %v9289_v36  ;;  %v1543_v15 = vmul.f32 %v11023_v2, %v9269_v58  ;;  %v11024_v24 = vld [vmem:[#allocation133_spill] sm:$0xff]  ;;  %v1545_v47 = vmul.f32 %v11025_v31, %v9279_v54  ;;  %v9300_v7 = vld [vmem:[%s10320_s7 + $0xb8] sm:$0xff] }
 0x2cd   :  { %v1544_v43 = vmul.f32 %v11024_v24, %v9274_v16  ;;  %v1626_v20 = vadd.f32 %v1625_v32, %v1624_v34  ;;  %v1348_v59 = vadd.f32 %v1347_v11, %v1346_v55  ;;  %11026 = vst [vmem:[#allocation100_spill] sm:$0xff] %v9300_v7  ;;  %v9305_v10 = vld [vmem:[%s10320_s7 + $0xc0] sm:$0xff]  ;;  %v9310_v12 = vld [vmem:[%s10320_s7 + $0xc8] sm:$0xff]  ;;  %v1546_v54 = vmul.f32 %v11029_v60, %v9289_v36  ;;  %v9317_v16 = vpop.xlane.xlu1 %3513  ;;  %v11036_v36 = vld [vmem:[#allocation139_spill] sm:$0xff] }
 0x2ce   :  { %11027 = vst [vmem:[#allocation123_spill] sm:$0xff] %v9305_v10  ;;  %11028 = vst [vmem:[#allocation125_spill] sm:$0xff] %v9310_v12  ;;  %v11030_v32 = vld [vmem:[#allocation76_spill] sm:$0xff]  ;;  %v11031_v11 = vld [vmem:[#allocation150_spill] sm:$0xff]  ;;  %v1629_v55 = vsel %vm1315_vm8, %v1561_v44, 0.0  ;;  %v9330_v51 = vmul.f32 %v11036_v36, %v9310_v12 }
 0x2cf   :  { %v1563_v34 = vmul.f32 %v11031_v11, %v11030_v32  ;;  %11032 = vst [vmem:[#allocation101_spill] sm:$0xff] %v9317_v16  ;;  %v11034_v58 = vld [vmem:[#allocation137_spill] sm:$0xff]  ;;  %v11035_v40 = vld [vmem:[#allocation138_spill] sm:$0xff]  ;;  %v1628_v32 = vadd.f32 %v1627_v19, %v1626_v20  ;;  %v1350_v44 = vadd.f32 %v9150_v38, %v1348_v59  ;;  %v9336_v11 = vld [vmem:[%s10320_s7 + $0xd8] sm:$0xff]  ;;  %v1631_v19 = vsel %vm1315_vm8, %v1562_v28, 0.0 }
 0x2d0   :  { %v1547_v63 = vmul.f32 %v11034_v58, %v9300_v7  ;;  %v1548_v13 = vmul.f32 %v11035_v40, %v9305_v10  ;;  %11037 = vst [vmem:[#allocation128_spill] sm:$0xff] %v9336_v11  ;;  %v9341_v16 = vld [vmem:[%s10320_s7 + $0xe0] sm:$0xff]  ;;  %v11039_v7 = vld [vmem:[#allocation142_spill] sm:$0xff]  ;;  %v11041_v39 = vld [vmem:[#allocation151_spill] sm:$0xff] }
 0x2d1   :  { %11038 = vst [vmem:[#allocation102_spill] sm:$0xff] %v9341_v16  ;;  %v1550_v10 = vmul.f32 %v11039_v7, %v9322_v53  ;;  %v11040_v14 = vld [vmem:[#allocation80_spill] sm:$0xff]  ;;  %v11042_v38 = vld [vmem:[#allocation143_spill] sm:$0xff]  ;;  %v11045_v17 = vld [vmem:[#allocation81_spill] sm:$0xff]  ;;  %v1630_v22 = vadd.f32 %v1629_v55, %v1628_v32  ;;  %v1352_v5 = vadd.f32 %v9153_v4, %v1350_v44  ;;  %v9362_v56 = vpop.xlane.xlu1 %3612  ;;  %v1569_v32 = vmul.f32 %v9231_v45, %v8721_v41 }
 0x2d2   :  { %v1564_v12 = vmul.f32 %v11041_v39, %v11040_v14  ;;  %v1551_v59 = vmul.f32 %v11042_v38, %v9336_v11  ;;  %v11043_v20 = vld [vmem:[#allocation144_spill] sm:$0xff]  ;;  %v11048_v53 = vld [vmem:[#allocation154_spill] sm:$0xff]  ;;  %v1633_v39 = vsel %vm1315_vm8, %v1563_v34, 0.0  ;;  %v11050_v11 = vld [vmem:[#allocation51_spill] sm:$0xff]  ;;  %v1570_v44 = vmul.f32 %v1538_v57, %v8734_v50  ;;  %v9389_v57 = vpop.xlane.xlu0 %3549 }
 0x2d3   :  { %v9352_v42 = vmul.f32 %v11043_v20, %v9341_v16  ;;  %v11046_v18 = vld [vmem:[#allocation152_spill] sm:$0xff]  ;;  %v1566_v27 = vmul.f32 %v11048_v53, %v11047_v8  ;;  %v11051_v33 = vld [vmem:[#allocation155_spill] sm:$0xff]  ;;  %v11052_v20 = vld [vmem:[#allocation141_spill] sm:$0xff]  ;;  %v1354_v55 = vadd.f32 %v9158_v46, %v1352_v5  ;;  %v1568_v8 = vmul.f32 %v1536_v52, %v8719_v35 }
 0x2d4   :  { %v1565_v62 = vmul.f32 %v11046_v18, %v11045_v17  ;;  %v11049_v14 = vld [vmem:[#allocation140_spill] sm:$0xff]  ;;  %v1567_v16 = vmul.f32 %v11051_v33, %v11050_v11  ;;  %v1722_v18 = vsel %vm1315_vm8, %v11052_v20, 0.0  ;;  %v11053_v17 = vld [vmem:[#allocation145_spill] sm:$0xff]  ;;  %v1635_v53 = vsel %vm1315_vm8, %v1564_v12, 0.0 }
 0x2d5   :  { %11044 = vst [vmem:[#allocation103_spill] sm:$0xff] %v9352_v42  ;;  %v1721_v28 = vsel %vm1315_vm8, %v11049_v14, 0.0  ;;  %v1632_v42 = vadd.f32 %v1631_v19, %v1630_v22  ;;  %v1724_v4 = vsel %vm1315_vm8, %v11053_v17, 0.0  ;;  %v11054_v22 = vld [vmem:[#allocation146_spill] sm:$0xff]  ;;  %v4910_v19 = vpop.eup %4909  ;;  %v1356_v20 = vadd.f32 %v9161_v29, %v1354_v55  ;;  %v9381_v5 = vpop.xlane.xlu1 %3660 }
 0x2d6   :  { %v1723_v34 = vadd.f32 %v1722_v18, %v1721_v28  ;;  %v1726_v11 = vsel %vm1315_vm8, %v11054_v22, 0.0  ;;  %v1571_v14 = vmul.f32 %v1539_v30, %v8736_v9  ;;  %v1637_v46 = vsel %vm1315_vm8, %v1565_v62, 0.0  ;;  %v9440_v17 = vpop.xlane.xlu0 %3648 }
 0x2d7   :  { %v1634_v33 = vadd.f32 %v1633_v39, %v1632_v42  ;;  %v1572_v52 = vmul.f32 %v1540_v21, %v8738_v49  ;;  %v9385_v41 = vmul.f32 %v1541_v3, %v11015_v48  ;;  %v11055_v42 = vld [vmem:[#allocation61_spill] sm:$0xff]  ;;  %v1358_v29 = vadd.f32 %v9164_v23, %v1356_v20  ;;  %v11056_v48 = vld [vmem:[#allocation64_spill] sm:$0xff] }
 0x2d8   :  { %v1725_v35 = vadd.f32 %v1724_v4, %v1723_v34  ;;  %v1728_v45 = vsel %vm1315_vm8, %v11055_v42, 0.0  ;;  %v9393_v9 = vmul.f32 %v1542_v37, %v11019_v61  ;;  %v1639_v62 = vsel %vm1315_vm8, %v1566_v27, 0.0  ;;  %v11063_v42 = vld [vmem:[#allocation67_spill] sm:$0xff] }
 0x2d9   :  { %v1636_v50 = vadd.f32 %v1635_v53, %v1634_v33  ;;  %v9397_v12 = vmul.f32 %v1543_v15, %v11023_v2  ;;  %v9400_v49 = vmul.f32 %v1544_v43, %v11024_v24  ;;  %v1730_v3 = vsel %vm1315_vm8, %v11056_v48, 0.0  ;;  %v9409_v27 = vpop.xlane.xlu1 %3516  ;;  %v11057_v43 = vld [vmem:[#allocation65_spill] sm:$0xff]  ;;  %v11061_v33 = vld [vmem:[#allocation23_spill] sm:$0xff] }
 0x2da   :  { %v1727_v30 = vadd.f32 %v1726_v11, %v1725_v35  ;;  %v1360_v39 = vadd.f32 %v9167_v25, %v1358_v29  ;;  %v9406_v23 = vmul.f32 %v1545_v47, %v11025_v31  ;;  %v1641_v61 = vsel %vm1315_vm8, %v1567_v16, 0.0  ;;  %v11064_v48 = vld [vmem:[#allocation77_spill] sm:$0xff] }
 0x2db   :  { %v1638_v21 = vadd.f32 %v1637_v46, %v1636_v50  ;;  %v9412_v2 = vmul.f32 %v1546_v54, %v11029_v60  ;;  %v9415_v15 = vmul.f32 %v1547_v63, %v11034_v58  ;;  %v1732_v28 = vsel %vm1315_vm8, %v11057_v43, 0.0  ;;  %v3422_v60 = vld [vmem:[%s10325_s12 + $0x1c0] sm:$0xff]  ;;  %v3423_v63 = vld [vmem:[%s10325_s12 + $0x1c8] sm:$0xff]  ;;  %v3425_v46 = vld [vmem:[%s10325_s12 + $0x1d8] sm:$0xff] }
 0x2dc   :  { %v1729_v37 = vadd.f32 %v1728_v45, %v1727_v30  ;;  %v1362_v25 = vadd.f32 %v9176_v1, %v1360_v39  ;;  %v9421_v31 = vmul.f32 %v1548_v13, %v11035_v40  ;;  %v1643_v16 = vsel %vm1315_vm8, %v1568_v8, 0.0  ;;  %v11058_v13 = vld [vmem:[#allocation66_spill] sm:$0xff] }
 0x2dd   :  { %v1640_v24 = vadd.f32 %v1639_v62, %v1638_v21  ;;  %v9432_v58 = vmul.f32 %v9330_v51, %v11036_v36  ;;  %v9435_v1 = vmul.f32 %v1550_v10, %v11039_v7  ;;  %v1734_v54 = vsel %vm1315_vm8, %v11058_v13, 0.0  ;;  %v9446_v53 = vpop.xlane.xlu1 %3615  ;;  %v11059_v36 = vld [vmem:[#allocation148_spill] sm:$0xff]  ;;  %v11060_v10 = vld [vmem:[#allocation27_spill] sm:$0xff]  ;;  %v11065_v39 = vld [vmem:[#allocation38_spill] sm:$0xff] }
 0x2de   :  { %v1731_v47 = vadd.f32 %v1730_v3, %v1729_v37  ;;  %v1364_v18 = vadd.f32 %v9179_v6, %v1362_v25  ;;  %v9443_v4 = vmul.f32 %v1551_v59, %v11042_v38  ;;  %v1645_v55 = vsel %vm1315_vm8, %v1569_v32, 0.0  ;;  %v11062_v38 = vld [vmem:[#allocation83_spill] sm:$0xff]  ;;  %v9478_v25 = vpop.xlane.xlu0 %3651 }
 0x2df   :  { %v1642_v40 = vadd.f32 %v1641_v61, %v1640_v24  ;;  %v1736_v7 = vsel %vm1315_vm8, %v11059_v36, 0.0  ;;  %v3486_v34 = vmul.f32 %v11060_v10, %v3422_v60  ;;  %v3487_v22 = vmul.f32 %v11061_v33, %v3423_v63  ;;  %v3424_v32 = vld [vmem:[%s10325_s12 + $0x1d0] sm:$0xff]  ;;  %v3427_v24 = vld [vmem:[%s10325_s12 + $0x1e8] sm:$0xff]  ;;  %v3429_v36 = vld [vmem:[%s10325_s12 + $0x1f8] sm:$0xff] }
 0x2e0   :  { %v1733_v8 = vadd.f32 %v1732_v28, %v1731_v47  ;;  %v1366_v6 = vadd.f32 %v9182_v0, %v1364_v18  ;;  %v1647_v11 = vsel %vm1315_vm8, %v1570_v44, 0.0  ;;  %v3693_v59 = vmul.f32 %v4910_v19, %v11062_v38  ;;  %v11068_v63 = vld [vmem:[#allocation153_spill] sm:$0xff]  ;;  %v11072_v33 = vld [vmem:[#allocation40_spill] sm:$0xff] }
 0x2e1   :  { %v1644_v51 = vadd.f32 %v1643_v16, %v1642_v40  ;;  %v1649_v50 = vsel %vm1315_vm8, %v1571_v14, 0.0  ;;  %v1738_v45 = vsel %vm1315_vm8, %v11063_v42, 0.0  ;;  %v3578_v0 = vadd.f32 %v3487_v22, %v3486_v34  ;;  %v9466_v30 = vpop.xlane.xlu1 %3519  ;;  %v11066_v14 = vld [vmem:[#allocation34_spill] sm:$0xff]  ;;  %v3426_v16 = vld [vmem:[%s10325_s12 + $0x1e0] sm:$0xff] }
 0x2e2   :  { %v1735_v20 = vadd.f32 %v1734_v54, %v1733_v8  ;;  %v1368_v44 = vadd.f32 %v9185_v26, %v1366_v6  ;;  %v1651_v29 = vsel %vm1315_vm8, %v1572_v52, 0.0  ;;  %v3753_v62 = vadd.f32 1e-07, %v3693_v59  ;;  %v11067_v26 = vld [vmem:[#allocation113_spill] sm:$0xff]  ;;  %v11069_v54 = vld [vmem:[#allocation115_spill] sm:$0xff]  ;;  %v11070_v8 = vld [vmem:[#allocation14_spill] sm:$0xff] }
 0x2e3   :  { %v1646_v35 = vadd.f32 %v1645_v55, %v1644_v51  ;;  %v1740_v3 = vsel %vm1315_vm8, %v11064_v48, 0.0  ;;  %3579 = vadd.xlane.f32.xlu1 %v3578_v0  ;;  %v3488_v61 = vmul.f32 %v11065_v39, %v3424_v32  ;;  %v3489_v37 = vmul.f32 %v11066_v14, %v3425_v46  ;;  %v11073_v6 = vld [vmem:[#allocation85_spill] sm:$0xff]  ;;  %v11075_v59 = vld [vmem:[#allocation107_spill] sm:$0xff]  ;;  %v9521_v39 = vpop.xlane.xlu0 %3555 }
 0x2e4   :  { %v1737_v19 = vadd.f32 %v1736_v7, %v1735_v20  ;;  %v1370_v43 = vadd.f32 %v11067_v26, %v1368_v44  ;;  %v1653_v52 = vsel %vm1315_vm8, %v9385_v41, 0.0  ;;  %4911 = vlog2.f32 %v3753_v62  ;;  %v3428_v46 = vld [vmem:[%s10325_s12 + $0x1f0] sm:$0xff]  ;;  %v11080_v26 = vld [vmem:[#allocation56_spill] sm:$0xff] }
 0x2e5   :  { %v1648_v21 = vadd.f32 %v1647_v11, %v1646_v35  ;;  %v1655_v60 = vsel %vm1315_vm8, %v9393_v9, 0.0  ;;  %v1742_v40 = vsel %vm1315_vm8, %v11068_v63, 0.0  ;;  %v3581_v13 = vadd.f32 %v3489_v37, %v3488_v61  ;;  %v9494_v7 = vpop.xlane.xlu1 %3618  ;;  %v11071_v9 = vld [vmem:[#allocation88_spill] sm:$0xff]  ;;  %v11074_v11 = vld [vmem:[#allocation117_spill] sm:$0xff]  ;;  %v11077_v0 = vld [vmem:[#allocation55_spill] sm:$0xff] }
 0x2e6   :  { %v1739_v28 = vadd.f32 %v1738_v45, %v1737_v19  ;;  %v1372_v18 = vadd.f32 %v11069_v54, %v1370_v43  ;;  %v1657_v41 = vsel %vm1315_vm8, %v9397_v12, 0.0  ;;  %v3491_v51 = vmul.f32 %v11070_v8, %v3427_v24  ;;  %v11078_v19 = vld [vmem:[#allocation87_spill] sm:$0xff]  ;;  %v11079_v37 = vld [vmem:[#allocation89_spill] sm:$0xff] }
 0x2e7   :  { %v1650_v47 = vadd.f32 %v1649_v50, %v1648_v21  ;;  %v1744_v34 = vsel %vm1315_vm8, %v11071_v9, 0.0  ;;  %3582 = vadd.xlane.f32.xlu1 %v3581_v13  ;;  %v3490_v22 = vmul.f32 %v11072_v33, %v3426_v16  ;;  %4913 = vrcp.f32 %v11073_v6  ;;  %v11076_v50 = vld [vmem:[#allocation120_spill] sm:$0xff]  ;;  %v11083_v13 = vld [vmem:[#allocation90_spill] sm:$0xff] }
 0x2e8   :  { %v1741_v55 = vadd.f32 %v1740_v3, %v1739_v28  ;;  %v1374_v12 = vadd.f32 %v11074_v11, %v1372_v18  ;;  %v1659_v20 = vsel %vm1315_vm8, %v9400_v49, 0.0  ;;  %v3787_v32 = vmul.f32 0.6931472, %v11075_v59  ;;  %v1885_v49 = vld [vmem:[%s10322_s9 + $0x98] sm:$0xff] }
 0x2e9   :  { %v1652_v10 = vadd.f32 %v1651_v29, %v1650_v47  ;;  %v1746_v42 = vsel %vm1315_vm8, %v11076_v50, 0.0  ;;  %v3584_v45 = vadd.f32 %v3491_v51, %v3490_v22  ;;  %v3493_v44 = vmul.f32 %v11077_v0, %v3429_v36  ;;  %v1853_v29 = vld [vmem:[%s10321_s8 + $0x98] sm:$0xff]  ;;  %v9523_v61 = vpop.xlane.xlu1 %3666  ;;  %v11084_v36 = vld [vmem:[#allocation94_spill] sm:$0xff] }
 0x2ea   :  { %v1743_v38 = vadd.f32 %v1742_v40, %v1741_v55  ;;  %v1376_v62 = vadd.f32 %v11078_v19, %v1374_v12  ;;  %v1661_v21 = vsel %vm1315_vm8, %v9406_v23, 0.0  ;;  %v1663_v48 = vsel %vm1315_vm8, %v9412_v2, 0.0  ;;  %v11082_v28 = vld [vmem:[#allocation119_spill] sm:$0xff]  ;;  %v1855_v2 = vld [vmem:[%s10321_s8 + $0xa8] sm:$0xff]  ;;  %v9547_v12 = vpop.xlane.xlu0 %3654 }
 0x2eb   :  { %v1654_v35 = vadd.f32 %v1653_v52, %v1652_v10  ;;  %v1748_v24 = vsel %vm1315_vm8, %v11079_v37, 0.0  ;;  %3585 = vadd.xlane.f32.xlu1 %v3584_v45  ;;  %v3492_v43 = vmul.f32 %v11080_v26, %v3428_v46  ;;  %v11081_v52 = vld [vmem:[#allocation111_spill] sm:$0xff]  ;;  %vm3982_vm12 = vcmp.eq.f32.partialorder %v3787_v32, %v3787_v32 }
 0x2ec   :  { %v1745_v3 = vadd.f32 %v1744_v34, %v1743_v38  ;;  %4915 = vrcp.f32 %v11081_v52  ;;  %v1378_v16 = vadd.f32 %v11082_v28, %v1376_v62  ;;  %v1917_v47 = vmul.f32 %v1885_v49, %v1853_v29  ;;  %v11086_v59 = vld [vmem:[#allocation95_spill] sm:$0xff]  ;;  %v11089_v49 = vld [vmem:[#allocation97_spill] sm:$0xff] }
 0x2ed   :  { %v1656_v14 = vadd.f32 %v1655_v60, %v1654_v35  ;;  %v1887_v60 = vld [vmem:[%s10322_s9 + $0xa8] sm:$0xff]  ;;  %v1665_v40 = vsel %vm1315_vm8, %v9415_v15, 0.0  ;;  %v1750_v54 = vsel %vm1315_vm8, %v11083_v13, 0.0  ;;  %v3587_v18 = vadd.f32 %v3493_v44, %v3492_v43  ;;  %v9544_v9 = vpop.xlane.xlu1 %3522  ;;  %v11087_v50 = vld [vmem:[#allocation91_spill] sm:$0xff] }
 0x2ee   :  { %v1747_v23 = vadd.f32 %v1746_v42, %v1745_v3  ;;  %v1379_v55 = vrot.slane %v1378_v16, 4  ;;  %v1667_v8 = vsel %vm1315_vm8, %v9421_v31, 0.0  ;;  %v1752_v10 = vsel %vm1315_vm8, %v11084_v36, 0.0  ;;  %v1857_v45 = vld [vmem:[%s10321_s8 + $0xb8] sm:$0xff]  ;;  %v11090_v3 = vld [vmem:[#allocation78_spill] sm:$0xff] }
 0x2ef   :  { %v1658_v63 = vadd.f32 %v1657_v41, %v1656_v14  ;;  %v4014_v33 = vsel %vm3982_vm12, %v3787_v32, 0.0  ;;  %v11085_v41 = vmov 0.0   ;;  %3588 = vadd.xlane.f32.xlu1 %v3587_v18  ;;  %v1919_v15 = vmul.f32 %v1887_v60, %v1855_v2  ;;  %v11088_v32 = vld [vmem:[#allocation96_spill] sm:$0xff]  ;;  %v11091_v37 = vld [vmem:[#allocation79_spill] sm:$0xff]  ;;  %v11092_v60 = vld [vmem:[#allocation109_spill] sm:$0xff] }
 0x2f0   :  { %v1749_v51 = vadd.f32 %v1748_v24, %v1747_v23  ;;  %v4083_v22 = vsel %vm3982_vm12, 1.0, %v11085_v41  ;;  %v1380_v6 = vadd.f32 %v1379_v55, %v1378_v16  ;;  %v1987_v38 = vsel %vm175_vm1, %v1917_v47, 0.0  ;;  %v1889_v0 = vld [vmem:[%s10322_s9 + $0xb8] sm:$0xff]  ;;  %v1891_v13 = vld [vmem:[%s10322_s9 + $0xc8] sm:$0xff] }
 0x2f1   :  { %v1660_v34 = vadd.f32 %v1659_v20, %v1658_v63  ;;  %4917 = vrcp.f32 %v11086_v59  ;;  %v4912_v31 = vpop.eup %4911  ;;  %v1669_v35 = vsel %vm1315_vm8, %v9432_v58, 0.0  ;;  %v1754_v20 = vsel %vm1315_vm8, %v11087_v50, 0.0  ;;  %v9565_v62 = vpop.xlane.xlu1 %3621 }
 0x2f2   :  { %v1751_v11 = vadd.f32 %v1750_v54, %v1749_v51  ;;  %v1756_v42 = vsel %vm1315_vm8, %v11088_v32, 0.0  ;;  %v1381_v44 = vrot.slane %v1380_v6, 2  ;;  %v1758_v19 = vsel %vm1315_vm8, %v11089_v49, 0.0  ;;  %v11094_v32 = vld [vmem:[#allocation121_spill] sm:$0xff]  ;;  %v1491_v49 = vld [vmem:[%s10319_s6 + $0xf8] sm:$0xff] }
 0x2f3   :  { %v1662_v46 = vadd.f32 %v1661_v21, %v1660_v34  ;;  %v3789_v58 = vmul.f32 0.6931472, %v4912_v31  ;;  %v4045_v14 = vadd.f32 %v11090_v3, %v4014_v33  ;;  %v4114_v24 = vadd.f32 %v11091_v37, %v4083_v22  ;;  %1988 = vadd.xlane.f32.xlu1 %v1987_v38  ;;  %v1490_v34 = vld [vmem:[%s10319_s6 + $0xf0] sm:$0xff]  ;;  %v11097_v37 = vld [vmem:[#allocation144_spill] sm:$0xff] }
 0x2f4   :  { %v1753_v29 = vadd.f32 %v1752_v10, %v1751_v11  ;;  %v1993_v26 = vsel %vm175_vm1, %v1919_v15, 0.0  ;;  %v4914_v43 = vpop.eup %4913  ;;  %v1382_v52 = vadd.f32 %v1381_v44, %v1380_v6  ;;  %v1921_v16 = vmul.f32 %v1889_v0, %v1857_v45  ;;  %v1458_v10 = vld [vmem:[%s10318_s5 + $0xf0] sm:$0xff]  ;;  %v1861_v0 = vld [vmem:[%s10321_s8 + $0xd8] sm:$0xff] }
 0x2f5   :  { %v1664_v21 = vadd.f32 %v1663_v48, %v1662_v46  ;;  %vm3983_vm13 = vcmp.eq.f32.partialorder %v3789_v58, %v3789_v58  ;;  %v3695_v63 = vmul.f32 %v4914_v43, %v11092_v60  ;;  %v1859_v48 = vld [vmem:[%s10321_s8 + $0xc8] sm:$0xff]  ;;  %v9584_v36 = vpop.xlane.xlu1 %3525  ;;  %v1671_v22 = vsel %vm1315_vm8, %v9435_v1, 0.0  ;;  %v1893_v44 = vld [vmem:[%s10322_s9 + $0xd8] sm:$0xff] }
 0x2f6   :  { %v1755_v28 = vadd.f32 %v1754_v20, %v1753_v29  ;;  %v4015_v47 = vsel %vm3983_vm13, %v3789_v58, 0.0  ;;  %v4084_v2 = vsel %vm3983_vm13, 1.0, %v11085_v41  ;;  %v1383_v54 = vrot.slane %v1382_v52, 1  ;;  %v11093_v15 = vld [vmem:[#allocation98_spill] sm:$0xff]  ;;  %v11096_v58 = vld [vmem:[#allocation147_spill] sm:$0xff] }
 0x2f7   :  { %v1666_v23 = vadd.f32 %v1665_v40, %v1664_v21  ;;  %v9578_v55 = vadd.f32 %v4045_v14, %v4015_v47  ;;  %v9580_v51 = vadd.f32 %v4114_v24, %v4084_v2  ;;  %v9582_v40 = vpop.xlane.xlu0 %3657  ;;  %v1760_v6 = vsel %vm1315_vm8, %v11093_v15, 0.0  ;;  %1994 = vadd.xlane.f32.xlu1 %v1993_v26  ;;  %v9600_v20 = vld [vmem:[%s10320_s7 + $0xe8] sm:$0xff]  ;;  %v11098_v24 = vld [vmem:[#allocation103_spill] sm:$0xff] }
 0x2f8   :  { %v1757_v18 = vadd.f32 %v1756_v42, %v1755_v28  ;;  %v3754_v11 = vadd.f32 1e-07, %v3695_v63  ;;  %v1384_v59 = vadd.f32 %v1383_v54, %v1382_v52  ;;  %v1999_v46 = vsel %vm175_vm1, %v1921_v16, 0.0  ;;  %v11095_v42 = vld [vmem:[#allocation86_spill] sm:$0xff]  ;;  %v11099_v52 = vld [vmem:[#allocation99_spill] sm:$0xff] }
 0x2f9   :  { %v1668_v33 = vadd.f32 %v1667_v8, %v1666_v23  ;;  %v4916_v38 = vpop.eup %4915  ;;  %v1923_v50 = vmul.f32 %v1891_v13, %v1859_v48  ;;  %v1762_v1 = vsel %vm1315_vm8, %v11094_v32, 0.0  ;;  %v1553_v21 = vmul.f32 %v11096_v58, %v9600_v20  ;;  %v9621_v14 = vpop.xlane.xlu1 %3624  ;;  %v11100_v13 = vld [vmem:[#allocation39_spill] sm:$0xff]  ;;  %v1895_v15 = vld [vmem:[%s10322_s9 + $0xe8] sm:$0xff] }
 0x2fa   :  { %v1759_v31 = vadd.f32 %v1758_v19, %v1757_v18  ;;  %4919 = vlog2.f32 %v3754_v11  ;;  %v3697_v45 = vmul.f32 %v4916_v38, %v11095_v42  ;;  %v9611_v29 = vmul.f32 0.00390625, %v1384_v59  ;;  %v11101_v54 = vld [vmem:[#allocation35_spill] sm:$0xff]  ;;  %v11103_v38 = vld [vmem:[#allocation101_spill] sm:$0xff] }
 0x2fb   :  { %v1670_v8 = vadd.f32 %v1669_v35, %v1668_v33  ;;  %v1459_v35 = vld [vmem:[%s10318_s5 + $0xf8] sm:$0xff]  ;;  %v1522_v19 = vsub.f32 %v1458_v10, %v1490_v34  ;;  %v1584_v26 = vmul.f32 %v11098_v24, %v11097_v37  ;;  %v1764_v28 = vsel %vm1315_vm8, %v11099_v52, 0.0  ;;  %2000 = vadd.xlane.f32.xlu1 %v1999_v46  ;;  %v9630_v2 = vpop.xlane.xlu0 %3663  ;;  %v9640_v10 = vld [vmem:[%s10320_s7 + $0xf0] sm:$0xff]  ;;  %v11106_v37 = vld [vmem:[#allocation125_spill] sm:$0xff] }
 0x2fc   :  { %v1761_v3 = vadd.f32 %v1760_v6, %v1759_v31  ;;  %v3755_v16 = vadd.f32 1e-07, %v3697_v45  ;;  %1389 = vperm.xlu0 %4445, %v9611_v29   ;;  %v1673_v23 = vsel %vm1315_vm8, %v9443_v4, 0.0  ;;  %v2005_v60 = vsel %vm175_vm1, %v1923_v50, 0.0  ;;  %v11102_v33 = vld [vmem:[#allocation100_spill] sm:$0xff]  ;;  %v11104_v32 = vld [vmem:[#allocation123_spill] sm:$0xff] }
 0x2fd   :  { %v1672_v43 = vadd.f32 %v1671_v22, %v1670_v8  ;;  %v1925_v63 = vmul.f32 %v1893_v44, %v1861_v0  ;;  %v9635_v18 = vadd.f32 %v11101_v54, %v11100_v13  ;;  %v1523_v34 = vsub.f32 %v1459_v35, %v1491_v49  ;;  %v1863_v22 = vld [vmem:[%s10321_s8 + $0xe8] sm:$0xff]  ;;  %v9653_v31 = vpop.xlane.xlu1 %3672  ;;  %v5029_v35 = vld [vmem:[%s10323_s10] sm:$0xff] }
 0x2fe   :  { %v1763_v47 = vadd.f32 %v1762_v1, %v1761_v3  ;;  %v4918_v48 = vpop.eup %4917  ;;  %v1766_v4 = vsel %vm1315_vm8, %v11102_v33, 0.0  ;;  %4921 = vlog2.f32 %v3755_v16  ;;  %v1554_v6 = vmul.f32 %v1522_v19, %v9640_v10  ;;  %v11105_v44 = vld [vmem:[#allocation25_spill] sm:$0xff]  ;;  %v9672_v3 = vld [vmem:[%s10320_s7 + $0xf8] sm:$0xff] }
 0x2ff   :  { %4923 = vrcp.f32 %v9440_v17  ;;  %v3699_v59 = vmul.f32 %v4918_v48, %v11103_v38  ;;  %v1585_v46 = vmul.f32 %v1553_v21, %v11096_v58  ;;  %v1674_v50 = vadd.f32 %v1673_v23, %v1672_v43  ;;  %2006 = vadd.xlane.f32.xlu1 %v2005_v60  ;;  %v5030_v58 = vld [vmem:[%s10323_s10 + $0x8] sm:$0xff]  ;;  %v1897_v43 = vld [vmem:[%s10322_s9 + $0xf8] sm:$0xff]  ;;  %v9683_v23 = vpop.xlane.xlu0 %3669 }
 0x300   :  { %v1765_v11 = vadd.f32 %v1764_v28, %v1763_v47  ;;  %v1675_v8 = vsel %vm1315_vm8, %v1584_v26, 0.0  ;;  %v1768_v1 = vsel %vm1315_vm8, %v11104_v32, 0.0  ;;  %v2011_v45 = vsel %vm175_vm1, %v1925_v63, 0.0  ;;  %v1865_v26 = vld [vmem:[%s10321_s8 + $0xf8] sm:$0xff]  ;;  %v11112_v32 = vld [vmem:[#allocation58_spill] sm:$0xff] }
 0x301   :  { %v3756_v17 = vadd.f32 1e-07, %v3699_v59  ;;  %v1927_v0 = vmul.f32 %v1895_v15, %v1863_v22  ;;  %4925 = vrsqrt.f32 %v11105_v44  ;;  %v2255_v49 = vsel %vm1315_vm8, %v5029_v35, 0.0  ;;  %v9685_v47 = vpop.xlane.xlu1 %3528  ;;  %v11107_v48 = vld [vmem:[#allocation127_spill] sm:$0xff]  ;;  %v11108_v22 = vld [vmem:[#allocation22_spill] sm:$0xff] }
 0x302   :  { %v1767_v42 = vadd.f32 %v1766_v4, %v1765_v11  ;;  %v2256_v21 = vsel %vm1315_vm8, %v5030_v58, 0.0  ;;  %v1770_v24 = vsel %vm1315_vm8, %v11106_v37, 0.0  ;;  %v1555_v52 = vmul.f32 %v1523_v34, %v9672_v3  ;;  %v5031_v59 = vld [vmem:[%s10323_s10 + $0x10] sm:$0xff] }
 0x303   :  { %v1586_v28 = vmul.f32 %v1554_v6, %v1522_v19  ;;  %4927 = vlog2.f32 %v3756_v17  ;;  %v1676_v60 = vadd.f32 %v1675_v8, %v1674_v50  ;;  %v1677_v63 = vsel %vm1315_vm8, %v1585_v46, 0.0  ;;  %2012 = vadd.xlane.f32.xlu1 %v2011_v45  ;;  %v11109_v6 = vld [vmem:[#allocation128_spill] sm:$0xff]  ;;  %v11110_v46 = vld [vmem:[#allocation126_spill] sm:$0xff]  ;;  %v11111_v8 = vld [vmem:[#allocation71_spill] sm:$0xff] }
 0x304   :  { %v1769_v16 = vadd.f32 %v1768_v1, %v1767_v42  ;;  %v1772_v13 = vsel %vm1315_vm8, %v11107_v48, 0.0  ;;  %4929 = vrcp.f32 %v9362_v56  ;;  %v2017_v33 = vsel %vm175_vm1, %v1927_v0, 0.0  ;;  %v11113_v45 = vld [vmem:[#allocation136_spill] sm:$0xff]  ;;  %v11114_v35 = vld [vmem:[#allocation102_spill] sm:$0xff] }
 0x305   :  { %v1929_v4 = vmul.f32 %v1897_v43, %v1865_v26  ;;  %4931 = vrcp.f32 %v9446_v53  ;;  %v303_v19 = vrot.slane %v9635_v18, 4  ;;  %v2257_v15 = vadd.f32 %v2256_v21, %v2255_v49  ;;  %v9704_v42 = vpop.xlane.xlu1 %3627  ;;  %v9711_v26 = vpop.xlane.xlu0 %3675 }
 0x306   :  { %v1771_v54 = vadd.f32 %v1770_v24, %v1769_v16  ;;  %4933 = vrsqrt.f32 %v11108_v22  ;;  %v1774_v11 = vsel %vm1315_vm8, %v11109_v6, 0.0  ;;  %v2258_v56 = vsel %vm1315_vm8, %v5031_v59, 0.0 }
 0x307   :  { %v4920_v38 = vpop.eup %4919  ;;  %v3766_v50 = vadd.f32 1e-07, %v11110_v46  ;;  %v3721_v53 = vmul.f32 %v11112_v32, %v11111_v8  ;;  %v3723_v17 = vmul.f32 %v11113_v45, %v9389_v57  ;;  %v1678_v0 = vadd.f32 %v1677_v63, %v1676_v60  ;;  %2018 = vadd.xlane.f32.xlu1 %v2017_v33  ;;  %v11115_v46 = vld [vmem:[#allocation84_spill] sm:$0xff] }
 0x308   :  { %v1773_v1 = vadd.f32 %v1772_v13, %v1771_v54  ;;  %v1776_v49 = vsel %vm1315_vm8, %v11114_v35, 0.0  ;;  %v3791_v58 = vmul.f32 0.6931472, %v4920_v38  ;;  %v1587_v21 = vmul.f32 %v1555_v52, %v1523_v34 }
 0x309   :  { %v1679_v37 = vsel %vm1315_vm8, %v1586_v28, 0.0  ;;  %v2023_v43 = vsel %vm175_vm1, %v1929_v4, 0.0  ;;  %v1778_v16 = vsel %vm1315_vm8, %v9600_v20, 0.0  ;;  %v1780_v57 = vsel %vm1315_vm8, %v9640_v10, 0.0  ;;  %v9721_v52 = vpop.xlane.xlu1 %3531  ;;  %v3631_v32 = vpop.xlane.xlu0 %3630 }
 0x30a   :  { %v1775_v24 = vadd.f32 %v1774_v11, %v1773_v1  ;;  %vm3984_vm14 = vcmp.eq.f32.partialorder %v3791_v58, %v3791_v58  ;;  %4935 = vrcp.f32 %v9494_v7  ;;  %v1680_v13 = vadd.f32 %v1679_v37, %v1678_v0  ;;  %v5032_v11 = vld [vmem:[%s10323_s10 + $0x18] sm:$0xff]  ;;  %v11116_v37 = vld [vmem:[#allocation6_spill] sm:$0xff] }
 0x30b   :  { %v4922_v60 = vpop.eup %4921  ;;  %v4016_v48 = vsel %vm3984_vm14, %v3791_v58, 0.0  ;;  %v4085_v34 = vsel %vm3984_vm14, 1.0, %v11085_v41  ;;  %4937 = vrcp.f32 %v9565_v62  ;;  %2024 = vadd.xlane.f32.xlu1 %v2023_v43  ;;  %v2259_v10 = vadd.f32 %v2258_v56, %v2257_v15 }
 0x30c   :  { %v1777_v63 = vadd.f32 %v1776_v49, %v1775_v24  ;;  %v4924_v28 = vpop.eup %4923  ;;  %v4047_v54 = vadd.f32 %v9578_v55, %v4016_v48  ;;  %v4116_v20 = vadd.f32 %v9580_v51, %v4085_v34  ;;  %v3793_v33 = vmul.f32 0.6931472, %v4922_v60  ;;  %v11117_v34 = vld [vmem:[#allocation21_spill] sm:$0xff] }
 0x30d   :  { %v3767_v4 = vadd.f32 1e-07, %v3721_v53  ;;  %v1681_v7 = vsel %vm1315_vm8, %v1587_v21, 0.0  ;;  %v2260_v62 = vsel %vm1315_vm8, %v5032_v11, 0.0  ;;  %v3768_v38 = vadd.f32 1e-07, %v3723_v17  ;;  %v9737_v58 = vpop.xlane.xlu1 %3534 }
 0x30e   :  { %v1779_v6 = vadd.f32 %v1778_v16, %v1777_v63  ;;  %v1782_v59 = vsel %vm1315_vm8, %v9672_v3, 0.0  ;;  %vm3985_vm1 = vcmp.eq.f32.partialorder %v3793_v33, %v3793_v33  ;;  %v4926_v55 = vpop.eup %4925  ;;  %v3725_v8 = vmul.f32 %v4924_v28, %v11115_v46 }
 0x30f   :  { %v4017_v15 = vsel %vm3985_vm1, %v3793_v33, 0.0  ;;  %v4086_v56 = vsel %vm3985_vm1, 1.0, %v11085_v41  ;;  %4939 = vlog2.f32 %v3766_v50  ;;  %v1682_v1 = vadd.f32 %v1681_v7, %v1680_v13  ;;  %v5033_v50 = vld [vmem:[%s10323_s10 + $0x20] sm:$0xff] }
 0x310   :  { %v1781_v51 = vadd.f32 %v1780_v57, %v1779_v6  ;;  %v4928_v53 = vpop.eup %4927  ;;  %v4048_v45 = vadd.f32 %v4047_v54, %v4017_v15  ;;  %v4117_v0 = vadd.f32 %v4116_v20, %v4086_v56  ;;  %v9735_v17 = vadd.f32 %v303_v19, %v9635_v18  ;;  %v3634_v20 = vpop.xlane.xlu0 %3633 }
 0x311   :  { %v4930_v35 = vpop.eup %4929  ;;  %4941 = vlog2.f32 %v3767_v4  ;;  %v3795_v49 = vmul.f32 0.6931472, %v4928_v53  ;;  %vm677_vm15 = vcmp.eq.f32.partialorder %v11116_v37, inf  ;;  %v2261_v24 = vadd.f32 %v2260_v62, %v2259_v10  ;;  %v11118_v10 = vld [vmem:[#allocation59_spill] sm:$0xff]  ;;  %v9761_v62 = vpop.xlane.xlu1 %3537 }
 0x312   :  { %v1783_v3 = vadd.f32 %v1782_v59, %v1781_v51  ;;  %v4932_v21 = vpop.eup %4931  ;;  %v2262_v43 = vsel %vm1315_vm8, %v5033_v50, 0.0  ;;  %4943 = vlog2.f32 %v3768_v38  ;;  %v3769_v19 = vadd.f32 1e-07, %v3725_v8  ;;  %v5034_v59 = vld [vmem:[%s10323_s10 + $0x28] sm:$0xff] }
 0x313   :  { %v9744_v16 = vpop.eup %4933  ;;  %4945 = vrcp.f32 %v3631_v32  ;;  %vm3986_vm0 = vcmp.eq.f32.partialorder %v3795_v49, %v3795_v49  ;;  %v1683_v57 = vrot.slane %v1682_v1, 4  ;;  %v3701_v48 = vmul.f32 %v4930_v35, %v9409_v27  ;;  %v5035_v35 = vld [vmem:[%s10323_s10 + $0x30] sm:$0xff] }
 0x314   :  { %v1784_v18 = vrot.slane %v1783_v3, 4  ;;  %v4018_v60 = vsel %vm3986_vm0, %v3795_v49, 0.0  ;;  %v4087_v63 = vsel %vm3986_vm0, 1.0, %v11085_v41  ;;  %vm2631_vm2 = vcmp.eq.f32.partialorder %v11117_v34, 0.0 }
 0x315   :  { %v9749_v13 = vadd.f32 %v4048_v45, %v4018_v60  ;;  %v9751_v54 = vadd.f32 %v4117_v0, %v4087_v63  ;;  %v3703_v33 = vmul.f32 %v4932_v21, %v9466_v30  ;;  %v676_v4 = vmul.f32 %v11118_v10, %v11116_v37  ;;  %v3637_v45 = vpop.xlane.xlu0 %3636 }
 0x316   :  { %v1785_v28 = vadd.f32 %v1784_v18, %v1783_v3  ;;  %vm679_vm3 = vcmp.eq.f32.partialorder %v11116_v37, 0.0  ;;  %v680_v7 = vand.u32 2147483648, %v11116_v37  ;;  %4947 = vrcp.f32 %v9478_v25 }
 0x317   :  { %v4936_v27 = vpop.eup %4935  ;;  %vm684_vm4 = vcmp.eq.f32.partialorder %v11105_v44, inf  ;;  %v2263_v6 = vadd.f32 %v2262_v43, %v2261_v24  ;;  %4949 = vrcp.f32 %v9547_v12  ;;  %v683_v30 = vmul.f32 %v4926_v55, %v11105_v44  ;;  %v11119_v24 = vld [vmem:[#allocation50_spill] sm:$0xff] }
 0x318   :  { %v1786_v11 = vrot.slane %v1785_v28, 2  ;;  %v4938_v38 = vpop.eup %4937  ;;  %v2264_v51 = vsel %vm1315_vm8, %v5034_v59, 0.0  ;;  %4951 = vrcp.f32 %v3634_v20  ;;  %v3757_v25 = vadd.f32 1e-07, %v3701_v48  ;;  %v11121_v20 = vld [vmem:[#allocation53_spill] sm:$0xff] }
 0x319   :  { %v1684_v46 = vadd.f32 %v1683_v57, %v1682_v1  ;;  %4953 = vlog2.f32 %v3769_v19  ;;  %v3758_v15 = vadd.f32 1e-07, %v3703_v33  ;;  %v678_v12 = vsel %vm677_vm15, %v11116_v37, %v676_v4  ;;  %v11123_v37 = vld [vmem:[#allocation31_spill] sm:$0xff]  ;;  %v11124_v4 = vld [vmem:[#allocation37_spill] sm:$0xff] }
 0x31a   :  { %v1787_v8 = vadd.f32 %v1786_v11, %v1785_v28  ;;  %v687_v56 = vand.u32 2147483648, %v11105_v44  ;;  %v3705_v55 = vmul.f32 %v4936_v27, %v9544_v9  ;;  %4955 = vrcp.f32 %v9621_v14 }
 0x31b   :  { %v2265_v32 = vadd.f32 %v2264_v51, %v2263_v6  ;;  %4957 = vrcp.f32 %v9582_v40  ;;  %v3707_v1 = vmul.f32 %v4938_v38, %v9584_v36  ;;  %v685_v0 = vsel %vm684_vm4, %v11105_v44, %v683_v30  ;;  %v9785_v36 = vpop.xlane.xlu1 %3678  ;;  %v9816_v38 = vpop.xlane.xlu0 %3561 }
 0x31c   :  { %v1788_v53 = vrot.slane %v1787_v8, 1  ;;  %vm686_vm5 = vcmp.eq.f32.partialorder %v11105_v44, 0.0  ;;  %v2266_v9 = vsel %vm1315_vm8, %v5035_v35, 0.0  ;;  %4959 = vlog2.f32 %v3757_v25  ;;  %v4940_v14 = vpop.eup %4939 }
 0x31d   :  { %v305_v3 = vrot.slane %v9735_v17, 2  ;;  %v1685_v40 = vrot.slane %v1684_v46, 2  ;;  %4961 = vlog2.f32 %v3758_v15  ;;  %v11120_v50 = vand.u32 2147483648, %v11117_v34  ;;  %v11122_v34 = vld [vmem:[#allocation54_spill] sm:$0xff]  ;;  %v1810_v15 = vld [vmem:[%s10323_s10 + $0x40] sm:$0xff] }
 0x31e   :  { %v1789_v49 = vadd.f32 %v1788_v53, %v1787_v8  ;;  %v4942_v21 = vpop.eup %4941  ;;  %v681_v18 = vsel %vm679_vm3, %v680_v7, %v678_v12  ;;  %v3759_v19 = vadd.f32 1e-07, %v3705_v55  ;;  %4963 = vrcp.f32 %v9704_v42  ;;  %v5036_v42 = vld [vmem:[%s10323_s10 + $0x38] sm:$0xff]  ;;  %v11125_v55 = vld [vmem:[#allocation29_spill] sm:$0xff] }
 0x31f   :  { %v9792_v43 = vsel %vm2631_vm2, %v11120_v50, %v11119_v24  ;;  %v4944_v57 = vpop.eup %4943  ;;  %v688_v60 = vsel %vm686_vm5, %v687_v56, %v685_v0  ;;  %v2267_v63 = vadd.f32 %v2266_v9, %v2265_v32  ;;  %v3760_v48 = vadd.f32 1e-07, %v3707_v1  ;;  %v9824_v56 = vpop.xlane.xlu1 %3564 }
 0x320   :  { %4965 = vrcp.f32 %v1789_v49  ;;  %v4946_v28 = vpop.eup %4945  ;;  %v9800_v33 = vadd.f32 -1.0, %v11121_v20  ;;  %v9804_v10 = vmul.f32 %v11122_v34, %v11122_v34  ;;  %v3954_v7 = vadd.f32 %v11124_v4, %v11123_v37 }
 0x321   :  { %v2268_v44 = vsel %vm1315_vm8, %v5036_v42, 0.0  ;;  %v9813_v27 = vadd.f32 %v305_v3, %v9735_v17  ;;  %vm691_vm6 = vcmp.eq.f32.partialorder %v11108_v22, inf  ;;  %v3815_v6 = vmul.f32 0.6931472, %v4940_v14 }
 0x322   :  { %v1686_v11 = vadd.f32 %v1685_v40, %v1684_v46  ;;  %v4215_v30 = vadd.f32 -1.0, %v681_v18  ;;  %v4216_v59 = vadd.f32 -1.0, %v688_v60  ;;  %v690_v51 = vmul.f32 %v9744_v16, %v11108_v22  ;;  %v11126_v16 = vld [vmem:[#allocation92_spill] sm:$0xff]  ;;  %v9843_v18 = vpop.xlane.xlu0 %1958 }
 0x323   :  { %4967 = vlog2.f32 %v3759_v19  ;;  %v4948_v25 = vpop.eup %4947  ;;  %v2269_v8 = vadd.f32 %v2268_v44, %v2267_v63  ;;  %v3817_v17 = vmul.f32 0.6931472, %v4942_v21  ;;  %v3713_v12 = vmul.f32 %v4946_v28, %v9737_v58 }
 0x324   :  { %4969 = vlog2.f32 %v3760_v48  ;;  %v4950_v46 = vpop.eup %4949  ;;  %v9827_v32 = vadd.f32 %v3954_v7, %v11125_v55  ;;  %v2270_v53 = vsel %vm1315_vm8, %v1810_v15, 0.0  ;;  %v2034_v1 = vsub.f32 1.0, %v11126_v16  ;;  %v9863_v7 = vpop.xlane.xlu1 %1961 }
 0x325   :  { %4971 = vrcp.f32 %v3637_v45  ;;  %v4952_v0 = vpop.eup %4951  ;;  %v694_v9 = vand.u32 2147483648, %v11108_v22  ;;  %vm3996_vm7 = vcmp.eq.f32.partialorder %v3815_v6, %v3815_v6  ;;  %v1687_v14 = vrot.slane %v1686_v11, 1 }
 0x326   :  { %v4954_v3 = vpop.eup %4953  ;;  %v9833_v58 = vmul.f32 %v4215_v30, %v4215_v30  ;;  %v9835_v40 = vmul.f32 %v4216_v59, %v4216_v59  ;;  %v9840_v49 = vsel %vm691_vm6, %v11108_v22, %v690_v51  ;;  %v3715_v21 = vmul.f32 %v4952_v0, %v9761_v62  ;;  %v9855_v62 = vld [vmem:[%s10323_s10 + $0x48] sm:$0xff] }
 0x327   :  { %v4956_v45 = vpop.eup %4955  ;;  %v2271_v24 = vadd.f32 %v2270_v53, %v2269_v8  ;;  %vm3997_vm9 = vcmp.eq.f32.partialorder %v3817_v17, %v3817_v17  ;;  %v3819_v50 = vmul.f32 0.6931472, %v4944_v57  ;;  %v3763_v19 = vadd.f32 1e-07, %v3713_v12 }
 0x328   :  { %v4958_v60 = vpop.eup %4957  ;;  %v2066_v63 = vand.u32 2147483647, %v2034_v1  ;;  %v9846_v48 = vsel %vm3996_vm7, %v3815_v6, 0.0  ;;  %v9850_v28 = vsel %vm3996_vm7, 1.0, %v11085_v41  ;;  %v3709_v20 = vmul.f32 %v4956_v45, %v9685_v47 }
 0x329   :  { %v4960_v57 = vpop.eup %4959  ;;  %vm693_vm10 = vcmp.eq.f32.partialorder %v11108_v22, 0.0  ;;  %v1688_v34 = vadd.f32 %v1687_v14, %v1686_v11  ;;  %v3727_v37 = vmul.f32 %v4948_v25, %v9521_v39  ;;  %4973 = vrcp.f32 %v9381_v5  ;;  %v11127_v5 = vld [vmem:[#allocation93_spill] sm:$0xff] }
 0x32a   :  { %v2272_v4 = vsel %vm1315_vm8, %v9855_v62, 0.0  ;;  %v4962_v42 = vpop.eup %4961  ;;  %v9866_v44 = vsel %vm3997_vm9, %v3817_v17, 0.0  ;;  %4975 = vrcp.f32 %v9630_v2  ;;  %v3761_v47 = vadd.f32 1e-07, %v3709_v20  ;;  %v9879_v17 = vpop.xlane.xlu0 %3681 }
 0x32b   :  { %v3764_v6 = vadd.f32 1e-07, %v3715_v21  ;;  %v4964_v30 = vpop.eup %4963  ;;  %v9871_v11 = vsel %vm3997_vm9, 1.0, %v11085_v41  ;;  %vm3998_vm11 = vcmp.eq.f32.partialorder %v3819_v50, %v3819_v50  ;;  %v3729_v39 = vmul.f32 %v4950_v46, %v11127_v5  ;;  %11128 = vst [vmem:[#allocation129_spill] sm:$0xff] %v9879_v17  ;;  %v9886_v46 = vld [vmem:[%s10323_s10 + $0x58] sm:$0xff] }
 0x32c   :  { %4977 = vlog2.f32 %v3763_v19  ;;  %v3821_v51 = vmul.f32 0.6931472, %v4954_v3  ;;  %v2273_v25 = vadd.f32 %v2272_v4, %v2271_v24  ;;  %v3711_v8 = vmul.f32 %v4964_v30, %v9721_v52  ;;  %v9891_v52 = vld [vmem:[%s10323_s10 + $0x50] sm:$0xff]  ;;  %v3541_v3 = vpop.xlane.xlu1 %3540  ;;  %v9904_v24 = vld [vmem:[%s10323_s10 + $0x60] sm:$0xff] }
 0x32d   :  { %v4966_v59 = vpop.eup %4965  ;;  %4979 = vlog2.f32 %v3761_v47  ;;  %v3770_v2 = vadd.f32 1e-07, %v3727_v37  ;;  %v3731_v55 = vmul.f32 %v4958_v60, %v9816_v38  ;;  %v9881_v53 = vmul.f32 %v2066_v63, %v1810_v15 }
 0x32e   :  { %v9875_v12 = vmul.f32 %v4966_v59, %v1688_v34  ;;  %4981 = vrcp.f32 %v9683_v23  ;;  %v3797_v16 = vmul.f32 0.6931472, %v4960_v57  ;;  %v3762_v1 = vadd.f32 1e-07, %v3711_v8  ;;  %v9915_v47 = vpop.xlane.xlu0 %3567 }
 0x32f   :  { %4983 = vlog2.f32 %v3764_v6  ;;  %v3771_v38 = vadd.f32 1e-07, %v3729_v39  ;;  %v3799_v0 = vmul.f32 0.6931472, %v4962_v42  ;;  %v2276_v15 = vsel %vm1315_vm8, %v9886_v46, 0.0 }
 0x330   :  { %v4968_v23 = vpop.eup %4967  ;;  %1795 = vperm.xlu0 %4445, %v9875_v12   ;;  %v2274_v14 = vsel %vm1315_vm8, %v9891_v52, 0.0  ;;  %v9899_v45 = vsel %vm3998_vm11, %v3819_v50, 0.0  ;;  %vm3999_vm12 = vcmp.eq.f32.partialorder %v3821_v51, %v3821_v51  ;;  %4985 = vlog2.f32 %v3762_v1  ;;  %v9920_v50 = vld [vmem:[%s10323_s10 + $0x68] sm:$0xff] }
 0x331   :  { %v4970_v21 = vpop.eup %4969  ;;  %v2275_v19 = vadd.f32 %v2274_v14, %v2273_v25  ;;  %v9908_v63 = vsel %vm3998_vm11, 1.0, %v11085_v41  ;;  %4987 = vlog2.f32 %v3770_v2  ;;  %v3772_v20 = vadd.f32 1e-07, %v3731_v55  ;;  %11129 = vst [vmem:[#allocation104_spill] sm:$0xff] %v9920_v50 }
 0x332   :  { %v4972_v60 = vpop.eup %4971  ;;  %v2278_v57 = vsel %vm1315_vm8, %v9904_v24, 0.0  ;;  %vm3987_vm13 = vcmp.eq.f32.partialorder %v3797_v16, %v3797_v16  ;;  %v3801_v34 = vmul.f32 0.6931472, %v4968_v23  ;;  %v9913_v42 = vsel %vm3999_vm12, %v3821_v51, 0.0  ;;  %v9939_v22 = vpop.xlane.xlu0 %1964 }
 0x333   :  { %v2277_v37 = vadd.f32 %v2276_v15, %v2275_v19  ;;  %v3717_v4 = vmul.f32 %v4972_v60, %v3541_v3  ;;  %4989 = vlog2.f32 %v3771_v38  ;;  %vm3988_vm14 = vcmp.eq.f32.partialorder %v3799_v0, %v3799_v0 }
 0x334   :  { %v3803_v6 = vmul.f32 0.6931472, %v4970_v21  ;;  %v2280_v30 = vsel %vm1315_vm8, %v9920_v50, 0.0  ;;  %v695_v59 = vsel %vm693_vm10, %v694_v9, %v9840_v49  ;;  %v9931_v25 = vsel %vm3999_vm12, 1.0, %v11085_v41  ;;  %v9944_v9 = vld [vmem:[%s10323_s10 + $0x70] sm:$0xff]  ;;  %v9949_v49 = vld [vmem:[%s10323_s10 + $0x78] sm:$0xff] }
 0x335   :  { %v2279_v5 = vadd.f32 %v2278_v57, %v2277_v37  ;;  %v3765_v39 = vadd.f32 1e-07, %v3717_v4  ;;  %4991 = vlog2.f32 %v3772_v20  ;;  %v4019_v8 = vsel %vm3987_vm13, %v3797_v16, 0.0  ;;  %11130 = vst [vmem:[#allocation130_spill] sm:$0xff] %v9944_v9  ;;  %11131 = vst [vmem:[#allocation131_spill] sm:$0xff] %v9949_v49  ;;  %v11132_v37 = vld [vmem:[#allocation20_spill] sm:$0xff] }
 0x336   :  { %v4088_v2 = vsel %vm3987_vm13, 1.0, %v11085_v41  ;;  %v4974_v55 = vpop.eup %4973  ;;  %v4020_v1 = vsel %vm3988_vm14, %v3799_v0, 0.0  ;;  %v4089_v23 = vsel %vm3988_vm14, 1.0, %v11085_v41  ;;  %vm3989_vm1 = vcmp.eq.f32.partialorder %v3801_v34, %v3801_v34 }
 0x337   :  { %4993 = vlog2.f32 %v3765_v39  ;;  %v9937_v38 = vpop.eup %4975  ;;  %vm3990_vm15 = vcmp.eq.f32.partialorder %v3803_v6, %v3803_v6  ;;  %v3733_v51 = vmul.f32 %v4974_v55, %v9824_v56  ;;  %v2281_v16 = vadd.f32 %v2280_v30, %v2279_v5 }
 0x338   :  { %v4217_v0 = vadd.f32 -1.0, %v695_v59  ;;  %v4050_v14 = vadd.f32 %v9749_v13, %v4019_v8  ;;  %v4119_v3 = vadd.f32 %v9751_v54, %v4088_v2  ;;  %v2282_v21 = vsel %vm1315_vm8, %v9944_v9, 0.0 }
 0x339   :  { %v4978_v15 = vpop.eup %4977  ;;  %v2284_v19 = vsel %vm1315_vm8, %v9949_v49, 0.0  ;;  %v4021_v20 = vsel %vm3989_vm1, %v3801_v34, 0.0  ;;  %v4090_v57 = vsel %vm3989_vm1, 1.0, %v11085_v41  ;;  %v820_v4 = vadd.f32 %v11132_v37, %v9833_v58  ;;  %v9972_v58 = vld [vmem:[%s10323_s10 + $0x80] sm:$0xff] }
 0x33a   :  { %v4980_v60 = vpop.eup %4979  ;;  %v759_v56 = vmul.f32 %v4217_v0, %v4217_v0  ;;  %v4051_v13 = vadd.f32 %v4050_v14, %v4020_v1  ;;  %v4120_v54 = vadd.f32 %v4119_v3, %v4089_v23  ;;  %v4022_v5 = vsel %vm3990_vm15, %v3803_v6, 0.0  ;;  %11133 = vst [vmem:[#allocation105_spill] sm:$0xff] %v9972_v58  ;;  %v9974_v14 = vpop.xlane.xlu0 %1967 }
 0x33b   :  { %v9963_v30 = vpop.eup %4981  ;;  %v3805_v39 = vmul.f32 0.6931472, %v4980_v60  ;;  %v4091_v8 = vsel %vm3990_vm15, 1.0, %v11085_v41  ;;  %v3773_v2 = vadd.f32 1e-07, %v3733_v51  ;;  %v2283_v55 = vadd.f32 %v2282_v21, %v2281_v16 }
 0x33c   :  { %v4984_v59 = vpop.eup %4983  ;;  %v821_v34 = vadd.f32 %v820_v4, %v9835_v40  ;;  %v4052_v35 = vadd.f32 %v4051_v13, %v4021_v20  ;;  %v4121_v0 = vadd.f32 %v4120_v54, %v4090_v57  ;;  %v3809_v1 = vmul.f32 0.6931472, %v4978_v15  ;;  %v9982_v20 = vld [vmem:[%s10323_s10 + $0x88] sm:$0xff] }
 0x33d   :  { %vm3991_vm0 = vcmp.eq.f32.partialorder %v3805_v39, %v3805_v39  ;;  %v4986_v23 = vpop.eup %4985  ;;  %v2286_v6 = vsel %vm1315_vm8, %v9972_v58, 0.0  ;;  %11134 = vst [vmem:[#allocation132_spill] sm:$0xff] %v9982_v20  ;;  %v3811_v15 = vmul.f32 0.6931472, %v4984_v59  ;;  %v2288_v37 = vsel %vm1315_vm8, %v9982_v20, 0.0 }
 0x33e   :  { %v4023_v3 = vsel %vm3991_vm0, %v3805_v39, 0.0  ;;  %v4092_v51 = vsel %vm3991_vm0, 1.0, %v11085_v41  ;;  %v822_v16 = vadd.f32 %v821_v34, %v759_v56  ;;  %v4988_v40 = vpop.eup %4987  ;;  %v4053_v21 = vadd.f32 %v4052_v35, %v4022_v5 }
 0x33f   :  { %v4122_v60 = vadd.f32 %v4121_v0, %v4091_v8  ;;  %v3807_v57 = vmul.f32 0.6931472, %v4986_v23  ;;  %4995 = vlog2.f32 %v3773_v2  ;;  %v2285_v13 = vadd.f32 %v2284_v19, %v2283_v55  ;;  %v9990_v19 = vpop.xlane.xlu0 %1970  ;;  %v9995_v55 = vld [vmem:[%s10323_s10 + $0x90] sm:$0xff] }
 0x340   :  { %v823_v4 = vrot.slane %v822_v16, 4  ;;  %v4990_v54 = vpop.eup %4989  ;;  %v4054_v39 = vadd.f32 %v4053_v21, %v4023_v3  ;;  %vm3993_vm3 = vcmp.eq.f32.partialorder %v3809_v1, %v3809_v1  ;;  %v45_v8 = vlaneseq  ;;  %11136 = vst [vmem:[#allocation60_spill] sm:$0xff] %v9995_v55 }
 0x341   :  { %v4123_v58 = vadd.f32 %v4122_v60, %v4092_v51  ;;  %vm3992_vm2 = vcmp.eq.f32.partialorder %v3807_v57, %v3807_v57  ;;  %vm3994_vm4 = vcmp.eq.f32.partialorder %v3811_v15, %v3811_v15  ;;  %v11135_v59 = vrot.slane %v9813_v27, 1 }
 0x342   :  { %v4024_v35 = vsel %vm3992_vm2, %v3807_v57, 0.0  ;;  %v4093_v56 = vsel %vm3992_vm2, 1.0, %v11085_v41  ;;  %v824_v5 = vadd.f32 %v823_v4, %v822_v16  ;;  %v4992_v34 = vpop.eup %4991  ;;  %v4025_v3 = vsel %vm3993_vm3, %v3809_v1, 0.0 }
 0x343   :  { %v4055_v0 = vadd.f32 %v4054_v39, %v4024_v35  ;;  %v4124_v23 = vadd.f32 %v4123_v58, %v4093_v56  ;;  %v308_v2 = vadd.f32 %v11135_v59, %v9813_v27  ;;  %v4094_v51 = vsel %vm3993_vm3, 1.0, %v11085_v41 }
 0x344   :  { %v4994_v20 = vpop.eup %4993  ;;  %v825_v16 = vrot.slane %v824_v5, 2  ;;  %v2287_v21 = vadd.f32 %v2286_v6, %v2285_v13  ;;  %v2290_v58 = vsel %vm1315_vm8, %v9995_v55, 0.0  ;;  %v4026_v27 = vsel %vm3994_vm4, %v3811_v15, 0.0 }
 0x345   :  { %v4056_v60 = vadd.f32 %v4055_v0, %v4025_v3  ;;  %v4125_v57 = vadd.f32 %v4124_v23, %v4094_v51  ;;  %v3813_v4 = vmul.f32 0.6931472, %v4994_v20  ;;  %v4095_v39 = vsel %vm3994_vm4, 1.0, %v11085_v41  ;;  %v10008_v20 = vld [vmem:[%s10323_s10 + $0x98] sm:$0xff] }
 0x346   :  { %v826_v35 = vadd.f32 %v825_v16, %v824_v5  ;;  %v10001_v56 = vand.u32 127, %v45_v8  ;;  %v2289_v1 = vadd.f32 %v2288_v37, %v2287_v21  ;;  %v309_v6 = vmul.f32 0.0013020834, %v308_v2  ;;  %v10012_v37 = vpop.xlane.xlu0 %1973 }
 0x347   :  { %v4057_v59 = vadd.f32 %v4056_v60, %v4026_v27  ;;  %v4126_v49 = vadd.f32 %v4125_v57, %v4095_v39  ;;  %vm3995_vm5 = vcmp.eq.f32.partialorder %v3813_v4, %v3813_v4  ;;  %v3823_v17 = vmul.f32 0.6931472, %v4988_v40  ;;  %v11138_v27 = vld [vmem:[#allocation19_spill] sm:$0xff] }
 0x348   :  { %v4027_v9 = vsel %vm3995_vm5, %v3813_v4, 0.0  ;;  %v4096_v50 = vsel %vm3995_vm5, 1.0, %v11085_v41  ;;  %v827_v13 = vrot.slane %v826_v35, 1  ;;  %vm310_vm6 = vcmp.eq.s32.totalorder %v10001_v56, 1 }
 0x349   :  { %v4058_v55 = vadd.f32 %v4057_v59, %v4027_v9  ;;  %v4127_v0 = vadd.f32 %v4126_v49, %v4096_v50  ;;  %v1394_v15 = vmul.f32 0.05, %v9611_v29  ;;  %v3825_v5 = vmul.f32 0.6931472, %v4990_v54  ;;  %v10017_v50 = vpop.xlane.xlu1 %3684 }
 0x34a   :  { %4997 = vrcp.f32 %v9523_v61  ;;  %v828_v8 = vadd.f32 %v827_v13, %v826_v35  ;;  %vm830_vm7 = vcmp.eq.s32.totalorder %v10001_v56, 2  ;;  %v2291_v49 = vadd.f32 %v2290_v58, %v2289_v1  ;;  %v10038_v4 = vpop.xlane.xlu0 %1976 }
 0x34b   :  { %v4059_v23 = vadd.f32 %v4058_v55, %v9846_v48  ;;  %v4128_v9 = vadd.f32 %v4127_v0, %v9850_v28  ;;  %v3735_v40 = vmul.f32 %v9937_v38, %v9915_v47  ;;  %v311_v29 = vsel %vm310_vm6, %v309_v6, 0.0  ;;  %v10027_v48 = vld [vmem:[%s10323_s10 + $0xa0] sm:$0xff] }
 0x34c   :  { %v829_v2 = vmul.f32 0.00390625, %v828_v8  ;;  %v2292_v61 = vsel %vm1315_vm8, %v10008_v20, 0.0  ;;  %v4996_v54 = vpop.eup %4995  ;;  %vm4000_vm9 = vcmp.eq.f32.partialorder %v3823_v17, %v3823_v17  ;;  %v2035_v3 = vsub.f32 1.0, %v9843_v18 }
 0x34d   :  { %v4060_v28 = vadd.f32 %v4059_v23, %v9866_v44  ;;  %v4129_v55 = vadd.f32 %v4128_v9, %v9871_v11  ;;  %vm4001_vm10 = vcmp.eq.f32.partialorder %v3825_v5, %v3825_v5  ;;  %v3827_v47 = vmul.f32 0.6931472, %v4992_v34  ;;  %v11137_v34 = vld [vmem:[#allocation17_spill] sm:$0xff]  ;;  %v3571_v59 = vpop.xlane.xlu1 %3570  ;;  %v11139_v23 = vld [vmem:[#allocation15_spill] sm:$0xff] }
 0x34e   :  { %v833_v38 = vmul.f32 0.1, %v829_v2  ;;  %v831_v51 = vsel %vm830_vm7, %v829_v2, 0.0  ;;  %v2293_v58 = vadd.f32 %v2292_v61, %v2291_v49  ;;  %v1800_v60 = vmul.f32 0.1, %v9875_v12  ;;  %v10050_v12 = vld [vmem:[%s10323_s10 + $0xa8] sm:$0xff] }
 0x34f   :  { %v4061_v16 = vadd.f32 %v4060_v28, %v9899_v45  ;;  %v4130_v21 = vadd.f32 %v4129_v55, %v9908_v63  ;;  %v10035_v18 = vadd.f32 %v831_v51, %v311_v29  ;;  %v3774_v57 = vadd.f32 1e-07, %v3735_v40  ;;  %v11140_v49 = vld [vmem:[#allocation12_spill] sm:$0xff] }
 0x350   :  { %v2294_v44 = vsel %vm1315_vm8, %v10027_v48, 0.0  ;;  %v834_v11 = vadd.f32 %v833_v38, %v309_v6  ;;  %vm2643_vm11 = vcmp.eq.f32.partialorder %v11137_v34, inf  ;;  %vm2638_vm12 = vcmp.eq.f32.partialorder %v11138_v27, 0.0 }
 0x351   :  { %v4032_v45 = vsel %vm4000_vm9, %v3823_v17, 0.0  ;;  %v3829_v39 = vmul.f32 0.6931472, %v4996_v54  ;;  %v4062_v63 = vadd.f32 %v4061_v16, %v9913_v42  ;;  %v4131_v35 = vadd.f32 %v4130_v21, %v9931_v25  ;;  %v3574_v16 = vpop.xlane.xlu1 %3573 }
 0x352   :  { %v4101_v1 = vsel %vm4000_vm9, 1.0, %v11085_v41  ;;  %v4033_v6 = vsel %vm4001_vm10, %v3825_v5, 0.0  ;;  %4999 = vrcp.f32 %v9653_v31  ;;  %v1395_v13 = vadd.f32 %v1394_v15, %v834_v11  ;;  %v10069_v31 = vld [vmem:[%s10323_s10 + $0xb0] sm:$0xff] }
 0x353   :  { %vm4002_vm13 = vcmp.eq.f32.partialorder %v3827_v47, %v3827_v47  ;;  %v4063_v0 = vadd.f32 %v4062_v63, %v4032_v45  ;;  %v4132_v8 = vadd.f32 %v4131_v35, %v4101_v1  ;;  %v2295_v42 = vadd.f32 %v2294_v44, %v2293_v58  ;;  %v10092_v45 = vld [vmem:[%s10323_s10 + $0xb8] sm:$0xff] }
 0x354   :  { %vm2650_vm14 = vcmp.eq.f32.partialorder %v11139_v23, inf  ;;  %v4102_v25 = vsel %vm4001_vm10, 1.0, %v11085_v41  ;;  %v10059_v9 = vadd.f32 %v1800_v60, %v1395_v13  ;;  %v2296_v17 = vsel %vm1315_vm8, %v10050_v12, 0.0  ;;  %v11141_v60 = vld [vmem:[#allocation13_spill] sm:$0xff]  ;;  %v11142_v63 = vld [vmem:[#allocation47_spill] sm:$0xff] }
 0x355   :  { %v3956_v40 = vadd.f32 %v9827_v32, %v11140_v49  ;;  %vm2645_vm1 = vcmp.eq.f32.partialorder %v11137_v34, 0.0  ;;  %vm4003_vm15 = vcmp.eq.f32.partialorder %v3829_v39, %v3829_v39  ;;  %v2036_v15 = vsub.f32 1.0, %v9863_v7  ;;  %v10075_v32 = vpop.xlane.xlu0 %1979 }
 0x356   :  { %v4064_v5 = vadd.f32 %v4063_v0, %v4033_v6  ;;  %v4133_v2 = vadd.f32 %v4132_v8, %v4102_v25  ;;  %v4034_v29 = vsel %vm4002_vm13, %v3827_v47, 0.0  ;;  %v4103_v61 = vsel %vm4002_vm13, 1.0, %v11085_v41  ;;  %v11145_v25 = vld [vmem:[#allocation48_spill] sm:$0xff] }
 0x357   :  { %v2067_v54 = vand.u32 2147483647, %v2035_v3  ;;  %5001 = vlog2.f32 %v3774_v57  ;;  %v4998_v28 = vpop.eup %4997  ;;  %v2037_v55 = vsub.f32 1.0, %v9939_v22  ;;  %v2297_v21 = vadd.f32 %v2296_v17, %v2295_v42 }
 0x358   :  { %v4065_v38 = vadd.f32 %v4064_v5, %v4034_v29  ;;  %v4134_v51 = vadd.f32 %v4133_v2, %v4103_v61  ;;  %v2298_v7 = vsel %vm1315_vm8, %v10069_v31, 0.0  ;;  %v4035_v58 = vsel %vm4003_vm15, %v3829_v39, 0.0  ;;  %v11143_v39 = vld [vmem:[#allocation49_spill] sm:$0xff]  ;;  %v3577_v29 = vpop.xlane.xlu1 %3576 }
 0x359   :  { %v4104_v47 = vsel %vm4003_vm15, 1.0, %v11085_v41  ;;  %v3957_v3 = vadd.f32 %v3956_v40, %v9804_v10  ;;  %vm2657_vm0 = vcmp.eq.f32.partialorder %v11141_v60, inf  ;;  %v2068_v57 = vand.u32 2147483647, %v2036_v15  ;;  %v10113_v40 = vpop.xlane.xlu0 %1982  ;;  %v11146_v15 = vld [vmem:[#allocation11_spill] sm:$0xff] }
 0x35a   :  { %v3737_v44 = vmul.f32 %v4998_v28, %v3571_v59  ;;  %v10085_v11 = vadd.f32 %v4065_v38, %v4035_v58  ;;  %v10087_v22 = vadd.f32 %v4134_v51, %v4104_v47  ;;  %vm2652_vm2 = vcmp.eq.f32.partialorder %v11139_v23, 0.0  ;;  %v11149_v38 = vld [vmem:[#allocation16_spill] sm:$0xff] }
 0x35b   :  { %v2644_v10 = vsel %vm2643_vm11, %v11137_v34, %v11142_v63  ;;  %v11144_v35 = vand.u32 2147483648, %v11138_v27  ;;  %v4300_v1 = vadd.f32 -1.0, %v9792_v43  ;;  %v3895_v6 = vmul.f32 %v9800_v33, %v9800_v33  ;;  %v11147_v33 = vld [vmem:[#allocation46_spill] sm:$0xff] }
 0x35c   :  { %v2169_v13 = vsel %vm1315_vm8, %v9881_v53, 0.0  ;;  %v2099_v0 = vmul.f32 %v2067_v54, %v9855_v62  ;;  %v2038_v8 = vsub.f32 1.0, %v9974_v14  ;;  %v2299_v42 = vadd.f32 %v2298_v7, %v2297_v21  ;;  %v10125_v53 = vld [vmem:[%s10323_s10 + $0xc0] sm:$0xff] }
 0x35d   :  { %v2640_v59 = vsel %vm2638_vm12, %v11144_v35, %v11143_v39  ;;  %v2656_v17 = vmul.f32 %v11145_v25, %v11141_v60  ;;  %v2069_v49 = vand.u32 2147483647, %v2037_v55  ;;  %v2300_v43 = vsel %vm1315_vm8, %v10092_v45, 0.0  ;;  %v10150_v35 = vpop.xlane.xlu0 %1985 }
 0x35e   :  { %v3958_v27 = vadd.f32 %v3957_v3, %v3895_v6  ;;  %vm2666_vm3 = vcmp.eq.f32.partialorder %v11146_v15, 0.0  ;;  %v2651_v62 = vsel %vm2650_vm14, %v11139_v23, %v11147_v33  ;;  %v2100_v14 = vmul.f32 %v2068_v57, %v9891_v52 }
 0x35f   :  { %v3775_v5 = vadd.f32 1e-07, %v3737_v44  ;;  %v3739_v2 = vmul.f32 %v9963_v30, %v3574_v16  ;;  %vm2659_vm4 = vcmp.eq.f32.partialorder %v11141_v60, 0.0  ;;  %v11148_v61 = vand.u32 2147483648, %v11137_v34  ;;  %v5000_v21 = vpop.eup %4999 }
 0x360   :  { %v4301_v28 = vadd.f32 -1.0, %v2640_v59  ;;  %v3896_v55 = vmul.f32 %v4300_v1, %v4300_v1  ;;  %v2170_v51 = vadd.f32 %v2169_v13, %v11149_v38  ;;  %5003 = vrcp.f32 %v9711_v26  ;;  %v10145_v26 = vld [vmem:[%s10323_s10 + $0xc8] sm:$0xff] }
 0x361   :  { %v2647_v54 = vsel %vm2645_vm1, %v11148_v61, %v2644_v10  ;;  %v2171_v52 = vsel %vm1315_vm8, %v2099_v0, 0.0  ;;  %v2070_v7 = vand.u32 2147483647, %v2038_v8  ;;  %v2301_v58 = vadd.f32 %v2300_v43, %v2299_v42  ;;  %v11154_v38 = vld [vmem:[#allocation129_spill] sm:$0xff] }
 0x362   :  { %v2101_v30 = vmul.f32 %v2069_v49, %v9886_v46  ;;  %v2302_v16 = vsel %vm1315_vm8, %v10125_v53, 0.0  ;;  %v3741_v47 = vmul.f32 %v5000_v21, %v3577_v29  ;;  %v3959_v3 = vadd.f32 %v3958_v27, %v3896_v55 }
 0x363   :  { %v2039_v34 = vsub.f32 1.0, %v9990_v19  ;;  %v2173_v57 = vsel %vm1315_vm8, %v2100_v14, 0.0  ;;  %5005 = vlog2.f32 %v3775_v5  ;;  %v3776_v44 = vadd.f32 1e-07, %v3739_v2 }
 0x364   :  { %v2658_v46 = vsel %vm2657_vm0, %v11141_v60, %v2656_v17  ;;  %v4302_v63 = vadd.f32 -1.0, %v2647_v54  ;;  %v3897_v10 = vmul.f32 %v4301_v28, %v4301_v28  ;;  %v2172_v39 = vadd.f32 %v2171_v52, %v2170_v51  ;;  %v5002_v59 = vpop.eup %5001  ;;  %v1992_v54 = vpop.xlane.xlu0 %1991  ;;  %v11155_v51 = vld [vmem:[#allocation104_spill] sm:$0xff] }
 0x365   :  { %v11150_v19 = vand.u32 2147483648, %v11139_v23  ;;  %v2102_v6 = vmul.f32 %v2070_v7, %v9904_v24  ;;  %5007 = vrcp.f32 %v9785_v36  ;;  %v2303_v13 = vadd.f32 %v2302_v16, %v2301_v58  ;;  %v10165_v23 = vld [vmem:[%s10323_s10 + $0xd0] sm:$0xff]  ;;  %v11151_v24 = vld [vmem:[#allocation45_spill] sm:$0xff] }
 0x366   :  { %v2174_v0 = vadd.f32 %v2173_v57, %v2172_v39  ;;  %v3777_v8 = vadd.f32 1e-07, %v3741_v47  ;;  %v2304_v42 = vsel %vm1315_vm8, %v10145_v26, 0.0  ;;  %v3960_v25 = vadd.f32 %v3959_v3, %v3897_v10  ;;  %v11156_v16 = vld [vmem:[#allocation41_spill] sm:$0xff]  ;;  %v11157_v3 = vld [vmem:[#allocation43_spill] sm:$0xff] }
 0x367   :  { %v2654_v1 = vsel %vm2652_vm2, %v11150_v19, %v2651_v62  ;;  %v2175_v17 = vsel %vm1315_vm8, %v2101_v30, 0.0  ;;  %v2071_v49 = vand.u32 2147483647, %v2039_v34  ;;  %v2040_v43 = vsub.f32 1.0, %v10012_v37  ;;  %v11158_v19 = vld [vmem:[#allocation130_spill] sm:$0xff] }
 0x368   :  { %5009 = vlog2.f32 %v3776_v44  ;;  %v11152_v36 = vand.u32 2147483648, %v11146_v15  ;;  %v4303_v33 = vadd.f32 -1.0, %v2654_v1  ;;  %v3898_v62 = vmul.f32 %v4302_v63, %v4302_v63 }
 0x369   :  { %v2041_v14 = vsub.f32 1.0, %v10038_v4  ;;  %v11153_v5 = vand.u32 2147483648, %v11141_v60  ;;  %v3831_v2 = vmul.f32 0.6931472, %v5002_v59  ;;  %v2042_v29 = vsub.f32 1.0, %v10075_v32  ;;  %v10186_v60 = vld [vmem:[%s10323_s10 + $0xd8] sm:$0xff] }
 0x36a   :  { %v2668_v27 = vsel %vm2666_vm3, %v11152_v36, %v11151_v24  ;;  %v2305_v61 = vadd.f32 %v2304_v42, %v2303_v13  ;;  %v2306_v28 = vsel %vm1315_vm8, %v10165_v23, 0.0  ;;  %v2176_v55 = vadd.f32 %v2175_v17, %v2174_v0  ;;  %v11160_v36 = vld [vmem:[#allocation105_spill] sm:$0xff] }
 0x36b   :  { %v2661_v37 = vsel %vm2659_vm4, %v11153_v5, %v2658_v46  ;;  %5011 = vlog2.f32 %v3777_v8  ;;  %v3961_v15 = vadd.f32 %v3960_v25, %v3898_v62  ;;  %v2177_v4 = vsel %vm1315_vm8, %v2102_v6, 0.0  ;;  %v10204_v6 = vld [vmem:[%s10323_s10 + $0xe0] sm:$0xff]  ;;  %v11159_v8 = vld [vmem:[#allocation131_spill] sm:$0xff] }
 0x36c   :  { %5013 = vrcp.f32 %v11154_v38  ;;  %v2103_v21 = vmul.f32 %v2071_v49, %v11155_v51  ;;  %v2072_v52 = vand.u32 2147483647, %v2040_v43  ;;  %v4304_v32 = vadd.f32 -1.0, %v2661_v37  ;;  %v1998_v49 = vpop.xlane.xlu0 %1997  ;;  %v3580_v43 = vpop.xlane.xlu1 %3579  ;;  %v11161_v51 = vld [vmem:[#allocation132_spill] sm:$0xff] }
 0x36d   :  { %v3899_v7 = vmul.f32 %v4303_v33, %v4303_v33  ;;  %v2073_v58 = vand.u32 2147483647, %v2041_v14  ;;  %v2043_v30 = vsub.f32 1.0, %v10113_v40  ;;  %v10191_v47 = vmul.f32 %v11156_v16, %v11156_v16  ;;  %v5004_v46 = vpop.eup %5003 }
 0x36e   :  { %v10195_v34 = vmul.f32 %v11157_v3, %v11157_v3  ;;  %v2074_v57 = vand.u32 2147483647, %v2042_v29  ;;  %v2307_v44 = vadd.f32 %v2306_v28, %v2305_v61  ;;  %vm4004_vm5 = vcmp.eq.f32.partialorder %v3831_v2, %v3831_v2 }
 0x36f   :  { %v2178_v63 = vadd.f32 %v2177_v4, %v2176_v55  ;;  %v2308_v10 = vsel %vm1315_vm8, %v10186_v60, 0.0  ;;  %v3962_v39 = vadd.f32 %v3961_v15, %v3899_v7  ;;  %v4305_v59 = vadd.f32 -1.0, %v2668_v27  ;;  %v10217_v15 = vld [vmem:[%s10323_s10 + $0xe8] sm:$0xff] }
 0x370   :  { %v2179_v40 = vsel %vm1315_vm8, %v2103_v21, 0.0  ;;  %v2104_v1 = vmul.f32 %v2072_v52, %v11158_v19  ;;  %5015 = vrcp.f32 %v10017_v50  ;;  %v5006_v13 = vpop.eup %5005  ;;  %v3900_v0 = vmul.f32 %v4304_v32, %v4304_v32  ;;  %v3583_v32 = vpop.xlane.xlu1 %3582 }
 0x371   :  { %v2105_v42 = vmul.f32 %v2073_v58, %v11159_v8  ;;  %v2075_v25 = vand.u32 2147483647, %v2043_v30  ;;  %v2044_v17 = vsub.f32 1.0, %v10150_v35  ;;  %v4036_v24 = vsel %vm4004_vm5, %v3831_v2, 0.0  ;;  %v2004_v3 = vpop.xlane.xlu0 %2003 }
 0x372   :  { %v2106_v27 = vmul.f32 %v2074_v57, %v11160_v36  ;;  %v3743_v33 = vmul.f32 %v5004_v46, %v3580_v43  ;;  %v2309_v62 = vadd.f32 %v2308_v10, %v2307_v44  ;;  %v5008_v14 = vpop.eup %5007  ;;  %v2046_v5 = vsub.f32 1.0, %v1992_v54  ;;  %v10227_v44 = vld [vmem:[%s10323_s10 + $0xf0] sm:$0xff] }
 0x373   :  { %v2310_v50 = vsel %vm1315_vm8, %v10204_v6, 0.0  ;;  %v2180_v37 = vadd.f32 %v2179_v40, %v2178_v63  ;;  %v3963_v29 = vadd.f32 %v3962_v39, %v3900_v0  ;;  %v3901_v61 = vmul.f32 %v4305_v59, %v4305_v59 }
 0x374   :  { %v2181_v28 = vsel %vm1315_vm8, %v2104_v1, 0.0  ;;  %v3833_v55 = vmul.f32 0.6931472, %v5006_v13  ;;  %v3778_v35 = vadd.f32 1e-07, %v3743_v33  ;;  %v4105_v4 = vsel %vm4004_vm5, 1.0, %v11085_v41  ;;  %v3586_v8 = vpop.xlane.xlu1 %3585 }
 0x375   :  { %v5010_v38 = vpop.eup %5009  ;;  %v2183_v54 = vsel %vm1315_vm8, %v2105_v42, 0.0  ;;  %v2107_v21 = vmul.f32 %v2075_v25, %v11161_v51  ;;  %v2076_v52 = vand.u32 2147483647, %v2044_v17  ;;  %v2185_v7 = vsel %vm1315_vm8, %v2106_v27, 0.0 }
 0x376   :  { %5017 = vlog2.f32 %v3778_v35  ;;  %v3745_v58 = vmul.f32 %v5008_v14, %v3583_v32  ;;  %v2311_v30 = vadd.f32 %v2310_v50, %v2309_v62  ;;  %v2078_v16 = vand.u32 2147483647, %v2046_v5  ;;  %v11162_v14 = vld [vmem:[#allocation60_spill] sm:$0xff] }
 0x377   :  { %v2182_v57 = vadd.f32 %v2181_v28, %v2180_v37  ;;  %v2312_v2 = vsel %vm1315_vm8, %v10217_v15, 0.0  ;;  %v3964_v46 = vadd.f32 %v3963_v29, %v3901_v61  ;;  %vm4005_vm6 = vcmp.eq.f32.partialorder %v3833_v55, %v3833_v55  ;;  %v2010_v29 = vpop.xlane.xlu0 %2009 }
 0x378   :  { %v5012_v63 = vpop.eup %5011  ;;  %v4136_v10 = vadd.f32 %v10087_v22, %v4105_v4  ;;  %v3835_v39 = vmul.f32 0.6931472, %v5010_v38  ;;  %v3779_v59 = vadd.f32 1e-07, %v3745_v58  ;;  %v2187_v19 = vsel %vm1315_vm8, %v2107_v21, 0.0  ;;  %v3589_v28 = vpop.xlane.xlu1 %3588  ;;  %v11163_v58 = vld [vmem:[#allocation5_spill] sm:$0xff] }
 0x379   :  { %v5014_v40 = vpop.eup %5013  ;;  %v2048_v1 = vsub.f32 1.0, %v1998_v49  ;;  %v2050_v13 = vsub.f32 1.0, %v2004_v3  ;;  %v4067_v0 = vadd.f32 %v10085_v11, %v4036_v24  ;;  %v2314_v42 = vsel %vm1315_vm8, %v10227_v44, 0.0  ;;  %v10243_v11 = vld [vmem:[%s10323_s10 + $0xf8] sm:$0xff]  ;;  %s5061_s10 = smov [#allocation2]  }
 0x37a   :  { %5019 = vlog2.f32 %v3779_v59  ;;  %v3747_v25 = vmul.f32 %v5014_v40, %v3586_v8  ;;  %v2313_v17 = vadd.f32 %v2312_v2, %v2311_v30  ;;  %v4106_v43 = vsel %vm4005_vm6, 1.0, %v11085_v41  ;;  %s4178_s9 = sshll.u32 %s5061_s10, 4  ;;  %s4179_s9 = int_to_ptr.vmem [resolvable:$true] %s4178_s9 }
 0x37b   :  { %v3837_v22 = vmul.f32 0.6931472, %v5012_v63  ;;  %v2184_v36 = vadd.f32 %v2183_v54, %v2182_v57  ;;  %v3965_v27 = vadd.f32 %v3964_v46, %v10195_v34  ;;  %v4037_v33 = vsel %vm4005_vm6, %v3833_v55, 0.0  ;;  %s5037_s3 = scalar_lea.vmem %s4179_s9, 16  ;;  %s5041_s25 = scalar_lea.vmem %s4179_s9, 32 }
 0x37c   :  { %v4137_v49 = vadd.f32 %v4136_v10, %v4106_v43  ;;  %vm4006_vm7 = vcmp.eq.f32.partialorder %v3835_v39, %v3835_v39  ;;  %v3780_v62 = vadd.f32 1e-07, %v3747_v25  ;;  %v2108_v5 = vmul.f32 %v2076_v52, %v11162_v14  ;;  %v2016_v14 = vpop.xlane.xlu0 %2015  ;;  %p5038_p0 = scmp.ne.s32.totalorder %s4179_s9, %s5037_s3  ;;  %p5042_p1 = scmp.lt.s32.totalorder %s4179_s9, %s4179_s9 }
 0x37d   :  { %v5016_v24 = vpop.eup %5015  ;;  %v2080_v50 = vand.u32 2147483647, %v2048_v1  ;;  %v2082_v37 = vand.u32 2147483647, %v2050_v13  ;;  %v4068_v61 = vadd.f32 %v4067_v0, %v4037_v33  ;;  %v2052_v35 = vsub.f32 1.0, %v2010_v29  ;;  %v11164_v1 = vld [vmem:[#allocation18_spill] sm:$0xff]  ;;  %p5043_p2 = scmp.lt.s32.totalorder %s5041_s25, %s5037_s3 }
 0x37e   :  { %5021 = vlog2.f32 %v3780_v62  ;;  %v3749_v34 = vmul.f32 %v5016_v24, %v3589_v28  ;;  %v2315_v55 = vadd.f32 %v2314_v42, %v2313_v17  ;;  %v4107_v38 = vsel %vm4006_vm7, 1.0, %v11085_v41  ;;  %v11165_v62 = vld [vmem:[#allocation36_spill] sm:$0xff] }
 0x37f   :  { %v2186_v4 = vadd.f32 %v2185_v7, %v2184_v36  ;;  %v2316_v54 = vsel %vm1315_vm8, %v10243_v11, 0.0  ;;  %v3966_v51 = vadd.f32 %v3965_v27, %v10191_v47  ;;  %v4038_v21 = vsel %vm4006_vm7, %v3835_v39, 0.0  ;;  %v1989_v7 = vpop.xlane.xlu1 %1988  ;;  %p5044_p3 = por %p5043_p2, %p5042_p1 }
 0x380   :  { %v4138_v52 = vadd.f32 %v4137_v49, %v4107_v38  ;;  %vm4007_vm9 = vcmp.eq.f32.partialorder %v3837_v22, %v3837_v22  ;;  %v3781_v32 = vadd.f32 1e-07, %v3749_v34  ;;  %vm2722_vm10 = vcmp.eq.f32.partialorder %v11163_v58, 0.0 }
 0x381   :  { %v2110_v30 = vmul.f32 %v2078_v16, %v10027_v48  ;;  %v2112_v3 = vmul.f32 %v2080_v50, %v10069_v31  ;;  %v2114_v57 = vmul.f32 %v2082_v37, %v10125_v53  ;;  %v4069_v2 = vadd.f32 %v4068_v61, %v4038_v21  ;;  %p5045_p4 = pnand %p5044_p3, %p5038_p0 }
 0x382   :  { %v2189_v46 = vsel %vm1315_vm8, %v2108_v5, 0.0  ;;  %5023 = vlog2.f32 %v3781_v32  ;;  %v2045_v63 = vsub.f32 1.0, %v1989_v7  ;;  %v2317_v47 = vadd.f32 %v2316_v54, %v2315_v55 }
 0x383   :  { %v5018_v10 = vpop.eup %5017  ;;  %v2084_v39 = vand.u32 2147483647, %v2052_v35  ;;  %v4108_v59 = vsel %vm4007_vm9, 1.0, %v11085_v41  ;;  %v2188_v40 = vadd.f32 %v2187_v19, %v2186_v4  ;;  %v3967_v13 = vadd.f32 %v3966_v51, %v11164_v1  ;;  %v1995_v17 = vpop.xlane.xlu1 %1994 }
 0x384   :  { %v4039_v48 = vsel %vm4007_vm9, %v3837_v22, 0.0  ;;  %v4139_v31 = vadd.f32 %v4138_v52, %v4108_v59  ;;  %v3839_v16 = vmul.f32 0.6931472, %v5018_v10  ;;  %v2077_v53 = vand.u32 2147483647, %v2045_v63  ;;  %v2022_v59 = vpop.xlane.xlu0 %2021 }
 0x385   :  { %v2193_v0 = vsel %vm1315_vm8, %v2110_v30, 0.0  ;;  %v2197_v8 = vsel %vm1315_vm8, %v2112_v3, 0.0  ;;  %v10264_v42 = vsel %vm1315_vm8, %v2114_v57, 0.0  ;;  %v4070_v25 = vadd.f32 %v4069_v2, %v4039_v48  ;;  %v11168_v30 = vld [vmem:[#allocation32_spill] sm:$0xff] }
 0x386   :  { %vm4008_vm11 = vcmp.eq.f32.partialorder %v3839_v16, %v3839_v16  ;;  %v2109_v43 = vmul.f32 %v2077_v53, %v10008_v20  ;;  %v2047_v19 = vsub.f32 1.0, %v1995_v17  ;;  %v2318_v36 = vrot.slane %v2317_v47, 4 }
 0x387   :  { %v5020_v27 = vpop.eup %5019  ;;  %v2116_v22 = vmul.f32 %v2084_v39, %v10165_v23  ;;  %v4109_v33 = vsel %vm4008_vm11, 1.0, %v11085_v41  ;;  %v2190_v49 = vadd.f32 %v2189_v46, %v2188_v40  ;;  %v3968_v24 = vadd.f32 %v3967_v13, %v11165_v62  ;;  %v2001_v34 = vpop.xlane.xlu1 %2000  ;;  %v11166_v23 = vld [vmem:[#allocation8_spill] sm:$0xff] }
 0x388   :  { %v4040_v5 = vsel %vm4008_vm11, %v3839_v16, 0.0  ;;  %v4140_v50 = vadd.f32 %v4139_v31, %v4109_v33  ;;  %v3841_v37 = vmul.f32 0.6931472, %v5020_v27  ;;  %v2191_v29 = vsel %vm1315_vm8, %v2109_v43, 0.0  ;;  %v11169_v43 = vld [vmem:[#allocation30_spill] sm:$0xff] }
 0x389   :  { %v2054_v61 = vsub.f32 1.0, %v2016_v14  ;;  %v4071_v28 = vadd.f32 %v4070_v25, %v4040_v5  ;;  %v2192_v35 = vadd.f32 %v2191_v29, %v2190_v49  ;;  %v2079_v20 = vand.u32 2147483647, %v2047_v19  ;;  %v11170_v49 = vld [vmem:[#allocation7_spill] sm:$0xff] }
 0x38a   :  { %vm4009_vm12 = vcmp.eq.f32.partialorder %v3841_v37, %v3841_v37  ;;  %v2049_v55 = vsub.f32 1.0, %v2001_v34  ;;  %v2319_v38 = vadd.f32 %v2318_v36, %v2317_v47  ;;  %v11167_v4 = vand.u32 2147483648, %v11163_v58 }
 0x38b   :  { %v5022_v51 = vpop.eup %5021  ;;  %v4110_v21 = vsel %vm4009_vm12, 1.0, %v11085_v41  ;;  %v2111_v52 = vmul.f32 %v2079_v20, %v10050_v12  ;;  %v2194_v32 = vadd.f32 %v2193_v0, %v2192_v35  ;;  %v3969_v3 = vadd.f32 %v3968_v24, %v11168_v30  ;;  %v2007_v58 = vpop.xlane.xlu1 %2006 }
 0x38c   :  { %v2724_v54 = vsel %vm2722_vm10, %v11167_v4, %v11166_v23  ;;  %v4041_v57 = vsel %vm4009_vm12, %v3841_v37, 0.0  ;;  %v4141_v2 = vadd.f32 %v4140_v50, %v4110_v21  ;;  %v3843_v7 = vmul.f32 0.6931472, %v5022_v51 }
 0x38d   :  { %v2081_v46 = vand.u32 2147483647, %v2049_v55  ;;  %v2205_v63 = vsel %vm1315_vm8, %v2116_v22, 0.0  ;;  %v2086_v47 = vand.u32 2147483647, %v2054_v61  ;;  %v4072_v10 = vadd.f32 %v4071_v28, %v4041_v57 }
 0x38e   :  { %v2195_v39 = vsel %vm1315_vm8, %v2111_v52, 0.0  ;;  %vm4010_vm13 = vcmp.eq.f32.partialorder %v3843_v7, %v3843_v7  ;;  %v2051_v12 = vsub.f32 1.0, %v2007_v58  ;;  %v2056_v48 = vsub.f32 1.0, %v2022_v59 }
 0x38f   :  { %v2196_v40 = vadd.f32 %v2195_v39, %v2194_v32  ;;  %v2113_v1 = vmul.f32 %v2081_v46, %v10092_v45  ;;  %v5024_v13 = vpop.eup %5023  ;;  %v4111_v31 = vsel %vm4010_vm13, 1.0, %v11085_v41  ;;  %v2320_v16 = vrot.slane %v2319_v38, 2  ;;  %v2013_v33 = vpop.xlane.xlu1 %2012 }
 0x390   :  { %v4313_v53 = vadd.f32 -1.0, %v2724_v54  ;;  %v4142_v0 = vadd.f32 %v4141_v2, %v4111_v31  ;;  %v3845_v25 = vmul.f32 0.6931472, %v5024_v13  ;;  %v3970_v19 = vadd.f32 %v3969_v3, %v11169_v43 }
 0x391   :  { %v2198_v17 = vadd.f32 %v2197_v8, %v2196_v40  ;;  %v4042_v36 = vsel %vm4010_vm13, %v3843_v7, 0.0  ;;  %v2199_v27 = vsel %vm1315_vm8, %v2113_v1, 0.0  ;;  %v2083_v22 = vand.u32 2147483647, %v2051_v12 }
 0x392   :  { %v3908_v45 = vmul.f32 %v11170_v49, %v11170_v49  ;;  %v4073_v62 = vadd.f32 %v4072_v10, %v4042_v36  ;;  %vm4011_vm14 = vcmp.eq.f32.partialorder %v3845_v25, %v3845_v25  ;;  %v2053_v14 = vsub.f32 1.0, %v2013_v33 }
 0x393   :  { %v2200_v24 = vadd.f32 %v2199_v27, %v2198_v17  ;;  %v4043_v5 = vsel %vm4011_vm14, %v3845_v25, 0.0  ;;  %v4112_v50 = vsel %vm4011_vm14, 1.0, %v11085_v41  ;;  %v2115_v37 = vmul.f32 %v2083_v22, %v10145_v26  ;;  %v2019_v23 = vpop.xlane.xlu1 %2018 }
 0x394   :  { %v2321_v8 = vadd.f32 %v2320_v16, %v2319_v38  ;;  %v4143_v29 = vadd.f32 %v4142_v0, %v4112_v50  ;;  %v2085_v28 = vand.u32 2147483647, %v2053_v14  ;;  %v3971_v35 = vadd.f32 %v3970_v19, %v3908_v45 }
 0x395   :  { %v2202_v61 = vadd.f32 %v10264_v42, %v2200_v24  ;;  %v2118_v20 = vmul.f32 %v2086_v47, %v10204_v6  ;;  %v2088_v34 = vand.u32 2147483647, %v2056_v48  ;;  %v2203_v55 = vsel %vm1315_vm8, %v2115_v37, 0.0 }
 0x396   :  { %v3909_v4 = vmul.f32 %v4313_v53, %v4313_v53  ;;  %v4074_v54 = vadd.f32 %v4073_v62, %v4043_v5  ;;  %v4144_v51 = vrot.slane %v4143_v29, 4  ;;  %v2117_v41 = vmul.f32 %v2085_v28, %v10186_v60 }
 0x397   :  { %v2204_v21 = vadd.f32 %v2203_v55, %v2202_v61  ;;  %v2055_v52 = vsub.f32 1.0, %v2019_v23  ;;  %v2322_v26 = vrot.slane %v2321_v8, 1  ;;  %v2209_v3 = vsel %vm1315_vm8, %v2118_v20, 0.0  ;;  %v2025_v2 = vpop.xlane.xlu1 %2024 }
 0x398   :  { %v4145_v38 = vadd.f32 %v4144_v51, %v4143_v29  ;;  %v2207_v42 = vsel %vm1315_vm8, %v2117_v41, 0.0  ;;  %v3972_v30 = vadd.f32 %v3971_v35, %v3909_v4  ;;  %v2120_v6 = vmul.f32 %v2088_v34, %v10227_v44  ;;  %v1390_v51 = vpop.permute.xlu0 %1389 }
 0x399   :  { %v2206_v32 = vadd.f32 %v2205_v63, %v2204_v21  ;;  %v2087_v57 = vand.u32 2147483647, %v2055_v52  ;;  %v4075_v7 = vrot.slane %v4074_v54, 4  ;;  %v2057_v10 = vsub.f32 1.0, %v2025_v2 }
 0x39a   :  { %v4146_v46 = vrot.slane %v4145_v38, 2  ;;  %v2323_v60 = vadd.f32 %v2322_v26, %v2321_v8  ;;  %v3973_v63 = vrot.slane %v3972_v30, 4  ;;  %v2213_v1 = vsel %vm1315_vm8, %v2120_v6, 0.0 }
 0x39b   :  { %v2208_v47 = vadd.f32 %v2207_v42, %v2206_v32  ;;  %v2119_v39 = vmul.f32 %v2087_v57, %v10217_v15  ;;  %v2089_v40 = vand.u32 2147483647, %v2057_v10  ;;  %v4076_v13 = vadd.f32 %v4075_v7, %v4074_v54 }
 0x39c   :  { %v4147_v58 = vadd.f32 %v4146_v46, %v4145_v38  ;;  %5025 = vrcp.f32 %v2323_v60  ;;  %v3974_v15 = vadd.f32 %v3973_v63, %v3972_v30  ;;  %vm1792_vm1 = vcmp.eq.s32.totalorder %v10001_v56, 4 }
 0x39d   :  { %v2210_v59 = vadd.f32 %v2209_v3, %v2208_v47  ;;  %v2211_v12 = vsel %vm1315_vm8, %v2119_v39, 0.0  ;;  %v2121_v31 = vmul.f32 %v2089_v40, %v10243_v11  ;;  %v4077_v25 = vrot.slane %v4076_v13, 2 }
 0x39e   :  { %v4148_v48 = vrot.slane %v4147_v58, 1  ;;  %v3975_v19 = vrot.slane %v3974_v15, 2  ;;  %vm2326_vm15 = vcmp.eq.s32.totalorder %v10001_v56, 5  ;;  %vm2336_vm0 = vcmp.eq.s32.totalorder %v10001_v56, 6 }
 0x39f   :  { %v2212_v44 = vadd.f32 %v2211_v12, %v2210_v59  ;;  %v2215_v0 = vsel %vm1315_vm8, %v2121_v31, 0.0  ;;  %v4078_v36 = vadd.f32 %v4077_v25, %v4076_v13  ;;  %vm1386_vm8 = vcmp.eq.s32.totalorder %v10001_v56, 3 }
 0x3a0   :  { %v4149_v16 = vadd.f32 %v4148_v48, %v4147_v58  ;;  %v3976_v33 = vadd.f32 %v3975_v19, %v3974_v15  ;;  %v1392_v41 = vsel %vm1386_vm8, %v1390_v51, 0.0  ;;  %vm4153_vm2 = vcmp.eq.s32.totalorder %v10001_v56, 7 }
 0x3a1   :  { %v2214_v53 = vadd.f32 %v2213_v1, %v2212_v44  ;;  %v4079_v49 = vrot.slane %v4078_v36, 1  ;;  %v1393_v26 = vadd.f32 %v1392_v41, %v10035_v18  ;;  %vm4156_vm3 = vcmp.eq.s32.totalorder %v10001_v56, 8 }
 0x3a2   :  { %5027 = vrcp.f32 %v4149_v16  ;;  %v3977_v11 = vrot.slane %v3976_v33, 1  ;;  %vm4163_vm4 = vcmp.eq.s32.totalorder %v10001_v56, 0 }
 0x3a3   :  { %v2216_v17 = vadd.f32 %v2215_v0, %v2214_v53  ;;  %v4080_v14 = vadd.f32 %v4079_v49, %v4078_v36 }
 0x3a4   :  { %v3978_v8 = vadd.f32 %v3977_v11, %v3976_v33 }
 0x3a5   :  { %v2217_v43 = vrot.slane %v2216_v17, 4 }
 0x3a6   :  { %v3979_v20 = vmul.f32 0.00390625, %v3978_v8 }
 0x3a7   :  { %v2218_v27 = vadd.f32 %v2217_v43, %v2216_v17 }
 0x3a8   :  { %v4161_v4 = vmul.f32 0.01, %v3979_v20  ;;  %v4154_v6 = vsel %vm4153_vm2, %v3979_v20, 0.0 }
 0x3a9   :  { %v2219_v22 = vrot.slane %v2218_v27, 2  ;;  %v5026_v62 = vpop.eup %5025 }
 0x3ab   :  { %v2220_v45 = vadd.f32 %v2219_v22, %v2218_v27  ;;  %v1796_v21 = vpop.permute.xlu0 %1795 }
 0x3ac   :  { %v1798_v52 = vsel %vm1792_vm1, %v1796_v21, 0.0 }
 0x3ad   :  { %v2221_v24 = vrot.slane %v2220_v45, 1 }
 0x3af   :  { %v2222_v5 = vadd.f32 %v2221_v24, %v2220_v45  ;;  %v5028_v50 = vpop.eup %5027 }
 0x3b0   :  { %v4151_v29 = vmul.f32 %v5028_v50, %v4080_v14 }
 0x3b1   :  { %v2325_v37 = vmul.f32 %v5026_v62, %v2222_v5 }
 0x3b2   :  { %v4152_v28 = vsub.f32 0.0, %v4151_v29 }
 0x3b3   :  { %2329 = vperm.xlu1 %4446, %v2325_v37   ;;  %v2334_v61 = vmul.f32 0.05, %v2325_v37 }
 0x3b4   :  { %v4159_v34 = vmul.f32 0.01, %v4152_v28  ;;  %v4157_v2 = vsel %vm4156_vm3, %v4152_v28, 0.0 }
 0x3b5   :  { %v2335_v35 = vadd.f32 %v2334_v61, %v10059_v9  ;;  %v1799_v9 = vadd.f32 %v1798_v52, %v1393_v26 }
 0x3b7   :  { %v2339_v55 = vadd.f32 %v2335_v35, %v2334_v61 }
 0x3b9   :  { %v4160_v23 = vadd.f32 %v4159_v34, %v2339_v55 }
 0x3bb   :  { %v4162_v54 = vadd.f32 %v4161_v4, %v4160_v23 }
 0x3bd   :  { %4166 = vperm.xlu1 %4446, %v4162_v54  }
 0x42e   :  { %v2330_v38 = vpop.permute.xlu1 %2329 }
 0x42f   :  { %v2332_v32 = vsel %vm2326_vm15, %v2330_v38, 0.0  ;;  %v2337_v30 = vsel %vm2336_vm0, %v2330_v38, 0.0 }
 0x430   :  { %v2333_v42 = vadd.f32 %v2332_v32, %v1799_v9 }
 0x432   :  { %v2338_v3 = vadd.f32 %v2337_v30, %v2333_v42 }
 0x434   :  { %v4155_v57 = vadd.f32 %v4154_v6, %v2338_v3 }
 0x436   :  { %v4158_v7 = vadd.f32 %v4157_v2, %v4155_v57 }
 0x438   :  { %v4167_v18 = vpop.permute.xlu1 %4166 }
 0x439   :  { %v4169_v46 = vsel %vm4163_vm4, %v4167_v18, 0.0 }
 0x43a   :  { %v4170_v47 = vadd.f32 %v4169_v46, %v4158_v7 }
 0x43c   :  { %4171 = vst [vmem:[#allocation2] sm:$0x1] %v4170_v47 }
 0x43d   :  { %5048 = shalt.err (!%p5045_p4)
}
 0x43e   :  { %4181 = dma.vmem_to_hbm [thread:$0]  %s4179_s9, 16, %s10326_s13, [#allocation3]  }
 0x43f   :  { %5057 = dma.done.wait [#allocation3], 16  }
 0x440   :  { %5058 = vsyncadd [#allocation3], 4294967280 }
 0x441   :  { %4185 = vsyncpa [#allocation3], 1 }

</bundles_post_ra>
